<compile_context>
chip_gen: v5e
topology: v5e:2x2
jax: 0.10.0
libtpu: 0.0.40
codegen_flags: <defaults>
</compile_context>

<pallas_src>
import functools

import jax
import jax.numpy as jnp
from jax.experimental import pallas as pl
from jax.experimental.pallas import tpu as pltpu


def _fused_conv_block_kernel(x_ref, w1_ref, b1_ref, w2_ref, b2_ref, o_ref,
                             xpad_s, hpad_s, *, negative_slope):
    # x_ref : (Bblk, H, W, C1)       input tile, compute dtype
    # w1_ref: (9, C1, Cp)            conv1 weights, tap-major, Cout padded to Cp
    # b1_ref: (1, Cp)                f32 (padded channels are zero)
    # w2_ref: (9, Cp, Cp)            conv2 weights (Cin and Cout padded)
    # b2_ref: (1, Cp)                f32
    # o_ref : (Bblk*H*W, Cp)         lane-dense output block
    # xpad_s: (Bblk, H+2, W+2, C1)   VMEM scratch, zero halo
    # hpad_s: (Bblk, H+2, W+2, Cp)   VMEM scratch, zero halo
    Bblk, H, W, C1 = x_ref.shape
    Cp = w1_ref.shape[2]
    M = Bblk * H * W
    cdt = xpad_s.dtype

    def zero_halo(ref, C):
        # Zero only the 1-pixel border; the interior is fully overwritten
        # below, so no full-buffer zero pass is needed.
        z_row = jnp.zeros((Bblk, 1, W + 2, C), ref.dtype)
        z_col = jnp.zeros((Bblk, H + 2, 1, C), ref.dtype)
        ref[:, 0:1, :, :] = z_row
        ref[:, H + 1:H + 2, :, :] = z_row
        ref[:, :, 0:1, :] = z_col
        ref[:, :, W + 1:W + 2, :] = z_col

    def conv3x3(src_ref, w_ref, b_ref):
        # Unrolled 9-tap accumulate: one (M, Cin) x (Cin, Cp) MXU matmul per
        # tap, f32 accumulation.  No im2col concatenate / patches buffer.
        Cin = src_ref.shape[-1]
        acc = None
        k = 0
        for kh in range(3):
            for kw in range(3):
                v = src_ref[:, kh:kh + H, kw:kw + W, :].reshape(M, Cin)
                d = jnp.dot(v, w_ref[k], preferred_element_type=jnp.float32)
                acc = d if acc is None else acc + d
                k += 1
        acc = acc + b_ref[...].astype(jnp.float32)          # (1, Cp) bcast
        return jnp.where(acc >= 0, acc, negative_slope * acc)

    # ---- conv1 + LeakyReLU -------------------------------------------------
    zero_halo(xpad_s, C1)
    xpad_s[:, 1:H + 1, 1:W + 1, :] = x_ref[...].astype(cdt)
    h = conv3x3(xpad_s, w1_ref, b1_ref)                      # (M, Cp) f32

    # ---- conv2 + LeakyReLU: intermediate stays in VMEM (no HBM trip) -------
    zero_halo(hpad_s, Cp)
    hpad_s[:, 1:H + 1, 1:W + 1, :] = h.reshape(Bblk, H, W, Cp).astype(cdt)
    y = conv3x3(hpad_s, w2_ref, b2_ref)                      # (M, Cp) f32

    # Lane-dense store: last dim Cp is a multiple of 128, no reshape needed.
    o_ref[...] = y.astype(o_ref.dtype)


def _pick_batch_block(B, H, W, Cp, *, target_m=512, scratch_cap=8 << 20):
    """Largest divisor of B whose padded scratch fits a small VMEM cap;
    stop growing once the matmul M dimension reaches target_m."""
    best = 1
    for d in range(1, B + 1):
        if B % d:
            continue
        if d * (H + 2) * (W + 2) * Cp * 4 > scratch_cap:
            break
        best = d
        if d * H * W >= target_m:
            break
    return best


def fused_conv_block_nhwc(x_nhwc, w1_oihw, b1, w2_oihw, b2, *,
                          negative_slope=0.2, compute_dtype=jnp.float32):
    """Fused Conv3x3+LReLU -> Conv3x3+LReLU on NHWC input via one pallas_call.

    x_nhwc : (B, H, W, Cin)
    w*_oihw: PyTorch nn.Conv2d weight layout (Cout, Cin, 3, 3)
    b*     : (Cout,)
    returns: (B, H, W, Cout) in x_nhwc.dtype
    """
    B, H, W, C1 = x_nhwc.shape
    C2 = w1_oihw.shape[0]
    assert w1_oihw.shape == (C2, C1, 3, 3), w1_oihw.shape
    assert w2_oihw.shape == (C2, C2, 3, 3), w2_oihw.shape
    out_dtype = x_nhwc.dtype

    # Lane-dense padded output-channel count (multiple of 128).
    Cp = ((C2 + 127) // 128) * 128

    # Weight relayout once, in the wrapper:
    # OIHW -> (kh, kw, Cin, Cout) -> (9, Cin, Cout), Cout zero-padded to Cp
    # (and Cin padded to Cp for conv2, matching the padded intermediate).
    def flatten_w(w_oihw, cin, pad_cin_to=None):
        w = jnp.transpose(w_oihw, (2, 3, 1, 0)).reshape(9, cin, C2)
        w = jnp.pad(w, ((0, 0), (0, 0), (0, Cp - C2)))
        if pad_cin_to is not None and pad_cin_to > cin:
            w = jnp.pad(w, ((0, 0), (0, pad_cin_to - cin), (0, 0)))
        return w

    w1_flat = flatten_w(w1_oihw, C1).astype(compute_dtype)              # (9, C1, Cp)
    w2_flat = flatten_w(w2_oihw, C2, pad_cin_to=Cp).astype(compute_dtype)  # (9, Cp, Cp)
    b1_p = jnp.pad(b1, (0, Cp - C2)).reshape(1, Cp).astype(jnp.float32)
    b2_p = jnp.pad(b2, (0, Cp - C2)).reshape(1, Cp).astype(jnp.float32)

    x_in = x_nhwc.astype(compute_dtype)

    # Batch blocking: Bblk images per grid step (M = Bblk*H*W >= 512 target).
    Bblk = _pick_batch_block(B, H, W, Cp)
    n_blocks = B // Bblk
    M = Bblk * H * W

    kernel = functools.partial(_fused_conv_block_kernel,
                               negative_slope=negative_slope)

    # VMEM budget derived from actual buffer sizes (stay well under the
    # 64 MiB per-TensorCore budget on v7x; double-buffered pipeline blocks
    # accounted with the 2x factors).
    csize = jnp.dtype(compute_dtype).itemsize
    osize = jnp.dtype(out_dtype).itemsize
    buf_bytes = (
        2 * (M * C1 * csize)                        # input blocks (2 bufs)
        + 2 * (M * Cp * osize)                      # output blocks (2 bufs)
        + 2 * (9 * C1 * Cp + 9 * Cp * Cp) * csize   # weights
        + 2 * 2 * Cp * 4                            # biases (f32)
        + Bblk * (H + 2) * (W + 2) * (C1 + Cp) * csize)  # padded scratch
    vmem_limit = int(min(48 * 1024 * 1024,
                         max(8 * 1024 * 1024, 2 * buf_bytes)))

    cost = pl.CostEstimate(
        flops=2 * B * H * W * 9 * (C1 * C2 + C2 * C2),
        transcendentals=0,
        bytes_accessed=(x_nhwc.size * csize
                        + B * H * W * C2 * osize
                        + (9 * C1 * C2 + 9 * C2 * C2 + 2 * C2) * csize))

    out = pl.pallas_call(
        kernel,
        out_shape=jax.ShapeDtypeStruct((B * H * W, Cp), out_dtype),
        grid_spec=pltpu.PrefetchScalarGridSpec(
            num_scalar_prefetch=0,
            grid=(n_blocks,),
            in_specs=[
                pl.BlockSpec((Bblk, H, W, C1), lambda b: (b, 0, 0, 0)),
                # constant index_maps -> weights/bias stay VMEM-resident
                pl.BlockSpec((9, C1, Cp), lambda b: (0, 0, 0)),
                pl.BlockSpec((1, Cp), lambda b: (0, 0)),
                pl.BlockSpec((9, Cp, Cp), lambda b: (0, 0, 0)),
                pl.BlockSpec((1, Cp), lambda b: (0, 0)),
            ],
            out_specs=pl.BlockSpec((M, Cp), lambda b: (b, 0)),
            scratch_shapes=[
                pltpu.VMEM((Bblk, H + 2, W + 2, C1), compute_dtype),
                pltpu.VMEM((Bblk, H + 2, W + 2, Cp), compute_dtype),
            ],
        ),
        compiler_params=pltpu.CompilerParams(
            dimension_semantics=("parallel",),
            vmem_limit_bytes=vmem_limit,
        ),
        cost_estimate=cost,
    )(x_in, w1_flat, b1_p, w2_flat, b2_p)

    # Padded channels carry zeros; drop them and restore NHWC.
    return out.reshape(B, H, W, Cp)[:, :, :, :C2]


def unet_conv_block(x_nchw, w1, b1, w2, b2, *, negative_slope=0.2,
                    compute_dtype=jnp.float32):
    """Full `Conv` module forward.  Takes/returns NCHW to match PyTorch."""
    x = jnp.transpose(x_nchw, (0, 2, 3, 1))          # NCHW -> NHWC (once)
    y = fused_conv_block_nhwc(x, w1, b1, w2, b2,
                              negative_slope=negative_slope,
                              compute_dtype=compute_dtype)
    return jnp.transpose(y, (0, 3, 1, 2))            # NHWC -> NCHW (once)


def _reference(x_nchw, w1, b1, w2, b2, negative_slope=0.2):
    """Pure-JAX reference (lax.conv) for correctness checking."""
    def conv(x, w, b):
        y = jax.lax.conv_general_dilated(
            x, w, window_strides=(1, 1), padding=((1, 1), (1, 1)),
            dimension_numbers=("NCHW", "OIHW", "NCHW"))
        y = y + b[None, :, None, None]
        return jnp.where(y >= 0, y, negative_slope * y)
    return conv(conv(x_nchw, w1, b1), w2, b2)


if __name__ == "__main__":
    # Small shapes consistent with the module's forward: [B, Cin, H, W]
    B, Cin, Cout, H, W = 2, 4, 8, 16, 16

    key = jax.random.PRNGKey(0)
    kx, kw1, kb1, kw2, kb2 = jax.random.split(key, 5)

    x = jax.random.normal(kx, (B, Cin, H, W), dtype=jnp.float32)
    # Deterministic parameter init (synthetic; not a checkpoint load).
    w1 = jax.random.normal(kw1, (Cout, Cin, 3, 3), dtype=jnp.float32) * 0.1
    b1 = jax.random.normal(kb1, (Cout,), dtype=jnp.float32) * 0.1
    w2 = jax.random.normal(kw2, (Cout, Cout, 3, 3), dtype=jnp.float32) * 0.1
    b2 = jax.random.normal(kb2, (Cout,), dtype=jnp.float32) * 0.1

    ref = jax.block_until_ready(_reference(x, w1, b1, w2, b2))

    # Exact path (f32 MXU operands): must match the lax.conv reference.
    out_f32 = jax.block_until_ready(
        unet_conv_block(x, w1, b1, w2, b2, compute_dtype=jnp.float32))
    assert out_f32.shape == (B, Cout, H, W), out_f32.shape
    assert jnp.allclose(out_f32, ref, atol=1e-4, rtol=1e-4), (
        float(jnp.max(jnp.abs(out_f32 - ref))))

    # Fast path (bf16 MXU operands, f32 accumulation): looser tolerance.
    out_bf16 = jax.block_until_ready(
        unet_conv_block(x, w1, b1, w2, b2, compute_dtype=jnp.bfloat16))
    assert out_bf16.shape == (B, Cout, H, W), out_bf16.shape
    assert jnp.allclose(out_bf16, ref, atol=6e-2, rtol=5e-2), (
        float(jnp.max(jnp.abs(out_bf16 - ref))))

    print("KERNEL_OK")
</pallas_src>

<mosaic_0001>
module attributes {stable_mosaic.version = 11 : i64} {
  func.func @_fused_conv_block_kernel(%arg0: i32, %arg1: memref<2x16x16x4xf32, #tpu.memory_space<vmem>>, %arg2: memref<9x4x128xf32, #tpu.memory_space<vmem>>, %arg3: memref<1x128xf32, #tpu.memory_space<vmem>>, %arg4: memref<9x128x128xf32, #tpu.memory_space<vmem>>, %arg5: memref<1x128xf32, #tpu.memory_space<vmem>>, %arg6: memref<512x128xf32, #tpu.memory_space<vmem>>, %arg7: memref<2x18x18x4xf32, #tpu.memory_space<vmem>>, %arg8: memref<2x18x18x128xf32, #tpu.memory_space<vmem>>) attributes {dimension_semantics = [#tpu.dimension_semantics<parallel>], iteration_bounds = array<i64: 1>, scalar_prefetch = 0 : i64, scratch_operands = 2 : i64, tpu.core_type = #tpu.core_type<tc>, window_params = [{transform_indices = @transform_0, window_bounds = array<i64: 2, 16, 16, 4>}, {pipeline_mode = #tpu.pipeline_mode<synchronous>, transform_indices = @transform_1, window_bounds = array<i64: 9, 4, 128>}, {pipeline_mode = #tpu.pipeline_mode<synchronous>, transform_indices = @transform_2, window_bounds = array<i64: 1, 128>}, {pipeline_mode = #tpu.pipeline_mode<synchronous>, transform_indices = @transform_3, window_bounds = array<i64: 9, 128, 128>}, {pipeline_mode = #tpu.pipeline_mode<synchronous>, transform_indices = @transform_4, window_bounds = array<i64: 1, 128>}, {transform_indices = @transform_5, window_bounds = array<i64: 512, 128>}]} {
    %cst = arith.constant 0.000000e+00 : f32
    %0 = vector.broadcast %cst : f32 to vector<2x1x18x4xf32>
    %cst_0 = arith.constant 0.000000e+00 : f32
    %1 = vector.broadcast %cst_0 : f32 to vector<2x18x1x4xf32>
    %c0 = arith.constant 0 : index
    %c0_1 = arith.constant 0 : index
    %c0_2 = arith.constant 0 : index
    %c0_3 = arith.constant 0 : index
    %2 = vector.load %arg7[%c0, %c0_1, %c0_2, %c0_3] : memref<2x18x18x4xf32, #tpu.memory_space<vmem>>, vector<2x1x18x4xf32>
    tpu.vector_store %arg7[%c0, %c0_1, %c0_2, %c0_3], %0 {strides = array<i32>} : memref<2x18x18x4xf32, #tpu.memory_space<vmem>>, vector<2x1x18x4xf32>,
    %c0_4 = arith.constant 0 : index
    %c17 = arith.constant 17 : index
    %c0_5 = arith.constant 0 : index
    %c0_6 = arith.constant 0 : index
    %3 = vector.load %arg7[%c0_4, %c17, %c0_5, %c0_6] : memref<2x18x18x4xf32, #tpu.memory_space<vmem>>, vector<2x1x18x4xf32>
    tpu.vector_store %arg7[%c0_4, %c17, %c0_5, %c0_6], %0 {strides = array<i32>} : memref<2x18x18x4xf32, #tpu.memory_space<vmem>>, vector<2x1x18x4xf32>,
    %c0_7 = arith.constant 0 : index
    %c0_8 = arith.constant 0 : index
    %c0_9 = arith.constant 0 : index
    %c0_10 = arith.constant 0 : index
    %4 = vector.load %arg7[%c0_7, %c0_8, %c0_9, %c0_10] : memref<2x18x18x4xf32, #tpu.memory_space<vmem>>, vector<2x18x1x4xf32>
    tpu.vector_store %arg7[%c0_7, %c0_8, %c0_9, %c0_10], %1 {strides = array<i32>} : memref<2x18x18x4xf32, #tpu.memory_space<vmem>>, vector<2x18x1x4xf32>,
    %c0_11 = arith.constant 0 : index
    %c0_12 = arith.constant 0 : index
    %c17_13 = arith.constant 17 : index
    %c0_14 = arith.constant 0 : index
    %5 = vector.load %arg7[%c0_11, %c0_12, %c17_13, %c0_14] : memref<2x18x18x4xf32, #tpu.memory_space<vmem>>, vector<2x18x1x4xf32>
    tpu.vector_store %arg7[%c0_11, %c0_12, %c17_13, %c0_14], %1 {strides = array<i32>} : memref<2x18x18x4xf32, #tpu.memory_space<vmem>>, vector<2x18x1x4xf32>,
    %c0_15 = arith.constant 0 : index
    %c0_16 = arith.constant 0 : index
    %c0_17 = arith.constant 0 : index
    %c0_18 = arith.constant 0 : index
    %6 = vector.load %arg1[%c0_15, %c0_16, %c0_17, %c0_18] : memref<2x16x16x4xf32, #tpu.memory_space<vmem>>, vector<2x16x16x4xf32>
    %c0_19 = arith.constant 0 : index
    %c1 = arith.constant 1 : index
    %c1_20 = arith.constant 1 : index
    %c0_21 = arith.constant 0 : index
    %7 = vector.load %arg7[%c0_19, %c1, %c1_20, %c0_21] : memref<2x18x18x4xf32, #tpu.memory_space<vmem>>, vector<2x16x16x4xf32>
    tpu.vector_store %arg7[%c0_19, %c1, %c1_20, %c0_21], %6 {strides = array<i32>} : memref<2x18x18x4xf32, #tpu.memory_space<vmem>>, vector<2x16x16x4xf32>,
    %c0_22 = arith.constant 0 : index
    %c0_23 = arith.constant 0 : index
    %c0_24 = arith.constant 0 : index
    %c0_25 = arith.constant 0 : index
    %8 = vector.load %arg7[%c0_22, %c0_23, %c0_24, %c0_25] : memref<2x18x18x4xf32, #tpu.memory_space<vmem>>, vector<2x16x16x4xf32>
    %9 = vector.shape_cast %8 : vector<2x16x16x4xf32> to vector<512x4xf32>
    %c0_26 = arith.constant 0 : index
    %c0_27 = arith.constant 0 : index
    %c0_28 = arith.constant 0 : index
    %10 = vector.load %arg2[%c0_26, %c0_27, %c0_28] : memref<9x4x128xf32, #tpu.memory_space<vmem>>, vector<1x4x128xf32>
    %11 = vector.shape_cast %10 : vector<1x4x128xf32> to vector<4x128xf32>
    %cst_29 = arith.constant dense<0.000000e+00> : vector<512x128xf32>
    %12 = tpu.matmul %9, %11, %cst_29 {dimension_numbers = #tpu.dot_dimension_numbers<[1], [0], [0], [1], [0, 0, 1, 1], [], []>} : vector<512x4xf32>, vector<4x128xf32>, vector<512x128xf32> -> vector<512x128xf32>
    %c0_30 = arith.constant 0 : index
    %c0_31 = arith.constant 0 : index
    %c1_32 = arith.constant 1 : index
    %c0_33 = arith.constant 0 : index
    %13 = vector.load %arg7[%c0_30, %c0_31, %c1_32, %c0_33] : memref<2x18x18x4xf32, #tpu.memory_space<vmem>>, vector<2x16x16x4xf32>
    %14 = vector.shape_cast %13 : vector<2x16x16x4xf32> to vector<512x4xf32>
    %c1_34 = arith.constant 1 : index
    %c0_35 = arith.constant 0 : index
    %c0_36 = arith.constant 0 : index
    %15 = vector.load %arg2[%c1_34, %c0_35, %c0_36] : memref<9x4x128xf32, #tpu.memory_space<vmem>>, vector<1x4x128xf32>
    %16 = vector.shape_cast %15 : vector<1x4x128xf32> to vector<4x128xf32>
    %cst_37 = arith.constant dense<0.000000e+00> : vector<512x128xf32>
    %17 = tpu.matmul %14, %16, %cst_37 {dimension_numbers = #tpu.dot_dimension_numbers<[1], [0], [0], [1], [0, 0, 1, 1], [], []>} : vector<512x4xf32>, vector<4x128xf32>, vector<512x128xf32> -> vector<512x128xf32>
    %18 = arith.addf %12, %17 : vector<512x128xf32>
    %c0_38 = arith.constant 0 : index
    %c0_39 = arith.constant 0 : index
    %c2 = arith.constant 2 : index
    %c0_40 = arith.constant 0 : index
    %19 = vector.load %arg7[%c0_38, %c0_39, %c2, %c0_40] : memref<2x18x18x4xf32, #tpu.memory_space<vmem>>, vector<2x16x16x4xf32>
    %20 = vector.shape_cast %19 : vector<2x16x16x4xf32> to vector<512x4xf32>
    %c2_41 = arith.constant 2 : index
    %c0_42 = arith.constant 0 : index
    %c0_43 = arith.constant 0 : index
    %21 = vector.load %arg2[%c2_41, %c0_42, %c0_43] : memref<9x4x128xf32, #tpu.memory_space<vmem>>, vector<1x4x128xf32>
    %22 = vector.shape_cast %21 : vector<1x4x128xf32> to vector<4x128xf32>
    %cst_44 = arith.constant dense<0.000000e+00> : vector<512x128xf32>
    %23 = tpu.matmul %20, %22, %cst_44 {dimension_numbers = #tpu.dot_dimension_numbers<[1], [0], [0], [1], [0, 0, 1, 1], [], []>} : vector<512x4xf32>, vector<4x128xf32>, vector<512x128xf32> -> vector<512x128xf32>
    %24 = arith.addf %18, %23 : vector<512x128xf32>
    %c0_45 = arith.constant 0 : index
    %c1_46 = arith.constant 1 : index
    %c0_47 = arith.constant 0 : index
    %c0_48 = arith.constant 0 : index
    %25 = vector.load %arg7[%c0_45, %c1_46, %c0_47, %c0_48] : memref<2x18x18x4xf32, #tpu.memory_space<vmem>>, vector<2x16x16x4xf32>
    %26 = vector.shape_cast %25 : vector<2x16x16x4xf32> to vector<512x4xf32>
    %c3 = arith.constant 3 : index
    %c0_49 = arith.constant 0 : index
    %c0_50 = arith.constant 0 : index
    %27 = vector.load %arg2[%c3, %c0_49, %c0_50] : memref<9x4x128xf32, #tpu.memory_space<vmem>>, vector<1x4x128xf32>
    %28 = vector.shape_cast %27 : vector<1x4x128xf32> to vector<4x128xf32>
    %cst_51 = arith.constant dense<0.000000e+00> : vector<512x128xf32>
    %29 = tpu.matmul %26, %28, %cst_51 {dimension_numbers = #tpu.dot_dimension_numbers<[1], [0], [0], [1], [0, 0, 1, 1], [], []>} : vector<512x4xf32>, vector<4x128xf32>, vector<512x128xf32> -> vector<512x128xf32>
    %30 = arith.addf %24, %29 : vector<512x128xf32>
    %c0_52 = arith.constant 0 : index
    %c1_53 = arith.constant 1 : index
    %c1_54 = arith.constant 1 : index
    %c0_55 = arith.constant 0 : index
    %31 = vector.load %arg7[%c0_52, %c1_53, %c1_54, %c0_55] : memref<2x18x18x4xf32, #tpu.memory_space<vmem>>, vector<2x16x16x4xf32>
    %32 = vector.shape_cast %31 : vector<2x16x16x4xf32> to vector<512x4xf32>
    %c4 = arith.constant 4 : index
    %c0_56 = arith.constant 0 : index
    %c0_57 = arith.constant 0 : index
    %33 = vector.load %arg2[%c4, %c0_56, %c0_57] : memref<9x4x128xf32, #tpu.memory_space<vmem>>, vector<1x4x128xf32>
    %34 = vector.shape_cast %33 : vector<1x4x128xf32> to vector<4x128xf32>
    %cst_58 = arith.constant dense<0.000000e+00> : vector<512x128xf32>
    %35 = tpu.matmul %32, %34, %cst_58 {dimension_numbers = #tpu.dot_dimension_numbers<[1], [0], [0], [1], [0, 0, 1, 1], [], []>} : vector<512x4xf32>, vector<4x128xf32>, vector<512x128xf32> -> vector<512x128xf32>
    %36 = arith.addf %30, %35 : vector<512x128xf32>
    %c0_59 = arith.constant 0 : index
    %c1_60 = arith.constant 1 : index
    %c2_61 = arith.constant 2 : index
    %c0_62 = arith.constant 0 : index
    %37 = vector.load %arg7[%c0_59, %c1_60, %c2_61, %c0_62] : memref<2x18x18x4xf32, #tpu.memory_space<vmem>>, vector<2x16x16x4xf32>
    %38 = vector.shape_cast %37 : vector<2x16x16x4xf32> to vector<512x4xf32>
    %c5 = arith.constant 5 : index
    %c0_63 = arith.constant 0 : index
    %c0_64 = arith.constant 0 : index
    %39 = vector.load %arg2[%c5, %c0_63, %c0_64] : memref<9x4x128xf32, #tpu.memory_space<vmem>>, vector<1x4x128xf32>
    %40 = vector.shape_cast %39 : vector<1x4x128xf32> to vector<4x128xf32>
    %cst_65 = arith.constant dense<0.000000e+00> : vector<512x128xf32>
    %41 = tpu.matmul %38, %40, %cst_65 {dimension_numbers = #tpu.dot_dimension_numbers<[1], [0], [0], [1], [0, 0, 1, 1], [], []>} : vector<512x4xf32>, vector<4x128xf32>, vector<512x128xf32> -> vector<512x128xf32>
    %42 = arith.addf %36, %41 : vector<512x128xf32>
    %c0_66 = arith.constant 0 : index
    %c2_67 = arith.constant 2 : index
    %c0_68 = arith.constant 0 : index
    %c0_69 = arith.constant 0 : index
    %43 = vector.load %arg7[%c0_66, %c2_67, %c0_68, %c0_69] : memref<2x18x18x4xf32, #tpu.memory_space<vmem>>, vector<2x16x16x4xf32>
    %44 = vector.shape_cast %43 : vector<2x16x16x4xf32> to vector<512x4xf32>
    %c6 = arith.constant 6 : index
    %c0_70 = arith.constant 0 : index
    %c0_71 = arith.constant 0 : index
    %45 = vector.load %arg2[%c6, %c0_70, %c0_71] : memref<9x4x128xf32, #tpu.memory_space<vmem>>, vector<1x4x128xf32>
    %46 = vector.shape_cast %45 : vector<1x4x128xf32> to vector<4x128xf32>
    %cst_72 = arith.constant dense<0.000000e+00> : vector<512x128xf32>
    %47 = tpu.matmul %44, %46, %cst_72 {dimension_numbers = #tpu.dot_dimension_numbers<[1], [0], [0], [1], [0, 0, 1, 1], [], []>} : vector<512x4xf32>, vector<4x128xf32>, vector<512x128xf32> -> vector<512x128xf32>
    %48 = arith.addf %42, %47 : vector<512x128xf32>
    %c0_73 = arith.constant 0 : index
    %c2_74 = arith.constant 2 : index
    %c1_75 = arith.constant 1 : index
    %c0_76 = arith.constant 0 : index
    %49 = vector.load %arg7[%c0_73, %c2_74, %c1_75, %c0_76] : memref<2x18x18x4xf32, #tpu.memory_space<vmem>>, vector<2x16x16x4xf32>
    %50 = vector.shape_cast %49 : vector<2x16x16x4xf32> to vector<512x4xf32>
    %c7 = arith.constant 7 : index
    %c0_77 = arith.constant 0 : index
    %c0_78 = arith.constant 0 : index
    %51 = vector.load %arg2[%c7, %c0_77, %c0_78] : memref<9x4x128xf32, #tpu.memory_space<vmem>>, vector<1x4x128xf32>
    %52 = vector.shape_cast %51 : vector<1x4x128xf32> to vector<4x128xf32>
    %cst_79 = arith.constant dense<0.000000e+00> : vector<512x128xf32>
    %53 = tpu.matmul %50, %52, %cst_79 {dimension_numbers = #tpu.dot_dimension_numbers<[1], [0], [0], [1], [0, 0, 1, 1], [], []>} : vector<512x4xf32>, vector<4x128xf32>, vector<512x128xf32> -> vector<512x128xf32>
    %54 = arith.addf %48, %53 : vector<512x128xf32>
    %c0_80 = arith.constant 0 : index
    %c2_81 = arith.constant 2 : index
    %c2_82 = arith.constant 2 : index
    %c0_83 = arith.constant 0 : index
    %55 = vector.load %arg7[%c0_80, %c2_81, %c2_82, %c0_83] : memref<2x18x18x4xf32, #tpu.memory_space<vmem>>, vector<2x16x16x4xf32>
    %56 = vector.shape_cast %55 : vector<2x16x16x4xf32> to vector<512x4xf32>
    %c8 = arith.constant 8 : index
    %c0_84 = arith.constant 0 : index
    %c0_85 = arith.constant 0 : index
    %57 = vector.load %arg2[%c8, %c0_84, %c0_85] : memref<9x4x128xf32, #tpu.memory_space<vmem>>, vector<1x4x128xf32>
    %58 = vector.shape_cast %57 : vector<1x4x128xf32> to vector<4x128xf32>
    %cst_86 = arith.constant dense<0.000000e+00> : vector<512x128xf32>
    %59 = tpu.matmul %56, %58, %cst_86 {dimension_numbers = #tpu.dot_dimension_numbers<[1], [0], [0], [1], [0, 0, 1, 1], [], []>} : vector<512x4xf32>, vector<4x128xf32>, vector<512x128xf32> -> vector<512x128xf32>
    %60 = arith.addf %54, %59 : vector<512x128xf32>
    %c0_87 = arith.constant 0 : index
    %c0_88 = arith.constant 0 : index
    %61 = vector.load %arg3[%c0_87, %c0_88] : memref<1x128xf32, #tpu.memory_space<vmem>>, vector<1x128xf32>
    %62 = vector.broadcast %61 : vector<1x128xf32> to vector<512x128xf32>
    %63 = arith.addf %60, %62 : vector<512x128xf32>
    %cst_89 = arith.constant 0.000000e+00 : f32
    %64 = vector.broadcast %cst_89 : f32 to vector<512x128xf32>
    %65 = arith.cmpf oge, %63, %64 : vector<512x128xf32>
    %cst_90 = arith.constant 2.000000e-01 : f32
    %66 = vector.broadcast %cst_90 : f32 to vector<512x128xf32>
    %67 = arith.mulf %66, %63 : vector<512x128xf32>
    %68 = arith.select %65, %63, %67 : vector<512x128xi1>, vector<512x128xf32>
    %cst_91 = arith.constant 0.000000e+00 : f32
    %69 = vector.broadcast %cst_91 : f32 to vector<2x1x18x128xf32>
    %cst_92 = arith.constant 0.000000e+00 : f32
    %70 = vector.broadcast %cst_92 : f32 to vector<2x18x1x128xf32>
    %c0_93 = arith.constant 0 : index
    %c0_94 = arith.constant 0 : index
    %c0_95 = arith.constant 0 : index
    %c0_96 = arith.constant 0 : index
    %71 = vector.load %arg8[%c0_93, %c0_94, %c0_95, %c0_96] : memref<2x18x18x128xf32, #tpu.memory_space<vmem>>, vector<2x1x18x128xf32>
    tpu.vector_store %arg8[%c0_93, %c0_94, %c0_95, %c0_96], %69 {strides = array<i32>} : memref<2x18x18x128xf32, #tpu.memory_space<vmem>>, vector<2x1x18x128xf32>,
    %c0_97 = arith.constant 0 : index
    %c17_98 = arith.constant 17 : index
    %c0_99 = arith.constant 0 : index
    %c0_100 = arith.constant 0 : index
    %72 = vector.load %arg8[%c0_97, %c17_98, %c0_99, %c0_100] : memref<2x18x18x128xf32, #tpu.memory_space<vmem>>, vector<2x1x18x128xf32>
    tpu.vector_store %arg8[%c0_97, %c17_98, %c0_99, %c0_100], %69 {strides = array<i32>} : memref<2x18x18x128xf32, #tpu.memory_space<vmem>>, vector<2x1x18x128xf32>,
    %c0_101 = arith.constant 0 : index
    %c0_102 = arith.constant 0 : index
    %c0_103 = arith.constant 0 : index
    %c0_104 = arith.constant 0 : index
    %73 = vector.load %arg8[%c0_101, %c0_102, %c0_103, %c0_104] : memref<2x18x18x128xf32, #tpu.memory_space<vmem>>, vector<2x18x1x128xf32>
    tpu.vector_store %arg8[%c0_101, %c0_102, %c0_103, %c0_104], %70 {strides = array<i32>} : memref<2x18x18x128xf32, #tpu.memory_space<vmem>>, vector<2x18x1x128xf32>,
    %c0_105 = arith.constant 0 : index
    %c0_106 = arith.constant 0 : index
    %c17_107 = arith.constant 17 : index
    %c0_108 = arith.constant 0 : index
    %74 = vector.load %arg8[%c0_105, %c0_106, %c17_107, %c0_108] : memref<2x18x18x128xf32, #tpu.memory_space<vmem>>, vector<2x18x1x128xf32>
    tpu.vector_store %arg8[%c0_105, %c0_106, %c17_107, %c0_108], %70 {strides = array<i32>} : memref<2x18x18x128xf32, #tpu.memory_space<vmem>>, vector<2x18x1x128xf32>,
    %75 = vector.shape_cast %68 : vector<512x128xf32> to vector<2x16x16x128xf32>
    %c0_109 = arith.constant 0 : index
    %c1_110 = arith.constant 1 : index
    %c1_111 = arith.constant 1 : index
    %c0_112 = arith.constant 0 : index
    %76 = vector.load %arg8[%c0_109, %c1_110, %c1_111, %c0_112] : memref<2x18x18x128xf32, #tpu.memory_space<vmem>>, vector<2x16x16x128xf32>
    tpu.vector_store %arg8[%c0_109, %c1_110, %c1_111, %c0_112], %75 {strides = array<i32>} : memref<2x18x18x128xf32, #tpu.memory_space<vmem>>, vector<2x16x16x128xf32>,
    %c0_113 = arith.constant 0 : index
    %c0_114 = arith.constant 0 : index
    %c0_115 = arith.constant 0 : index
    %c0_116 = arith.constant 0 : index
    %77 = vector.load %arg8[%c0_113, %c0_114, %c0_115, %c0_116] : memref<2x18x18x128xf32, #tpu.memory_space<vmem>>, vector<2x16x16x128xf32>
    %78 = vector.shape_cast %77 : vector<2x16x16x128xf32> to vector<512x128xf32>
    %c0_117 = arith.constant 0 : index
    %c0_118 = arith.constant 0 : index
    %c0_119 = arith.constant 0 : index
    %79 = vector.load %arg4[%c0_117, %c0_118, %c0_119] : memref<9x128x128xf32, #tpu.memory_space<vmem>>, vector<1x128x128xf32>
    %80 = vector.shape_cast %79 : vector<1x128x128xf32> to vector<128x128xf32>
    %cst_120 = arith.constant dense<0.000000e+00> : vector<512x128xf32>
    %81 = tpu.matmul %78, %80, %cst_120 {dimension_numbers = #tpu.dot_dimension_numbers<[1], [0], [0], [1], [0, 0, 1, 1], [], []>} : vector<512x128xf32>, vector<128x128xf32>, vector<512x128xf32> -> vector<512x128xf32>
    %c0_121 = arith.constant 0 : index
    %c0_122 = arith.constant 0 : index
    %c1_123 = arith.constant 1 : index
    %c0_124 = arith.constant 0 : index
    %82 = vector.load %arg8[%c0_121, %c0_122, %c1_123, %c0_124] : memref<2x18x18x128xf32, #tpu.memory_space<vmem>>, vector<2x16x16x128xf32>
    %83 = vector.shape_cast %82 : vector<2x16x16x128xf32> to vector<512x128xf32>
    %c1_125 = arith.constant 1 : index
    %c0_126 = arith.constant 0 : index
    %c0_127 = arith.constant 0 : index
    %84 = vector.load %arg4[%c1_125, %c0_126, %c0_127] : memref<9x128x128xf32, #tpu.memory_space<vmem>>, vector<1x128x128xf32>
    %85 = vector.shape_cast %84 : vector<1x128x128xf32> to vector<128x128xf32>
    %cst_128 = arith.constant dense<0.000000e+00> : vector<512x128xf32>
    %86 = tpu.matmul %83, %85, %cst_128 {dimension_numbers = #tpu.dot_dimension_numbers<[1], [0], [0], [1], [0, 0, 1, 1], [], []>} : vector<512x128xf32>, vector<128x128xf32>, vector<512x128xf32> -> vector<512x128xf32>
    %87 = arith.addf %81, %86 : vector<512x128xf32>
    %c0_129 = arith.constant 0 : index
    %c0_130 = arith.constant 0 : index
    %c2_131 = arith.constant 2 : index
    %c0_132 = arith.constant 0 : index
    %88 = vector.load %arg8[%c0_129, %c0_130, %c2_131, %c0_132] : memref<2x18x18x128xf32, #tpu.memory_space<vmem>>, vector<2x16x16x128xf32>
    %89 = vector.shape_cast %88 : vector<2x16x16x128xf32> to vector<512x128xf32>
    %c2_133 = arith.constant 2 : index
    %c0_134 = arith.constant 0 : index
    %c0_135 = arith.constant 0 : index
    %90 = vector.load %arg4[%c2_133, %c0_134, %c0_135] : memref<9x128x128xf32, #tpu.memory_space<vmem>>, vector<1x128x128xf32>
    %91 = vector.shape_cast %90 : vector<1x128x128xf32> to vector<128x128xf32>
    %cst_136 = arith.constant dense<0.000000e+00> : vector<512x128xf32>
    %92 = tpu.matmul %89, %91, %cst_136 {dimension_numbers = #tpu.dot_dimension_numbers<[1], [0], [0], [1], [0, 0, 1, 1], [], []>} : vector<512x128xf32>, vector<128x128xf32>, vector<512x128xf32> -> vector<512x128xf32>
    %93 = arith.addf %87, %92 : vector<512x128xf32>
    %c0_137 = arith.constant 0 : index
    %c1_138 = arith.constant 1 : index
    %c0_139 = arith.constant 0 : index
    %c0_140 = arith.constant 0 : index
    %94 = vector.load %arg8[%c0_137, %c1_138, %c0_139, %c0_140] : memref<2x18x18x128xf32, #tpu.memory_space<vmem>>, vector<2x16x16x128xf32>
    %95 = vector.shape_cast %94 : vector<2x16x16x128xf32> to vector<512x128xf32>
    %c3_141 = arith.constant 3 : index
    %c0_142 = arith.constant 0 : index
    %c0_143 = arith.constant 0 : index
    %96 = vector.load %arg4[%c3_141, %c0_142, %c0_143] : memref<9x128x128xf32, #tpu.memory_space<vmem>>, vector<1x128x128xf32>
    %97 = vector.shape_cast %96 : vector<1x128x128xf32> to vector<128x128xf32>
    %cst_144 = arith.constant dense<0.000000e+00> : vector<512x128xf32>
    %98 = tpu.matmul %95, %97, %cst_144 {dimension_numbers = #tpu.dot_dimension_numbers<[1], [0], [0], [1], [0, 0, 1, 1], [], []>} : vector<512x128xf32>, vector<128x128xf32>, vector<512x128xf32> -> vector<512x128xf32>
    %99 = arith.addf %93, %98 : vector<512x128xf32>
    %c0_145 = arith.constant 0 : index
    %c1_146 = arith.constant 1 : index
    %c1_147 = arith.constant 1 : index
    %c0_148 = arith.constant 0 : index
    %100 = vector.load %arg8[%c0_145, %c1_146, %c1_147, %c0_148] : memref<2x18x18x128xf32, #tpu.memory_space<vmem>>, vector<2x16x16x128xf32>
    %101 = vector.shape_cast %100 : vector<2x16x16x128xf32> to vector<512x128xf32>
    %c4_149 = arith.constant 4 : index
    %c0_150 = arith.constant 0 : index
    %c0_151 = arith.constant 0 : index
    %102 = vector.load %arg4[%c4_149, %c0_150, %c0_151] : memref<9x128x128xf32, #tpu.memory_space<vmem>>, vector<1x128x128xf32>
    %103 = vector.shape_cast %102 : vector<1x128x128xf32> to vector<128x128xf32>
    %cst_152 = arith.constant dense<0.000000e+00> : vector<512x128xf32>
    %104 = tpu.matmul %101, %103, %cst_152 {dimension_numbers = #tpu.dot_dimension_numbers<[1], [0], [0], [1], [0, 0, 1, 1], [], []>} : vector<512x128xf32>, vector<128x128xf32>, vector<512x128xf32> -> vector<512x128xf32>
    %105 = arith.addf %99, %104 : vector<512x128xf32>
    %c0_153 = arith.constant 0 : index
    %c1_154 = arith.constant 1 : index
    %c2_155 = arith.constant 2 : index
    %c0_156 = arith.constant 0 : index
    %106 = vector.load %arg8[%c0_153, %c1_154, %c2_155, %c0_156] : memref<2x18x18x128xf32, #tpu.memory_space<vmem>>, vector<2x16x16x128xf32>
    %107 = vector.shape_cast %106 : vector<2x16x16x128xf32> to vector<512x128xf32>
    %c5_157 = arith.constant 5 : index
    %c0_158 = arith.constant 0 : index
    %c0_159 = arith.constant 0 : index
    %108 = vector.load %arg4[%c5_157, %c0_158, %c0_159] : memref<9x128x128xf32, #tpu.memory_space<vmem>>, vector<1x128x128xf32>
    %109 = vector.shape_cast %108 : vector<1x128x128xf32> to vector<128x128xf32>
    %cst_160 = arith.constant dense<0.000000e+00> : vector<512x128xf32>
    %110 = tpu.matmul %107, %109, %cst_160 {dimension_numbers = #tpu.dot_dimension_numbers<[1], [0], [0], [1], [0, 0, 1, 1], [], []>} : vector<512x128xf32>, vector<128x128xf32>, vector<512x128xf32> -> vector<512x128xf32>
    %111 = arith.addf %105, %110 : vector<512x128xf32>
    %c0_161 = arith.constant 0 : index
    %c2_162 = arith.constant 2 : index
    %c0_163 = arith.constant 0 : index
    %c0_164 = arith.constant 0 : index
    %112 = vector.load %arg8[%c0_161, %c2_162, %c0_163, %c0_164] : memref<2x18x18x128xf32, #tpu.memory_space<vmem>>, vector<2x16x16x128xf32>
    %113 = vector.shape_cast %112 : vector<2x16x16x128xf32> to vector<512x128xf32>
    %c6_165 = arith.constant 6 : index
    %c0_166 = arith.constant 0 : index
    %c0_167 = arith.constant 0 : index
    %114 = vector.load %arg4[%c6_165, %c0_166, %c0_167] : memref<9x128x128xf32, #tpu.memory_space<vmem>>, vector<1x128x128xf32>
    %115 = vector.shape_cast %114 : vector<1x128x128xf32> to vector<128x128xf32>
    %cst_168 = arith.constant dense<0.000000e+00> : vector<512x128xf32>
    %116 = tpu.matmul %113, %115, %cst_168 {dimension_numbers = #tpu.dot_dimension_numbers<[1], [0], [0], [1], [0, 0, 1, 1], [], []>} : vector<512x128xf32>, vector<128x128xf32>, vector<512x128xf32> -> vector<512x128xf32>
    %117 = arith.addf %111, %116 : vector<512x128xf32>
    %c0_169 = arith.constant 0 : index
    %c2_170 = arith.constant 2 : index
    %c1_171 = arith.constant 1 : index
    %c0_172 = arith.constant 0 : index
    %118 = vector.load %arg8[%c0_169, %c2_170, %c1_171, %c0_172] : memref<2x18x18x128xf32, #tpu.memory_space<vmem>>, vector<2x16x16x128xf32>
    %119 = vector.shape_cast %118 : vector<2x16x16x128xf32> to vector<512x128xf32>
    %c7_173 = arith.constant 7 : index
    %c0_174 = arith.constant 0 : index
    %c0_175 = arith.constant 0 : index
    %120 = vector.load %arg4[%c7_173, %c0_174, %c0_175] : memref<9x128x128xf32, #tpu.memory_space<vmem>>, vector<1x128x128xf32>
    %121 = vector.shape_cast %120 : vector<1x128x128xf32> to vector<128x128xf32>
    %cst_176 = arith.constant dense<0.000000e+00> : vector<512x128xf32>
    %122 = tpu.matmul %119, %121, %cst_176 {dimension_numbers = #tpu.dot_dimension_numbers<[1], [0], [0], [1], [0, 0, 1, 1], [], []>} : vector<512x128xf32>, vector<128x128xf32>, vector<512x128xf32> -> vector<512x128xf32>
    %123 = arith.addf %117, %122 : vector<512x128xf32>
    %c0_177 = arith.constant 0 : index
    %c2_178 = arith.constant 2 : index
    %c2_179 = arith.constant 2 : index
    %c0_180 = arith.constant 0 : index
    %124 = vector.load %arg8[%c0_177, %c2_178, %c2_179, %c0_180] : memref<2x18x18x128xf32, #tpu.memory_space<vmem>>, vector<2x16x16x128xf32>
    %125 = vector.shape_cast %124 : vector<2x16x16x128xf32> to vector<512x128xf32>
    %c8_181 = arith.constant 8 : index
    %c0_182 = arith.constant 0 : index
    %c0_183 = arith.constant 0 : index
    %126 = vector.load %arg4[%c8_181, %c0_182, %c0_183] : memref<9x128x128xf32, #tpu.memory_space<vmem>>, vector<1x128x128xf32>
    %127 = vector.shape_cast %126 : vector<1x128x128xf32> to vector<128x128xf32>
    %cst_184 = arith.constant dense<0.000000e+00> : vector<512x128xf32>
    %128 = tpu.matmul %125, %127, %cst_184 {dimension_numbers = #tpu.dot_dimension_numbers<[1], [0], [0], [1], [0, 0, 1, 1], [], []>} : vector<512x128xf32>, vector<128x128xf32>, vector<512x128xf32> -> vector<512x128xf32>
    %129 = arith.addf %123, %128 : vector<512x128xf32>
    %c0_185 = arith.constant 0 : index
    %c0_186 = arith.constant 0 : index
    %130 = vector.load %arg5[%c0_185, %c0_186] : memref<1x128xf32, #tpu.memory_space<vmem>>, vector<1x128xf32>
    %131 = vector.broadcast %130 : vector<1x128xf32> to vector<512x128xf32>
    %132 = arith.addf %129, %131 : vector<512x128xf32>
    %cst_187 = arith.constant 0.000000e+00 : f32
    %133 = vector.broadcast %cst_187 : f32 to vector<512x128xf32>
    %134 = arith.cmpf oge, %132, %133 : vector<512x128xf32>
    %cst_188 = arith.constant 2.000000e-01 : f32
    %135 = vector.broadcast %cst_188 : f32 to vector<512x128xf32>
    %136 = arith.mulf %135, %132 : vector<512x128xf32>
    %137 = arith.select %134, %132, %136 : vector<512x128xi1>, vector<512x128xf32>
    %c0_189 = arith.constant 0 : index
    %c0_190 = arith.constant 0 : index
    %138 = vector.load %arg6[%c0_189, %c0_190] : memref<512x128xf32, #tpu.memory_space<vmem>>, vector<512x128xf32>
    tpu.vector_store %arg6[%c0_189, %c0_190], %137 {strides = array<i32>} : memref<512x128xf32, #tpu.memory_space<vmem>>, vector<512x128xf32>,
    return
  }
  func.func @transform_0(%arg0: i32) -> (i32, i32, i32, i32) {
    %c0_i32 = arith.constant 0 : i32
    %c0_i32_0 = arith.constant 0 : i32
    %c0_i32_1 = arith.constant 0 : i32
    %c0_i32_2 = arith.constant 0 : i32
    return %arg0, %c0_i32, %c0_i32_0, %c0_i32_1 : i32, i32, i32, i32
  }
  func.func @transform_1(%arg0: i32) -> (i32, i32, i32) {
    %c0_i32 = arith.constant 0 : i32
    %c0_i32_0 = arith.constant 0 : i32
    %c0_i32_1 = arith.constant 0 : i32
    %c0_i32_2 = arith.constant 0 : i32
    return %c0_i32, %c0_i32_0, %c0_i32_1 : i32, i32, i32
  }
  func.func @transform_2(%arg0: i32) -> (i32, i32) {
    %c0_i32 = arith.constant 0 : i32
    %c0_i32_0 = arith.constant 0 : i32
    %c0_i32_1 = arith.constant 0 : i32
    return %c0_i32, %c0_i32_0 : i32, i32
  }
  func.func @transform_3(%arg0: i32) -> (i32, i32, i32) {
    %c0_i32 = arith.constant 0 : i32
    %c0_i32_0 = arith.constant 0 : i32
    %c0_i32_1 = arith.constant 0 : i32
    %c0_i32_2 = arith.constant 0 : i32
    return %c0_i32, %c0_i32_0, %c0_i32_1 : i32, i32, i32
  }
  func.func @transform_4(%arg0: i32) -> (i32, i32) {
    %c0_i32 = arith.constant 0 : i32
    %c0_i32_0 = arith.constant 0 : i32
    %c0_i32_1 = arith.constant 0 : i32
    return %c0_i32, %c0_i32_0 : i32, i32
  }
  func.func @transform_5(%arg0: i32) -> (i32, i32) {
    %c0_i32 = arith.constant 0 : i32
    %c0_i32_0 = arith.constant 0 : i32
    return %arg0, %c0_i32 : i32, i32
  }
}

</mosaic_0001>

<bundles_post_ra>
// kernel: tpu_custom_call.1
= control target key start
LH: loop header
LB: loop body
LE: loop exit
PB: predicated region body
PF: predicated region fallthrough
CT: control target
= control target key end

     0   :  { %10 = vsyncpa [#allocation5], 0  ;;  %s12762_s0 = inlined_call_operand.vmem [shape: f32[2,16,16,4], index: 0, kind: input, shape index: {}]   ;;  %s12763_s1 = inlined_call_operand.vmem [shape: f32[9,4,128], index: 1, kind: input, shape index: {}]   ;;  %s12764_s2 = inlined_call_operand.vmem [shape: f32[1,128], index: 2, kind: input, shape index: {}]   ;;  %s12765_s3 = inlined_call_operand.hbm [shape: f32[9,128,128], index: 3, kind: input, shape index: {}]   ;;  %s12766_s4 = inlined_call_operand.vmem [shape: f32[1,128], index: 4, kind: input, shape index: {}]   ;;  %s12767_s5 = inlined_call_operand.hbm [shape: f32[512,128], index: 5, kind: output, shape index: {}]  }
   0x1   :  { %11 = vsyncpa [#allocation6], 0  ;;  %s22_s20 = sshll.u32 %s12765_s3, 4  ;;  %s9406_s21 = smov [#allocation4]   ;;  %s23_s20 = int_to_ptr.hbm [resolvable:$true] %s22_s20 }
   0x2   :  { %s24_s22 = sshll.u32 %s9406_s21, 4  ;;  %s9407_s23 = smov 128   ;;  %s25_s22 = int_to_ptr.vmem [resolvable:$true] %s24_s22 }
   0x3   :  { %s9408_s24 = smov 8  }
   0x4   :  { %30 = dma.hbm_to_vmem [thread:$0]  %s23_s20, 18432, %s25_s22, [#allocation5], %s9407_s23, %s9407_s23, %s9408_s24  }
   0x5   :  { %9402 = dma.done.wait [#allocation5], 18432  }
   0x6   :  { %9403 = vsyncadd [#allocation5], 4294948864  ;;  %vm37_vm0 = vcmask 31744   ;;  %v9409_v0 = vmov 0.0   ;;  %vm577_vm1 = vcmask 1043456   ;;  %vm52_vm2 = vcmask 24576  }
   0x7   :  { %38 = vst.msk [vmem:[#allocation2] sm:$0xff] %vm37_vm0, %v9409_v0  ;;  %v8744_v1 = vld [vmem:[%s12763_s1 + $0x4] sm:$0xf]  ;;  %v318_v2 = vld [vmem:[%s12763_s1] sm:$0xf]  ;;  %vm40_vm3 = vcmask 25600  }
   0x8   :  { %39 = vst.msk [vmem:[#allocation2 + $0x8] sm:$0xff] %vm37_vm0, %v9409_v0  ;;  %8745 = vmatpush.msk.msra.mxu0 %vm577_vm1, %v8744_v1  ;;  %9337 = vmatpush.msk.msra.mxu2 %vm577_vm1, %v8744_v1  ;;  %v8875_v5 = vld [vmem:[%s12763_s1 + $0x8] sm:$0xf]  ;;  %v8941_v7 = vld [vmem:[%s12763_s1 + $0xc] sm:$0xf]  ;;  %v125_v12 = vld [vmem:[%s12762_s0] sm:$0xff] }
   0x9   :  { %42 = vst.msk [vmem:[#allocation2 + $0x1b0] sm:$0xff] %vm37_vm0, %v9409_v0  ;;  %9338 = vmatpush.msk.msra.mxu3 %vm577_vm1, %v318_v2  ;;  %8810 = vmatpush.msk.msra.mxu1 %vm577_vm1, %v318_v2  ;;  %v9007_v10 = vld [vmem:[%s12763_s1 + $0x10] sm:$0xf]  ;;  %v157_v13 = vld [vmem:[%s12762_s0 + $0x100] sm:$0xff]  ;;  %v126_v15 = vld [vmem:[%s12762_s0 + $0x8] sm:$0xff]  ;;  %s8731_s13 = sshll.u32 %s12767_s5, 4  ;;  %s8732_s13 = int_to_ptr.hbm [resolvable:$true] %s8731_s13 }
   0xa   :  { %43 = vst.msk [vmem:[#allocation2 + $0x1b8] sm:$0xff] %vm37_vm0, %v9409_v0  ;;  %8876 = vmatpush.msk.msrb.mxu2 %vm577_vm1, %v8875_v5  ;;  %9008 = vmatpush.msk.msrb.mxu0 %vm577_vm1, %v9007_v10  ;;  %v158_v17 = vld [vmem:[%s12762_s0 + $0x108] sm:$0xff]  ;;  %v127_v18 = vld [vmem:[%s12762_s0 + $0x10] sm:$0xff]  ;;  %v128_v20 = vld [vmem:[%s12762_s0 + $0x18] sm:$0xff] }
   0xb   :  { %46 = vst.msk [vmem:[#allocation2 + $0x198] sm:$0xff] %vm37_vm0, %v9409_v0  ;;  %8942 = vmatpush.msk.msrb.mxu3 %vm577_vm1, %v8941_v7  ;;  %v159_v19 = vld [vmem:[%s12762_s0 + $0x110] sm:$0xff]  ;;  %v160_v21 = vld [vmem:[%s12762_s0 + $0x118] sm:$0xff]  ;;  %v129_v22 = vld [vmem:[%s12762_s0 + $0x20] sm:$0xff] }
   0xc   :  { %47 = vst.msk [vmem:[#allocation2 + $0x1a0] sm:$0xff] %vm37_vm0, %v9409_v0  ;;  %v161_v23 = vld [vmem:[%s12762_s0 + $0x120] sm:$0xff]  ;;  %v130_v28 = vld [vmem:[%s12762_s0 + $0x28] sm:$0xff]  ;;  %v131_v34 = vld [vmem:[%s12762_s0 + $0x30] sm:$0xff] }
   0xd   :  { %49 = vst.msk [vmem:[#allocation2 + $0x348] sm:$0xff] %vm37_vm0, %v9409_v0  ;;  %v162_v29 = vld [vmem:[%s12762_s0 + $0x128] sm:$0xff]  ;;  %v163_v35 = vld [vmem:[%s12762_s0 + $0x130] sm:$0xff]  ;;  %v132_v40 = vld [vmem:[%s12762_s0 + $0x38] sm:$0xff] }
   0xe   :  { %50 = vst.msk [vmem:[#allocation2 + $0x350] sm:$0xff] %vm37_vm0, %v9409_v0  ;;  %v164_v41 = vld [vmem:[%s12762_s0 + $0x138] sm:$0xff]  ;;  %v133_v46 = vld [vmem:[%s12762_s0 + $0x40] sm:$0xff]  ;;  %v134_v52 = vld [vmem:[%s12762_s0 + $0x48] sm:$0xff] }
   0xf   :  { %v319_v3 = vld [vmem:[#allocation2 + $0x1] sm:$0xff]  ;;  %5193 = vst [vmem:[#allocation3] sm:$0xff] %v9409_v0  ;;  %v135_v58 = vld [vmem:[%s12762_s0 + $0x50] sm:$0xff]  ;;  %v168_v1 = vld [vmem:[%s12762_s0 + $0x158] sm:$0xff] }
  0x10   :  { %8746 = vmatmul.msk.f32.vlgmr.msra.gmra.mxu0 %vm37_vm0, %v319_v3  ;;  %5194 = vst [vmem:[#allocation3 + $0x8] sm:$0xff] %v9409_v0  ;;  %v255_v11 = vld [vmem:[#allocation2 + $0x8] sm:$0xff]  ;;  %v165_v47 = vld [vmem:[%s12762_s0 + $0x140] sm:$0xff]  ;;  %v167_v59 = vld [vmem:[%s12762_s0 + $0x150] sm:$0xff] }
  0x11   :  { %5195 = vst [vmem:[#allocation3 + $0x10] sm:$0x3] %v9409_v0  ;;  %v351_v4 = vld [vmem:[#allocation2 + $0x1b1] sm:$0xff]  ;;  %v166_v53 = vld [vmem:[%s12762_s0 + $0x148] sm:$0xff]  ;;  %v169_v7 = vld [vmem:[%s12762_s0 + $0x160] sm:$0xff] }
  0x12   :  { %5196 = vst [vmem:[#allocation3 + $0x1b0] sm:$0xff] %v9409_v0  ;;  %8778 = vmatmul.msk.f32.vlgmr.msra.gmra.mxu2 %vm37_vm0, %v351_v4  ;;  %v287_v8 = vld [vmem:[#allocation2 + $0x1b8] sm:$0xff] }
  0x13   :  { %5197 = vst [vmem:[#allocation3 + $0x1b8] sm:$0xff] %v9409_v0 }
  0x14   :  { %5198 = vst [vmem:[#allocation3 + $0x1c0] sm:$0x3] %v9409_v0 }
  0x15   :  { %5200 = vst [vmem:[#allocation3 + $0x198] sm:$0xff] %v9409_v0 }
  0x16   :  { %5201 = vst [vmem:[#allocation3 + $0x1a0] sm:$0xff] %v9409_v0 }
  0x17   :  { %5202 = vst [vmem:[#allocation3 + $0x1a8] sm:$0x3] %v9409_v0 }
  0x18   :  { %5203 = vst [vmem:[#allocation3 + $0x348] sm:$0xff] %v9409_v0 }
  0x19   :  { %5204 = vst [vmem:[#allocation3 + $0x350] sm:$0xff] %v9409_v0 }
  0x1a   :  { %5205 = vst [vmem:[#allocation3 + $0x358] sm:$0x3] %v9409_v0 }
  0x1b   :  { %5207 = vst [vmem:[#allocation3 + $0x18] sm:$0x1] %v9409_v0 }
  0x1c   :  { %5208 = vst [vmem:[#allocation3 + $0x30] sm:$0x1] %v9409_v0 }
  0x1d   :  { %5209 = vst [vmem:[#allocation3 + $0x48] sm:$0x1] %v9409_v0 }
  0x1e   :  { %5210 = vst [vmem:[#allocation3 + $0x60] sm:$0x1] %v9409_v0 }
  0x1f   :  { %5211 = vst [vmem:[#allocation3 + $0x78] sm:$0x1] %v9409_v0 }
  0x20   :  { %5212 = vst [vmem:[#allocation3 + $0x90] sm:$0x1] %v9409_v0 }
  0x21   :  { %5213 = vst [vmem:[#allocation3 + $0xa8] sm:$0x1] %v9409_v0 }
  0x22   :  { %5214 = vst [vmem:[#allocation3 + $0xc0] sm:$0x1] %v9409_v0 }
  0x23   :  { %5215 = vst [vmem:[#allocation3 + $0xd8] sm:$0x1] %v9409_v0 }
  0x24   :  { %5216 = vst [vmem:[#allocation3 + $0xf0] sm:$0x1] %v9409_v0 }
  0x25   :  { %5217 = vst [vmem:[#allocation3 + $0x108] sm:$0x1] %v9409_v0 }
  0x26   :  { %5218 = vst [vmem:[#allocation3 + $0x120] sm:$0x1] %v9409_v0 }
  0x27   :  { %5219 = vst [vmem:[#allocation3 + $0x138] sm:$0x1] %v9409_v0 }
  0x28   :  { %5220 = vst [vmem:[#allocation3 + $0x150] sm:$0x1] %v9409_v0 }
  0x29   :  { %5221 = vst [vmem:[#allocation3 + $0x168] sm:$0x1] %v9409_v0 }
  0x2a   :  { %5222 = vst [vmem:[#allocation3 + $0x180] sm:$0x1] %v9409_v0 }
  0x2b   :  { %5225 = vst [vmem:[#allocation3 + $0x1c8] sm:$0x1] %v9409_v0 }
  0x2c   :  { %5226 = vst [vmem:[#allocation3 + $0x1e0] sm:$0x1] %v9409_v0 }
  0x2d   :  { %5227 = vst [vmem:[#allocation3 + $0x1f8] sm:$0x1] %v9409_v0 }
  0x2e   :  { %5228 = vst [vmem:[#allocation3 + $0x210] sm:$0x1] %v9409_v0 }
  0x2f   :  { %5229 = vst [vmem:[#allocation3 + $0x228] sm:$0x1] %v9409_v0 }
  0x30   :  { %5230 = vst [vmem:[#allocation3 + $0x240] sm:$0x1] %v9409_v0 }
  0x31   :  { %5231 = vst [vmem:[#allocation3 + $0x258] sm:$0x1] %v9409_v0 }
  0x32   :  { %5232 = vst [vmem:[#allocation3 + $0x270] sm:$0x1] %v9409_v0 }
  0x33   :  { %5233 = vst [vmem:[#allocation3 + $0x288] sm:$0x1] %v9409_v0 }
  0x34   :  { %5234 = vst [vmem:[#allocation3 + $0x2a0] sm:$0x1] %v9409_v0 }
  0x35   :  { %5235 = vst [vmem:[#allocation3 + $0x2b8] sm:$0x1] %v9409_v0 }
  0x36   :  { %5236 = vst [vmem:[#allocation3 + $0x2d0] sm:$0x1] %v9409_v0 }
  0x37   :  { %5237 = vst [vmem:[#allocation3 + $0x2e8] sm:$0x1] %v9409_v0 }
  0x38   :  { %5238 = vst [vmem:[#allocation3 + $0x300] sm:$0x1] %v9409_v0 }
  0x39   :  { %5239 = vst [vmem:[#allocation3 + $0x318] sm:$0x1] %v9409_v0 }
  0x3a   :  { %5240 = vst [vmem:[#allocation3 + $0x330] sm:$0x1] %v9409_v0 }
  0x3b   :  { %5243 = vst [vmem:[#allocation3 + $0x29] sm:$0x1] %v9409_v0 }
  0x3c   :  { %5244 = vst [vmem:[#allocation3 + $0x41] sm:$0x1] %v9409_v0 }
  0x3d   :  { %5245 = vst [vmem:[#allocation3 + $0x59] sm:$0x1] %v9409_v0 }
  0x3e   :  { %5246 = vst [vmem:[#allocation3 + $0x71] sm:$0x1] %v9409_v0 }
  0x3f   :  { %5247 = vst [vmem:[#allocation3 + $0x89] sm:$0x1] %v9409_v0 }
  0x40   :  { %5248 = vst [vmem:[#allocation3 + $0xa1] sm:$0x1] %v9409_v0 }
  0x41   :  { %5249 = vst [vmem:[#allocation3 + $0xb9] sm:$0x1] %v9409_v0 }
  0x42   :  { %5250 = vst [vmem:[#allocation3 + $0xd1] sm:$0x1] %v9409_v0 }
  0x43   :  { %5251 = vst [vmem:[#allocation3 + $0xe9] sm:$0x1] %v9409_v0 }
  0x44   :  { %5252 = vst [vmem:[#allocation3 + $0x101] sm:$0x1] %v9409_v0 }
  0x45   :  { %5253 = vst [vmem:[#allocation3 + $0x119] sm:$0x1] %v9409_v0 }
  0x46   :  { %5254 = vst [vmem:[#allocation3 + $0x131] sm:$0x1] %v9409_v0 }
  0x47   :  { %5255 = vst [vmem:[#allocation3 + $0x149] sm:$0x1] %v9409_v0 }
  0x48   :  { %5256 = vst [vmem:[#allocation3 + $0x161] sm:$0x1] %v9409_v0 }
  0x49   :  { %5257 = vst [vmem:[#allocation3 + $0x179] sm:$0x1] %v9409_v0 }
  0x4a   :  { %5258 = vst [vmem:[#allocation3 + $0x191] sm:$0x1] %v9409_v0 }
  0x4b   :  { %5261 = vst [vmem:[#allocation3 + $0x1d9] sm:$0x1] %v9409_v0 }
  0x4c   :  { %5262 = vst [vmem:[#allocation3 + $0x1f1] sm:$0x1] %v9409_v0 }
  0x4d   :  { %5263 = vst [vmem:[#allocation3 + $0x209] sm:$0x1] %v9409_v0 }
  0x4e   :  { %5264 = vst [vmem:[#allocation3 + $0x221] sm:$0x1] %v9409_v0 }
  0x4f   :  { %5265 = vst [vmem:[#allocation3 + $0x239] sm:$0x1] %v9409_v0 }
  0x50   :  { %5266 = vst [vmem:[#allocation3 + $0x251] sm:$0x1] %v9409_v0 }
  0x51   :  { %5267 = vst [vmem:[#allocation3 + $0x269] sm:$0x1] %v9409_v0 }
  0x52   :  { %5268 = vst [vmem:[#allocation3 + $0x281] sm:$0x1] %v9409_v0 }
  0x53   :  { %5269 = vst [vmem:[#allocation3 + $0x299] sm:$0x1] %v9409_v0 }
  0x54   :  { %5270 = vst [vmem:[#allocation3 + $0x2b1] sm:$0x1] %v9409_v0 }
  0x55   :  { %5271 = vst [vmem:[#allocation3 + $0x2c9] sm:$0x1] %v9409_v0 }
  0x56   :  { %5272 = vst [vmem:[#allocation3 + $0x2e1] sm:$0x1] %v9409_v0 }
  0x57   :  { %5273 = vst [vmem:[#allocation3 + $0x2f9] sm:$0x1] %v9409_v0 }
  0x58   :  { %5274 = vst [vmem:[#allocation3 + $0x311] sm:$0x1] %v9409_v0 }
  0x59   :  { %5275 = vst [vmem:[#allocation3 + $0x329] sm:$0x1] %v9409_v0 }
  0x5a   :  { %5276 = vst [vmem:[#allocation3 + $0x341] sm:$0x1] %v9409_v0 }
  0x5b   :  { %5206 = vst [vmem:[#allocation3] sm:$0x1] %v9409_v0 }
  0x5c   :  { %5223 = vst [vmem:[#allocation3 + $0x198] sm:$0x1] %v9409_v0 }
  0x5d   :  { %5224 = vst [vmem:[#allocation3 + $0x1b0] sm:$0x1] %v9409_v0 }
  0x5e   :  { %5241 = vst [vmem:[#allocation3 + $0x348] sm:$0x1] %v9409_v0 }
  0x5f   :  { %5242 = vst [vmem:[#allocation3 + $0x11] sm:$0x1] %v9409_v0 }
  0x60   :  { %5259 = vst [vmem:[#allocation3 + $0x1a9] sm:$0x1] %v9409_v0 }
  0x61   :  { %5260 = vst [vmem:[#allocation3 + $0x1c1] sm:$0x1] %v9409_v0 }
  0x62   :  { %5277 = vst [vmem:[#allocation3 + $0x359] sm:$0x1] %v9409_v0 }
  0x63   :  { %71 = vst.msk [vmem:[#allocation2 + $0x1b0] sm:$0x1] %vm52_vm2, %v9409_v0 }
  0x64   :  { %53 = vst.msk [vmem:[#allocation2] sm:$0x1] %vm52_vm2, %v9409_v0 }
  0x65   :  { %54 = vst.msk [vmem:[#allocation2 + $0x18] sm:$0x1] %vm52_vm2, %v9409_v0 }
  0x66   :  { %55 = vst.msk [vmem:[#allocation2 + $0x30] sm:$0x1] %vm52_vm2, %v9409_v0 }
  0x67   :  { %56 = vst.msk [vmem:[#allocation2 + $0x48] sm:$0x1] %vm52_vm2, %v9409_v0 }
  0x68   :  { %57 = vst.msk [vmem:[#allocation2 + $0x60] sm:$0x1] %vm52_vm2, %v9409_v0 }
  0x69   :  { %58 = vst.msk [vmem:[#allocation2 + $0x78] sm:$0x1] %vm52_vm2, %v9409_v0 }
  0x6a   :  { %v286_v6 = vld [vmem:[#allocation2 + $0x1b0] sm:$0xff]  ;;  %59 = vst.msk [vmem:[#allocation2 + $0x90] sm:$0x1] %vm52_vm2, %v9409_v0 }
  0x6b   :  { %8843 = vmatmul.msk.f32.vlgmr.msra.gmra.mxu3 %vm37_vm0, %v286_v6  ;;  %60 = vst.msk [vmem:[#allocation2 + $0xa8] sm:$0x1] %vm52_vm2, %v9409_v0  ;;  %v254_v9 = vld [vmem:[#allocation2] sm:$0xff] }
  0x6c   :  { %61 = vst.msk [vmem:[#allocation2 + $0xc0] sm:$0x1] %vm52_vm2, %v9409_v0  ;;  %8811 = vmatmul.msk.f32.vlgmr.msra.gmra.mxu1 %vm37_vm0, %v254_v9  ;;  %v137_v6 = vld [vmem:[%s12762_s0 + $0x60] sm:$0xff] }
  0x6d   :  { %62 = vst.msk [vmem:[#allocation2 + $0xd8] sm:$0x1] %vm52_vm2, %v9409_v0 }
  0x6e   :  { %63 = vst.msk [vmem:[#allocation2 + $0xf0] sm:$0x1] %vm52_vm2, %v9409_v0 }
  0x6f   :  { %64 = vst.msk [vmem:[#allocation2 + $0x108] sm:$0x1] %vm52_vm2, %v9409_v0 }
  0x70   :  { %65 = vst.msk [vmem:[#allocation2 + $0x120] sm:$0x1] %vm52_vm2, %v9409_v0 }
  0x71   :  { %66 = vst.msk [vmem:[#allocation2 + $0x138] sm:$0x1] %vm52_vm2, %v9409_v0 }
  0x72   :  { %67 = vst.msk [vmem:[#allocation2 + $0x150] sm:$0x1] %vm52_vm2, %v9409_v0 }
  0x73   :  { %68 = vst.msk [vmem:[#allocation2 + $0x168] sm:$0x1] %vm52_vm2, %v9409_v0  ;;  %8844 = vmatmul.msk.f32.gmra.mxu3 %vm37_vm0, %v287_v8 }
  0x74   :  { %69 = vst.msk [vmem:[#allocation2 + $0x180] sm:$0x1] %vm52_vm2, %v9409_v0  ;;  %8812 = vmatmul.msk.f32.gmra.mxu1 %vm37_vm0, %v255_v11 }
  0x75   :  { %70 = vst.msk [vmem:[#allocation2 + $0x198] sm:$0x1] %vm52_vm2, %v9409_v0 }
  0x76   :  { %72 = vst.msk [vmem:[#allocation2 + $0x1c8] sm:$0x1] %vm52_vm2, %v9409_v0 }
  0x77   :  { %73 = vst.msk [vmem:[#allocation2 + $0x1e0] sm:$0x1] %vm52_vm2, %v9409_v0 }
  0x78   :  { %74 = vst.msk [vmem:[#allocation2 + $0x1f8] sm:$0x1] %vm52_vm2, %v9409_v0 }
  0x79   :  { %75 = vst.msk [vmem:[#allocation2 + $0x210] sm:$0x1] %vm52_vm2, %v9409_v0 }
  0x7a   :  { %76 = vst.msk [vmem:[#allocation2 + $0x228] sm:$0x1] %vm52_vm2, %v9409_v0 }
  0x7b   :  { %77 = vst.msk [vmem:[#allocation2 + $0x240] sm:$0x1] %vm52_vm2, %v9409_v0 }
  0x7c   :  { %78 = vst.msk [vmem:[#allocation2 + $0x258] sm:$0x1] %vm52_vm2, %v9409_v0 }
  0x7d   :  { %79 = vst.msk [vmem:[#allocation2 + $0x270] sm:$0x1] %vm52_vm2, %v9409_v0 }
  0x7e   :  { %80 = vst.msk [vmem:[#allocation2 + $0x288] sm:$0x1] %vm52_vm2, %v9409_v0 }
  0x7f   :  { %81 = vst.msk [vmem:[#allocation2 + $0x2a0] sm:$0x1] %vm52_vm2, %v9409_v0 }
  0x80   :  { %82 = vst.msk [vmem:[#allocation2 + $0x2b8] sm:$0x1] %vm52_vm2, %v9409_v0 }
  0x81   :  { %83 = vst.msk [vmem:[#allocation2 + $0x2d0] sm:$0x1] %vm52_vm2, %v9409_v0 }
  0x82   :  { %84 = vst.msk [vmem:[#allocation2 + $0x2e8] sm:$0x1] %vm52_vm2, %v9409_v0 }
  0x83   :  { %85 = vst.msk [vmem:[#allocation2 + $0x300] sm:$0x1] %vm52_vm2, %v9409_v0 }
  0x84   :  { %86 = vst.msk [vmem:[#allocation2 + $0x318] sm:$0x1] %vm52_vm2, %v9409_v0 }
  0x85   :  { %87 = vst.msk [vmem:[#allocation2 + $0x330] sm:$0x1] %vm52_vm2, %v9409_v0 }
  0x86   :  { %88 = vst.msk [vmem:[#allocation2 + $0x348] sm:$0x1] %vm52_vm2, %v9409_v0 }
  0x87   :  { %90 = vst.msk [vmem:[#allocation2 + $0x29] sm:$0x1] %vm52_vm2, %v9409_v0 }
  0x88   :  { %91 = vst.msk [vmem:[#allocation2 + $0x41] sm:$0x1] %vm52_vm2, %v9409_v0 }
  0x89   :  { %92 = vst.msk [vmem:[#allocation2 + $0x59] sm:$0x1] %vm52_vm2, %v9409_v0 }
  0x8a   :  { %93 = vst.msk [vmem:[#allocation2 + $0x71] sm:$0x1] %vm52_vm2, %v9409_v0 }
  0x8b   :  { %94 = vst.msk [vmem:[#allocation2 + $0x89] sm:$0x1] %vm52_vm2, %v9409_v0 }
  0x8c   :  { %95 = vst.msk [vmem:[#allocation2 + $0xa1] sm:$0x1] %vm52_vm2, %v9409_v0 }
  0x8d   :  { %96 = vst.msk [vmem:[#allocation2 + $0xb9] sm:$0x1] %vm52_vm2, %v9409_v0 }
  0x8e   :  { %97 = vst.msk [vmem:[#allocation2 + $0xd1] sm:$0x1] %vm52_vm2, %v9409_v0 }
  0x8f   :  { %98 = vst.msk [vmem:[#allocation2 + $0xe9] sm:$0x1] %vm52_vm2, %v9409_v0 }
  0x90   :  { %99 = vst.msk [vmem:[#allocation2 + $0x101] sm:$0x1] %vm52_vm2, %v9409_v0 }
  0x91   :  { %100 = vst.msk [vmem:[#allocation2 + $0x119] sm:$0x1] %vm52_vm2, %v9409_v0 }
  0x92   :  { %101 = vst.msk [vmem:[#allocation2 + $0x131] sm:$0x1] %vm52_vm2, %v9409_v0 }
  0x93   :  { %102 = vst.msk [vmem:[#allocation2 + $0x149] sm:$0x1] %vm52_vm2, %v9409_v0 }
  0x94   :  { %103 = vst.msk [vmem:[#allocation2 + $0x161] sm:$0x1] %vm52_vm2, %v9409_v0 }
  0x95   :  { %104 = vst.msk [vmem:[#allocation2 + $0x179] sm:$0x1] %vm52_vm2, %v9409_v0 }
  0x96   :  { %105 = vst.msk [vmem:[#allocation2 + $0x191] sm:$0x1] %vm52_vm2, %v9409_v0 }
  0x97   :  { %108 = vst.msk [vmem:[#allocation2 + $0x1d9] sm:$0x1] %vm52_vm2, %v9409_v0 }
  0x98   :  { %109 = vst.msk [vmem:[#allocation2 + $0x1f1] sm:$0x1] %vm52_vm2, %v9409_v0 }
  0x99   :  { %110 = vst.msk [vmem:[#allocation2 + $0x209] sm:$0x1] %vm52_vm2, %v9409_v0 }
  0x9a   :  { %111 = vst.msk [vmem:[#allocation2 + $0x221] sm:$0x1] %vm52_vm2, %v9409_v0 }
  0x9b   :  { %112 = vst.msk [vmem:[#allocation2 + $0x239] sm:$0x1] %vm52_vm2, %v9409_v0 }
  0x9c   :  { %113 = vst.msk [vmem:[#allocation2 + $0x251] sm:$0x1] %vm52_vm2, %v9409_v0 }
  0x9d   :  { %114 = vst.msk [vmem:[#allocation2 + $0x269] sm:$0x1] %vm52_vm2, %v9409_v0 }
  0x9e   :  { %115 = vst.msk [vmem:[#allocation2 + $0x281] sm:$0x1] %vm52_vm2, %v9409_v0 }
  0x9f   :  { %116 = vst.msk [vmem:[#allocation2 + $0x299] sm:$0x1] %vm52_vm2, %v9409_v0 }
  0xa0   :  { %117 = vst.msk [vmem:[#allocation2 + $0x2b1] sm:$0x1] %vm52_vm2, %v9409_v0 }
  0xa1   :  { %118 = vst.msk [vmem:[#allocation2 + $0x2c9] sm:$0x1] %vm52_vm2, %v9409_v0 }
  0xa2   :  { %119 = vst.msk [vmem:[#allocation2 + $0x2e1] sm:$0x1] %vm52_vm2, %v9409_v0 }
  0xa3   :  { %120 = vst.msk [vmem:[#allocation2 + $0x2f9] sm:$0x1] %vm52_vm2, %v9409_v0 }
  0xa4   :  { %121 = vst.msk [vmem:[#allocation2 + $0x311] sm:$0x1] %vm52_vm2, %v9409_v0 }
  0xa5   :  { %122 = vst.msk [vmem:[#allocation2 + $0x329] sm:$0x1] %vm52_vm2, %v9409_v0 }
  0xa6   :  { %123 = vst.msk [vmem:[#allocation2 + $0x341] sm:$0x1] %vm52_vm2, %v9409_v0 }
  0xa7   :  { %41 = vst.msk [vmem:[#allocation2 + $0x10] sm:$0x3] %vm40_vm3, %v9409_v0 }
  0xa8   :  { %44 = vst.msk [vmem:[#allocation2 + $0x1c0] sm:$0x3] %vm40_vm3, %v9409_v0 }
  0xa9   :  { %48 = vst.msk [vmem:[#allocation2 + $0x1a8] sm:$0x3] %vm40_vm3, %v9409_v0 }
  0xaa   :  { %51 = vst.msk [vmem:[#allocation2 + $0x358] sm:$0x3] %vm40_vm3, %v9409_v0 }
  0xab   :  { %89 = vst.msk [vmem:[#allocation2 + $0x11] sm:$0x1] %vm52_vm2, %v9409_v0 }
  0xac   :  { %106 = vst.msk [vmem:[#allocation2 + $0x1a9] sm:$0x1] %vm52_vm2, %v9409_v0 }
  0xad   :  { %107 = vst.msk [vmem:[#allocation2 + $0x1c1] sm:$0x1] %vm52_vm2, %v9409_v0 }
  0xae   :  { %v320_v14 = vld [vmem:[#allocation2 + $0x9] sm:$0xff]  ;;  %124 = vst.msk [vmem:[#allocation2 + $0x359] sm:$0x1] %vm52_vm2, %v9409_v0  ;;  %v136_v0 = vld [vmem:[%s12762_s0 + $0x58] sm:$0xff] }
  0xaf   :  { %8747 = vmatmul.msk.f32.gmra.mxu0 %vm37_vm0, %v320_v14  ;;  %v352_v16 = vld [vmem:[#allocation2 + $0x1b9] sm:$0xff]  ;;  %190 = vst.msk [vmem:[#allocation2 + $0x19] sm:$0xff] %vm37_vm0, %v125_v12  ;;  %v138_v12 = vld [vmem:[%s12762_s0 + $0x68] sm:$0xff] }
  0xb0   :  { %8779 = vmatmul.msk.f32.gmra.mxu2 %vm37_vm0, %v352_v16  ;;  %222 = vst.msk [vmem:[#allocation2 + $0x1c9] sm:$0xff] %vm37_vm0, %v157_v13  ;;  %v170_v13 = vld [vmem:[%s12762_s0 + $0x168] sm:$0xff] }
  0xb1   :  { %191 = vst.msk [vmem:[#allocation2 + $0x21] sm:$0xff] %vm37_vm0, %v126_v15 }
  0xb2   :  { %223 = vst.msk [vmem:[#allocation2 + $0x1d1] sm:$0xff] %vm37_vm0, %v158_v17 }
  0xb3   :  { %192 = vst.msk [vmem:[#allocation2 + $0x31] sm:$0xff] %vm37_vm0, %v127_v18  ;;  %v139_v18 = vld [vmem:[%s12762_s0 + $0x70] sm:$0xff] }
  0xb4   :  { %224 = vst.msk [vmem:[#allocation2 + $0x1e1] sm:$0xff] %vm37_vm0, %v159_v19  ;;  %v171_v19 = vld [vmem:[%s12762_s0 + $0x170] sm:$0xff] }
  0xb5   :  { %193 = vst.msk [vmem:[#allocation2 + $0x39] sm:$0xff] %vm37_vm0, %v128_v20 }
  0xb6   :  { %v9762_v24 = vld [vmem:[#allocation2 + $0x19] sm:$0xff]  ;;  %225 = vst.msk [vmem:[#allocation2 + $0x1e9] sm:$0xff] %vm37_vm0, %v160_v21 }
  0xb7   :  { %v9764_v25 = vld [vmem:[#allocation2 + $0x18] sm:$0xff]  ;;  %8748 = vmatmul.msk.f32.gmra.mxu0 %vm37_vm0, %v9762_v24  ;;  %v353_v26 = vld [vmem:[#allocation2 + $0x1c9] sm:$0xff]  ;;  %194 = vst.msk [vmem:[#allocation2 + $0x49] sm:$0xff] %vm37_vm0, %v129_v22 }
  0xb8   :  { %v288_v27 = vld [vmem:[#allocation2 + $0x1c8] sm:$0xff]  ;;  %8813 = vmatmul.msk.f32.gmra.mxu1 %vm37_vm0, %v9764_v25  ;;  %8780 = vmatmul.msk.f32.gmra.mxu2 %vm37_vm0, %v353_v26  ;;  %226 = vst.msk [vmem:[#allocation2 + $0x1f9] sm:$0xff] %vm37_vm0, %v161_v23  ;;  %v9785_v31 = vld [vmem:[#allocation2 + $0x20] sm:$0xff]  ;;  %v140_v26 = vld [vmem:[%s12762_s0 + $0x78] sm:$0xff] }
  0xb9   :  { %8845 = vmatmul.msk.f32.gmra.mxu3 %vm37_vm0, %v288_v27  ;;  %195 = vst.msk [vmem:[#allocation2 + $0x51] sm:$0xff] %vm37_vm0, %v130_v28  ;;  %v9783_v30 = vld [vmem:[#allocation2 + $0x21] sm:$0xff]  ;;  %v354_v32 = vld [vmem:[#allocation2 + $0x1d1] sm:$0xff] }
  0xba   :  { %227 = vst.msk [vmem:[#allocation2 + $0x201] sm:$0xff] %vm37_vm0, %v162_v29  ;;  %v289_v33 = vld [vmem:[#allocation2 + $0x1d0] sm:$0xff]  ;;  %v172_v27 = vld [vmem:[%s12762_s0 + $0x178] sm:$0xff] }
  0xbb   :  { %196 = vst.msk [vmem:[#allocation2 + $0x61] sm:$0xff] %vm37_vm0, %v131_v34  ;;  %v9801_v36 = vld [vmem:[#allocation2 + $0x31] sm:$0xff]  ;;  %v355_v38 = vld [vmem:[#allocation2 + $0x1e1] sm:$0xff] }
  0xbc   :  { %228 = vst.msk [vmem:[#allocation2 + $0x211] sm:$0xff] %vm37_vm0, %v163_v35  ;;  %v9803_v37 = vld [vmem:[#allocation2 + $0x30] sm:$0xff]  ;;  %v290_v39 = vld [vmem:[#allocation2 + $0x1e0] sm:$0xff]  ;;  %v9821_v43 = vld [vmem:[#allocation2 + $0x38] sm:$0xff] }
  0xbd   :  { %197 = vst.msk [vmem:[#allocation2 + $0x69] sm:$0xff] %vm37_vm0, %v132_v40  ;;  %v9819_v42 = vld [vmem:[#allocation2 + $0x39] sm:$0xff]  ;;  %v356_v44 = vld [vmem:[#allocation2 + $0x1e9] sm:$0xff] }
  0xbe   :  { %229 = vst.msk [vmem:[#allocation2 + $0x219] sm:$0xff] %vm37_vm0, %v164_v41  ;;  %v291_v45 = vld [vmem:[#allocation2 + $0x1e8] sm:$0xff]  ;;  %v141_v35 = vld [vmem:[%s12762_s0 + $0x80] sm:$0xff] }
  0xbf   :  { %8749 = vmatmul.msk.f32.gmra.mxu0 %vm37_vm0, %v9783_v30  ;;  %198 = vst.msk [vmem:[#allocation2 + $0x79] sm:$0xff] %vm37_vm0, %v133_v46  ;;  %v9837_v48 = vld [vmem:[#allocation2 + $0x49] sm:$0xff]  ;;  %v357_v50 = vld [vmem:[#allocation2 + $0x1f9] sm:$0xff] }
  0xc0   :  { %8814 = vmatmul.msk.f32.gmra.mxu1 %vm37_vm0, %v9785_v31  ;;  %8781 = vmatmul.msk.f32.gmra.mxu2 %vm37_vm0, %v354_v32  ;;  %230 = vst.msk [vmem:[#allocation2 + $0x229] sm:$0xff] %vm37_vm0, %v165_v47  ;;  %v9839_v49 = vld [vmem:[#allocation2 + $0x48] sm:$0xff]  ;;  %v292_v51 = vld [vmem:[#allocation2 + $0x1f8] sm:$0xff]  ;;  %v9857_v55 = vld [vmem:[#allocation2 + $0x50] sm:$0xff] }
  0xc1   :  { %8846 = vmatmul.msk.f32.gmra.mxu3 %vm37_vm0, %v289_v33  ;;  %199 = vst.msk [vmem:[#allocation2 + $0x81] sm:$0xff] %vm37_vm0, %v134_v52  ;;  %v9855_v54 = vld [vmem:[#allocation2 + $0x51] sm:$0xff]  ;;  %v358_v56 = vld [vmem:[#allocation2 + $0x201] sm:$0xff] }
  0xc2   :  { %231 = vst.msk [vmem:[#allocation2 + $0x231] sm:$0xff] %vm37_vm0, %v166_v53  ;;  %v293_v57 = vld [vmem:[#allocation2 + $0x200] sm:$0xff]  ;;  %v9073_v32 = vld [vmem:[%s12763_s1 + $0x14] sm:$0xf]  ;;  %v174_v46 = vld [vmem:[%s12762_s0 + $0x188] sm:$0xff] }
  0xc3   :  { %200 = vst.msk [vmem:[#allocation2 + $0x91] sm:$0xff] %vm37_vm0, %v135_v58  ;;  %v9873_v60 = vld [vmem:[#allocation2 + $0x61] sm:$0xff]  ;;  %v359_v62 = vld [vmem:[#allocation2 + $0x211] sm:$0xff]  ;;  %9074 = vmatpush.msk.msrb.mxu1 %vm577_vm1, %v9073_v32  ;;  %v10023_v58 = vpop.f32.mrf.mxu0 }
  0xc4   :  { %232 = vst.msk [vmem:[#allocation2 + $0x241] sm:$0xff] %vm37_vm0, %v167_v59  ;;  %v9875_v61 = vld [vmem:[#allocation2 + $0x60] sm:$0xff]  ;;  %v294_v63 = vld [vmem:[#allocation2 + $0x210] sm:$0xff]  ;;  %v9893_v3 = vld [vmem:[#allocation2 + $0x68] sm:$0xff] }
  0xc5   :  { %201 = vst.msk [vmem:[#allocation2 + $0x99] sm:$0xff] %vm37_vm0, %v136_v0  ;;  %v9891_v2 = vld [vmem:[#allocation2 + $0x69] sm:$0xff]  ;;  %v360_v4 = vld [vmem:[#allocation2 + $0x219] sm:$0xff] }
  0xc6   :  { %233 = vst.msk [vmem:[#allocation2 + $0x249] sm:$0xff] %vm37_vm0, %v168_v1  ;;  %v295_v5 = vld [vmem:[#allocation2 + $0x218] sm:$0xff]  ;;  %v143_v53 = vld [vmem:[%s12762_s0 + $0x90] sm:$0xff] }
  0xc7   :  { %8750 = vmatmul.msk.f32.gmra.mxu0 %vm37_vm0, %v9801_v36  ;;  %202 = vst.msk [vmem:[#allocation2 + $0xa9] sm:$0xff] %vm37_vm0, %v137_v6  ;;  %v9909_v8 = vld [vmem:[#allocation2 + $0x79] sm:$0xff]  ;;  %v361_v10 = vld [vmem:[#allocation2 + $0x229] sm:$0xff]  ;;  %v10044_v6 = vpop.f32.mrf.mxu2 }
  0xc8   :  { %8815 = vmatmul.msk.f32.gmra.mxu1 %vm37_vm0, %v9803_v37  ;;  %8782 = vmatmul.msk.f32.gmra.mxu2 %vm37_vm0, %v355_v38  ;;  %234 = vst.msk [vmem:[#allocation2 + $0x259] sm:$0xff] %vm37_vm0, %v169_v7  ;;  %v9911_v9 = vld [vmem:[#allocation2 + $0x78] sm:$0xff]  ;;  %v296_v11 = vld [vmem:[#allocation2 + $0x228] sm:$0xff]  ;;  %v9929_v15 = vld [vmem:[#allocation2 + $0x80] sm:$0xff] }
  0xc9   :  { %8847 = vmatmul.msk.f32.gmra.mxu3 %vm37_vm0, %v290_v39  ;;  %203 = vst.msk [vmem:[#allocation2 + $0xb1] sm:$0xff] %vm37_vm0, %v138_v12  ;;  %v9927_v14 = vld [vmem:[#allocation2 + $0x81] sm:$0xff]  ;;  %v362_v16 = vld [vmem:[#allocation2 + $0x231] sm:$0xff] }
  0xca   :  { %235 = vst.msk [vmem:[#allocation2 + $0x261] sm:$0xff] %vm37_vm0, %v170_v13  ;;  %v297_v17 = vld [vmem:[#allocation2 + $0x230] sm:$0xff]  ;;  %v173_v38 = vld [vmem:[%s12762_s0 + $0x180] sm:$0xff] }
  0xcb   :  { %204 = vst.msk [vmem:[#allocation2 + $0xc1] sm:$0xff] %vm37_vm0, %v139_v18  ;;  %v9945_v20 = vld [vmem:[#allocation2 + $0x91] sm:$0xff]  ;;  %v363_v22 = vld [vmem:[#allocation2 + $0x241] sm:$0xff] }
  0xcc   :  { %236 = vst.msk [vmem:[#allocation2 + $0x271] sm:$0xff] %vm37_vm0, %v171_v19  ;;  %v9947_v21 = vld [vmem:[#allocation2 + $0x90] sm:$0xff]  ;;  %v298_v23 = vld [vmem:[#allocation2 + $0x240] sm:$0xff]  ;;  %v9965_v29 = vld [vmem:[#allocation2 + $0x98] sm:$0xff] }
  0xcd   :  { %205 = vst.msk [vmem:[#allocation2 + $0xc9] sm:$0xff] %vm37_vm0, %v140_v26  ;;  %v9963_v28 = vld [vmem:[#allocation2 + $0x99] sm:$0xff]  ;;  %v364_v33 = vld [vmem:[#allocation2 + $0x249] sm:$0xff] }
  0xce   :  { %237 = vst.msk [vmem:[#allocation2 + $0x279] sm:$0xff] %vm37_vm0, %v172_v27  ;;  %v299_v34 = vld [vmem:[#allocation2 + $0x248] sm:$0xff]  ;;  %v177_v18 = vld [vmem:[%s12762_s0 + $0x1a0] sm:$0xff] }
  0xcf   :  { %8751 = vmatmul.msk.f32.gmra.mxu0 %vm37_vm0, %v9819_v42  ;;  %206 = vst.msk [vmem:[#allocation2 + $0xd9] sm:$0xff] %vm37_vm0, %v141_v35  ;;  %v9985_v39 = vld [vmem:[#allocation2 + $0xa9] sm:$0xff]  ;;  %v365_v41 = vld [vmem:[#allocation2 + $0x259] sm:$0xff] }
  0xd0   :  { %8816 = vmatmul.msk.f32.gmra.mxu1 %vm37_vm0, %v9821_v43  ;;  %8783 = vmatmul.msk.f32.gmra.mxu2 %vm37_vm0, %v356_v44  ;;  %238 = vst.msk [vmem:[#allocation2 + $0x289] sm:$0xff] %vm37_vm0, %v173_v38  ;;  %v9987_v40 = vld [vmem:[#allocation2 + $0xa8] sm:$0xff]  ;;  %v300_v44 = vld [vmem:[#allocation2 + $0x258] sm:$0xff] }
  0xd1   :  { %8848 = vmatmul.msk.f32.gmra.mxu3 %vm37_vm0, %v291_v45  ;;  %v142_v45 = vld [vmem:[%s12762_s0 + $0x88] sm:$0xff]  ;;  %239 = vst.msk [vmem:[#allocation2 + $0x291] sm:$0xff] %vm37_vm0, %v174_v46  ;;  %v10003_v47 = vld [vmem:[#allocation2 + $0xb1] sm:$0xff]  ;;  %v301_v52 = vld [vmem:[#allocation2 + $0x260] sm:$0xff] }
  0xd2   :  { %207 = vst.msk [vmem:[#allocation2 + $0xe1] sm:$0xff] %vm37_vm0, %v142_v45  ;;  %v10025_v59 = vld [vmem:[#allocation2 + $0xc1] sm:$0xff] }
  0xd3   :  { %208 = vst.msk [vmem:[#allocation2 + $0xf1] sm:$0xff] %vm37_vm0, %v143_v53  ;;  %v302_v0 = vld [vmem:[#allocation2 + $0x270] sm:$0xff]  ;;  %v146_v38 = vld [vmem:[%s12762_s0 + $0xa8] sm:$0xff] }
  0xd4   :  { %12787 = vst [vmem:[#allocation11_spill] sm:$0xff] %v10044_v6  ;;  %v10053_v12 = vld [vmem:[#allocation2 + $0xc8] sm:$0xff] }
  0xd5   :  { %v368_v13 = vld [vmem:[#allocation2 + $0x279] sm:$0xff]  ;;  %242 = vst.msk [vmem:[#allocation2 + $0x2b9] sm:$0xff] %vm37_vm0, %v177_v18 }
  0xd6   :  { %v10073_v27 = vld [vmem:[#allocation2 + $0xd9] sm:$0xff]  ;;  %211 = vst.msk [vmem:[#allocation2 + $0x111] sm:$0xff] %vm37_vm0, %v146_v38 }
  0xd7   :  { %8752 = vmatmul.msk.f32.gmra.mxu0 %vm37_vm0, %v9837_v48  ;;  %v304_v35 = vld [vmem:[#allocation2 + $0x288] sm:$0xff] }
  0xd8   :  { %8817 = vmatmul.msk.f32.gmra.mxu1 %vm37_vm0, %v9839_v49  ;;  %8784 = vmatmul.msk.f32.gmra.mxu2 %vm37_vm0, %v357_v50  ;;  %v10005_v50 = vld [vmem:[#allocation2 + $0xb0] sm:$0xff] }
  0xd9   :  { %8849 = vmatmul.msk.f32.gmra.mxu3 %vm37_vm0, %v292_v51  ;;  %v366_v51 = vld [vmem:[#allocation2 + $0x261] sm:$0xff] }
  0xdc   :  { %v373_v6 = vld [vmem:[#allocation2 + $0x2b9] sm:$0xff] }
  0xdf   :  { %8753 = vmatmul.msk.f32.gmra.mxu0 %vm37_vm0, %v9855_v54 }
  0xe0   :  { %8818 = vmatmul.msk.f32.gmra.mxu1 %vm37_vm0, %v9857_v55  ;;  %8785 = vmatmul.msk.f32.gmra.mxu2 %vm37_vm0, %v358_v56  ;;  %v175_v56 = vld [vmem:[%s12762_s0 + $0x190] sm:$0xff] }
  0xe1   :  { %8850 = vmatmul.msk.f32.gmra.mxu3 %vm37_vm0, %v293_v57  ;;  %240 = vst.msk [vmem:[#allocation2 + $0x2a1] sm:$0xff] %vm37_vm0, %v175_v56  ;;  %v10101_v56 = vld [vmem:[#allocation2 + $0xe0] sm:$0xff] }
  0xe7   :  { %8754 = vmatmul.msk.f32.gmra.mxu0 %vm37_vm0, %v9873_v60 }
  0xe8   :  { %8819 = vmatmul.msk.f32.gmra.mxu1 %vm37_vm0, %v9875_v61  ;;  %8786 = vmatmul.msk.f32.gmra.mxu2 %vm37_vm0, %v359_v62  ;;  %v10027_v62 = vld [vmem:[#allocation2 + $0xc0] sm:$0xff] }
  0xe9   :  { %8851 = vmatmul.msk.f32.gmra.mxu3 %vm37_vm0, %v294_v63  ;;  %v10019_v57 = vpop.f32.mrf.mxu1  ;;  %v367_v63 = vld [vmem:[#allocation2 + $0x271] sm:$0xff]  ;;  %v306_v38 = vld [vmem:[#allocation2 + $0x2a0] sm:$0xff] }
  0xee   :  { %v10031_v1 = vpop.f32.mrf.mxu3 }
  0xef   :  { %8755 = vmatmul.msk.f32.gmra.mxu0 %vm37_vm0, %v9891_v2  ;;  %12786 = vst [vmem:[#allocation10_spill] sm:$0xff] %v10031_v1 }
  0xf0   :  { %8820 = vmatmul.msk.f32.gmra.mxu1 %vm37_vm0, %v9893_v3  ;;  %8787 = vmatmul.msk.f32.gmra.mxu2 %vm37_vm0, %v360_v4  ;;  %v144_v4 = vld [vmem:[%s12762_s0 + $0x98] sm:$0xff] }
  0xf1   :  { %8852 = vmatmul.msk.f32.gmra.mxu3 %vm37_vm0, %v295_v5  ;;  %v176_v5 = vld [vmem:[%s12762_s0 + $0x198] sm:$0xff]  ;;  %209 = vst.msk [vmem:[#allocation2 + $0xf9] sm:$0xff] %vm37_vm0, %v144_v4  ;;  %v10047_v7 = vpop.f32.mrf.mxu1  ;;  %v147_v4 = vld [vmem:[%s12762_s0 + $0xb0] sm:$0xff] }
  0xf2   :  { %241 = vst.msk [vmem:[#allocation2 + $0x2a9] sm:$0xff] %vm37_vm0, %v176_v5  ;;  %v179_v5 = vld [vmem:[%s12762_s0 + $0x1b0] sm:$0xff] }
  0xf3   :  { %212 = vst.msk [vmem:[#allocation2 + $0x121] sm:$0xff] %vm37_vm0, %v147_v4 }
  0xf4   :  { %244 = vst.msk [vmem:[#allocation2 + $0x2d1] sm:$0xff] %vm37_vm0, %v179_v5 }
  0xf6   :  { %v1101_v19 = vpop.f32.mrf.mxu3 }
  0xf7   :  { %8756 = vmatmul.msk.f32.gmra.mxu0 %vm37_vm0, %v9909_v8 }
  0xf8   :  { %8821 = vmatmul.msk.f32.gmra.mxu1 %vm37_vm0, %v9911_v9  ;;  %8788 = vmatmul.msk.f32.gmra.mxu2 %vm37_vm0, %v361_v10  ;;  %v10145_v5 = vld [vmem:[#allocation2 + $0xf9] sm:$0xff] }
  0xf9   :  { %8853 = vmatmul.msk.f32.gmra.mxu3 %vm37_vm0, %v296_v11  ;;  %v10051_v11 = vld [vmem:[#allocation2 + $0xc9] sm:$0xff] }
  0xff   :  { %8757 = vmatmul.msk.f32.gmra.mxu0 %vm37_vm0, %v9927_v14 }
 0x100   :  { %8822 = vmatmul.msk.f32.gmra.mxu1 %vm37_vm0, %v9929_v15  ;;  %8789 = vmatmul.msk.f32.gmra.mxu2 %vm37_vm0, %v362_v16  ;;  %v303_v16 = vld [vmem:[#allocation2 + $0x278] sm:$0xff] }
 0x101   :  { %8854 = vmatmul.msk.f32.gmra.mxu3 %vm37_vm0, %v297_v17  ;;  %v145_v17 = vld [vmem:[%s12762_s0 + $0xa0] sm:$0xff] }
 0x102   :  { %210 = vst.msk [vmem:[#allocation2 + $0x109] sm:$0xff] %vm37_vm0, %v145_v17 }
 0x107   :  { %8758 = vmatmul.msk.f32.gmra.mxu0 %vm37_vm0, %v9945_v20 }
 0x108   :  { %8823 = vmatmul.msk.f32.gmra.mxu1 %vm37_vm0, %v9947_v21  ;;  %8790 = vmatmul.msk.f32.gmra.mxu2 %vm37_vm0, %v363_v22 }
 0x109   :  { %8855 = vmatmul.msk.f32.gmra.mxu3 %vm37_vm0, %v298_v23  ;;  %v10173_v1 = vld [vmem:[#allocation2 + $0x108] sm:$0xff] }
 0x10f   :  { %8759 = vmatmul.msk.f32.gmra.mxu0 %vm37_vm0, %v9963_v28 }
 0x110   :  { %8824 = vmatmul.msk.f32.gmra.mxu1 %vm37_vm0, %v9965_v29  ;;  %8791 = vmatmul.msk.f32.gmra.mxu2 %vm37_vm0, %v364_v33  ;;  %v10077_v33 = vld [vmem:[#allocation2 + $0xd8] sm:$0xff] }
 0x111   :  { %8856 = vmatmul.msk.f32.gmra.mxu3 %vm37_vm0, %v299_v34  ;;  %v369_v34 = vld [vmem:[#allocation2 + $0x289] sm:$0xff] }
 0x117   :  { %8760 = vmatmul.msk.f32.gmra.mxu0 %vm37_vm0, %v9985_v39 }
 0x118   :  { %8825 = vmatmul.msk.f32.gmra.mxu1 %vm37_vm0, %v9987_v40  ;;  %8792 = vmatmul.msk.f32.gmra.mxu2 %vm37_vm0, %v365_v41  ;;  %v178_v41 = vld [vmem:[%s12762_s0 + $0x1a8] sm:$0xff] }
 0x119   :  { %8857 = vmatmul.msk.f32.gmra.mxu3 %vm37_vm0, %v300_v44  ;;  %243 = vst.msk [vmem:[#allocation2 + $0x2c1] sm:$0xff] %vm37_vm0, %v178_v41  ;;  %v148_v41 = vld [vmem:[%s12762_s0 + $0xb8] sm:$0xff] }
 0x11a   :  { %213 = vst.msk [vmem:[#allocation2 + $0x129] sm:$0xff] %vm37_vm0, %v148_v41  ;;  %v181_v41 = vld [vmem:[%s12762_s0 + $0x1c0] sm:$0xff] }
 0x11b   :  { %246 = vst.msk [vmem:[#allocation2 + $0x2e9] sm:$0xff] %vm37_vm0, %v181_v41 }
 0x11f   :  { %8761 = vmatmul.msk.f32.gmra.mxu0 %vm37_vm0, %v10003_v47 }
 0x120   :  { %8826 = vmatmul.msk.f32.gmra.mxu1 %vm37_vm0, %v10005_v50  ;;  %8793 = vmatmul.msk.f32.gmra.mxu2 %vm37_vm0, %v366_v51 }
 0x121   :  { %8858 = vmatmul.msk.f32.gmra.mxu3 %vm37_vm0, %v301_v52  ;;  %v10097_v52 = vld [vmem:[#allocation2 + $0xe1] sm:$0xff] }
 0x127   :  { %8762 = vmatmul.msk.f32.gmra.mxu0 %vm37_vm0, %v10025_v59 }
 0x128   :  { %8827 = vmatmul.msk.f32.gmra.mxu1 %vm37_vm0, %v10027_v62  ;;  %8794 = vmatmul.msk.f32.gmra.mxu2 %vm37_vm0, %v367_v63  ;;  %v370_v63 = vld [vmem:[#allocation2 + $0x291] sm:$0xff] }
 0x129   :  { %8859 = vmatmul.msk.f32.gmra.mxu3 %vm37_vm0, %v302_v0  ;;  %v305_v0 = vld [vmem:[#allocation2 + $0x290] sm:$0xff] }
 0x12c   :  { %v10049_v10 = vpop.f32.mrf.mxu0 }
 0x12f   :  { %8763 = vmatmul.msk.f32.gmra.mxu0 %vm37_vm0, %v10051_v11 }
 0x130   :  { %8828 = vmatmul.msk.f32.gmra.mxu1 %vm37_vm0, %v10053_v12  ;;  %8795 = vmatmul.msk.f32.gmra.mxu2 %vm37_vm0, %v368_v13 }
 0x131   :  { %8860 = vmatmul.msk.f32.gmra.mxu3 %vm37_vm0, %v303_v16 }
 0x133   :  { %v697_v22 = vpop.f32.mrf.mxu2 }
 0x134   :  { %v10069_v23 = vadd.f32 %v1101_v19, %v697_v22  ;;  %v10071_v26 = vpop.f32.mrf.mxu0  ;;  %v10121_v19 = vld [vmem:[#allocation2 + $0xf1] sm:$0xff] }
 0x135   :  { %v10075_v32 = vpop.f32.mrf.mxu1 }
 0x136   :  { %12788 = vst [vmem:[#allocation12_spill] sm:$0xff] %v10069_v23 }
 0x137   :  { %8764 = vmatmul.msk.f32.gmra.mxu0 %vm37_vm0, %v10073_v27 }
 0x138   :  { %8829 = vmatmul.msk.f32.gmra.mxu1 %vm37_vm0, %v10077_v33  ;;  %8796 = vmatmul.msk.f32.gmra.mxu2 %vm37_vm0, %v369_v34  ;;  %v10125_v34 = vld [vmem:[#allocation2 + $0xf0] sm:$0xff] }
 0x139   :  { %8861 = vmatmul.msk.f32.gmra.mxu3 %vm37_vm0, %v304_v35  ;;  %v371_v35 = vld [vmem:[#allocation2 + $0x2a1] sm:$0xff] }
 0x13b   :  { %v700_v44 = vpop.f32.mrf.mxu2 }
 0x13c   :  { %v1104_v45 = vpop.f32.mrf.mxu3  ;;  %v10095_v51 = vpop.f32.mrf.mxu0 }
 0x13d   :  { %v10093_v46 = vadd.f32 %v1104_v45, %v700_v44  ;;  %v10099_v53 = vpop.f32.mrf.mxu1  ;;  %v180_v44 = vld [vmem:[%s12762_s0 + $0x1b8] sm:$0xff] }
 0x13e   :  { %245 = vst.msk [vmem:[#allocation2 + $0x2d9] sm:$0xff] %vm37_vm0, %v180_v44 }
 0x13f   :  { %12789 = vst [vmem:[#allocation13_spill] sm:$0xff] %v10093_v46  ;;  %8765 = vmatmul.msk.f32.gmra.mxu0 %vm37_vm0, %v10097_v52  ;;  %v10169_v46 = vld [vmem:[#allocation2 + $0x109] sm:$0xff] }
 0x140   :  { %8830 = vmatmul.msk.f32.gmra.mxu1 %vm37_vm0, %v10101_v56  ;;  %8797 = vmatmul.msk.f32.gmra.mxu2 %vm37_vm0, %v370_v63 }
 0x141   :  { %8862 = vmatmul.msk.f32.gmra.mxu3 %vm37_vm0, %v305_v0 }
 0x143   :  { %v703_v13 = vpop.f32.mrf.mxu2 }
 0x144   :  { %v1107_v16 = vpop.f32.mrf.mxu3  ;;  %v10119_v18 = vpop.f32.mrf.mxu0 }
 0x145   :  { %v10117_v17 = vadd.f32 %v1107_v16, %v703_v13  ;;  %v10123_v22 = vpop.f32.mrf.mxu1  ;;  %v10149_v16 = vld [vmem:[#allocation2 + $0xf8] sm:$0xff] }
 0x147   :  { %12790 = vst [vmem:[#allocation14_spill] sm:$0xff] %v10117_v17  ;;  %8766 = vmatmul.msk.f32.gmra.mxu0 %vm37_vm0, %v10121_v19  ;;  %v372_v17 = vld [vmem:[#allocation2 + $0x2a9] sm:$0xff] }
 0x148   :  { %8831 = vmatmul.msk.f32.gmra.mxu1 %vm37_vm0, %v10125_v34  ;;  %8798 = vmatmul.msk.f32.gmra.mxu2 %vm37_vm0, %v371_v35  ;;  %v307_v35 = vld [vmem:[#allocation2 + $0x2a8] sm:$0xff] }
 0x149   :  { %8863 = vmatmul.msk.f32.gmra.mxu3 %vm37_vm0, %v306_v38  ;;  %v149_v38 = vld [vmem:[%s12762_s0 + $0xc0] sm:$0xff] }
 0x14a   :  { %214 = vst.msk [vmem:[#allocation2 + $0x139] sm:$0xff] %vm37_vm0, %v149_v38  ;;  %v182_v38 = vld [vmem:[%s12762_s0 + $0x1c8] sm:$0xff] }
 0x14b   :  { %v706_v45 = vpop.f32.mrf.mxu2  ;;  %247 = vst.msk [vmem:[#allocation2 + $0x2f1] sm:$0xff] %vm37_vm0, %v182_v38 }
 0x14c   :  { %v1110_v63 = vpop.f32.mrf.mxu3  ;;  %v10143_v4 = vpop.f32.mrf.mxu0 }
 0x14d   :  { %v10141_v0 = vadd.f32 %v1110_v63, %v706_v45  ;;  %12792 = vst [vmem:[#allocation16_spill] sm:$0xff] %v10143_v4  ;;  %v10147_v13 = vpop.f32.mrf.mxu1  ;;  %v374_v4 = vld [vmem:[#allocation2 + $0x2c1] sm:$0xff] }
 0x14e   :  { %12793 = vst [vmem:[#allocation17_spill] sm:$0xff] %v10147_v13  ;;  %v10197_v13 = vld [vmem:[#allocation2 + $0x110] sm:$0xff] }
 0x14f   :  { %12791 = vst [vmem:[#allocation15_spill] sm:$0xff] %v10141_v0  ;;  %8767 = vmatmul.msk.f32.gmra.mxu0 %vm37_vm0, %v10145_v5 }
 0x150   :  { %8832 = vmatmul.msk.f32.gmra.mxu1 %vm37_vm0, %v10149_v16  ;;  %8799 = vmatmul.msk.f32.gmra.mxu2 %vm37_vm0, %v372_v17  ;;  %v308_v17 = vld [vmem:[#allocation2 + $0x2b8] sm:$0xff]  ;;  %12801 = vst [vmem:[#allocation25_spill] sm:$0xff] %v10197_v13 }
 0x151   :  { %8864 = vmatmul.msk.f32.gmra.mxu3 %vm37_vm0, %v307_v35  ;;  %v150_v35 = vld [vmem:[%s12762_s0 + $0xc8] sm:$0xff] }
 0x152   :  { %215 = vst.msk [vmem:[#allocation2 + $0x141] sm:$0xff] %vm37_vm0, %v150_v35  ;;  %v183_v35 = vld [vmem:[%s12762_s0 + $0x1d0] sm:$0xff] }
 0x153   :  { %v709_v44 = vpop.f32.mrf.mxu2  ;;  %248 = vst.msk [vmem:[#allocation2 + $0x301] sm:$0xff] %vm37_vm0, %v183_v35 }
 0x154   :  { %v1113_v45 = vpop.f32.mrf.mxu3  ;;  %v10167_v0 = vpop.f32.mrf.mxu0 }
 0x155   :  { %v10165_v63 = vadd.f32 %v1113_v45, %v709_v44  ;;  %12795 = vst [vmem:[#allocation19_spill] sm:$0xff] %v10167_v0  ;;  %v10171_v23 = vpop.f32.mrf.mxu1 }
 0x156   :  { %12796 = vst [vmem:[#allocation20_spill] sm:$0xff] %v10171_v23  ;;  %v10193_v23 = vld [vmem:[#allocation2 + $0x111] sm:$0xff] }
 0x157   :  { %12794 = vst [vmem:[#allocation18_spill] sm:$0xff] %v10165_v63  ;;  %8768 = vmatmul.msk.f32.gmra.mxu0 %vm37_vm0, %v10169_v46 }
 0x158   :  { %8833 = vmatmul.msk.f32.gmra.mxu1 %vm37_vm0, %v10173_v1  ;;  %8800 = vmatmul.msk.f32.gmra.mxu2 %vm37_vm0, %v373_v6  ;;  %12799 = vst [vmem:[#allocation23_spill] sm:$0xff] %v10193_v23  ;;  %v309_v6 = vld [vmem:[#allocation2 + $0x2c0] sm:$0xff] }
 0x159   :  { %8865 = vmatmul.msk.f32.gmra.mxu3 %vm37_vm0, %v308_v17  ;;  %v151_v17 = vld [vmem:[%s12762_s0 + $0xd0] sm:$0xff] }
 0x15a   :  { %216 = vst.msk [vmem:[#allocation2 + $0x151] sm:$0xff] %vm37_vm0, %v151_v17  ;;  %v184_v17 = vld [vmem:[%s12762_s0 + $0x1d8] sm:$0xff] }
 0x15b   :  { %v712_v41 = vpop.f32.mrf.mxu2  ;;  %249 = vst.msk [vmem:[#allocation2 + $0x309] sm:$0xff] %vm37_vm0, %v184_v17 }
 0x15c   :  { %v1116_v44 = vpop.f32.mrf.mxu3  ;;  %v10191_v63 = vpop.f32.mrf.mxu0 }
 0x15d   :  { %v10189_v45 = vadd.f32 %v1116_v44, %v712_v41  ;;  %12798 = vst [vmem:[#allocation22_spill] sm:$0xff] %v10191_v63  ;;  %v10195_v0 = vpop.f32.mrf.mxu1 }
 0x15e   :  { %12800 = vst [vmem:[#allocation24_spill] sm:$0xff] %v10195_v0  ;;  %v10217_v0 = vld [vmem:[#allocation2 + $0x121] sm:$0xff] }
 0x15f   :  { %12797 = vst [vmem:[#allocation21_spill] sm:$0xff] %v10189_v45  ;;  %8769 = vmatmul.msk.f32.gmra.mxu0 %vm37_vm0, %v10193_v23  ;;  %v375_v23 = vld [vmem:[#allocation2 + $0x2d1] sm:$0xff] }
 0x160   :  { %8834 = vmatmul.msk.f32.gmra.mxu1 %vm37_vm0, %v10197_v13  ;;  %8801 = vmatmul.msk.f32.gmra.mxu2 %vm37_vm0, %v374_v4  ;;  %12804 = vst [vmem:[#allocation28_spill] sm:$0xff] %v10217_v0  ;;  %v10221_v13 = vld [vmem:[#allocation2 + $0x120] sm:$0xff]  ;;  %v310_v4 = vld [vmem:[#allocation2 + $0x2d0] sm:$0xff] }
 0x161   :  { %8866 = vmatmul.msk.f32.gmra.mxu3 %vm37_vm0, %v309_v6  ;;  %12806 = vst [vmem:[#allocation30_spill] sm:$0xff] %v10221_v13  ;;  %v152_v6 = vld [vmem:[%s12762_s0 + $0xd8] sm:$0xff] }
 0x162   :  { %217 = vst.msk [vmem:[#allocation2 + $0x159] sm:$0xff] %vm37_vm0, %v152_v6  ;;  %v185_v6 = vld [vmem:[%s12762_s0 + $0x1e0] sm:$0xff] }
 0x163   :  { %v715_v38 = vpop.f32.mrf.mxu2  ;;  %250 = vst.msk [vmem:[#allocation2 + $0x319] sm:$0xff] %vm37_vm0, %v185_v6 }
 0x164   :  { %v1119_v41 = vpop.f32.mrf.mxu3  ;;  %v10215_v45 = vpop.f32.mrf.mxu0 }
 0x165   :  { %v10213_v44 = vadd.f32 %v1119_v41, %v715_v38  ;;  %12803 = vst [vmem:[#allocation27_spill] sm:$0xff] %v10215_v45  ;;  %v10219_v63 = vpop.f32.mrf.mxu1 }
 0x166   :  { %12805 = vst [vmem:[#allocation29_spill] sm:$0xff] %v10219_v63  ;;  %v10241_v63 = vld [vmem:[#allocation2 + $0x129] sm:$0xff] }
 0x167   :  { %12802 = vst [vmem:[#allocation26_spill] sm:$0xff] %v10213_v44  ;;  %8770 = vmatmul.msk.f32.gmra.mxu0 %vm37_vm0, %v10217_v0  ;;  %v376_v0 = vld [vmem:[#allocation2 + $0x2d9] sm:$0xff] }
 0x168   :  { %8835 = vmatmul.msk.f32.gmra.mxu1 %vm37_vm0, %v10221_v13  ;;  %8802 = vmatmul.msk.f32.gmra.mxu2 %vm37_vm0, %v375_v23  ;;  %12809 = vst [vmem:[#allocation33_spill] sm:$0xff] %v10241_v63  ;;  %v10245_v13 = vld [vmem:[#allocation2 + $0x128] sm:$0xff]  ;;  %v311_v23 = vld [vmem:[#allocation2 + $0x2d8] sm:$0xff] }
 0x169   :  { %8867 = vmatmul.msk.f32.gmra.mxu3 %vm37_vm0, %v310_v4  ;;  %12811 = vst [vmem:[#allocation35_spill] sm:$0xff] %v10245_v13  ;;  %v153_v4 = vld [vmem:[%s12762_s0 + $0xe0] sm:$0xff] }
 0x16a   :  { %218 = vst.msk [vmem:[#allocation2 + $0x169] sm:$0xff] %vm37_vm0, %v153_v4  ;;  %v186_v4 = vld [vmem:[%s12762_s0 + $0x1e8] sm:$0xff] }
 0x16b   :  { %v718_v35 = vpop.f32.mrf.mxu2  ;;  %251 = vst.msk [vmem:[#allocation2 + $0x321] sm:$0xff] %vm37_vm0, %v186_v4 }
 0x16c   :  { %v1122_v38 = vpop.f32.mrf.mxu3  ;;  %v10239_v44 = vpop.f32.mrf.mxu0 }
 0x16d   :  { %v10237_v41 = vadd.f32 %v1122_v38, %v718_v35  ;;  %12808 = vst [vmem:[#allocation32_spill] sm:$0xff] %v10239_v44  ;;  %v10243_v45 = vpop.f32.mrf.mxu1 }
 0x16e   :  { %12810 = vst [vmem:[#allocation34_spill] sm:$0xff] %v10243_v45  ;;  %v10265_v45 = vld [vmem:[#allocation2 + $0x139] sm:$0xff] }
 0x16f   :  { %12807 = vst [vmem:[#allocation31_spill] sm:$0xff] %v10237_v41  ;;  %8771 = vmatmul.msk.f32.gmra.mxu0 %vm37_vm0, %v10241_v63  ;;  %v377_v63 = vld [vmem:[#allocation2 + $0x2e9] sm:$0xff] }
 0x170   :  { %8836 = vmatmul.msk.f32.gmra.mxu1 %vm37_vm0, %v10245_v13  ;;  %8803 = vmatmul.msk.f32.gmra.mxu2 %vm37_vm0, %v376_v0  ;;  %12814 = vst [vmem:[#allocation38_spill] sm:$0xff] %v10265_v45  ;;  %v10269_v13 = vld [vmem:[#allocation2 + $0x138] sm:$0xff]  ;;  %v312_v0 = vld [vmem:[#allocation2 + $0x2e8] sm:$0xff] }
 0x171   :  { %8868 = vmatmul.msk.f32.gmra.mxu3 %vm37_vm0, %v311_v23  ;;  %12816 = vst [vmem:[#allocation40_spill] sm:$0xff] %v10269_v13  ;;  %v154_v23 = vld [vmem:[%s12762_s0 + $0xe8] sm:$0xff] }
 0x172   :  { %219 = vst.msk [vmem:[#allocation2 + $0x171] sm:$0xff] %vm37_vm0, %v154_v23 }
 0x173   :  { %v721_v17 = vpop.f32.mrf.mxu2 }
 0x174   :  { %v1125_v35 = vpop.f32.mrf.mxu3  ;;  %v10263_v41 = vpop.f32.mrf.mxu0 }
 0x175   :  { %v10261_v38 = vadd.f32 %v1125_v35, %v721_v17  ;;  %12813 = vst [vmem:[#allocation37_spill] sm:$0xff] %v10263_v41  ;;  %v10267_v44 = vpop.f32.mrf.mxu1 }
 0x176   :  { %12815 = vst [vmem:[#allocation39_spill] sm:$0xff] %v10267_v44  ;;  %v10289_v44 = vld [vmem:[#allocation2 + $0x141] sm:$0xff] }
 0x177   :  { %12812 = vst [vmem:[#allocation36_spill] sm:$0xff] %v10261_v38  ;;  %8772 = vmatmul.msk.f32.gmra.mxu0 %vm37_vm0, %v10265_v45  ;;  %v378_v45 = vld [vmem:[#allocation2 + $0x2f1] sm:$0xff] }
 0x178   :  { %8837 = vmatmul.msk.f32.gmra.mxu1 %vm37_vm0, %v10269_v13  ;;  %8804 = vmatmul.msk.f32.gmra.mxu2 %vm37_vm0, %v377_v63  ;;  %12819 = vst [vmem:[#allocation43_spill] sm:$0xff] %v10289_v44  ;;  %v10293_v13 = vld [vmem:[#allocation2 + $0x140] sm:$0xff]  ;;  %v313_v63 = vld [vmem:[#allocation2 + $0x2f0] sm:$0xff] }
 0x179   :  { %8869 = vmatmul.msk.f32.gmra.mxu3 %vm37_vm0, %v312_v0  ;;  %12821 = vst [vmem:[#allocation45_spill] sm:$0xff] %v10293_v13 }
 0x17b   :  { %v724_v6 = vpop.f32.mrf.mxu2 }
 0x17c   :  { %v1128_v17 = vpop.f32.mrf.mxu3  ;;  %v10287_v38 = vpop.f32.mrf.mxu0 }
 0x17d   :  { %v10285_v35 = vadd.f32 %v1128_v17, %v724_v6  ;;  %12818 = vst [vmem:[#allocation42_spill] sm:$0xff] %v10287_v38  ;;  %v10291_v41 = vpop.f32.mrf.mxu1  ;;  %v10305_v17 = vld [vmem:[#allocation2 + $0x151] sm:$0xff]  ;;  %v379_v38 = vld [vmem:[#allocation2 + $0x301] sm:$0xff] }
 0x17e   :  { %12820 = vst [vmem:[#allocation44_spill] sm:$0xff] %v10291_v41  ;;  %v10309_v41 = vld [vmem:[#allocation2 + $0x150] sm:$0xff] }
 0x17f   :  { %12817 = vst [vmem:[#allocation41_spill] sm:$0xff] %v10285_v35  ;;  %8773 = vmatmul.msk.f32.gmra.mxu0 %vm37_vm0, %v10289_v44  ;;  %v314_v44 = vld [vmem:[#allocation2 + $0x300] sm:$0xff] }
 0x180   :  { %8838 = vmatmul.msk.f32.gmra.mxu1 %vm37_vm0, %v10293_v13  ;;  %8805 = vmatmul.msk.f32.gmra.mxu2 %vm37_vm0, %v378_v45  ;;  %12824 = vst [vmem:[#allocation48_spill] sm:$0xff] %v10305_v17  ;;  %v9139_v45 = vld [vmem:[%s12763_s1 + $0x18] sm:$0xf]  ;;  %v317_v13 = vld [vmem:[#allocation2 + $0x320] sm:$0xff] }
 0x181   :  { %8870 = vmatmul.msk.f32.gmra.mxu3 %vm37_vm0, %v313_v63  ;;  %12826 = vst [vmem:[#allocation50_spill] sm:$0xff] %v10309_v41  ;;  %v9205_v63 = vld [vmem:[%s12763_s1 + $0x1c] sm:$0xf]  ;;  %9140 = vmatpush.msk.msra.mxu2 %vm577_vm1, %v9139_v45  ;;  %v9271_v45 = vld [vmem:[%s12763_s1 + $0x20] sm:$0xf] }
 0x182   :  { %9206 = vmatpush.msk.msra.mxu3 %vm577_vm1, %v9205_v63  ;;  %9272 = vmatpush.msk.msra.mxu0 %vm577_vm1, %v9271_v45 }
 0x183   :  { %v727_v0 = vpop.f32.mrf.mxu2 }
 0x184   :  { %v1131_v23 = vpop.f32.mrf.mxu3  ;;  %v10303_v6 = vpop.f32.mrf.mxu0 }
 0x185   :  { %v10301_v4 = vadd.f32 %v1131_v23, %v727_v0  ;;  %12823 = vst [vmem:[#allocation47_spill] sm:$0xff] %v10303_v6  ;;  %v10307_v35 = vpop.f32.mrf.mxu1  ;;  %v10333_v6 = vld [vmem:[#allocation2 + $0x158] sm:$0xff] }
 0x186   :  { %12825 = vst [vmem:[#allocation49_spill] sm:$0xff] %v10307_v35 }
 0x187   :  { %12822 = vst [vmem:[#allocation46_spill] sm:$0xff] %v10301_v4  ;;  %8774 = vmatmul.msk.f32.gmra.mxu0 %vm37_vm0, %v10305_v17  ;;  %v315_v17 = vld [vmem:[#allocation2 + $0x308] sm:$0xff] }
 0x188   :  { %8839 = vmatmul.msk.f32.gmra.mxu1 %vm37_vm0, %v10309_v41  ;;  %8806 = vmatmul.msk.f32.gmra.mxu2 %vm37_vm0, %v379_v38  ;;  %v10329_v38 = vld [vmem:[#allocation2 + $0x159] sm:$0xff]  ;;  %12831 = vst [vmem:[#allocation55_spill] sm:$0xff] %v10333_v6  ;;  %v380_v41 = vld [vmem:[#allocation2 + $0x309] sm:$0xff] }
 0x189   :  { %8871 = vmatmul.msk.f32.gmra.mxu3 %vm37_vm0, %v314_v44  ;;  %12829 = vst [vmem:[#allocation53_spill] sm:$0xff] %v10329_v38 }
 0x18b   :  { %v730_v0 = vpop.f32.mrf.mxu2 }
 0x18c   :  { %v1134_v23 = vpop.f32.mrf.mxu3  ;;  %v10327_v35 = vpop.f32.mrf.mxu0 }
 0x18d   :  { %v10325_v4 = vadd.f32 %v1134_v23, %v730_v0  ;;  %12828 = vst [vmem:[#allocation52_spill] sm:$0xff] %v10327_v35  ;;  %v10331_v44 = vpop.f32.mrf.mxu1 }
 0x18e   :  { %12830 = vst [vmem:[#allocation54_spill] sm:$0xff] %v10331_v44  ;;  %v10349_v44 = vld [vmem:[#allocation2 + $0x169] sm:$0xff] }
 0x18f   :  { %12827 = vst [vmem:[#allocation51_spill] sm:$0xff] %v10325_v4  ;;  %8775 = vmatmul.msk.f32.gmra.mxu0 %vm37_vm0, %v10329_v38  ;;  %v10369_v38 = vld [vmem:[#allocation2 + $0x170] sm:$0xff] }
 0x190   :  { %8840 = vmatmul.msk.f32.gmra.mxu1 %vm37_vm0, %v10333_v6  ;;  %8807 = vmatmul.msk.f32.gmra.mxu2 %vm37_vm0, %v380_v41  ;;  %12834 = vst [vmem:[#allocation58_spill] sm:$0xff] %v10349_v44  ;;  %v10353_v6 = vld [vmem:[#allocation2 + $0x168] sm:$0xff]  ;;  %v381_v41 = vld [vmem:[#allocation2 + $0x319] sm:$0xff] }
 0x191   :  { %8872 = vmatmul.msk.f32.gmra.mxu3 %vm37_vm0, %v315_v17  ;;  %v316_v17 = vld [vmem:[#allocation2 + $0x318] sm:$0xff] }
 0x193   :  { %v733_v63 = vpop.f32.mrf.mxu2 }
 0x194   :  { %v1137_v0 = vpop.f32.mrf.mxu3  ;;  %v10347_v4 = vpop.f32.mrf.mxu0 }
 0x195   :  { %v10345_v23 = vadd.f32 %v1137_v0, %v733_v63  ;;  %12833 = vst [vmem:[#allocation57_spill] sm:$0xff] %v10347_v4  ;;  %v10351_v35 = vpop.f32.mrf.mxu1 }
 0x196   :  { %12835 = vst [vmem:[#allocation59_spill] sm:$0xff] %v10351_v35  ;;  %v10365_v35 = vld [vmem:[#allocation2 + $0x171] sm:$0xff] }
 0x197   :  { %12832 = vst [vmem:[#allocation56_spill] sm:$0xff] %v10345_v23  ;;  %8776 = vmatmul.msk.f32.gmra.mxu0 %vm37_vm0, %v10349_v44  ;;  %v382_v44 = vld [vmem:[#allocation2 + $0x321] sm:$0xff] }
 0x198   :  { %8841 = vmatmul.msk.f32.gmra.mxu1 %vm37_vm0, %v10353_v6  ;;  %8808 = vmatmul.msk.f32.gmra.mxu2 %vm37_vm0, %v381_v41 }
 0x199   :  { %8873 = vmatmul.msk.f32.gmra.mxu3 %vm37_vm0, %v316_v17 }
 0x19b   :  { %v736_v45 = vpop.f32.mrf.mxu2 }
 0x19c   :  { %v1140_v63 = vpop.f32.mrf.mxu3  ;;  %v10363_v23 = vpop.f32.mrf.mxu0 }
 0x19d   :  { %v10361_v0 = vadd.f32 %v1140_v63, %v736_v45  ;;  %12837 = vst [vmem:[#allocation61_spill] sm:$0xff] %v10363_v23  ;;  %v10367_v4 = vpop.f32.mrf.mxu1  ;;  %v1194_v23 = vld [vmem:[#allocation2 + $0x2] sm:$0xff] }
 0x19e   :  { %12838 = vst [vmem:[#allocation62_spill] sm:$0xff] %v10367_v4  ;;  %v2796_v4 = vld [vmem:[#allocation2 + $0x1a] sm:$0xff] }
 0x19f   :  { %12836 = vst [vmem:[#allocation60_spill] sm:$0xff] %v10361_v0  ;;  %8777 = vmatmul.msk.f32.gmra.mxu0 %vm37_vm0, %v10365_v35 }
 0x1a0   :  { %8842 = vmatmul.msk.f32.gmra.mxu1 %vm37_vm0, %v10369_v38  ;;  %8809 = vmatmul.msk.f32.gmra.mxu2 %vm37_vm0, %v382_v44 }
 0x1a1   :  { %8874 = vmatmul.msk.f32.gmra.mxu3 %vm37_vm0, %v317_v13 }
 0x1a3   :  { %v739_v41 = vpop.f32.mrf.mxu2 }
 0x1a4   :  { %v1143_v17 = vpop.f32.mrf.mxu3  ;;  %v10379_v63 = vpop.f32.mrf.mxu0 }
 0x1a5   :  { %v10377_v45 = vadd.f32 %v1143_v17, %v739_v41  ;;  %12840 = vst [vmem:[#allocation64_spill] sm:$0xff] %v10379_v63  ;;  %v10381_v0 = vpop.f32.mrf.mxu1  ;;  %v1195_v63 = vld [vmem:[#allocation2 + $0xa] sm:$0xff] }
 0x1a6   :  { %12841 = vst [vmem:[#allocation65_spill] sm:$0xff] %v10381_v0  ;;  %v2797_v0 = vld [vmem:[#allocation2 + $0x22] sm:$0xff] }
 0x1a7   :  { %12839 = vst [vmem:[#allocation63_spill] sm:$0xff] %v10377_v45  ;;  %9009 = vmatmul.msk.f32.vlgmr.msrb.gmra.mxu0 %vm37_vm0, %v9762_v24 }
 0x1a8   :  { %9075 = vmatmul.msk.f32.vlgmr.msrb.gmra.mxu1 %vm37_vm0, %v2796_v4  ;;  %8877 = vmatmul.msk.f32.vlgmr.msrb.gmra.mxu2 %vm37_vm0, %v1194_v23 }
 0x1a9   :  { %8943 = vmatmul.msk.f32.vlgmr.msrb.gmra.mxu3 %vm37_vm0, %v9764_v25 }
 0x1ab   :  { %v742_v13 = vpop.f32.mrf.mxu2 }
 0x1ac   :  { %v1146_v44 = vpop.f32.mrf.mxu3  ;;  %v10391_v17 = vpop.f32.mrf.mxu0 }
 0x1ad   :  { %v10389_v41 = vadd.f32 %v1146_v44, %v742_v13  ;;  %v10393_v45 = vpop.f32.mrf.mxu1 }
 0x1af   :  { %12842 = vst [vmem:[#allocation66_spill] sm:$0xff] %v10389_v41  ;;  %9010 = vmatmul.msk.f32.gmra.mxu0 %vm37_vm0, %v9783_v30  ;;  %v2798_v41 = vld [vmem:[#allocation2 + $0x32] sm:$0xff] }
 0x1b0   :  { %9076 = vmatmul.msk.f32.gmra.mxu1 %vm37_vm0, %v2797_v0  ;;  %8878 = vmatmul.msk.f32.gmra.mxu2 %vm37_vm0, %v1195_v63 }
 0x1b1   :  { %8944 = vmatmul.msk.f32.gmra.mxu3 %vm37_vm0, %v9785_v31 }
 0x1b3   :  { %v745_v24 = vpop.f32.mrf.mxu2 }
 0x1b4   :  { %v1149_v25 = vpop.f32.mrf.mxu3  ;;  %v10403_v13 = vpop.f32.mrf.mxu0 }
 0x1b5   :  { %v10401_v23 = vadd.f32 %v1149_v25, %v745_v24  ;;  %v10405_v44 = vpop.f32.mrf.mxu1 }
 0x1b7   :  { %12843 = vst [vmem:[#allocation67_spill] sm:$0xff] %v10401_v23  ;;  %9011 = vmatmul.msk.f32.gmra.mxu0 %vm37_vm0, %v9801_v36  ;;  %v2799_v23 = vld [vmem:[#allocation2 + $0x3a] sm:$0xff] }
 0x1b8   :  { %9077 = vmatmul.msk.f32.gmra.mxu1 %vm37_vm0, %v2798_v41  ;;  %8879 = vmatmul.msk.f32.gmra.mxu2 %vm37_vm0, %v2796_v4 }
 0x1b9   :  { %8945 = vmatmul.msk.f32.gmra.mxu3 %vm37_vm0, %v9803_v37 }
 0x1bb   :  { %v748_v30 = vpop.f32.mrf.mxu2 }
 0x1bc   :  { %v1152_v31 = vpop.f32.mrf.mxu3  ;;  %v10415_v24 = vpop.f32.mrf.mxu0 }
 0x1bd   :  { %v10413_v63 = vadd.f32 %v1152_v31, %v748_v30  ;;  %v10417_v25 = vpop.f32.mrf.mxu1 }
 0x1bf   :  { %12844 = vst [vmem:[#allocation68_spill] sm:$0xff] %v10413_v63  ;;  %9012 = vmatmul.msk.f32.gmra.mxu0 %vm37_vm0, %v9819_v42  ;;  %v2800_v63 = vld [vmem:[#allocation2 + $0x4a] sm:$0xff] }
 0x1c0   :  { %9078 = vmatmul.msk.f32.gmra.mxu1 %vm37_vm0, %v2799_v23  ;;  %8880 = vmatmul.msk.f32.gmra.mxu2 %vm37_vm0, %v2797_v0 }
 0x1c1   :  { %8946 = vmatmul.msk.f32.gmra.mxu3 %vm37_vm0, %v9821_v43 }
 0x1c3   :  { %v751_v36 = vpop.f32.mrf.mxu2 }
 0x1c4   :  { %v1155_v37 = vpop.f32.mrf.mxu3  ;;  %v10427_v30 = vpop.f32.mrf.mxu0 }
 0x1c5   :  { %v10425_v4 = vadd.f32 %v1155_v37, %v751_v36  ;;  %v10429_v31 = vpop.f32.mrf.mxu1 }
 0x1c7   :  { %12845 = vst [vmem:[#allocation69_spill] sm:$0xff] %v10425_v4  ;;  %9013 = vmatmul.msk.f32.gmra.mxu0 %vm37_vm0, %v9837_v48  ;;  %v2801_v4 = vld [vmem:[#allocation2 + $0x52] sm:$0xff] }
 0x1c8   :  { %9079 = vmatmul.msk.f32.gmra.mxu1 %vm37_vm0, %v2800_v63  ;;  %8881 = vmatmul.msk.f32.gmra.mxu2 %vm37_vm0, %v2798_v41 }
 0x1c9   :  { %8947 = vmatmul.msk.f32.gmra.mxu3 %vm37_vm0, %v9839_v49 }
 0x1cb   :  { %v754_v42 = vpop.f32.mrf.mxu2 }
 0x1cc   :  { %v1158_v43 = vpop.f32.mrf.mxu3  ;;  %v10439_v36 = vpop.f32.mrf.mxu0 }
 0x1cd   :  { %v10437_v0 = vadd.f32 %v1158_v43, %v754_v42  ;;  %v10441_v37 = vpop.f32.mrf.mxu1 }
 0x1cf   :  { %12846 = vst [vmem:[#allocation70_spill] sm:$0xff] %v10437_v0  ;;  %9014 = vmatmul.msk.f32.gmra.mxu0 %vm37_vm0, %v9855_v54  ;;  %v2802_v0 = vld [vmem:[#allocation2 + $0x62] sm:$0xff] }
 0x1d0   :  { %9080 = vmatmul.msk.f32.gmra.mxu1 %vm37_vm0, %v2801_v4  ;;  %8882 = vmatmul.msk.f32.gmra.mxu2 %vm37_vm0, %v2799_v23 }
 0x1d1   :  { %8948 = vmatmul.msk.f32.gmra.mxu3 %vm37_vm0, %v9857_v55 }
 0x1d3   :  { %v757_v48 = vpop.f32.mrf.mxu2 }
 0x1d4   :  { %v1161_v49 = vpop.f32.mrf.mxu3  ;;  %v10451_v42 = vpop.f32.mrf.mxu0 }
 0x1d5   :  { %v10449_v41 = vadd.f32 %v1161_v49, %v757_v48  ;;  %v10453_v43 = vpop.f32.mrf.mxu1 }
 0x1d7   :  { %12847 = vst [vmem:[#allocation71_spill] sm:$0xff] %v10449_v41  ;;  %9015 = vmatmul.msk.f32.gmra.mxu0 %vm37_vm0, %v9873_v60  ;;  %v2803_v41 = vld [vmem:[#allocation2 + $0x6a] sm:$0xff] }
 0x1d8   :  { %9081 = vmatmul.msk.f32.gmra.mxu1 %vm37_vm0, %v2802_v0  ;;  %8883 = vmatmul.msk.f32.gmra.mxu2 %vm37_vm0, %v2800_v63 }
 0x1d9   :  { %8949 = vmatmul.msk.f32.gmra.mxu3 %vm37_vm0, %v9875_v61 }
 0x1db   :  { %v760_v54 = vpop.f32.mrf.mxu2 }
 0x1dc   :  { %v1164_v55 = vpop.f32.mrf.mxu3  ;;  %v10463_v48 = vpop.f32.mrf.mxu0 }
 0x1dd   :  { %v10461_v23 = vadd.f32 %v1164_v55, %v760_v54  ;;  %v10465_v49 = vpop.f32.mrf.mxu1 }
 0x1df   :  { %12848 = vst [vmem:[#allocation72_spill] sm:$0xff] %v10461_v23  ;;  %9016 = vmatmul.msk.f32.gmra.mxu0 %vm37_vm0, %v9891_v2  ;;  %v2804_v23 = vld [vmem:[#allocation2 + $0x7a] sm:$0xff] }
 0x1e0   :  { %9082 = vmatmul.msk.f32.gmra.mxu1 %vm37_vm0, %v2803_v41  ;;  %8884 = vmatmul.msk.f32.gmra.mxu2 %vm37_vm0, %v2801_v4 }
 0x1e1   :  { %8950 = vmatmul.msk.f32.gmra.mxu3 %vm37_vm0, %v9893_v3 }
 0x1e3   :  { %v763_v60 = vpop.f32.mrf.mxu2 }
 0x1e4   :  { %v1167_v61 = vpop.f32.mrf.mxu3  ;;  %v10475_v54 = vpop.f32.mrf.mxu0 }
 0x1e5   :  { %v10473_v63 = vadd.f32 %v1167_v61, %v763_v60  ;;  %v10477_v55 = vpop.f32.mrf.mxu1 }
 0x1e7   :  { %12849 = vst [vmem:[#allocation73_spill] sm:$0xff] %v10473_v63  ;;  %9017 = vmatmul.msk.f32.gmra.mxu0 %vm37_vm0, %v9909_v8  ;;  %v2805_v63 = vld [vmem:[#allocation2 + $0x82] sm:$0xff] }
 0x1e8   :  { %9083 = vmatmul.msk.f32.gmra.mxu1 %vm37_vm0, %v2804_v23  ;;  %8885 = vmatmul.msk.f32.gmra.mxu2 %vm37_vm0, %v2802_v0 }
 0x1e9   :  { %8951 = vmatmul.msk.f32.gmra.mxu3 %vm37_vm0, %v9911_v9 }
 0x1eb   :  { %v766_v2 = vpop.f32.mrf.mxu2 }
 0x1ec   :  { %v1170_v3 = vpop.f32.mrf.mxu3  ;;  %v10487_v60 = vpop.f32.mrf.mxu0 }
 0x1ed   :  { %v10485_v4 = vadd.f32 %v1170_v3, %v766_v2  ;;  %v10489_v61 = vpop.f32.mrf.mxu1 }
 0x1ef   :  { %12850 = vst [vmem:[#allocation74_spill] sm:$0xff] %v10485_v4  ;;  %9018 = vmatmul.msk.f32.gmra.mxu0 %vm37_vm0, %v9927_v14  ;;  %v2806_v4 = vld [vmem:[#allocation2 + $0x92] sm:$0xff] }
 0x1f0   :  { %9084 = vmatmul.msk.f32.gmra.mxu1 %vm37_vm0, %v2805_v63  ;;  %8886 = vmatmul.msk.f32.gmra.mxu2 %vm37_vm0, %v2803_v41 }
 0x1f1   :  { %8952 = vmatmul.msk.f32.gmra.mxu3 %vm37_vm0, %v9929_v15 }
 0x1f3   :  { %v769_v8 = vpop.f32.mrf.mxu2 }
 0x1f4   :  { %v1173_v9 = vpop.f32.mrf.mxu3  ;;  %v10499_v2 = vpop.f32.mrf.mxu0 }
 0x1f5   :  { %v10497_v0 = vadd.f32 %v1173_v9, %v769_v8  ;;  %v10501_v3 = vpop.f32.mrf.mxu1 }
 0x1f7   :  { %12851 = vst [vmem:[#allocation75_spill] sm:$0xff] %v10497_v0  ;;  %9019 = vmatmul.msk.f32.gmra.mxu0 %vm37_vm0, %v9945_v20  ;;  %v2807_v0 = vld [vmem:[#allocation2 + $0x9a] sm:$0xff] }
 0x1f8   :  { %9085 = vmatmul.msk.f32.gmra.mxu1 %vm37_vm0, %v2806_v4  ;;  %8887 = vmatmul.msk.f32.gmra.mxu2 %vm37_vm0, %v2804_v23 }
 0x1f9   :  { %8953 = vmatmul.msk.f32.gmra.mxu3 %vm37_vm0, %v9947_v21 }
 0x1fb   :  { %v772_v14 = vpop.f32.mrf.mxu2 }
 0x1fc   :  { %v1176_v15 = vpop.f32.mrf.mxu3  ;;  %v10511_v8 = vpop.f32.mrf.mxu0 }
 0x1fd   :  { %v10509_v41 = vadd.f32 %v1176_v15, %v772_v14  ;;  %v10513_v9 = vpop.f32.mrf.mxu1 }
 0x1ff   :  { %12852 = vst [vmem:[#allocation76_spill] sm:$0xff] %v10509_v41  ;;  %9020 = vmatmul.msk.f32.gmra.mxu0 %vm37_vm0, %v9963_v28  ;;  %v2808_v41 = vld [vmem:[#allocation2 + $0xaa] sm:$0xff] }
 0x200   :  { %9086 = vmatmul.msk.f32.gmra.mxu1 %vm37_vm0, %v2807_v0  ;;  %8888 = vmatmul.msk.f32.gmra.mxu2 %vm37_vm0, %v2805_v63 }
 0x201   :  { %8954 = vmatmul.msk.f32.gmra.mxu3 %vm37_vm0, %v9965_v29 }
 0x203   :  { %v775_v20 = vpop.f32.mrf.mxu2 }
 0x204   :  { %v1179_v21 = vpop.f32.mrf.mxu3  ;;  %v10523_v14 = vpop.f32.mrf.mxu0 }
 0x205   :  { %v10521_v23 = vadd.f32 %v1179_v21, %v775_v20  ;;  %v10525_v15 = vpop.f32.mrf.mxu1 }
 0x206   :  { %12854 = vst [vmem:[#allocation78_spill] sm:$0xff] %v10525_v15  ;;  %v5503_v15 = vld [vmem:[#allocation4 + $0xf8] sm:$0xff] }
 0x207   :  { %12853 = vst [vmem:[#allocation77_spill] sm:$0xff] %v10521_v23  ;;  %9021 = vmatmul.msk.f32.gmra.mxu0 %vm37_vm0, %v9985_v39  ;;  %v2809_v23 = vld [vmem:[#allocation2 + $0xb2] sm:$0xff]  ;;  %5504 = vmatpush.msra.mxu1 %v5503_v15 }
 0x208   :  { %9087 = vmatmul.msk.f32.gmra.mxu1 %vm37_vm0, %v2808_v41  ;;  %8889 = vmatmul.msk.f32.gmra.mxu2 %vm37_vm0, %v2806_v4 }
 0x209   :  { %8955 = vmatmul.msk.f32.gmra.mxu3 %vm37_vm0, %v9987_v40 }
 0x20b   :  { %v778_v28 = vpop.f32.mrf.mxu2 }
 0x20c   :  { %v1182_v29 = vpop.f32.mrf.mxu3  ;;  %v10535_v20 = vpop.f32.mrf.mxu0 }
 0x20d   :  { %v10533_v63 = vadd.f32 %v1182_v29, %v778_v28  ;;  %v10537_v21 = vpop.f32.mrf.mxu1 }
 0x20f   :  { %12855 = vst [vmem:[#allocation79_spill] sm:$0xff] %v10533_v63  ;;  %9022 = vmatmul.msk.f32.gmra.mxu0 %vm37_vm0, %v10003_v47  ;;  %v2810_v63 = vld [vmem:[#allocation2 + $0xc2] sm:$0xff] }
 0x210   :  { %9088 = vmatmul.msk.f32.gmra.mxu1 %vm37_vm0, %v2809_v23  ;;  %8890 = vmatmul.msk.f32.gmra.mxu2 %vm37_vm0, %v2807_v0 }
 0x211   :  { %8956 = vmatmul.msk.f32.gmra.mxu3 %vm37_vm0, %v10005_v50 }
 0x213   :  { %v781_v39 = vpop.f32.mrf.mxu2 }
 0x214   :  { %v1185_v40 = vpop.f32.mrf.mxu3  ;;  %v10547_v28 = vpop.f32.mrf.mxu0 }
 0x215   :  { %v10545_v4 = vadd.f32 %v1185_v40, %v781_v39  ;;  %v10549_v29 = vpop.f32.mrf.mxu1  ;;  %v2811_v40 = vld [vmem:[#allocation2 + $0xca] sm:$0xff] }
 0x217   :  { %12856 = vst [vmem:[#allocation80_spill] sm:$0xff] %v10545_v4  ;;  %9023 = vmatmul.msk.f32.gmra.mxu0 %vm37_vm0, %v10025_v59  ;;  %v2813_v4 = vld [vmem:[#allocation2 + $0xe2] sm:$0xff] }
 0x218   :  { %9089 = vmatmul.msk.f32.gmra.mxu1 %vm37_vm0, %v2810_v63  ;;  %8891 = vmatmul.msk.f32.gmra.mxu2 %vm37_vm0, %v2808_v41 }
 0x219   :  { %8957 = vmatmul.msk.f32.gmra.mxu3 %vm37_vm0, %v10027_v62 }
 0x21b   :  { %v784_v47 = vpop.f32.mrf.mxu2 }
 0x21c   :  { %v1188_v50 = vpop.f32.mrf.mxu3  ;;  %v10559_v15 = vpop.f32.mrf.mxu0 }
 0x21d   :  { %v10557_v0 = vadd.f32 %v1188_v50, %v784_v47  ;;  %12858 = vst [vmem:[#allocation82_spill] sm:$0xff] %v10559_v15  ;;  %v10561_v39 = vpop.f32.mrf.mxu1  ;;  %v5502_v15 = vld [vmem:[#allocation4 + $0xf0] sm:$0xff] }
 0x21e   :  { %12859 = vst [vmem:[#allocation83_spill] sm:$0xff] %v10561_v39  ;;  %5505 = vmatpush.msra.mxu1 %v5502_v15 }
 0x21f   :  { %12857 = vst [vmem:[#allocation81_spill] sm:$0xff] %v10557_v0  ;;  %9024 = vmatmul.msk.f32.gmra.mxu0 %vm37_vm0, %v10051_v11  ;;  %v2812_v0 = vld [vmem:[#allocation2 + $0xda] sm:$0xff]  ;;  %v1003_v11 = vadd.f32 %v10019_v57, %v10023_v58  ;;  %v1006_v57 = vadd.f32 %v10047_v7, %v10049_v10  ;;  %v1009_v10 = vadd.f32 %v10075_v32, %v10071_v26 }
 0x220   :  { %9090 = vmatmul.msk.f32.gmra.mxu1 %vm37_vm0, %v2811_v40  ;;  %8892 = vmatmul.msk.f32.gmra.mxu2 %vm37_vm0, %v2809_v23  ;;  %v1012_v32 = vadd.f32 %v10099_v53, %v10095_v51  ;;  %v1015_v53 = vadd.f32 %v10123_v22, %v10119_v18  ;;  %v12863_v22 = vld [vmem:[#allocation16_spill] sm:$0xff] }
 0x221   :  { %8958 = vmatmul.msk.f32.gmra.mxu3 %vm37_vm0, %v10053_v12 }
 0x223   :  { %v787_v59 = vpop.f32.mrf.mxu2 }
 0x224   :  { %v1191_v62 = vpop.f32.mrf.mxu3  ;;  %v2540_v47 = vpop.f32.mrf.mxu0 }
 0x225   :  { %v10569_v41 = vadd.f32 %v1191_v62, %v787_v59  ;;  %v3074_v50 = vpop.f32.mrf.mxu1 }
 0x227   :  { %12860 = vst [vmem:[#allocation84_spill] sm:$0xff] %v10569_v41  ;;  %9025 = vmatmul.msk.f32.gmra.mxu0 %vm37_vm0, %v10073_v27 }
 0x228   :  { %9091 = vmatmul.msk.f32.gmra.mxu1 %vm37_vm0, %v2812_v0  ;;  %8893 = vmatmul.msk.f32.gmra.mxu2 %vm37_vm0, %v2810_v63 }
 0x229   :  { %8959 = vmatmul.msk.f32.gmra.mxu3 %vm37_vm0, %v10077_v33 }
 0x22b   :  { %v1472_v12 = vpop.f32.mrf.mxu2 }
 0x22c   :  { %v2006_v23 = vpop.f32.mrf.mxu3  ;;  %v1664_v59 = vadd.f32 %v1472_v12, %v1003_v11  ;;  %v2543_v62 = vpop.f32.mrf.mxu0 }
 0x22d   :  { %v3077_v41 = vpop.f32.mrf.mxu1 }
 0x22e   :  { %v2198_v39 = vadd.f32 %v2006_v23, %v1664_v59 }
 0x22f   :  { %9026 = vmatmul.msk.f32.gmra.mxu0 %vm37_vm0, %v10097_v52  ;;  %v2814_v52 = vld [vmem:[#allocation2 + $0xf2] sm:$0xff] }
 0x230   :  { %9092 = vmatmul.msk.f32.gmra.mxu1 %vm37_vm0, %v2813_v4  ;;  %8894 = vmatmul.msk.f32.gmra.mxu2 %vm37_vm0, %v2811_v40  ;;  %v2732_v27 = vadd.f32 %v2540_v47, %v2198_v39 }
 0x231   :  { %8960 = vmatmul.msk.f32.gmra.mxu3 %vm37_vm0, %v10101_v56 }
 0x232   :  { %v10587_v58 = vadd.f32 %v3074_v50, %v2732_v27  ;;  %v2815_v27 = vld [vmem:[#allocation2 + $0xfa] sm:$0xff] }
 0x233   :  { %v1475_v33 = vpop.f32.mrf.mxu2 }
 0x234   :  { %v2009_v63 = vpop.f32.mrf.mxu3  ;;  %v1665_v11 = vadd.f32 %v1475_v33, %v1006_v57  ;;  %v2546_v12 = vpop.f32.mrf.mxu0 }
 0x235   :  { %v3080_v23 = vpop.f32.mrf.mxu1 }
 0x236   :  { %v2199_v59 = vadd.f32 %v2009_v63, %v1665_v11  ;;  %v2816_v63 = vld [vmem:[#allocation2 + $0x10a] sm:$0xff] }
 0x237   :  { %9027 = vmatmul.msk.f32.gmra.mxu0 %vm37_vm0, %v10121_v19 }
 0x238   :  { %9093 = vmatmul.msk.f32.gmra.mxu1 %vm37_vm0, %v2814_v52  ;;  %8895 = vmatmul.msk.f32.gmra.mxu2 %vm37_vm0, %v2812_v0  ;;  %v2733_v7 = vadd.f32 %v2543_v62, %v2199_v59 }
 0x239   :  { %8961 = vmatmul.msk.f32.gmra.mxu3 %vm37_vm0, %v10125_v34 }
 0x23a   :  { %v10597_v56 = vadd.f32 %v3077_v41, %v2733_v7  ;;  %v2817_v7 = vld [vmem:[#allocation2 + $0x112] sm:$0xff] }
 0x23b   :  { %v1478_v15 = vpop.f32.mrf.mxu2 }
 0x23c   :  { %v2012_v39 = vpop.f32.mrf.mxu3  ;;  %v1666_v40 = vadd.f32 %v1478_v15, %v1009_v10  ;;  %v2549_v47 = vpop.f32.mrf.mxu0  ;;  %v5501_v10 = vld [vmem:[#allocation4 + $0xe8] sm:$0xff] }
 0x23d   :  { %v3083_v50 = vpop.f32.mrf.mxu1  ;;  %v12861_v15 = vld [vmem:[#allocation23_spill] sm:$0xff]  ;;  %5506 = vmatpush.msra.mxu1 %v5501_v10 }
 0x23e   :  { %v2200_v19 = vadd.f32 %v2012_v39, %v1666_v40 }
 0x23f   :  { %9028 = vmatmul.msk.f32.gmra.mxu0 %vm37_vm0, %v10145_v5 }
 0x240   :  { %9094 = vmatmul.msk.f32.gmra.mxu1 %vm37_vm0, %v2815_v27  ;;  %8896 = vmatmul.msk.f32.gmra.mxu2 %vm37_vm0, %v2813_v4  ;;  %v2734_v26 = vadd.f32 %v2546_v12, %v2200_v19 }
 0x241   :  { %8962 = vmatmul.msk.f32.gmra.mxu3 %vm37_vm0, %v10149_v16 }
 0x242   :  { %v10607_v34 = vadd.f32 %v3080_v23, %v2734_v26 }
 0x243   :  { %v1481_v0 = vpop.f32.mrf.mxu2 }
 0x244   :  { %v2015_v41 = vpop.f32.mrf.mxu3  ;;  %v1667_v62 = vadd.f32 %v1481_v0, %v1012_v32  ;;  %v2552_v57 = vpop.f32.mrf.mxu0  ;;  %v2818_v0 = vld [vmem:[#allocation2 + $0x122] sm:$0xff] }
 0x245   :  { %v3086_v33 = vpop.f32.mrf.mxu1 }
 0x246   :  { %v2201_v5 = vadd.f32 %v2015_v41, %v1667_v62  ;;  %v12865_v62 = vld [vmem:[#allocation28_spill] sm:$0xff] }
 0x247   :  { %9029 = vmatmul.msk.f32.gmra.mxu0 %vm37_vm0, %v10169_v46 }
 0x248   :  { %9095 = vmatmul.msk.f32.gmra.mxu1 %vm37_vm0, %v2816_v63  ;;  %8897 = vmatmul.msk.f32.gmra.mxu2 %vm37_vm0, %v2814_v52  ;;  %v2735_v51 = vadd.f32 %v2549_v47, %v2201_v5  ;;  %v12864_v52 = vld [vmem:[#allocation17_spill] sm:$0xff]  ;;  %v12868_v5 = vld [vmem:[#allocation20_spill] sm:$0xff] }
 0x249   :  { %8963 = vmatmul.msk.f32.gmra.mxu3 %vm37_vm0, %v10173_v1  ;;  %v12862_v1 = vld [vmem:[#allocation25_spill] sm:$0xff]  ;;  %v1018_v39 = vadd.f32 %v12864_v52, %v12863_v22  ;;  %v12872_v22 = vld [vmem:[#allocation24_spill] sm:$0xff] }
 0x24a   :  { %v10617_v16 = vadd.f32 %v3083_v50, %v2735_v51 }
 0x24b   :  { %v1484_v4 = vpop.f32.mrf.mxu2 }
 0x24c   :  { %v2018_v11 = vpop.f32.mrf.mxu3  ;;  %v1668_v12 = vadd.f32 %v1484_v4, %v1015_v53  ;;  %v2555_v23 = vpop.f32.mrf.mxu0 }
 0x24d   :  { %v3089_v59 = vpop.f32.mrf.mxu1 }
 0x24e   :  { %v2202_v46 = vadd.f32 %v2018_v11, %v1668_v12 }
 0x24f   :  { %9030 = vmatmul.msk.f32.gmra.mxu0 %vm37_vm0, %v12861_v15  ;;  %v2819_v15 = vld [vmem:[#allocation2 + $0x12a] sm:$0xff] }
 0x250   :  { %9096 = vmatmul.msk.f32.gmra.mxu1 %vm37_vm0, %v2817_v7  ;;  %8898 = vmatmul.msk.f32.gmra.mxu2 %vm37_vm0, %v2815_v27  ;;  %v2736_v18 = vadd.f32 %v2552_v57, %v2202_v46  ;;  %v12866_v27 = vld [vmem:[#allocation30_spill] sm:$0xff] }
 0x251   :  { %8964 = vmatmul.msk.f32.gmra.mxu3 %vm37_vm0, %v12862_v1 }
 0x252   :  { %v10627_v40 = vadd.f32 %v3086_v33, %v2736_v18  ;;  %v12867_v33 = vld [vmem:[#allocation19_spill] sm:$0xff]  ;;  %v12869_v18 = vld [vmem:[#allocation33_spill] sm:$0xff] }
 0x253   :  { %v1487_v47 = vpop.f32.mrf.mxu2  ;;  %v1021_v51 = vadd.f32 %v12868_v5, %v12867_v33  ;;  %v12873_v33 = vld [vmem:[#allocation38_spill] sm:$0xff]  ;;  %v12876_v5 = vld [vmem:[#allocation29_spill] sm:$0xff] }
 0x254   :  { %v2021_v50 = vpop.f32.mrf.mxu3  ;;  %v1669_v19 = vadd.f32 %v1487_v47, %v1018_v39  ;;  %v2558_v26 = vpop.f32.mrf.mxu0 }
 0x255   :  { %v3092_v32 = vpop.f32.mrf.mxu1 }
 0x256   :  { %v2203_v41 = vadd.f32 %v2021_v50, %v1669_v19 }
 0x257   :  { %9031 = vmatmul.msk.f32.gmra.mxu0 %vm37_vm0, %v12865_v62 }
 0x258   :  { %9097 = vmatmul.msk.f32.gmra.mxu1 %vm37_vm0, %v2818_v0  ;;  %8899 = vmatmul.msk.f32.gmra.mxu2 %vm37_vm0, %v2816_v63  ;;  %v2737_v57 = vadd.f32 %v2555_v23, %v2203_v41  ;;  %v12870_v63 = vld [vmem:[#allocation35_spill] sm:$0xff] }
 0x259   :  { %8965 = vmatmul.msk.f32.gmra.mxu3 %vm37_vm0, %v12866_v27  ;;  %v2820_v27 = vld [vmem:[#allocation2 + $0x13a] sm:$0xff] }
 0x25a   :  { %v10637_v53 = vadd.f32 %v3089_v59, %v2737_v57  ;;  %v12871_v59 = vld [vmem:[#allocation22_spill] sm:$0xff] }
 0x25b   :  { %v1490_v4 = vpop.f32.mrf.mxu2  ;;  %v1024_v52 = vadd.f32 %v12872_v22, %v12871_v59  ;;  %v5500_v22 = vld [vmem:[#allocation4 + $0xe0] sm:$0xff] }
 0x25c   :  { %v2024_v11 = vpop.f32.mrf.mxu3  ;;  %v1670_v12 = vadd.f32 %v1490_v4, %v1021_v51  ;;  %v2561_v46 = vpop.f32.mrf.mxu0  ;;  %5507 = vmatpush.msra.mxu1 %v5500_v22 }
 0x25d   :  { %v3095_v10 = vpop.f32.mrf.mxu1 }
 0x25e   :  { %v2204_v1 = vadd.f32 %v2024_v11, %v1670_v12 }
 0x25f   :  { %9032 = vmatmul.msk.f32.gmra.mxu0 %vm37_vm0, %v12869_v18 }
 0x260   :  { %9098 = vmatmul.msk.f32.gmra.mxu1 %vm37_vm0, %v2819_v15  ;;  %8900 = vmatmul.msk.f32.gmra.mxu2 %vm37_vm0, %v2817_v7  ;;  %v2738_v23 = vadd.f32 %v2558_v26, %v2204_v1  ;;  %v12874_v7 = vld [vmem:[#allocation40_spill] sm:$0xff] }
 0x261   :  { %8966 = vmatmul.msk.f32.gmra.mxu3 %vm37_vm0, %v12870_v63 }
 0x262   :  { %v10647_v39 = vadd.f32 %v3092_v32, %v2738_v23  ;;  %v12875_v32 = vld [vmem:[#allocation27_spill] sm:$0xff] }
 0x263   :  { %v1493_v47 = vpop.f32.mrf.mxu2  ;;  %v1027_v51 = vadd.f32 %v12876_v5, %v12875_v32  ;;  %v2821_v23 = vld [vmem:[#allocation2 + $0x142] sm:$0xff] }
 0x264   :  { %v2027_v50 = vpop.f32.mrf.mxu3  ;;  %v1671_v19 = vadd.f32 %v1493_v47, %v1024_v52  ;;  %v2564_v41 = vpop.f32.mrf.mxu0  ;;  %v12877_v52 = vld [vmem:[#allocation43_spill] sm:$0xff]  ;;  %v12879_v47 = vld [vmem:[#allocation32_spill] sm:$0xff] }
 0x265   :  { %v3098_v62 = vpop.f32.mrf.mxu1 }
 0x266   :  { %v2205_v57 = vadd.f32 %v2027_v50, %v1671_v19  ;;  %v12880_v50 = vld [vmem:[#allocation34_spill] sm:$0xff] }
 0x267   :  { %9033 = vmatmul.msk.f32.gmra.mxu0 %vm37_vm0, %v12873_v33  ;;  %v1030_v19 = vadd.f32 %v12880_v50, %v12879_v47 }
 0x268   :  { %9099 = vmatmul.msk.f32.gmra.mxu1 %vm37_vm0, %v2820_v27  ;;  %8901 = vmatmul.msk.f32.gmra.mxu2 %vm37_vm0, %v2818_v0  ;;  %v2739_v26 = vadd.f32 %v2561_v46, %v2205_v57  ;;  %v155_v0 = vld [vmem:[%s12762_s0 + $0xf0] sm:$0xff]  ;;  %v12878_v46 = vld [vmem:[#allocation45_spill] sm:$0xff] }
 0x269   :  { %8967 = vmatmul.msk.f32.gmra.mxu3 %vm37_vm0, %v12874_v7  ;;  %220 = vst.msk [vmem:[#allocation2 + $0x181] sm:$0xff] %vm37_vm0, %v155_v0 }
 0x26a   :  { %v10657_v4 = vadd.f32 %v3095_v10, %v2739_v26 }
 0x26b   :  { %v1496_v11 = vpop.f32.mrf.mxu2 }
 0x26c   :  { %v2030_v12 = vpop.f32.mrf.mxu3  ;;  %v1672_v1 = vadd.f32 %v1496_v11, %v1027_v51  ;;  %v2567_v18 = vpop.f32.mrf.mxu0  ;;  %v2822_v51 = vld [vmem:[#allocation2 + $0x152] sm:$0xff] }
 0x26d   :  { %v3101_v63 = vpop.f32.mrf.mxu1 }
 0x26e   :  { %v2206_v59 = vadd.f32 %v2030_v12, %v1672_v1  ;;  %v12883_v1 = vld [vmem:[#allocation37_spill] sm:$0xff] }
 0x26f   :  { %9034 = vmatmul.msk.f32.gmra.mxu0 %vm37_vm0, %v12877_v52 }
 0x270   :  { %9100 = vmatmul.msk.f32.gmra.mxu1 %vm37_vm0, %v2821_v23  ;;  %8902 = vmatmul.msk.f32.gmra.mxu2 %vm37_vm0, %v2819_v15  ;;  %v2740_v10 = vadd.f32 %v2564_v41, %v2206_v59  ;;  %v12881_v15 = vld [vmem:[#allocation48_spill] sm:$0xff]  ;;  %v156_v41 = vld [vmem:[%s12762_s0 + $0xf8] sm:$0xff]  ;;  %v12884_v59 = vld [vmem:[#allocation39_spill] sm:$0xff] }
 0x271   :  { %8968 = vmatmul.msk.f32.gmra.mxu3 %vm37_vm0, %v12878_v46  ;;  %221 = vst.msk [vmem:[#allocation2 + $0x189] sm:$0xff] %vm37_vm0, %v156_v41  ;;  %v1033_v22 = vadd.f32 %v12884_v59, %v12883_v1 }
 0x272   :  { %v10671_v57 = vadd.f32 %v3098_v62, %v2740_v10  ;;  %v12882_v62 = vld [vmem:[#allocation50_spill] sm:$0xff] }
 0x273   :  { %v1499_v33 = vpop.f32.mrf.mxu2 }
 0x274   :  { %v2033_v7 = vpop.f32.mrf.mxu3  ;;  %v1673_v26 = vadd.f32 %v1499_v33, %v1030_v19  ;;  %v2570_v32 = vpop.f32.mrf.mxu0  ;;  %v2823_v19 = vld [vmem:[#allocation2 + $0x15a] sm:$0xff] }
 0x275   :  { %v3104_v5 = vpop.f32.mrf.mxu1 }
 0x276   :  { %v2207_v11 = vadd.f32 %v2033_v7, %v1673_v26  ;;  %v12885_v7 = vld [vmem:[#allocation53_spill] sm:$0xff]  ;;  %v12888_v26 = vld [vmem:[#allocation44_spill] sm:$0xff] }
 0x277   :  { %9035 = vmatmul.msk.f32.gmra.mxu0 %vm37_vm0, %v12881_v15 }
 0x278   :  { %9101 = vmatmul.msk.f32.gmra.mxu1 %vm37_vm0, %v2822_v51  ;;  %8903 = vmatmul.msk.f32.gmra.mxu2 %vm37_vm0, %v2820_v27  ;;  %v2741_v12 = vadd.f32 %v2567_v18, %v2207_v11  ;;  %v12886_v27 = vld [vmem:[#allocation55_spill] sm:$0xff] }
 0x279   :  { %8969 = vmatmul.msk.f32.gmra.mxu3 %vm37_vm0, %v12882_v62 }
 0x27a   :  { %v10685_v52 = vadd.f32 %v3101_v63, %v2741_v12  ;;  %v12887_v63 = vld [vmem:[#allocation42_spill] sm:$0xff] }
 0x27b   :  { %v1502_v0 = vpop.f32.mrf.mxu2  ;;  %v1036_v11 = vadd.f32 %v12888_v26, %v12887_v63 }
 0x27c   :  { %v2036_v46 = vpop.f32.mrf.mxu3  ;;  %v1674_v10 = vadd.f32 %v1502_v0, %v1033_v22  ;;  %v2573_v47 = vpop.f32.mrf.mxu0  ;;  %v2824_v22 = vld [vmem:[#allocation2 + $0x16a] sm:$0xff] }
 0x27d   :  { %v3107_v50 = vpop.f32.mrf.mxu1 }
 0x27e   :  { %v2208_v33 = vadd.f32 %v2036_v46, %v1674_v10  ;;  %v12889_v46 = vld [vmem:[#allocation58_spill] sm:$0xff] }
 0x27f   :  { %9036 = vmatmul.msk.f32.gmra.mxu0 %vm37_vm0, %v12885_v7 }
 0x280   :  { %9102 = vmatmul.msk.f32.gmra.mxu1 %vm37_vm0, %v2823_v19  ;;  %8904 = vmatmul.msk.f32.gmra.mxu2 %vm37_vm0, %v2821_v23  ;;  %v2742_v18 = vadd.f32 %v2570_v32, %v2208_v33  ;;  %v12890_v32 = vld [vmem:[#allocation47_spill] sm:$0xff] }
 0x281   :  { %8970 = vmatmul.msk.f32.gmra.mxu3 %vm37_vm0, %v12886_v27 }
 0x282   :  { %v10695_v15 = vadd.f32 %v3104_v5, %v2742_v18  ;;  %v12891_v5 = vld [vmem:[#allocation49_spill] sm:$0xff] }
 0x283   :  { %v1505_v41 = vpop.f32.mrf.mxu2  ;;  %v1039_v10 = vadd.f32 %v12891_v5, %v12890_v32  ;;  %v2292_v5 = vld [vmem:[#allocation2 + $0x181] sm:$0xff] }
 0x284   :  { %v2039_v62 = vpop.f32.mrf.mxu3  ;;  %v1675_v12 = vadd.f32 %v1505_v41, %v1036_v11  ;;  %v2576_v1 = vpop.f32.mrf.mxu0  ;;  %v2825_v11 = vld [vmem:[#allocation2 + $0x172] sm:$0xff] }
 0x285   :  { %v3110_v59 = vpop.f32.mrf.mxu1 }
 0x286   :  { %v2209_v0 = vadd.f32 %v2039_v62, %v1675_v12  ;;  %v5499_v62 = vld [vmem:[#allocation4 + $0xd8] sm:$0xff] }
 0x287   :  { %9037 = vmatmul.msk.f32.gmra.mxu0 %vm37_vm0, %v12889_v46  ;;  %5508 = vmatpush.msra.mxu1 %v5499_v62 }
 0x288   :  { %9103 = vmatmul.msk.f32.gmra.mxu1 %vm37_vm0, %v2824_v22  ;;  %8905 = vmatmul.msk.f32.gmra.mxu2 %vm37_vm0, %v2822_v51  ;;  %v2743_v23 = vadd.f32 %v2573_v47, %v2209_v0  ;;  %v12892_v51 = vld [vmem:[#allocation52_spill] sm:$0xff]  ;;  %v12893_v47 = vld [vmem:[#allocation54_spill] sm:$0xff] }
 0x289   :  { %8971 = vmatmul.msk.f32.gmra.mxu3 %vm37_vm0, %v10353_v6 }
 0x28a   :  { %v10705_v33 = vadd.f32 %v3107_v50, %v2743_v23  ;;  %v1042_v50 = vadd.f32 %v12893_v47, %v12892_v51  ;;  %v2293_v47 = vld [vmem:[#allocation2 + $0x189] sm:$0xff] }
 0x28b   :  { %v1508_v7 = vpop.f32.mrf.mxu2 }
 0x28c   :  { %v2042_v27 = vpop.f32.mrf.mxu3  ;;  %v1676_v18 = vadd.f32 %v1508_v7, %v1039_v10  ;;  %v2579_v63 = vpop.f32.mrf.mxu0  ;;  %v2826_v10 = vld [vmem:[#allocation2 + $0x182] sm:$0xff] }
 0x28d   :  { %v3113_v26 = vpop.f32.mrf.mxu1  ;;  %v1758_v7 = vld [vmem:[#allocation2 + $0x180] sm:$0xff] }
 0x28e   :  { %v2210_v41 = vadd.f32 %v2042_v27, %v1676_v18 }
 0x28f   :  { %9038 = vmatmul.msk.f32.gmra.mxu0 %vm37_vm0, %v10365_v35 }
 0x290   :  { %9104 = vmatmul.msk.f32.gmra.mxu1 %vm37_vm0, %v2825_v11  ;;  %8906 = vmatmul.msk.f32.gmra.mxu2 %vm37_vm0, %v2823_v19  ;;  %v2744_v6 = vadd.f32 %v2576_v1, %v2210_v41  ;;  %v12894_v19 = vld [vmem:[#allocation57_spill] sm:$0xff]  ;;  %v12895_v1 = vld [vmem:[#allocation59_spill] sm:$0xff] }
 0x291   :  { %8972 = vmatmul.msk.f32.gmra.mxu3 %vm37_vm0, %v10369_v38 }
 0x292   :  { %v10715_v12 = vadd.f32 %v3110_v59, %v2744_v6  ;;  %v1045_v59 = vadd.f32 %v12895_v1, %v12894_v19  ;;  %v2294_v1 = vld [vmem:[#allocation2 + $0x1c9] sm:$0xff] }
 0x293   :  { %v1511_v0 = vpop.f32.mrf.mxu2 }
 0x294   :  { %v2045_v46 = vpop.f32.mrf.mxu3  ;;  %v1677_v23 = vadd.f32 %v1511_v0, %v1042_v50  ;;  %v2582_v32 = vpop.f32.mrf.mxu0  ;;  %v2827_v0 = vld [vmem:[#allocation2 + $0x18a] sm:$0xff] }
 0x295   :  { %v3116_v35 = vpop.f32.mrf.mxu1 }
 0x296   :  { %v2211_v27 = vadd.f32 %v2045_v46, %v1677_v23  ;;  %v1759_v46 = vld [vmem:[#allocation2 + $0x188] sm:$0xff] }
 0x297   :  { %9039 = vmatmul.msk.f32.gmra.mxu0 %vm37_vm0, %v2292_v5 }
 0x298   :  { %9105 = vmatmul.msk.f32.gmra.mxu1 %vm37_vm0, %v2826_v10  ;;  %8907 = vmatmul.msk.f32.gmra.mxu2 %vm37_vm0, %v2824_v22  ;;  %v2745_v38 = vadd.f32 %v2579_v63, %v2211_v27  ;;  %v12897_v63 = vld [vmem:[#allocation61_spill] sm:$0xff] }
 0x299   :  { %8973 = vmatmul.msk.f32.gmra.mxu3 %vm37_vm0, %v1758_v7 }
 0x29a   :  { %v10723_v18 = vadd.f32 %v3113_v26, %v2745_v38  ;;  %v12898_v26 = vld [vmem:[#allocation62_spill] sm:$0xff] }
 0x29b   :  { %v1514_v41 = vpop.f32.mrf.mxu2  ;;  %v1048_v5 = vadd.f32 %v12898_v26, %v12897_v63 }
 0x29c   :  { %12896 = vst [vmem:[#allocation23_spill] sm:$0xff] %v10723_v18  ;;  %v2048_v62 = vpop.f32.mrf.mxu3  ;;  %v1678_v6 = vadd.f32 %v1514_v41, %v1045_v59  ;;  %v2585_v51 = vpop.f32.mrf.mxu0  ;;  %v2828_v41 = vld [vmem:[#allocation2 + $0x1ca] sm:$0xff] }
 0x29d   :  { %v3119_v50 = vpop.f32.mrf.mxu1  ;;  %v5498_v18 = vld [vmem:[#allocation4 + $0xd0] sm:$0xff] }
 0x29e   :  { %v2212_v23 = vadd.f32 %v2048_v62, %v1678_v6  ;;  %v1226_v62 = vld [vmem:[#allocation2 + $0x1b2] sm:$0xff]  ;;  %v1760_v6 = vld [vmem:[#allocation2 + $0x1c8] sm:$0xff]  ;;  %5509 = vmatpush.msra.mxu1 %v5498_v18 }
 0x29f   :  { %9040 = vmatmul.msk.f32.gmra.mxu0 %vm37_vm0, %v2293_v47 }
 0x2a0   :  { %9106 = vmatmul.msk.f32.gmra.mxu1 %vm37_vm0, %v2827_v0  ;;  %8908 = vmatmul.msk.f32.gmra.mxu2 %vm37_vm0, %v2825_v11  ;;  %v2746_v22 = vadd.f32 %v2582_v32, %v2212_v23  ;;  %v12900_v32 = vld [vmem:[#allocation64_spill] sm:$0xff] }
 0x2a1   :  { %8974 = vmatmul.msk.f32.gmra.mxu3 %vm37_vm0, %v1759_v46 }
 0x2a2   :  { %v10731_v10 = vadd.f32 %v3116_v35, %v2746_v22  ;;  %v12901_v35 = vld [vmem:[#allocation65_spill] sm:$0xff] }
 0x2a3   :  { %v1517_v7 = vpop.f32.mrf.mxu2  ;;  %v1051_v0 = vadd.f32 %v12901_v35, %v12900_v32  ;;  %v2296_v35 = vld [vmem:[#allocation2 + $0x1e1] sm:$0xff] }
 0x2a4   :  { %12899 = vst [vmem:[#allocation25_spill] sm:$0xff] %v10731_v10  ;;  %v2051_v27 = vpop.f32.mrf.mxu3  ;;  %v1679_v38 = vadd.f32 %v1517_v7, %v1048_v5  ;;  %v2588_v19 = vpop.f32.mrf.mxu0  ;;  %v2295_v5 = vld [vmem:[#allocation2 + $0x1d1] sm:$0xff] }
 0x2a5   :  { %v3122_v59 = vpop.f32.mrf.mxu1 }
 0x2a6   :  { %v2213_v47 = vadd.f32 %v2051_v27, %v1679_v38  ;;  %v2829_v27 = vld [vmem:[#allocation2 + $0x1d2] sm:$0xff]  ;;  %v1227_v38 = vld [vmem:[#allocation2 + $0x1ba] sm:$0xff] }
 0x2a7   :  { %9041 = vmatmul.msk.f32.gmra.mxu0 %vm37_vm0, %v2294_v1  ;;  %v1761_v1 = vld [vmem:[#allocation2 + $0x1d0] sm:$0xff] }
 0x2a8   :  { %9107 = vmatmul.msk.f32.gmra.mxu1 %vm37_vm0, %v2828_v41  ;;  %8909 = vmatmul.msk.f32.gmra.mxu2 %vm37_vm0, %v1226_v62  ;;  %v2747_v11 = vadd.f32 %v2585_v51, %v2213_v47 }
 0x2a9   :  { %8975 = vmatmul.msk.f32.gmra.mxu3 %vm37_vm0, %v1760_v6 }
 0x2aa   :  { %v10739_v46 = vadd.f32 %v3119_v50, %v2747_v11  ;;  %v1054_v50 = vadd.f32 %v10393_v45, %v10391_v17  ;;  %v1057_v17 = vadd.f32 %v10405_v44, %v10403_v13  ;;  %v1060_v44 = vadd.f32 %v10417_v25, %v10415_v24 }
 0x2ab   :  { %v1520_v23 = vpop.f32.mrf.mxu2  ;;  %v1063_v25 = vadd.f32 %v10429_v31, %v10427_v30  ;;  %v1066_v31 = vadd.f32 %v10441_v37, %v10439_v36  ;;  %v1069_v37 = vadd.f32 %v10453_v43, %v10451_v42  ;;  %v1072_v43 = vadd.f32 %v10465_v49, %v10463_v48 }
 0x2ac   :  { %v2054_v22 = vpop.f32.mrf.mxu3  ;;  %v1680_v63 = vadd.f32 %v1520_v23, %v1051_v0  ;;  %v2591_v26 = vpop.f32.mrf.mxu0  ;;  %v2830_v23 = vld [vmem:[#allocation2 + $0x1e2] sm:$0xff]  ;;  %v1075_v49 = vadd.f32 %v10477_v55, %v10475_v54  ;;  %v1078_v55 = vadd.f32 %v10489_v61, %v10487_v60  ;;  %v1081_v61 = vadd.f32 %v10501_v3, %v10499_v2 }
 0x2ad   :  { %v3125_v7 = vpop.f32.mrf.mxu1  ;;  %v1084_v3 = vadd.f32 %v10513_v9, %v10511_v8  ;;  %v12902_v9 = vld [vmem:[#allocation78_spill] sm:$0xff] }
 0x2ae   :  { %v2214_v10 = vadd.f32 %v2054_v22, %v1680_v63  ;;  %v1762_v22 = vld [vmem:[#allocation2 + $0x1e0] sm:$0xff] }
 0x2af   :  { %9042 = vmatmul.msk.f32.gmra.mxu0 %vm37_vm0, %v2295_v5 }
 0x2b0   :  { %9108 = vmatmul.msk.f32.gmra.mxu1 %vm37_vm0, %v2829_v27  ;;  %8910 = vmatmul.msk.f32.gmra.mxu2 %vm37_vm0, %v1227_v38  ;;  %v2748_v51 = vadd.f32 %v2588_v19, %v2214_v10  ;;  %v2297_v38 = vld [vmem:[#allocation2 + $0x1e9] sm:$0xff] }
 0x2b1   :  { %8976 = vmatmul.msk.f32.gmra.mxu3 %vm37_vm0, %v1761_v1 }
 0x2b2   :  { %v10747_v62 = vadd.f32 %v3122_v59, %v2748_v51  ;;  %v2831_v51 = vld [vmem:[#allocation2 + $0x1ea] sm:$0xff] }
 0x2b3   :  { %v1523_v6 = vpop.f32.mrf.mxu2 }
 0x2b4   :  { %v2057_v47 = vpop.f32.mrf.mxu3  ;;  %v1681_v11 = vadd.f32 %v1523_v6, %v1054_v50  ;;  %v2594_v32 = vpop.f32.mrf.mxu0  ;;  %v1763_v50 = vld [vmem:[#allocation2 + $0x1e8] sm:$0xff] }
 0x2b5   :  { %v3128_v0 = vpop.f32.mrf.mxu1 }
 0x2b6   :  { %v2215_v63 = vadd.f32 %v2057_v47, %v1681_v11 }
 0x2b7   :  { %9043 = vmatmul.msk.f32.gmra.mxu0 %vm37_vm0, %v2296_v35  ;;  %v2298_v35 = vld [vmem:[#allocation2 + $0x1f9] sm:$0xff] }
 0x2b8   :  { %9109 = vmatmul.msk.f32.gmra.mxu1 %vm37_vm0, %v2830_v23  ;;  %8911 = vmatmul.msk.f32.gmra.mxu2 %vm37_vm0, %v2828_v41  ;;  %v2749_v45 = vadd.f32 %v2591_v26, %v2215_v63  ;;  %v2832_v63 = vld [vmem:[#allocation2 + $0x1fa] sm:$0xff] }
 0x2b9   :  { %8977 = vmatmul.msk.f32.gmra.mxu3 %vm37_vm0, %v1762_v22 }
 0x2ba   :  { %v10755_v18 = vadd.f32 %v3125_v7, %v2749_v45  ;;  %v1764_v45 = vld [vmem:[#allocation2 + $0x1f8] sm:$0xff] }
 0x2bb   :  { %v1526_v10 = vpop.f32.mrf.mxu2 }
 0x2bc   :  { %v2060_v19 = vpop.f32.mrf.mxu3  ;;  %v1682_v59 = vadd.f32 %v1526_v10, %v1057_v17  ;;  %v2597_v5 = vpop.f32.mrf.mxu0 }
 0x2bd   :  { %v3131_v1 = vpop.f32.mrf.mxu1 }
 0x2be   :  { %v2216_v6 = vadd.f32 %v2060_v19, %v1682_v59  ;;  %v2299_v59 = vld [vmem:[#allocation2 + $0x201] sm:$0xff] }
 0x2bf   :  { %9044 = vmatmul.msk.f32.gmra.mxu0 %vm37_vm0, %v2297_v38 }
 0x2c0   :  { %9110 = vmatmul.msk.f32.gmra.mxu1 %vm37_vm0, %v2831_v51  ;;  %8912 = vmatmul.msk.f32.gmra.mxu2 %vm37_vm0, %v2829_v27  ;;  %v2750_v13 = vadd.f32 %v2594_v32, %v2216_v6  ;;  %v1765_v6 = vld [vmem:[#allocation2 + $0x200] sm:$0xff] }
 0x2c1   :  { %8978 = vmatmul.msk.f32.gmra.mxu3 %vm37_vm0, %v1763_v50  ;;  %v2833_v50 = vld [vmem:[#allocation2 + $0x202] sm:$0xff] }
 0x2c2   :  { %v10763_v41 = vadd.f32 %v3128_v0, %v2750_v13 }
 0x2c3   :  { %v1529_v26 = vpop.f32.mrf.mxu2 }
 0x2c4   :  { %v2063_v7 = vpop.f32.mrf.mxu3  ;;  %v1683_v47 = vadd.f32 %v1529_v26, %v1060_v44  ;;  %v2600_v11 = vpop.f32.mrf.mxu0  ;;  %v5497_v44 = vld [vmem:[#allocation4 + $0xc8] sm:$0xff] }
 0x2c5   :  { %v3134_v22 = vpop.f32.mrf.mxu1  ;;  %5510 = vmatpush.msra.mxu1 %v5497_v44 }
 0x2c6   :  { %v2217_v17 = vadd.f32 %v2063_v7, %v1683_v47  ;;  %v2300_v47 = vld [vmem:[#allocation2 + $0x211] sm:$0xff] }
 0x2c7   :  { %9045 = vmatmul.msk.f32.gmra.mxu0 %vm37_vm0, %v2298_v35 }
 0x2c8   :  { %9111 = vmatmul.msk.f32.gmra.mxu1 %vm37_vm0, %v2832_v63  ;;  %8913 = vmatmul.msk.f32.gmra.mxu2 %vm37_vm0, %v2830_v23  ;;  %v2751_v24 = vadd.f32 %v2597_v5, %v2217_v17  ;;  %v1766_v17 = vld [vmem:[#allocation2 + $0x210] sm:$0xff] }
 0x2c9   :  { %8979 = vmatmul.msk.f32.gmra.mxu3 %vm37_vm0, %v1764_v45  ;;  %v2834_v45 = vld [vmem:[#allocation2 + $0x212] sm:$0xff] }
 0x2ca   :  { %v10771_v27 = vadd.f32 %v3131_v1, %v2751_v24 }
 0x2cb   :  { %v1532_v32 = vpop.f32.mrf.mxu2 }
 0x2cc   :  { %v2066_v0 = vpop.f32.mrf.mxu3  ;;  %v1684_v10 = vadd.f32 %v1532_v32, %v1063_v25  ;;  %v2603_v19 = vpop.f32.mrf.mxu0 }
 0x2cd   :  { %v3137_v38 = vpop.f32.mrf.mxu1 }
 0x2ce   :  { %v2218_v13 = vadd.f32 %v2066_v0, %v1684_v10  ;;  %v2301_v0 = vld [vmem:[#allocation2 + $0x219] sm:$0xff] }
 0x2cf   :  { %9046 = vmatmul.msk.f32.gmra.mxu0 %vm37_vm0, %v2299_v59  ;;  %v2835_v59 = vld [vmem:[#allocation2 + $0x21a] sm:$0xff] }
 0x2d0   :  { %9112 = vmatmul.msk.f32.gmra.mxu1 %vm37_vm0, %v2833_v50  ;;  %8914 = vmatmul.msk.f32.gmra.mxu2 %vm37_vm0, %v2831_v51  ;;  %v2752_v30 = vadd.f32 %v2600_v11, %v2218_v13 }
 0x2d1   :  { %8980 = vmatmul.msk.f32.gmra.mxu3 %vm37_vm0, %v1765_v6  ;;  %v1767_v6 = vld [vmem:[#allocation2 + $0x218] sm:$0xff] }
 0x2d2   :  { %v10779_v23 = vadd.f32 %v3134_v22, %v2752_v30 }
 0x2d3   :  { %v1535_v5 = vpop.f32.mrf.mxu2 }
 0x2d4   :  { %v2069_v1 = vpop.f32.mrf.mxu3  ;;  %v1685_v26 = vadd.f32 %v1535_v5, %v1066_v31  ;;  %v2606_v7 = vpop.f32.mrf.mxu0  ;;  %v2302_v31 = vld [vmem:[#allocation2 + $0x229] sm:$0xff] }
 0x2d5   :  { %v3140_v35 = vpop.f32.mrf.mxu1 }
 0x2d6   :  { %v2219_v24 = vadd.f32 %v2069_v1, %v1685_v26  ;;  %v2836_v1 = vld [vmem:[#allocation2 + $0x22a] sm:$0xff] }
 0x2d7   :  { %9047 = vmatmul.msk.f32.gmra.mxu0 %vm37_vm0, %v2300_v47  ;;  %v1768_v26 = vld [vmem:[#allocation2 + $0x228] sm:$0xff] }
 0x2d8   :  { %9113 = vmatmul.msk.f32.gmra.mxu1 %vm37_vm0, %v2834_v45  ;;  %8915 = vmatmul.msk.f32.gmra.mxu2 %vm37_vm0, %v2832_v63  ;;  %v2753_v36 = vadd.f32 %v2603_v19, %v2219_v24 }
 0x2d9   :  { %8981 = vmatmul.msk.f32.gmra.mxu3 %vm37_vm0, %v1766_v17 }
 0x2da   :  { %v10787_v51 = vadd.f32 %v3137_v38, %v2753_v36  ;;  %v2303_v36 = vld [vmem:[#allocation2 + $0x231] sm:$0xff] }
 0x2db   :  { %v1538_v11 = vpop.f32.mrf.mxu2 }
 0x2dc   :  { %v2072_v22 = vpop.f32.mrf.mxu3  ;;  %v1686_v25 = vadd.f32 %v1538_v11, %v1069_v37  ;;  %v2609_v32 = vpop.f32.mrf.mxu0  ;;  %v2837_v11 = vld [vmem:[#allocation2 + $0x232] sm:$0xff] }
 0x2dd   :  { %v3143_v10 = vpop.f32.mrf.mxu1 }
 0x2de   :  { %v2220_v13 = vadd.f32 %v2072_v22, %v1686_v25  ;;  %v1769_v22 = vld [vmem:[#allocation2 + $0x230] sm:$0xff] }
 0x2df   :  { %9048 = vmatmul.msk.f32.gmra.mxu0 %vm37_vm0, %v2301_v0  ;;  %v5496_v0 = vld [vmem:[#allocation4 + $0xc0] sm:$0xff] }
 0x2e0   :  { %9114 = vmatmul.msk.f32.gmra.mxu1 %vm37_vm0, %v2835_v59  ;;  %8916 = vmatmul.msk.f32.gmra.mxu2 %vm37_vm0, %v2833_v50  ;;  %v2754_v42 = vadd.f32 %v2606_v7, %v2220_v13 }
 0x2e1   :  { %8982 = vmatmul.msk.f32.gmra.mxu3 %vm37_vm0, %v1767_v6  ;;  %5511 = vmatpush.msra.mxu1 %v5496_v0  ;;  %v2840_v0 = vld [vmem:[#allocation2 + $0x25a] sm:$0xff] }
 0x2e2   :  { %v10795_v63 = vadd.f32 %v3140_v35, %v2754_v42  ;;  %v2304_v42 = vld [vmem:[#allocation2 + $0x241] sm:$0xff] }
 0x2e3   :  { %v1541_v19 = vpop.f32.mrf.mxu2 }
 0x2e4   :  { %v2075_v38 = vpop.f32.mrf.mxu3  ;;  %v1687_v44 = vadd.f32 %v1541_v19, %v1072_v43  ;;  %v2612_v30 = vpop.f32.mrf.mxu0  ;;  %v2838_v19 = vld [vmem:[#allocation2 + $0x242] sm:$0xff] }
 0x2e5   :  { %v3146_v5 = vpop.f32.mrf.mxu1 }
 0x2e6   :  { %v2221_v47 = vadd.f32 %v2075_v38, %v1687_v44  ;;  %v1770_v38 = vld [vmem:[#allocation2 + $0x240] sm:$0xff] }
 0x2e7   :  { %9049 = vmatmul.msk.f32.gmra.mxu0 %vm37_vm0, %v2302_v31 }
 0x2e8   :  { %9115 = vmatmul.msk.f32.gmra.mxu1 %vm37_vm0, %v2836_v1  ;;  %8917 = vmatmul.msk.f32.gmra.mxu2 %vm37_vm0, %v2834_v45  ;;  %v2755_v48 = vadd.f32 %v2609_v32, %v2221_v47  ;;  %v2305_v47 = vld [vmem:[#allocation2 + $0x249] sm:$0xff] }
 0x2e9   :  { %8983 = vmatmul.msk.f32.gmra.mxu3 %vm37_vm0, %v1768_v26 }
 0x2ea   :  { %v10803_v50 = vadd.f32 %v3143_v10, %v2755_v48 }
 0x2eb   :  { %v1544_v7 = vpop.f32.mrf.mxu2 }
 0x2ec   :  { %v2078_v35 = vpop.f32.mrf.mxu3  ;;  %v1688_v17 = vadd.f32 %v1544_v7, %v1075_v49  ;;  %v2615_v24 = vpop.f32.mrf.mxu0  ;;  %v2839_v49 = vld [vmem:[#allocation2 + $0x24a] sm:$0xff] }
 0x2ed   :  { %v3149_v37 = vpop.f32.mrf.mxu1  ;;  %v1771_v7 = vld [vmem:[#allocation2 + $0x248] sm:$0xff] }
 0x2ee   :  { %v2222_v25 = vadd.f32 %v2078_v35, %v1688_v17 }
 0x2ef   :  { %9050 = vmatmul.msk.f32.gmra.mxu0 %vm37_vm0, %v2303_v36 }
 0x2f0   :  { %9116 = vmatmul.msk.f32.gmra.mxu1 %vm37_vm0, %v2837_v11  ;;  %8918 = vmatmul.msk.f32.gmra.mxu2 %vm37_vm0, %v2835_v59  ;;  %v2756_v54 = vadd.f32 %v2612_v30, %v2222_v25 }
 0x2f1   :  { %8984 = vmatmul.msk.f32.gmra.mxu3 %vm37_vm0, %v1769_v22  ;;  %v2306_v22 = vld [vmem:[#allocation2 + $0x259] sm:$0xff] }
 0x2f2   :  { %v10811_v45 = vadd.f32 %v3146_v5, %v2756_v54  ;;  %v1772_v54 = vld [vmem:[#allocation2 + $0x258] sm:$0xff] }
 0x2f3   :  { %v1547_v32 = vpop.f32.mrf.mxu2 }
 0x2f4   :  { %v2081_v10 = vpop.f32.mrf.mxu3  ;;  %v1689_v6 = vadd.f32 %v1547_v32, %v1078_v55  ;;  %v2618_v13 = vpop.f32.mrf.mxu0 }
 0x2f5   :  { %v3152_v43 = vpop.f32.mrf.mxu1 }
 0x2f6   :  { %v2223_v44 = vadd.f32 %v2081_v10, %v1689_v6 }
 0x2f7   :  { %9051 = vmatmul.msk.f32.gmra.mxu0 %vm37_vm0, %v2304_v42 }
 0x2f8   :  { %9117 = vmatmul.msk.f32.gmra.mxu1 %vm37_vm0, %v2838_v19  ;;  %8919 = vmatmul.msk.f32.gmra.mxu2 %vm37_vm0, %v2836_v1  ;;  %v2757_v60 = vadd.f32 %v2615_v24, %v2223_v44  ;;  %v2841_v44 = vld [vmem:[#allocation2 + $0x262] sm:$0xff] }
 0x2f9   :  { %8985 = vmatmul.msk.f32.gmra.mxu3 %vm37_vm0, %v1770_v38 }
 0x2fa   :  { %v10819_v59 = vadd.f32 %v3149_v37, %v2757_v60  ;;  %v1773_v60 = vld [vmem:[#allocation2 + $0x260] sm:$0xff] }
 0x2fb   :  { %v1550_v30 = vpop.f32.mrf.mxu2 }
 0x2fc   :  { %v2084_v31 = vpop.f32.mrf.mxu3  ;;  %v1690_v5 = vadd.f32 %v1550_v30, %v1081_v61  ;;  %v2621_v26 = vpop.f32.mrf.mxu0  ;;  %v5495_v30 = vld [vmem:[#allocation4 + $0xb8] sm:$0xff] }
 0x2fd   :  { %v3155_v48 = vpop.f32.mrf.mxu1  ;;  %5512 = vmatpush.msra.mxu1 %v5495_v30  ;;  %v1776_v30 = vld [vmem:[#allocation2 + $0x288] sm:$0xff] }
 0x2fe   :  { %v2224_v35 = vadd.f32 %v2084_v31, %v1690_v5 }
 0x2ff   :  { %9052 = vmatmul.msk.f32.gmra.mxu0 %vm37_vm0, %v2305_v47 }
 0x300   :  { %9118 = vmatmul.msk.f32.gmra.mxu1 %vm37_vm0, %v2839_v49  ;;  %8920 = vmatmul.msk.f32.gmra.mxu2 %vm37_vm0, %v2837_v11  ;;  %v2758_v2 = vadd.f32 %v2618_v13, %v2224_v35  ;;  %v1087_v11 = vadd.f32 %v12902_v9, %v10523_v14 }
 0x301   :  { %8986 = vmatmul.msk.f32.gmra.mxu3 %vm37_vm0, %v1771_v7  ;;  %v2308_v7 = vld [vmem:[#allocation2 + $0x271] sm:$0xff] }
 0x302   :  { %v10827_v1 = vadd.f32 %v3152_v43, %v2758_v2  ;;  %v2307_v43 = vld [vmem:[#allocation2 + $0x261] sm:$0xff]  ;;  %v2842_v2 = vld [vmem:[#allocation2 + $0x272] sm:$0xff] }
 0x303   :  { %v1553_v17 = vpop.f32.mrf.mxu2 }
 0x304   :  { %v2087_v24 = vpop.f32.mrf.mxu3  ;;  %v1691_v36 = vadd.f32 %v1553_v17, %v1084_v3  ;;  %v2624_v37 = vpop.f32.mrf.mxu0  ;;  %v1774_v3 = vld [vmem:[#allocation2 + $0x270] sm:$0xff] }
 0x305   :  { %v3158_v25 = vpop.f32.mrf.mxu1 }
 0x306   :  { %v2225_v55 = vadd.f32 %v2087_v24, %v1691_v36 }
 0x307   :  { %9053 = vmatmul.msk.f32.gmra.mxu0 %vm37_vm0, %v2306_v22 }
 0x308   :  { %9119 = vmatmul.msk.f32.gmra.mxu1 %vm37_vm0, %v2840_v0  ;;  %8921 = vmatmul.msk.f32.gmra.mxu2 %vm37_vm0, %v2838_v19  ;;  %v2759_v8 = vadd.f32 %v2621_v26, %v2225_v55  ;;  %v1090_v19 = vadd.f32 %v10537_v21, %v10535_v20  ;;  %v1093_v21 = vadd.f32 %v10549_v29, %v10547_v28  ;;  %v2843_v55 = vld [vmem:[#allocation2 + $0x27a] sm:$0xff] }
 0x309   :  { %8987 = vmatmul.msk.f32.gmra.mxu3 %vm37_vm0, %v1772_v54  ;;  %v12903_v29 = vld [vmem:[#allocation82_spill] sm:$0xff] }
 0x30a   :  { %v10835_v32 = vadd.f32 %v3155_v48, %v2759_v8  ;;  %v1775_v8 = vld [vmem:[#allocation2 + $0x278] sm:$0xff] }
 0x30b   :  { %v1556_v10 = vpop.f32.mrf.mxu2 }
 0x30c   :  { %v2090_v6 = vpop.f32.mrf.mxu3  ;;  %v1692_v13 = vadd.f32 %v1556_v10, %v1087_v11  ;;  %v2627_v42 = vpop.f32.mrf.mxu0 }
 0x30d   :  { %v3161_v38 = vpop.f32.mrf.mxu1 }
 0x30e   :  { %v2226_v61 = vadd.f32 %v2090_v6, %v1692_v13 }
 0x30f   :  { %9054 = vmatmul.msk.f32.gmra.mxu0 %vm37_vm0, %v2307_v43 }
 0x310   :  { %9120 = vmatmul.msk.f32.gmra.mxu1 %vm37_vm0, %v2841_v44  ;;  %8922 = vmatmul.msk.f32.gmra.mxu2 %vm37_vm0, %v2839_v49  ;;  %v2760_v14 = vadd.f32 %v2624_v37, %v2226_v61  ;;  %v2844_v61 = vld [vmem:[#allocation2 + $0x28a] sm:$0xff] }
 0x311   :  { %8988 = vmatmul.msk.f32.gmra.mxu3 %vm37_vm0, %v1773_v60 }
 0x312   :  { %v10843_v31 = vadd.f32 %v3158_v25, %v2760_v14  ;;  %v2309_v25 = vld [vmem:[#allocation2 + $0x279] sm:$0xff] }
 0x313   :  { %v1559_v5 = vpop.f32.mrf.mxu2 }
 0x314   :  { %v2093_v26 = vpop.f32.mrf.mxu3  ;;  %v1693_v47 = vadd.f32 %v1559_v5, %v1090_v19  ;;  %v2630_v48 = vpop.f32.mrf.mxu0  ;;  %v12905_v19 = vld [vmem:[#allocation11_spill] sm:$0xff]  ;;  %v12906_v5 = vld [vmem:[#allocation10_spill] sm:$0xff] }
 0x315   :  { %v3164_v35 = vpop.f32.mrf.mxu1 }
 0x316   :  { %v2227_v17 = vadd.f32 %v2093_v26, %v1693_v47  ;;  %v1099_v26 = vadd.f32 %v12906_v5, %v12905_v19  ;;  %v2847_v19 = vld [vmem:[#allocation2 + $0x2aa] sm:$0xff] }
 0x317   :  { %9055 = vmatmul.msk.f32.gmra.mxu0 %vm37_vm0, %v2308_v7  ;;  %v1779_v5 = vld [vmem:[#allocation2 + $0x2a8] sm:$0xff] }
 0x318   :  { %9121 = vmatmul.msk.f32.gmra.mxu1 %vm37_vm0, %v2842_v2  ;;  %8923 = vmatmul.msk.f32.gmra.mxu2 %vm37_vm0, %v2840_v0  ;;  %v2761_v20 = vadd.f32 %v2627_v42, %v2227_v17  ;;  %v12904_v0 = vld [vmem:[#allocation83_spill] sm:$0xff]  ;;  %v2311_v17 = vld [vmem:[#allocation2 + $0x291] sm:$0xff] }
 0x319   :  { %8989 = vmatmul.msk.f32.gmra.mxu3 %vm37_vm0, %v1774_v3  ;;  %v1096_v11 = vadd.f32 %v12904_v0, %v12903_v29  ;;  %v2312_v29 = vld [vmem:[#allocation2 + $0x2a1] sm:$0xff] }
 0x31a   :  { %v10851_v49 = vadd.f32 %v3161_v38, %v2761_v20  ;;  %v2310_v38 = vld [vmem:[#allocation2 + $0x289] sm:$0xff] }
 0x31b   :  { %v1562_v24 = vpop.f32.mrf.mxu2 }
 0x31c   :  { %v2096_v36 = vpop.f32.mrf.mxu3  ;;  %v1694_v37 = vadd.f32 %v1562_v24, %v1093_v21  ;;  %v2633_v22 = vpop.f32.mrf.mxu0  ;;  %v2845_v21 = vld [vmem:[#allocation2 + $0x292] sm:$0xff] }
 0x31d   :  { %v3167_v54 = vpop.f32.mrf.mxu1  ;;  %v1777_v24 = vld [vmem:[#allocation2 + $0x290] sm:$0xff] }
 0x31e   :  { %v2228_v9 = vadd.f32 %v2096_v36, %v1694_v37  ;;  %v5494_v37 = vld [vmem:[#allocation4 + $0xb0] sm:$0xff] }
 0x31f   :  { %9056 = vmatmul.msk.f32.gmra.mxu0 %vm37_vm0, %v2309_v25  ;;  %5513 = vmatpush.msra.mxu1 %v5494_v37  ;;  %v2848_v37 = vld [vmem:[#allocation2 + $0x2ba] sm:$0xff] }
 0x320   :  { %9122 = vmatmul.msk.f32.gmra.mxu1 %vm37_vm0, %v2843_v55  ;;  %8924 = vmatmul.msk.f32.gmra.mxu2 %vm37_vm0, %v2841_v44  ;;  %v2762_v28 = vadd.f32 %v2630_v48, %v2228_v9 }
 0x321   :  { %8990 = vmatmul.msk.f32.gmra.mxu3 %vm37_vm0, %v1775_v8  ;;  %v12907_v8 = vld [vmem:[#allocation12_spill] sm:$0xff] }
 0x322   :  { %v10859_v10 = vadd.f32 %v3164_v35, %v2762_v28 }
 0x323   :  { %v1565_v6 = vpop.f32.mrf.mxu2 }
 0x324   :  { %v2099_v13 = vpop.f32.mrf.mxu3  ;;  %v1695_v42 = vadd.f32 %v1565_v6, %v1096_v11  ;;  %v2636_v43 = vpop.f32.mrf.mxu0  ;;  %v2846_v11 = vld [vmem:[#allocation2 + $0x2a2] sm:$0xff] }
 0x325   :  { %v3170_v60 = vpop.f32.mrf.mxu1  ;;  %v1778_v6 = vld [vmem:[#allocation2 + $0x2a0] sm:$0xff] }
 0x326   :  { %v2229_v14 = vadd.f32 %v2099_v13, %v1695_v42 }
 0x327   :  { %9057 = vmatmul.msk.f32.gmra.mxu0 %vm37_vm0, %v2310_v38 }
 0x328   :  { %9123 = vmatmul.msk.f32.gmra.mxu1 %vm37_vm0, %v2844_v61  ;;  %8925 = vmatmul.msk.f32.gmra.mxu2 %vm37_vm0, %v2842_v2  ;;  %v2763_v44 = vadd.f32 %v2633_v22, %v2229_v14 }
 0x329   :  { %8991 = vmatmul.msk.f32.gmra.mxu3 %vm37_vm0, %v1776_v30 }
 0x32a   :  { %v10867_v47 = vadd.f32 %v3167_v54, %v2763_v44  ;;  %v2313_v44 = vld [vmem:[#allocation2 + $0x2a9] sm:$0xff] }
 0x32b   :  { %v1568_v48 = vpop.f32.mrf.mxu2 }
 0x32c   :  { %v2102_v7 = vpop.f32.mrf.mxu3  ;;  %v1696_v35 = vadd.f32 %v1568_v48, %v1099_v26  ;;  %v2639_v3 = vpop.f32.mrf.mxu0 }
 0x32d   :  { %v3173_v20 = vpop.f32.mrf.mxu1 }
 0x32e   :  { %v2230_v36 = vadd.f32 %v2102_v7, %v1696_v35 }
 0x32f   :  { %9058 = vmatmul.msk.f32.gmra.mxu0 %vm37_vm0, %v2311_v17  ;;  %v12909_v17 = vld [vmem:[#allocation14_spill] sm:$0xff] }
 0x330   :  { %9124 = vmatmul.msk.f32.gmra.mxu1 %vm37_vm0, %v2845_v21  ;;  %8926 = vmatmul.msk.f32.gmra.mxu2 %vm37_vm0, %v2843_v55  ;;  %v2764_v2 = vadd.f32 %v2636_v43, %v2230_v36  ;;  %v2314_v36 = vld [vmem:[#allocation2 + $0x2b9] sm:$0xff] }
 0x331   :  { %8992 = vmatmul.msk.f32.gmra.mxu3 %vm37_vm0, %v1777_v24 }
 0x332   :  { %v10873_v22 = vadd.f32 %v3170_v60, %v2764_v2  ;;  %v12908_v60 = vld [vmem:[#allocation13_spill] sm:$0xff] }
 0x333   :  { %v1571_v25 = vpop.f32.mrf.mxu2  ;;  %v1780_v2 = vld [vmem:[#allocation2 + $0x2b8] sm:$0xff] }
 0x334   :  { %v2105_v54 = vpop.f32.mrf.mxu3  ;;  %v1697_v9 = vadd.f32 %v1571_v25, %v12907_v8  ;;  %v2642_v28 = vpop.f32.mrf.mxu0 }
 0x335   :  { %v3176_v0 = vpop.f32.mrf.mxu1 }
 0x336   :  { %v2231_v13 = vadd.f32 %v2105_v54, %v1697_v9 }
 0x337   :  { %9059 = vmatmul.msk.f32.gmra.mxu0 %vm37_vm0, %v2312_v29  ;;  %v12910_v29 = vld [vmem:[#allocation15_spill] sm:$0xff] }
 0x338   :  { %9125 = vmatmul.msk.f32.gmra.mxu1 %vm37_vm0, %v2846_v11  ;;  %8927 = vmatmul.msk.f32.gmra.mxu2 %vm37_vm0, %v2844_v61  ;;  %v2765_v55 = vadd.f32 %v2639_v3, %v2231_v13  ;;  %v2315_v13 = vld [vmem:[#allocation2 + $0x2c1] sm:$0xff] }
 0x339   :  { %8993 = vmatmul.msk.f32.gmra.mxu3 %vm37_vm0, %v1778_v6 }
 0x33a   :  { %v10880_v42 = vadd.f32 %v3173_v20, %v2765_v55  ;;  %v2849_v55 = vld [vmem:[#allocation2 + $0x2c2] sm:$0xff] }
 0x33b   :  { %v1574_v43 = vpop.f32.mrf.mxu2 }
 0x33c   :  { %v2108_v38 = vpop.f32.mrf.mxu3  ;;  %v1698_v30 = vadd.f32 %v1574_v43, %v12908_v60  ;;  %v2645_v14 = vpop.f32.mrf.mxu0  ;;  %v1781_v43 = vld [vmem:[#allocation2 + $0x2c0] sm:$0xff]  ;;  %v5493_v60 = vld [vmem:[#allocation4 + $0xa8] sm:$0xff] }
 0x33d   :  { %v3179_v48 = vpop.f32.mrf.mxu1  ;;  %5514 = vmatpush.msra.mxu1 %v5493_v60  ;;  %v12913_v60 = vld [vmem:[#allocation26_spill] sm:$0xff] }
 0x33e   :  { %v2232_v26 = vadd.f32 %v2108_v38, %v1698_v30 }
 0x33f   :  { %9060 = vmatmul.msk.f32.gmra.mxu0 %vm37_vm0, %v2313_v44 }
 0x340   :  { %9126 = vmatmul.msk.f32.gmra.mxu1 %vm37_vm0, %v2847_v19  ;;  %8928 = vmatmul.msk.f32.gmra.mxu2 %vm37_vm0, %v2845_v21  ;;  %v2766_v61 = vadd.f32 %v2642_v28, %v2232_v26  ;;  %v12911_v26 = vld [vmem:[#allocation18_spill] sm:$0xff] }
 0x341   :  { %8994 = vmatmul.msk.f32.gmra.mxu3 %vm37_vm0, %v1779_v5 }
 0x342   :  { %v10887_v7 = vadd.f32 %v3176_v0, %v2766_v61 }
 0x343   :  { %v1577_v35 = vpop.f32.mrf.mxu2 }
 0x344   :  { %v2111_v3 = vpop.f32.mrf.mxu3  ;;  %v1699_v20 = vadd.f32 %v1577_v35, %v12909_v17  ;;  %v2648_v24 = vpop.f32.mrf.mxu0  ;;  %v2316_v35 = vld [vmem:[#allocation2 + $0x2d1] sm:$0xff] }
 0x345   :  { %v3182_v54 = vpop.f32.mrf.mxu1  ;;  %v1782_v17 = vld [vmem:[#allocation2 + $0x2d0] sm:$0xff] }
 0x346   :  { %v2233_v25 = vadd.f32 %v2111_v3, %v1699_v20  ;;  %v2850_v3 = vld [vmem:[#allocation2 + $0x2d2] sm:$0xff] }
 0x347   :  { %9061 = vmatmul.msk.f32.gmra.mxu0 %vm37_vm0, %v2314_v36 }
 0x348   :  { %9127 = vmatmul.msk.f32.gmra.mxu1 %vm37_vm0, %v2848_v37  ;;  %8929 = vmatmul.msk.f32.gmra.mxu2 %vm37_vm0, %v2846_v11  ;;  %v2767_v21 = vadd.f32 %v2645_v14, %v2233_v25  ;;  %v12912_v25 = vld [vmem:[#allocation21_spill] sm:$0xff] }
 0x349   :  { %8995 = vmatmul.msk.f32.gmra.mxu3 %vm37_vm0, %v1780_v2 }
 0x34a   :  { %v10894_v8 = vadd.f32 %v3179_v48, %v2767_v21 }
 0x34b   :  { %v1580_v9 = vpop.f32.mrf.mxu2 }
 0x34c   :  { %v2114_v28 = vpop.f32.mrf.mxu3  ;;  %v1700_v0 = vadd.f32 %v1580_v9, %v12910_v29  ;;  %v2651_v6 = vpop.f32.mrf.mxu0  ;;  %v2317_v9 = vld [vmem:[#allocation2 + $0x2d9] sm:$0xff] }
 0x34d   :  { %v3185_v14 = vpop.f32.mrf.mxu1  ;;  %v1783_v29 = vld [vmem:[#allocation2 + $0x2d8] sm:$0xff] }
 0x34e   :  { %v2234_v38 = vadd.f32 %v2114_v28, %v1700_v0  ;;  %v2851_v28 = vld [vmem:[#allocation2 + $0x2da] sm:$0xff] }
 0x34f   :  { %9062 = vmatmul.msk.f32.gmra.mxu0 %vm37_vm0, %v2315_v13 }
 0x350   :  { %9128 = vmatmul.msk.f32.gmra.mxu1 %vm37_vm0, %v2849_v55  ;;  %8930 = vmatmul.msk.f32.gmra.mxu2 %vm37_vm0, %v2847_v19  ;;  %v2768_v11 = vadd.f32 %v2648_v24, %v2234_v38 }
 0x351   :  { %8996 = vmatmul.msk.f32.gmra.mxu3 %vm37_vm0, %v1781_v43 }
 0x352   :  { %v10901_v30 = vadd.f32 %v3182_v54, %v2768_v11 }
 0x353   :  { %v1583_v44 = vpop.f32.mrf.mxu2 }
 0x354   :  { %v2117_v5 = vpop.f32.mrf.mxu3  ;;  %v1701_v48 = vadd.f32 %v1583_v44, %v12911_v26  ;;  %v2654_v61 = vpop.f32.mrf.mxu0  ;;  %v2318_v44 = vld [vmem:[#allocation2 + $0x2e9] sm:$0xff] }
 0x355   :  { %v3188_v0 = vpop.f32.mrf.mxu1  ;;  %v1784_v26 = vld [vmem:[#allocation2 + $0x2e8] sm:$0xff] }
 0x356   :  { %v2235_v20 = vadd.f32 %v2117_v5, %v1701_v48  ;;  %v2852_v5 = vld [vmem:[#allocation2 + $0x2ea] sm:$0xff] }
 0x357   :  { %9063 = vmatmul.msk.f32.gmra.mxu0 %vm37_vm0, %v2316_v35 }
 0x358   :  { %9129 = vmatmul.msk.f32.gmra.mxu1 %vm37_vm0, %v2850_v3  ;;  %8931 = vmatmul.msk.f32.gmra.mxu2 %vm37_vm0, %v2848_v37  ;;  %v2769_v19 = vadd.f32 %v2651_v6, %v2235_v20 }
 0x359   :  { %8997 = vmatmul.msk.f32.gmra.mxu3 %vm37_vm0, %v1782_v17 }
 0x35a   :  { %v10908_v24 = vadd.f32 %v3185_v14, %v2769_v19  ;;  %v12914_v19 = vld [vmem:[#allocation31_spill] sm:$0xff] }
 0x35b   :  { %v1586_v36 = vpop.f32.mrf.mxu2 }
 0x35c   :  { %v2120_v2 = vpop.f32.mrf.mxu3  ;;  %v1702_v21 = vadd.f32 %v1586_v36, %v12912_v25  ;;  %v2657_v54 = vpop.f32.mrf.mxu0  ;;  %v2319_v25 = vld [vmem:[#allocation2 + $0x2f1] sm:$0xff] }
 0x35d   :  { %v3191_v35 = vpop.f32.mrf.mxu1 }
 0x35e   :  { %v2236_v13 = vadd.f32 %v2120_v2, %v1702_v21  ;;  %v2853_v21 = vld [vmem:[#allocation2 + $0x2f2] sm:$0xff] }
 0x35f   :  { %9064 = vmatmul.msk.f32.gmra.mxu0 %vm37_vm0, %v2317_v9  ;;  %v1785_v9 = vld [vmem:[#allocation2 + $0x2f0] sm:$0xff] }
 0x360   :  { %9130 = vmatmul.msk.f32.gmra.mxu1 %vm37_vm0, %v2851_v28  ;;  %8932 = vmatmul.msk.f32.gmra.mxu2 %vm37_vm0, %v2849_v55  ;;  %v2770_v37 = vadd.f32 %v2654_v61, %v2236_v13 }
 0x361   :  { %8998 = vmatmul.msk.f32.gmra.mxu3 %vm37_vm0, %v1783_v29 }
 0x362   :  { %v10915_v6 = vadd.f32 %v3188_v0, %v2770_v37  ;;  %v5492_v0 = vld [vmem:[#allocation4 + $0xa0] sm:$0xff] }
 0x363   :  { %v1589_v43 = vpop.f32.mrf.mxu2  ;;  %5515 = vmatpush.msra.mxu1 %v5492_v0 }
 0x364   :  { %v2123_v38 = vpop.f32.mrf.mxu3  ;;  %v1703_v11 = vadd.f32 %v1589_v43, %v12913_v60  ;;  %v2660_v14 = vpop.f32.mrf.mxu0  ;;  %v12915_v43 = vld [vmem:[#allocation36_spill] sm:$0xff] }
 0x366   :  { %v2237_v48 = vadd.f32 %v2123_v38, %v1703_v11  ;;  %v2320_v11 = vld [vmem:[#allocation2 + $0x301] sm:$0xff] }
 0x367   :  { %9065 = vmatmul.msk.f32.gmra.mxu0 %vm37_vm0, %v2318_v44  ;;  %v2854_v44 = vld [vmem:[#allocation2 + $0x302] sm:$0xff] }
 0x368   :  { %9131 = vmatmul.msk.f32.gmra.mxu1 %vm37_vm0, %v2852_v5  ;;  %8933 = vmatmul.msk.f32.gmra.mxu2 %vm37_vm0, %v2850_v3  ;;  %v2771_v55 = vadd.f32 %v2657_v54, %v2237_v48  ;;  %v187_v3 = vld [vmem:[%s12762_s0 + $0x1f0] sm:$0xff] }
 0x369   :  { %8999 = vmatmul.msk.f32.gmra.mxu3 %vm37_vm0, %v1784_v26  ;;  %252 = vst.msk [vmem:[#allocation2 + $0x331] sm:$0xff] %vm37_vm0, %v187_v3  ;;  %v1786_v26 = vld [vmem:[#allocation2 + $0x300] sm:$0xff] }
 0x36a   :  { %v10922_v61 = vadd.f32 %v3191_v35, %v2771_v55  ;;  %v12917_v3 = vld [vmem:[#allocation46_spill] sm:$0xff] }
 0x36b   :  { %v1592_v17 = vpop.f32.mrf.mxu2 }
 0x36c   :  { %v2126_v20 = vpop.f32.mrf.mxu3  ;;  %v1704_v36 = vadd.f32 %v1592_v17, %v12914_v19  ;;  %v2663_v2 = vpop.f32.mrf.mxu0  ;;  %v12916_v17 = vld [vmem:[#allocation41_spill] sm:$0xff] }
 0x36e   :  { %v2238_v29 = vadd.f32 %v2126_v20, %v1704_v36  ;;  %v2321_v36 = vld [vmem:[#allocation2 + $0x309] sm:$0xff] }
 0x36f   :  { %9066 = vmatmul.msk.f32.gmra.mxu0 %vm37_vm0, %v2319_v25  ;;  %v2855_v25 = vld [vmem:[#allocation2 + $0x30a] sm:$0xff] }
 0x370   :  { %9132 = vmatmul.msk.f32.gmra.mxu1 %vm37_vm0, %v2853_v21  ;;  %8934 = vmatmul.msk.f32.gmra.mxu2 %vm37_vm0, %v2851_v28  ;;  %v10932_v54 = vadd.f32 %v2660_v14, %v2238_v29  ;;  %v188_v28 = vld [vmem:[%s12762_s0 + $0x1f8] sm:$0xff] }
 0x371   :  { %9000 = vmatmul.msk.f32.gmra.mxu3 %vm37_vm0, %v1785_v9  ;;  %253 = vst.msk [vmem:[#allocation2 + $0x339] sm:$0xff] %vm37_vm0, %v188_v28  ;;  %v1787_v9 = vld [vmem:[#allocation2 + $0x308] sm:$0xff] }
 0x372   :  { %v12918_v28 = vld [vmem:[#allocation51_spill] sm:$0xff] }
 0x373   :  { %v1595_v13 = vpop.f32.mrf.mxu2 }
 0x374   :  { %v2129_v37 = vpop.f32.mrf.mxu3  ;;  %v1705_v38 = vadd.f32 %v1595_v13, %v12915_v43  ;;  %v2666_v60 = vpop.f32.mrf.mxu0  ;;  %v2322_v43 = vld [vmem:[#allocation2 + $0x319] sm:$0xff] }
 0x376   :  { %v2239_v48 = vadd.f32 %v2129_v37, %v1705_v38  ;;  %v2856_v38 = vld [vmem:[#allocation2 + $0x31a] sm:$0xff] }
 0x377   :  { %9067 = vmatmul.msk.f32.gmra.mxu0 %vm37_vm0, %v2320_v11  ;;  %v1788_v11 = vld [vmem:[#allocation2 + $0x318] sm:$0xff] }
 0x378   :  { %9133 = vmatmul.msk.f32.gmra.mxu1 %vm37_vm0, %v2854_v44  ;;  %8935 = vmatmul.msk.f32.gmra.mxu2 %vm37_vm0, %v2852_v5  ;;  %v10943_v14 = vadd.f32 %v2663_v2, %v2239_v48 }
 0x379   :  { %9001 = vmatmul.msk.f32.gmra.mxu3 %vm37_vm0, %v1786_v26 }
 0x37b   :  { %v1598_v35 = vpop.f32.mrf.mxu2 }
 0x37c   :  { %v2132_v55 = vpop.f32.mrf.mxu3  ;;  %v1706_v20 = vadd.f32 %v1598_v35, %v12916_v17  ;;  %v2669_v19 = vpop.f32.mrf.mxu0  ;;  %v2323_v17 = vld [vmem:[#allocation2 + $0x321] sm:$0xff] }
 0x37e   :  { %v2240_v29 = vadd.f32 %v2132_v55, %v1706_v20  ;;  %v2857_v20 = vld [vmem:[#allocation2 + $0x322] sm:$0xff] }
 0x37f   :  { %9068 = vmatmul.msk.f32.gmra.mxu0 %vm37_vm0, %v2321_v36  ;;  %v1789_v36 = vld [vmem:[#allocation2 + $0x320] sm:$0xff] }
 0x380   :  { %9134 = vmatmul.msk.f32.gmra.mxu1 %vm37_vm0, %v2855_v25  ;;  %8936 = vmatmul.msk.f32.gmra.mxu2 %vm37_vm0, %v2853_v21  ;;  %v10951_v5 = vadd.f32 %v2666_v60, %v2240_v29  ;;  %v5491_v29 = vld [vmem:[#allocation4 + $0x98] sm:$0xff] }
 0x381   :  { %9002 = vmatmul.msk.f32.gmra.mxu3 %vm37_vm0, %v1787_v9  ;;  %5516 = vmatpush.msra.mxu1 %v5491_v29  ;;  %v1791_v29 = vld [vmem:[#allocation2 + $0x338] sm:$0xff] }
 0x383   :  { %v1601_v2 = vpop.f32.mrf.mxu2 }
 0x384   :  { %v2135_v0 = vpop.f32.mrf.mxu3  ;;  %v1707_v13 = vadd.f32 %v1601_v2, %v12917_v3  ;;  %v2672_v37 = vpop.f32.mrf.mxu0 }
 0x386   :  { %v2241_v26 = vadd.f32 %v2135_v0, %v1707_v13  ;;  %v12920_v0 = vld [vmem:[#allocation56_spill] sm:$0xff] }
 0x387   :  { %9069 = vmatmul.msk.f32.gmra.mxu0 %vm37_vm0, %v2322_v43  ;;  %v2324_v43 = vld [vmem:[#allocation2 + $0x331] sm:$0xff] }
 0x388   :  { %9135 = vmatmul.msk.f32.gmra.mxu1 %vm37_vm0, %v2856_v38  ;;  %8937 = vmatmul.msk.f32.gmra.mxu2 %vm37_vm0, %v2854_v44  ;;  %v10958_v21 = vadd.f32 %v2669_v19, %v2241_v26  ;;  %v1790_v26 = vld [vmem:[#allocation2 + $0x330] sm:$0xff] }
 0x389   :  { %9003 = vmatmul.msk.f32.gmra.mxu3 %vm37_vm0, %v1788_v11  ;;  %v2858_v11 = vld [vmem:[#allocation2 + $0x332] sm:$0xff] }
 0x38b   :  { %v1604_v60 = vpop.f32.mrf.mxu2 }
 0x38c   :  { %v2138_v48 = vpop.f32.mrf.mxu3  ;;  %v1708_v35 = vadd.f32 %v1604_v60, %v12918_v28  ;;  %v2675_v55 = vpop.f32.mrf.mxu0  ;;  %v12922_v28 = vld [vmem:[#allocation60_spill] sm:$0xff] }
 0x38e   :  { %v2242_v9 = vadd.f32 %v2138_v48, %v1708_v35 }
 0x38f   :  { %9070 = vmatmul.msk.f32.gmra.mxu0 %vm37_vm0, %v2323_v17 }
 0x390   :  { %9136 = vmatmul.msk.f32.gmra.mxu1 %vm37_vm0, %v2857_v20  ;;  %8938 = vmatmul.msk.f32.gmra.mxu2 %vm37_vm0, %v2855_v25  ;;  %v10965_v44 = vadd.f32 %v2672_v37, %v2242_v9  ;;  %v2859_v9 = vld [vmem:[#allocation2 + $0x33a] sm:$0xff] }
 0x391   :  { %9004 = vmatmul.msk.f32.gmra.mxu3 %vm37_vm0, %v1789_v36  ;;  %v2325_v36 = vld [vmem:[#allocation2 + $0x339] sm:$0xff] }
 0x392   :  { %12919 = vst [vmem:[#allocation16_spill] sm:$0xff] %v10965_v44  ;;  %v5489_v44 = vld [vmem:[#allocation4 + $0x88] sm:$0xff] }
 0x393   :  { %v1607_v19 = vpop.f32.mrf.mxu2 }
 0x394   :  { %v2141_v2 = vpop.f32.mrf.mxu3  ;;  %v1709_v3 = vadd.f32 %v1607_v19, %v12920_v0  ;;  %v2678_v13 = vpop.f32.mrf.mxu0  ;;  %v12924_v0 = vld [vmem:[#allocation63_spill] sm:$0xff] }
 0x396   :  { %v2243_v60 = vadd.f32 %v2141_v2, %v1709_v3 }
 0x397   :  { %9071 = vmatmul.msk.f32.gmra.mxu0 %vm37_vm0, %v2324_v43 }
 0x398   :  { %9137 = vmatmul.msk.f32.gmra.mxu1 %vm37_vm0, %v2858_v11  ;;  %8939 = vmatmul.msk.f32.gmra.mxu2 %vm37_vm0, %v2856_v38  ;;  %v10972_v25 = vadd.f32 %v2675_v55, %v2243_v60  ;;  %v4399_v11 = vld [vmem:[#allocation2 + $0x32] sm:$0xff] }
 0x399   :  { %9005 = vmatmul.msk.f32.gmra.mxu3 %vm37_vm0, %v1790_v26  ;;  %v3331_v26 = vld [vmem:[#allocation2 + $0x30] sm:$0xff] }
 0x39a   :  { %12921 = vst [vmem:[#allocation17_spill] sm:$0xff] %v10972_v25  ;;  %v3865_v60 = vld [vmem:[#allocation2 + $0x31] sm:$0xff] }
 0x39b   :  { %v1610_v37 = vpop.f32.mrf.mxu2 }
 0x39c   :  { %v2144_v48 = vpop.f32.mrf.mxu3  ;;  %v1710_v35 = vadd.f32 %v1610_v37, %v12922_v28  ;;  %v2681_v17 = vpop.f32.mrf.mxu0  ;;  %v12926_v28 = vld [vmem:[#allocation66_spill] sm:$0xff] }
 0x39e   :  { %v2244_v19 = vadd.f32 %v2144_v48, %v1710_v35 }
 0x39f   :  { %9072 = vmatmul.msk.f32.gmra.mxu0 %vm37_vm0, %v2325_v36 }
 0x3a0   :  { %9138 = vmatmul.msk.f32.gmra.mxu1 %vm37_vm0, %v2859_v9  ;;  %8940 = vmatmul.msk.f32.gmra.mxu2 %vm37_vm0, %v2857_v20  ;;  %v10979_v38 = vadd.f32 %v2678_v13, %v2244_v19  ;;  %v4400_v9 = vld [vmem:[#allocation2 + $0x3a] sm:$0xff] }
 0x3a1   :  { %9006 = vmatmul.msk.f32.gmra.mxu3 %vm37_vm0, %v1791_v29  ;;  %v3332_v29 = vld [vmem:[#allocation2 + $0x38] sm:$0xff] }
 0x3a2   :  { %12923 = vst [vmem:[#allocation28_spill] sm:$0xff] %v10979_v38  ;;  %v3866_v19 = vld [vmem:[#allocation2 + $0x39] sm:$0xff] }
 0x3a3   :  { %v1613_v55 = vpop.f32.mrf.mxu2 }
 0x3a4   :  { %v2147_v2 = vpop.f32.mrf.mxu3  ;;  %v1711_v3 = vadd.f32 %v1613_v55, %v12924_v0  ;;  %v2684_v43 = vpop.f32.mrf.mxu0  ;;  %v5490_v0 = vld [vmem:[#allocation4 + $0x90] sm:$0xff] }
 0x3a5   :  { %5517 = vmatpush.msra.mxu1 %v5490_v0 }
 0x3a6   :  { %v2245_v37 = vadd.f32 %v2147_v2, %v1711_v3 }
 0x3a7   :  { %9273 = vmatmul.msk.f32.vlgmr.msra.gmra.mxu0 %vm37_vm0, %v4399_v11  ;;  %5518 = vmatpush.msra.mxu1 %v5489_v44 }
 0x3a8   :  { %9141 = vmatmul.msk.f32.vlgmr.msra.gmra.mxu2 %vm37_vm0, %v3331_v26  ;;  %v10984_v48 = vadd.f32 %v2681_v17, %v2245_v37  ;;  %v10993_v17 = vpop.f32.mrf.mxu1  ;;  %v12928_v26 = vld [vmem:[#allocation67_spill] sm:$0xff] }
 0x3a9   :  { %9207 = vmatmul.msk.f32.vlgmr.msra.gmra.mxu3 %vm37_vm0, %v3865_v60 }
 0x3aa   :  { %12925 = vst [vmem:[#allocation30_spill] sm:$0xff] %v10984_v48  ;;  %v3868_v48 = vld [vmem:[#allocation2 + $0x51] sm:$0xff] }
 0x3ab   :  { %v1616_v20 = vpop.f32.mrf.mxu2 }
 0x3ac   :  { %v2150_v13 = vpop.f32.mrf.mxu3  ;;  %v1712_v35 = vadd.f32 %v1616_v20, %v12926_v28  ;;  %v2687_v36 = vpop.f32.mrf.mxu0  ;;  %v4401_v20 = vld [vmem:[#allocation2 + $0x4a] sm:$0xff] }
 0x3ad   :  { %v3333_v28 = vld [vmem:[#allocation2 + $0x48] sm:$0xff] }
 0x3ae   :  { %v2246_v55 = vadd.f32 %v2150_v13, %v1712_v35  ;;  %v3867_v13 = vld [vmem:[#allocation2 + $0x49] sm:$0xff] }
 0x3af   :  { %9274 = vmatmul.msk.f32.gmra.mxu0 %vm37_vm0, %v4400_v9 }
 0x3b0   :  { %9142 = vmatmul.msk.f32.gmra.mxu2 %vm37_vm0, %v3332_v29  ;;  %v10990_v2 = vadd.f32 %v2684_v43, %v2246_v55  ;;  %v12930_v55 = vld [vmem:[#allocation68_spill] sm:$0xff] }
 0x3b1   :  { %9208 = vmatmul.msk.f32.gmra.mxu3 %vm37_vm0, %v3866_v19  ;;  %v11001_v19 = vpop.f32.mrf.mxu1 }
 0x3b2   :  { %12927 = vst [vmem:[#allocation19_spill] sm:$0xff] %v10990_v2  ;;  %v3334_v2 = vld [vmem:[#allocation2 + $0x50] sm:$0xff] }
 0x3b3   :  { %v1619_v3 = vpop.f32.mrf.mxu2 }
 0x3b4   :  { %v2153_v11 = vpop.f32.mrf.mxu3  ;;  %v1713_v60 = vadd.f32 %v1619_v3, %v12928_v26  ;;  %v2690_v37 = vpop.f32.mrf.mxu0  ;;  %v4402_v26 = vld [vmem:[#allocation2 + $0x52] sm:$0xff] }
 0x3b6   :  { %v2247_v35 = vadd.f32 %v2153_v11, %v1713_v60 }
 0x3b7   :  { %9275 = vmatmul.msk.f32.gmra.mxu0 %vm37_vm0, %v4401_v20  ;;  %v12932_v20 = vld [vmem:[#allocation69_spill] sm:$0xff] }
 0x3b8   :  { %9143 = vmatmul.msk.f32.gmra.mxu2 %vm37_vm0, %v3333_v28  ;;  %v10998_v9 = vadd.f32 %v2687_v36, %v2247_v35  ;;  %v4403_v35 = vld [vmem:[#allocation2 + $0x62] sm:$0xff] }
 0x3b9   :  { %9209 = vmatmul.msk.f32.gmra.mxu3 %vm37_vm0, %v3867_v13 }
 0x3ba   :  { %12929 = vst [vmem:[#allocation20_spill] sm:$0xff] %v10998_v9  ;;  %v11010_v9 = vpop.f32.mrf.mxu1 }
 0x3bb   :  { %v1622_v43 = vpop.f32.mrf.mxu2 }
 0x3bc   :  { %v2156_v29 = vpop.f32.mrf.mxu3  ;;  %v1714_v0 = vadd.f32 %v1622_v43, %v12930_v55  ;;  %v2693_v3 = vpop.f32.mrf.mxu0  ;;  %v3335_v43 = vld [vmem:[#allocation2 + $0x60] sm:$0xff] }
 0x3bd   :  { %v3869_v55 = vld [vmem:[#allocation2 + $0x61] sm:$0xff] }
 0x3be   :  { %v2248_v38 = vadd.f32 %v2156_v29, %v1714_v0 }
 0x3bf   :  { %9276 = vmatmul.msk.f32.gmra.mxu0 %vm37_vm0, %v4402_v26  ;;  %v4404_v26 = vld [vmem:[#allocation2 + $0x6a] sm:$0xff] }
 0x3c0   :  { %9144 = vmatmul.msk.f32.gmra.mxu2 %vm37_vm0, %v3334_v2  ;;  %v11006_v11 = vadd.f32 %v2690_v37, %v2248_v38  ;;  %v12934_v37 = vld [vmem:[#allocation70_spill] sm:$0xff] }
 0x3c1   :  { %9210 = vmatmul.msk.f32.gmra.mxu3 %vm37_vm0, %v3868_v48 }
 0x3c2   :  { %12931 = vst [vmem:[#allocation33_spill] sm:$0xff] %v11006_v11 }
 0x3c3   :  { %v1625_v36 = vpop.f32.mrf.mxu2 }
 0x3c4   :  { %v2159_v60 = vpop.f32.mrf.mxu3  ;;  %v1715_v28 = vadd.f32 %v1625_v36, %v12932_v20  ;;  %v2696_v13 = vpop.f32.mrf.mxu0  ;;  %v3336_v36 = vld [vmem:[#allocation2 + $0x68] sm:$0xff] }
 0x3c5   :  { %v3870_v20 = vld [vmem:[#allocation2 + $0x69] sm:$0xff] }
 0x3c6   :  { %v2249_v25 = vadd.f32 %v2159_v60, %v1715_v28  ;;  %v11019_v60 = vpop.f32.mrf.mxu1 }
 0x3c7   :  { %9277 = vmatmul.msk.f32.gmra.mxu0 %vm37_vm0, %v4403_v35  ;;  %12935 = vst [vmem:[#allocation22_spill] sm:$0xff] %v11019_v60  ;;  %v12937_v35 = vld [vmem:[#allocation71_spill] sm:$0xff] }
 0x3c8   :  { %9145 = vmatmul.msk.f32.gmra.mxu2 %vm37_vm0, %v3335_v43  ;;  %v11014_v2 = vadd.f32 %v2693_v3, %v2249_v25 }
 0x3c9   :  { %9211 = vmatmul.msk.f32.gmra.mxu3 %vm37_vm0, %v3869_v55 }
 0x3ca   :  { %12933 = vst [vmem:[#allocation35_spill] sm:$0xff] %v11014_v2  ;;  %v3872_v2 = vld [vmem:[#allocation2 + $0x81] sm:$0xff] }
 0x3cb   :  { %v1628_v38 = vpop.f32.mrf.mxu2 }
 0x3cc   :  { %v2162_v48 = vpop.f32.mrf.mxu3  ;;  %v1716_v29 = vadd.f32 %v1628_v38, %v12934_v37  ;;  %v2699_v0 = vpop.f32.mrf.mxu0  ;;  %v4405_v38 = vld [vmem:[#allocation2 + $0x7a] sm:$0xff] }
 0x3cd   :  { %v3337_v37 = vld [vmem:[#allocation2 + $0x78] sm:$0xff] }
 0x3ce   :  { %v2250_v11 = vadd.f32 %v2162_v48, %v1716_v29  ;;  %v3871_v48 = vld [vmem:[#allocation2 + $0x79] sm:$0xff] }
 0x3cf   :  { %9278 = vmatmul.msk.f32.gmra.mxu0 %vm37_vm0, %v4404_v26 }
 0x3d0   :  { %9146 = vmatmul.msk.f32.gmra.mxu2 %vm37_vm0, %v3336_v36  ;;  %v11022_v25 = vadd.f32 %v2696_v13, %v2250_v11  ;;  %v11031_v11 = vpop.f32.mrf.mxu1  ;;  %v12940_v36 = vld [vmem:[#allocation72_spill] sm:$0xff] }
 0x3d1   :  { %9212 = vmatmul.msk.f32.gmra.mxu3 %vm37_vm0, %v3870_v20  ;;  %12939 = vst [vmem:[#allocation40_spill] sm:$0xff] %v11031_v11 }
 0x3d2   :  { %12936 = vst [vmem:[#allocation24_spill] sm:$0xff] %v11022_v25  ;;  %v3338_v25 = vld [vmem:[#allocation2 + $0x80] sm:$0xff] }
 0x3d3   :  { %v1631_v3 = vpop.f32.mrf.mxu2 }
 0x3d4   :  { %v2165_v28 = vpop.f32.mrf.mxu3  ;;  %v1717_v43 = vadd.f32 %v1631_v3, %v12937_v35  ;;  %v2702_v55 = vpop.f32.mrf.mxu0  ;;  %v4406_v35 = vld [vmem:[#allocation2 + $0x82] sm:$0xff] }
 0x3d6   :  { %v2251_v29 = vadd.f32 %v2165_v28, %v1717_v43 }
 0x3d7   :  { %9279 = vmatmul.msk.f32.gmra.mxu0 %vm37_vm0, %v4405_v38 }
 0x3d8   :  { %9147 = vmatmul.msk.f32.gmra.mxu2 %vm37_vm0, %v3337_v37  ;;  %v11028_v44 = vadd.f32 %v2699_v0, %v2251_v29  ;;  %v11039_v38 = vpop.f32.mrf.mxu1  ;;  %v12943_v37 = vld [vmem:[#allocation73_spill] sm:$0xff] }
 0x3d9   :  { %9213 = vmatmul.msk.f32.gmra.mxu3 %vm37_vm0, %v3871_v48  ;;  %12942 = vst [vmem:[#allocation29_spill] sm:$0xff] %v11039_v38 }
 0x3da   :  { %12938 = vst [vmem:[#allocation38_spill] sm:$0xff] %v11028_v44  ;;  %v3873_v44 = vld [vmem:[#allocation2 + $0x91] sm:$0xff] }
 0x3db   :  { %v1634_v13 = vpop.f32.mrf.mxu2 }
 0x3dc   :  { %v2168_v26 = vpop.f32.mrf.mxu3  ;;  %v1718_v20 = vadd.f32 %v1634_v13, %v12940_v36  ;;  %v2705_v3 = vpop.f32.mrf.mxu0  ;;  %v4407_v13 = vld [vmem:[#allocation2 + $0x92] sm:$0xff] }
 0x3dd   :  { %v3339_v36 = vld [vmem:[#allocation2 + $0x90] sm:$0xff] }
 0x3de   :  { %v2252_v60 = vadd.f32 %v2168_v26, %v1718_v20 }
 0x3df   :  { %9280 = vmatmul.msk.f32.gmra.mxu0 %vm37_vm0, %v4406_v35  ;;  %v4408_v35 = vld [vmem:[#allocation2 + $0x9a] sm:$0xff] }
 0x3e0   :  { %9148 = vmatmul.msk.f32.gmra.mxu2 %vm37_vm0, %v3338_v25  ;;  %v11036_v28 = vadd.f32 %v2702_v55, %v2252_v60  ;;  %v12945_v55 = vld [vmem:[#allocation74_spill] sm:$0xff] }
 0x3e1   :  { %9214 = vmatmul.msk.f32.gmra.mxu3 %vm37_vm0, %v3872_v2 }
 0x3e2   :  { %12941 = vst [vmem:[#allocation27_spill] sm:$0xff] %v11036_v28  ;;  %v11048_v28 = vpop.f32.mrf.mxu1 }
 0x3e3   :  { %v1637_v0 = vpop.f32.mrf.mxu2  ;;  %12946 = vst [vmem:[#allocation45_spill] sm:$0xff] %v11048_v28 }
 0x3e4   :  { %v2171_v43 = vpop.f32.mrf.mxu3  ;;  %v1719_v48 = vadd.f32 %v1637_v0, %v12943_v37  ;;  %v2708_v29 = vpop.f32.mrf.mxu0  ;;  %v3340_v0 = vld [vmem:[#allocation2 + $0x98] sm:$0xff] }
 0x3e5   :  { %v3874_v37 = vld [vmem:[#allocation2 + $0x99] sm:$0xff] }
 0x3e6   :  { %v2253_v11 = vadd.f32 %v2171_v43, %v1719_v48  ;;  %v5488_v43 = vld [vmem:[#allocation4 + $0x80] sm:$0xff]  ;;  %v12948_v48 = vld [vmem:[#allocation75_spill] sm:$0xff] }
 0x3e7   :  { %9281 = vmatmul.msk.f32.gmra.mxu0 %vm37_vm0, %v4407_v13  ;;  %5519 = vmatpush.msra.mxu1 %v5488_v43  ;;  %v4410_v43 = vld [vmem:[#allocation2 + $0xb2] sm:$0xff] }
 0x3e8   :  { %9149 = vmatmul.msk.f32.gmra.mxu2 %vm37_vm0, %v3339_v36  ;;  %v11044_v25 = vadd.f32 %v2705_v3, %v2253_v11 }
 0x3e9   :  { %9215 = vmatmul.msk.f32.gmra.mxu3 %vm37_vm0, %v3873_v44 }
 0x3ea   :  { %12944 = vst [vmem:[#allocation43_spill] sm:$0xff] %v11044_v25  ;;  %v3875_v25 = vld [vmem:[#allocation2 + $0xa9] sm:$0xff] }
 0x3eb   :  { %v1640_v2 = vpop.f32.mrf.mxu2 }
 0x3ec   :  { %v2174_v60 = vpop.f32.mrf.mxu3  ;;  %v1720_v26 = vadd.f32 %v1640_v2, %v12945_v55  ;;  %v2711_v20 = vpop.f32.mrf.mxu0  ;;  %v4409_v2 = vld [vmem:[#allocation2 + $0xaa] sm:$0xff] }
 0x3ed   :  { %v3341_v55 = vld [vmem:[#allocation2 + $0xa8] sm:$0xff] }
 0x3ee   :  { %v2254_v38 = vadd.f32 %v2174_v60, %v1720_v26  ;;  %v11057_v60 = vpop.f32.mrf.mxu1 }
 0x3ef   :  { %9282 = vmatmul.msk.f32.gmra.mxu0 %vm37_vm0, %v4408_v35  ;;  %12949 = vst [vmem:[#allocation34_spill] sm:$0xff] %v11057_v60  ;;  %v12951_v35 = vld [vmem:[#allocation76_spill] sm:$0xff]  ;;  %v3877_v60 = vld [vmem:[#allocation2 + $0xc1] sm:$0xff] }
 0x3f0   :  { %9150 = vmatmul.msk.f32.gmra.mxu2 %vm37_vm0, %v3340_v0  ;;  %v11052_v11 = vadd.f32 %v2708_v29, %v2254_v38 }
 0x3f1   :  { %9216 = vmatmul.msk.f32.gmra.mxu3 %vm37_vm0, %v3874_v37 }
 0x3f2   :  { %12947 = vst [vmem:[#allocation32_spill] sm:$0xff] %v11052_v11 }
 0x3f3   :  { %v1643_v44 = vpop.f32.mrf.mxu2 }
 0x3f4   :  { %v2177_v3 = vpop.f32.mrf.mxu3  ;;  %v1721_v13 = vadd.f32 %v1643_v44, %v12948_v48  ;;  %v2714_v36 = vpop.f32.mrf.mxu0  ;;  %v3342_v44 = vld [vmem:[#allocation2 + $0xb0] sm:$0xff] }
 0x3f5   :  { %v3876_v48 = vld [vmem:[#allocation2 + $0xb1] sm:$0xff] }
 0x3f6   :  { %v2255_v28 = vadd.f32 %v2177_v3, %v1721_v13  ;;  %v12954_v13 = vld [vmem:[#allocation77_spill] sm:$0xff] }
 0x3f7   :  { %9283 = vmatmul.msk.f32.gmra.mxu0 %vm37_vm0, %v4409_v2 }
 0x3f8   :  { %9151 = vmatmul.msk.f32.gmra.mxu2 %vm37_vm0, %v3341_v55  ;;  %v11060_v26 = vadd.f32 %v2711_v20, %v2255_v28  ;;  %v11069_v28 = vpop.f32.mrf.mxu1 }
 0x3f9   :  { %9217 = vmatmul.msk.f32.gmra.mxu3 %vm37_vm0, %v3875_v25  ;;  %12953 = vst [vmem:[#allocation37_spill] sm:$0xff] %v11069_v28 }
 0x3fa   :  { %12950 = vst [vmem:[#allocation48_spill] sm:$0xff] %v11060_v26  ;;  %v3343_v26 = vld [vmem:[#allocation2 + $0xc0] sm:$0xff] }
 0x3fb   :  { %v1646_v38 = vpop.f32.mrf.mxu2 }
 0x3fc   :  { %v2180_v29 = vpop.f32.mrf.mxu3  ;;  %v1722_v0 = vadd.f32 %v1646_v38, %v12951_v35  ;;  %v2717_v37 = vpop.f32.mrf.mxu0  ;;  %v4411_v38 = vld [vmem:[#allocation2 + $0xc2] sm:$0xff]  ;;  %v5422_v35 = vld [vmem:[#allocation4 + $0x78] sm:$0xff] }
 0x3fd   :  { %5713 = vmatpush.msrb.mxu2 %v5422_v35 }
 0x3fe   :  { %v2256_v11 = vadd.f32 %v2180_v29, %v1722_v0  ;;  %v6002_v0 = vld [vmem:[#allocation4 + $0x178] sm:$0xff] }
 0x3ff   :  { %9284 = vmatmul.msk.f32.gmra.mxu0 %vm37_vm0, %v4410_v43  ;;  %v5423_v43 = vld [vmem:[#allocation3 + $0x1] sm:$0xff]  ;;  %6003 = vmatpush.msrb.mxu3 %v6002_v0 }
 0x400   :  { %9152 = vmatmul.msk.f32.gmra.mxu2 %vm37_vm0, %v3342_v44  ;;  %v11066_v3 = vadd.f32 %v2714_v36, %v2256_v11  ;;  %5520 = vmatmul.f32.vlgmr.msra.gmra.mxu1 %v5423_v43 }
 0x401   :  { %9218 = vmatmul.msk.f32.gmra.mxu3 %vm37_vm0, %v3876_v48  ;;  %v11077_v48 = vpop.f32.mrf.mxu1 }
 0x402   :  { %12952 = vst [vmem:[#allocation50_spill] sm:$0xff] %v11066_v3  ;;  %v3878_v3 = vld [vmem:[#allocation2 + $0xc9] sm:$0xff] }
 0x403   :  { %v1649_v25 = vpop.f32.mrf.mxu2  ;;  %12956 = vst [vmem:[#allocation53_spill] sm:$0xff] %v11077_v48 }
 0x404   :  { %v2183_v20 = vpop.f32.mrf.mxu3  ;;  %v1723_v2 = vadd.f32 %v1649_v25, %v12954_v13  ;;  %v2720_v55 = vpop.f32.mrf.mxu0  ;;  %v12957_v25 = vld [vmem:[#allocation79_spill] sm:$0xff] }
 0x406   :  { %v2257_v29 = vadd.f32 %v2183_v20, %v1723_v2  ;;  %v4412_v20 = vld [vmem:[#allocation2 + $0xca] sm:$0xff] }
 0x407   :  { %9285 = vmatmul.msk.f32.gmra.mxu0 %vm37_vm0, %v4411_v38  ;;  %v3344_v2 = vld [vmem:[#allocation2 + $0xc8] sm:$0xff] }
 0x408   :  { %9153 = vmatmul.msk.f32.gmra.mxu2 %vm37_vm0, %v3343_v26  ;;  %v11074_v11 = vadd.f32 %v2717_v37, %v2257_v29  ;;  %v5424_v38 = vld [vmem:[#allocation3 + $0x9] sm:$0xff] }
 0x409   :  { %9219 = vmatmul.msk.f32.gmra.mxu3 %vm37_vm0, %v3877_v60  ;;  %5523 = vmatmul.f32.gmra.mxu1 %v5424_v38  ;;  %v12959_v29 = vld [vmem:[#allocation80_spill] sm:$0xff]  ;;  %v11086_v48 = vpop.f32.mrf.mxu1 }
 0x40a   :  { %12955 = vst [vmem:[#allocation39_spill] sm:$0xff] %v11074_v11  ;;  %v3879_v11 = vld [vmem:[#allocation2 + $0xd9] sm:$0xff] }
 0x40b   :  { %v1652_v36 = vpop.f32.mrf.mxu2  ;;  %12960 = vst [vmem:[#allocation42_spill] sm:$0xff] %v11086_v48 }
 0x40c   :  { %v2186_v44 = vpop.f32.mrf.mxu3  ;;  %v1724_v13 = vadd.f32 %v1652_v36, %v12957_v25  ;;  %v2723_v35 = vpop.f32.mrf.mxu0  ;;  %v4413_v36 = vld [vmem:[#allocation2 + $0xda] sm:$0xff] }
 0x40d   :  { %v3345_v25 = vld [vmem:[#allocation2 + $0xd8] sm:$0xff] }
 0x40e   :  { %v2258_v28 = vadd.f32 %v2186_v44, %v1724_v13  ;;  %v6356_v13 = vld [vmem:[#allocation4 + $0x1f8] sm:$0xff] }
 0x40f   :  { %9286 = vmatmul.msk.f32.gmra.mxu0 %vm37_vm0, %v4412_v20  ;;  %v6710_v20 = vld [vmem:[#allocation4 + $0x278] sm:$0xff] }
 0x410   :  { %9154 = vmatmul.msk.f32.gmra.mxu2 %vm37_vm0, %v3344_v2  ;;  %v11082_v26 = vadd.f32 %v2720_v55, %v2258_v28  ;;  %6357 = vmatpush.msrb.mxu0 %v6356_v13  ;;  %v12962_v2 = vld [vmem:[#allocation81_spill] sm:$0xff] }
 0x411   :  { %9220 = vmatmul.msk.f32.gmra.mxu3 %vm37_vm0, %v3878_v3  ;;  %6711 = vmatpush.msrb.mxu1 %v6710_v20 }
 0x412   :  { %12958 = vst [vmem:[#allocation55_spill] sm:$0xff] %v11082_v26  ;;  %v3346_v26 = vld [vmem:[#allocation2 + $0xe0] sm:$0xff] }
 0x413   :  { %v1655_v60 = vpop.f32.mrf.mxu2 }
 0x414   :  { %v2189_v37 = vpop.f32.mrf.mxu3  ;;  %v1725_v0 = vadd.f32 %v1655_v60, %v12959_v29  ;;  %v2726_v43 = vpop.f32.mrf.mxu0  ;;  %v4414_v29 = vld [vmem:[#allocation2 + $0xe2] sm:$0xff] }
 0x416   :  { %v2259_v44 = vadd.f32 %v2189_v37, %v1725_v0  ;;  %v3880_v37 = vld [vmem:[#allocation2 + $0xe1] sm:$0xff] }
 0x417   :  { %9287 = vmatmul.msk.f32.gmra.mxu0 %vm37_vm0, %v4413_v36  ;;  %v11095_v36 = vpop.f32.mrf.mxu1 }
 0x418   :  { %9155 = vmatmul.msk.f32.gmra.mxu2 %vm37_vm0, %v3345_v25  ;;  %v11090_v28 = vadd.f32 %v2723_v35, %v2259_v44  ;;  %v12964_v44 = vld [vmem:[#allocation84_spill] sm:$0xff] }
 0x419   :  { %9221 = vmatmul.msk.f32.gmra.mxu3 %vm37_vm0, %v3879_v11 }
 0x41a   :  { %12961 = vst [vmem:[#allocation44_spill] sm:$0xff] %v11090_v28  ;;  %v3881_v28 = vld [vmem:[#allocation2 + $0xf1] sm:$0xff] }
 0x41b   :  { %v1658_v3 = vpop.f32.mrf.mxu2 }
 0x41c   :  { %v2192_v55 = vpop.f32.mrf.mxu3  ;;  %v1726_v38 = vadd.f32 %v1658_v3, %v12962_v2  ;;  %v2729_v60 = vpop.f32.mrf.mxu0  ;;  %v4415_v3 = vld [vmem:[#allocation2 + $0xf2] sm:$0xff] }
 0x41d   :  { %v3347_v2 = vld [vmem:[#allocation2 + $0xf0] sm:$0xff] }
 0x41e   :  { %v2260_v0 = vadd.f32 %v2192_v55, %v1726_v38  ;;  %v5421_v55 = vld [vmem:[#allocation4 + $0x70] sm:$0xff] }
 0x41f   :  { %9288 = vmatmul.msk.f32.gmra.mxu0 %vm37_vm0, %v4414_v29  ;;  %5714 = vmatpush.msrb.mxu2 %v5421_v55 }
 0x420   :  { %9156 = vmatmul.msk.f32.gmra.mxu2 %vm37_vm0, %v3346_v26  ;;  %v11098_v35 = vadd.f32 %v2726_v43, %v2260_v0  ;;  %v11107_v26 = vpop.f32.mrf.mxu1 }
 0x421   :  { %9222 = vmatmul.msk.f32.gmra.mxu3 %vm37_vm0, %v3880_v37 }
 0x422   :  { %12963 = vst [vmem:[#allocation58_spill] sm:$0xff] %v11098_v35  ;;  %v3883_v35 = vld [vmem:[#allocation2 + $0x109] sm:$0xff] }
 0x423   :  { %v1661_v11 = vpop.f32.mrf.mxu2 }
 0x424   :  { %v2195_v25 = vpop.f32.mrf.mxu3  ;;  %v1727_v13 = vadd.f32 %v1661_v11, %v12964_v44  ;;  %v4677_v20 = vpop.f32.mrf.mxu0  ;;  %v4416_v11 = vld [vmem:[#allocation2 + $0xfa] sm:$0xff] }
 0x425   :  { %v3348_v44 = vld [vmem:[#allocation2 + $0xf8] sm:$0xff] }
 0x426   :  { %v2261_v48 = vadd.f32 %v2195_v25, %v1727_v13  ;;  %v3882_v25 = vld [vmem:[#allocation2 + $0xf9] sm:$0xff] }
 0x427   :  { %9289 = vmatmul.msk.f32.gmra.mxu0 %vm37_vm0, %v4415_v3  ;;  %v11113_v3 = vld [vmem:[%s12764_s2] ss:$0 sm:$0xff] }
 0x428   :  { %9157 = vmatmul.msk.f32.gmra.mxu2 %vm37_vm0, %v3347_v2  ;;  %v11104_v38 = vadd.f32 %v2729_v60, %v2261_v48  ;;  %v6001_v48 = vld [vmem:[#allocation4 + $0x170] sm:$0xff]  ;;  %v11119_v55 = vpop.f32.mrf.mxu1 }
 0x429   :  { %9223 = vmatmul.msk.f32.gmra.mxu3 %vm37_vm0, %v3881_v28  ;;  %12966 = vst [vmem:[#allocation49_spill] sm:$0xff] %v11119_v55 }
 0x42a   :  { %12965 = vst [vmem:[#allocation47_spill] sm:$0xff] %v11104_v38  ;;  %6004 = vmatpush.msrb.mxu3 %v6001_v48  ;;  %v4417_v38 = vld [vmem:[#allocation2 + $0x10a] sm:$0xff] }
 0x42b   :  { %v3609_v43 = vpop.f32.mrf.mxu2 }
 0x42c   :  { %v4143_v29 = vpop.f32.mrf.mxu3  ;;  %v3801_v37 = vadd.f32 %v3609_v43, %v10587_v58  ;;  %v4680_v0 = vpop.f32.mrf.mxu0 }
 0x42e   :  { %v4335_v13 = vadd.f32 %v4143_v29, %v3801_v37 }
 0x42f   :  { %9290 = vmatmul.msk.f32.gmra.mxu0 %vm37_vm0, %v4416_v11  ;;  %v3349_v11 = vld [vmem:[#allocation2 + $0x108] sm:$0xff] }
 0x430   :  { %v4869_v28 = vadd.f32 %v4677_v20, %v4335_v13  ;;  %9158 = vmatmul.msk.f32.gmra.mxu2 %vm37_vm0, %v3348_v44  ;;  %v6355_v44 = vld [vmem:[#allocation4 + $0x1f0] sm:$0xff]  ;;  %v11127_v55 = vpop.f32.mrf.mxu1 }
 0x431   :  { %9224 = vmatmul.msk.f32.gmra.mxu3 %vm37_vm0, %v3882_v25  ;;  %v6709_v25 = vld [vmem:[#allocation4 + $0x270] sm:$0xff]  ;;  %6358 = vmatpush.msrb.mxu0 %v6355_v44 }
 0x432   :  { %v4937_v58 = vadd.f32 %v11113_v3, %v4869_v28  ;;  %6712 = vmatpush.msrb.mxu1 %v6709_v25 }
 0x433   :  { %v3612_v60 = vpop.f32.mrf.mxu2 }
 0x434   :  { %v4146_v2 = vpop.f32.mrf.mxu3  ;;  %vm5001_vm4 = vcmp.ge.f32.partialorder %v4937_v58, 0.0  ;;  %v5065_v43 = vmul.f32 0.2, %v4937_v58  ;;  %v3802_v29 = vadd.f32 %v3612_v60, %v10597_v56  ;;  %v4683_v37 = vpop.f32.mrf.mxu0 }
 0x436   :  { %v5129_v20 = vsel %vm5001_vm4, %v4937_v58, %v5065_v43  ;;  %v4336_v13 = vadd.f32 %v4146_v2, %v3802_v29  ;;  %v3350_v29 = vld [vmem:[#allocation2 + $0x110] sm:$0xff] }
 0x437   :  { %5279 = vst [vmem:[#allocation3 + $0x19] sm:$0xff] %v5129_v20  ;;  %9291 = vmatmul.msk.f32.gmra.mxu0 %vm37_vm0, %v4417_v38  ;;  %5526 = vmatmul.f32.gmra.mxu1 %v5129_v20  ;;  %v4418_v38 = vld [vmem:[#allocation2 + $0x112] sm:$0xff] }
 0x438   :  { %v4870_v48 = vadd.f32 %v4680_v0, %v4336_v13  ;;  %9159 = vmatmul.msk.f32.gmra.mxu2 %vm37_vm0, %v3349_v11  ;;  %v3884_v20 = vld [vmem:[#allocation2 + $0x111] sm:$0xff] }
 0x439   :  { %9225 = vmatmul.msk.f32.gmra.mxu3 %vm37_vm0, %v3883_v35 }
 0x43a   :  { %v4938_v56 = vadd.f32 %v11113_v3, %v4870_v48 }
 0x43b   :  { %v3615_v28 = vpop.f32.mrf.mxu2 }
 0x43c   :  { %v4149_v60 = vpop.f32.mrf.mxu3  ;;  %vm5002_vm5 = vcmp.ge.f32.partialorder %v4938_v56, 0.0  ;;  %v5066_v58 = vmul.f32 0.2, %v4938_v56  ;;  %v3803_v2 = vadd.f32 %v3615_v28, %v10607_v34  ;;  %v4686_v43 = vpop.f32.mrf.mxu0 }
 0x43e   :  { %v5130_v0 = vsel %vm5002_vm5, %v4938_v56, %v5066_v58  ;;  %v4337_v11 = vadd.f32 %v4149_v60, %v3803_v2  ;;  %v4419_v56 = vld [vmem:[#allocation2 + $0x122] sm:$0xff] }
 0x43f   :  { %5280 = vst [vmem:[#allocation3 + $0x21] sm:$0xff] %v5130_v0  ;;  %9292 = vmatmul.msk.f32.gmra.mxu0 %vm37_vm0, %v4418_v38  ;;  %5529 = vmatmul.f32.gmra.mxu1 %v5130_v0  ;;  %v3351_v60 = vld [vmem:[#allocation2 + $0x120] sm:$0xff] }
 0x440   :  { %v4871_v35 = vadd.f32 %v4683_v37, %v4337_v11  ;;  %9160 = vmatmul.msk.f32.gmra.mxu2 %vm37_vm0, %v3350_v29  ;;  %v3885_v58 = vld [vmem:[#allocation2 + $0x121] sm:$0xff]  ;;  %v11135_v29 = vpop.f32.mrf.mxu1 }
 0x441   :  { %9226 = vmatmul.msk.f32.gmra.mxu3 %vm37_vm0, %v3884_v20  ;;  %v5420_v37 = vld [vmem:[#allocation4 + $0x68] sm:$0xff] }
 0x442   :  { %v4939_v13 = vadd.f32 %v11113_v3, %v4871_v35  ;;  %5715 = vmatpush.msrb.mxu2 %v5420_v37 }
 0x443   :  { %v3618_v34 = vpop.f32.mrf.mxu2 }
 0x444   :  { %v4152_v44 = vpop.f32.mrf.mxu3  ;;  %vm5003_vm6 = vcmp.ge.f32.partialorder %v4939_v13, 0.0  ;;  %v5067_v25 = vmul.f32 0.2, %v4939_v13  ;;  %v3804_v48 = vadd.f32 %v3618_v34, %v10617_v16  ;;  %v4689_v28 = vpop.f32.mrf.mxu0 }
 0x446   :  { %v5131_v2 = vsel %vm5003_vm6, %v4939_v13, %v5067_v25  ;;  %v4338_v38 = vadd.f32 %v4152_v44, %v3804_v48  ;;  %v4420_v44 = vld [vmem:[#allocation2 + $0x12a] sm:$0xff] }
 0x447   :  { %5281 = vst [vmem:[#allocation3 + $0x31] sm:$0xff] %v5131_v2  ;;  %9293 = vmatmul.msk.f32.gmra.mxu0 %vm37_vm0, %v4419_v56  ;;  %5532 = vmatmul.f32.gmra.mxu1 %v5131_v2  ;;  %v3352_v25 = vld [vmem:[#allocation2 + $0x128] sm:$0xff] }
 0x448   :  { %v4872_v20 = vadd.f32 %v4686_v43, %v4338_v38  ;;  %9161 = vmatmul.msk.f32.gmra.mxu2 %vm37_vm0, %v3351_v60  ;;  %v3886_v48 = vld [vmem:[#allocation2 + $0x129] sm:$0xff] }
 0x449   :  { %9227 = vmatmul.msk.f32.gmra.mxu3 %vm37_vm0, %v3885_v58  ;;  %v6000_v43 = vld [vmem:[#allocation4 + $0x168] sm:$0xff]  ;;  %v11144_v58 = vpop.f32.mrf.mxu1 }
 0x44a   :  { %v4940_v16 = vadd.f32 %v11113_v3, %v4872_v20  ;;  %6005 = vmatpush.msrb.mxu3 %v6000_v43 }
 0x44b   :  { %v3621_v0 = vpop.f32.mrf.mxu2 }
 0x44c   :  { %v4155_v11 = vpop.f32.mrf.mxu3  ;;  %vm5004_vm7 = vcmp.ge.f32.partialorder %v4940_v16, 0.0  ;;  %v5068_v35 = vmul.f32 0.2, %v4940_v16  ;;  %v3805_v13 = vadd.f32 %v3621_v0, %v10627_v40  ;;  %v4692_v34 = vpop.f32.mrf.mxu0 }
 0x44e   :  { %v5132_v56 = vsel %vm5004_vm7, %v4940_v16, %v5068_v35  ;;  %v4339_v2 = vadd.f32 %v4155_v11, %v3805_v13  ;;  %v4421_v11 = vld [vmem:[#allocation2 + $0x13a] sm:$0xff] }
 0x44f   :  { %5282 = vst [vmem:[#allocation3 + $0x39] sm:$0xff] %v5132_v56  ;;  %9294 = vmatmul.msk.f32.gmra.mxu0 %vm37_vm0, %v4420_v44  ;;  %5535 = vmatmul.f32.gmra.mxu1 %v5132_v56  ;;  %v3353_v35 = vld [vmem:[#allocation2 + $0x138] sm:$0xff] }
 0x450   :  { %v4873_v60 = vadd.f32 %v4689_v28, %v4339_v2  ;;  %9162 = vmatmul.msk.f32.gmra.mxu2 %vm37_vm0, %v3352_v25  ;;  %v3887_v13 = vld [vmem:[#allocation2 + $0x139] sm:$0xff]  ;;  %v6354_v25 = vld [vmem:[#allocation4 + $0x1e8] sm:$0xff] }
 0x451   :  { %9228 = vmatmul.msk.f32.gmra.mxu3 %vm37_vm0, %v3886_v48  ;;  %v6708_v48 = vld [vmem:[#allocation4 + $0x268] sm:$0xff]  ;;  %6359 = vmatpush.msrb.mxu0 %v6354_v25 }
 0x452   :  { %v4941_v40 = vadd.f32 %v11113_v3, %v4873_v60  ;;  %6713 = vmatpush.msrb.mxu1 %v6708_v48  ;;  %v11152_v60 = vpop.f32.mrf.mxu1 }
 0x453   :  { %v3624_v38 = vpop.f32.mrf.mxu2 }
 0x454   :  { %v4158_v37 = vpop.f32.mrf.mxu3  ;;  %vm5005_vm8 = vcmp.ge.f32.partialorder %v4941_v40, 0.0  ;;  %v5069_v20 = vmul.f32 0.2, %v4941_v40  ;;  %v3806_v16 = vadd.f32 %v3624_v38, %v10637_v53  ;;  %v4695_v0 = vpop.f32.mrf.mxu0 }
 0x456   :  { %v5133_v28 = vsel %vm5005_vm8, %v4941_v40, %v5069_v20  ;;  %v4340_v44 = vadd.f32 %v4158_v37, %v3806_v16  ;;  %v4422_v20 = vld [vmem:[#allocation2 + $0x142] sm:$0xff] }
 0x457   :  { %5283 = vst [vmem:[#allocation3 + $0x49] sm:$0xff] %v5133_v28  ;;  %9295 = vmatmul.msk.f32.gmra.mxu0 %vm37_vm0, %v4421_v11  ;;  %5538 = vmatmul.f32.gmra.mxu1 %v5133_v28  ;;  %v3354_v16 = vld [vmem:[#allocation2 + $0x140] sm:$0xff] }
 0x458   :  { %v4874_v56 = vadd.f32 %v4692_v34, %v4340_v44  ;;  %9163 = vmatmul.msk.f32.gmra.mxu2 %vm37_vm0, %v3353_v35  ;;  %v3888_v34 = vld [vmem:[#allocation2 + $0x141] sm:$0xff] }
 0x459   :  { %9229 = vmatmul.msk.f32.gmra.mxu3 %vm37_vm0, %v3887_v13 }
 0x45a   :  { %v4942_v53 = vadd.f32 %v11113_v3, %v4874_v56 }
 0x45b   :  { %v3627_v2 = vpop.f32.mrf.mxu2 }
 0x45c   :  { %v4161_v43 = vpop.f32.mrf.mxu3  ;;  %vm5006_vm9 = vcmp.ge.f32.partialorder %v4942_v53, 0.0  ;;  %v5070_v40 = vmul.f32 0.2, %v4942_v53  ;;  %v3807_v38 = vadd.f32 %v3627_v2, %v10647_v39  ;;  %v4698_v37 = vpop.f32.mrf.mxu0  ;;  %v3355_v2 = vld [vmem:[#allocation2 + $0x150] sm:$0xff] }
 0x45e   :  { %v5134_v11 = vsel %vm5006_vm9, %v4942_v53, %v5070_v40  ;;  %v4341_v35 = vadd.f32 %v4161_v43, %v3807_v38  ;;  %v4423_v53 = vld [vmem:[#allocation2 + $0x152] sm:$0xff]  ;;  %v11160_v40 = vpop.f32.mrf.mxu1 }
 0x45f   :  { %5284 = vst [vmem:[#allocation3 + $0x51] sm:$0xff] %v5134_v11  ;;  %9296 = vmatmul.msk.f32.gmra.mxu0 %vm37_vm0, %v4422_v20  ;;  %5541 = vmatmul.f32.gmra.mxu1 %v5134_v11  ;;  %v3889_v43 = vld [vmem:[#allocation2 + $0x151] sm:$0xff]  ;;  %v5419_v20 = vld [vmem:[#allocation4 + $0x60] sm:$0xff] }
 0x460   :  { %v4875_v13 = vadd.f32 %v4695_v0, %v4341_v35  ;;  %9164 = vmatmul.msk.f32.gmra.mxu2 %vm37_vm0, %v3354_v16 }
 0x461   :  { %9230 = vmatmul.msk.f32.gmra.mxu3 %vm37_vm0, %v3888_v34  ;;  %5716 = vmatpush.msrb.mxu2 %v5419_v20 }
 0x462   :  { %v4943_v28 = vadd.f32 %v11113_v3, %v4875_v13 }
 0x463   :  { %v3630_v44 = vpop.f32.mrf.mxu2 }
 0x464   :  { %v4164_v25 = vpop.f32.mrf.mxu3  ;;  %vm5007_vm10 = vcmp.ge.f32.partialorder %v4943_v28, 0.0  ;;  %v5071_v39 = vmul.f32 0.2, %v4943_v28  ;;  %v3808_v48 = vadd.f32 %v3630_v44, %v10657_v4  ;;  %v4701_v56 = vpop.f32.mrf.mxu0  ;;  %v4424_v44 = vld [vmem:[#allocation2 + $0x15a] sm:$0xff] }
 0x466   :  { %v5135_v38 = vsel %vm5007_vm10, %v4943_v28, %v5071_v39  ;;  %v4342_v0 = vadd.f32 %v4164_v25, %v3808_v48  ;;  %v3356_v25 = vld [vmem:[#allocation2 + $0x158] sm:$0xff] }
 0x467   :  { %5285 = vst [vmem:[#allocation3 + $0x61] sm:$0xff] %v5135_v38  ;;  %9297 = vmatmul.msk.f32.gmra.mxu0 %vm37_vm0, %v4423_v53  ;;  %5544 = vmatmul.f32.gmra.mxu1 %v5135_v38  ;;  %v3890_v39 = vld [vmem:[#allocation2 + $0x159] sm:$0xff] }
 0x468   :  { %v4876_v16 = vadd.f32 %v4698_v37, %v4342_v0  ;;  %9165 = vmatmul.msk.f32.gmra.mxu2 %vm37_vm0, %v3355_v2  ;;  %v5999_v37 = vld [vmem:[#allocation4 + $0x160] sm:$0xff]  ;;  %v11168_v2 = vpop.f32.mrf.mxu1 }
 0x469   :  { %9231 = vmatmul.msk.f32.gmra.mxu3 %vm37_vm0, %v3889_v43 }
 0x46a   :  { %v4944_v4 = vadd.f32 %v11113_v3, %v4876_v16  ;;  %6006 = vmatpush.msrb.mxu3 %v5999_v37 }
 0x46b   :  { %v3633_v34 = vpop.f32.mrf.mxu2 }
 0x46c   :  { %v4167_v11 = vpop.f32.mrf.mxu3  ;;  %vm5008_vm11 = vcmp.ge.f32.partialorder %v4944_v4, 0.0  ;;  %v5072_v35 = vmul.f32 0.2, %v4944_v4  ;;  %v3809_v13 = vadd.f32 %v3633_v34, %v10671_v57  ;;  %v4704_v28 = vpop.f32.mrf.mxu0  ;;  %v4425_v34 = vld [vmem:[#allocation2 + $0x16a] sm:$0xff] }
 0x46e   :  { %v5136_v48 = vsel %vm5008_vm11, %v4944_v4, %v5072_v35  ;;  %v4343_v53 = vadd.f32 %v4167_v11, %v3809_v13  ;;  %v3357_v11 = vld [vmem:[#allocation2 + $0x168] sm:$0xff] }
 0x46f   :  { %5286 = vst [vmem:[#allocation3 + $0x69] sm:$0xff] %v5136_v48  ;;  %9298 = vmatmul.msk.f32.gmra.mxu0 %vm37_vm0, %v4424_v44  ;;  %5547 = vmatmul.f32.gmra.mxu1 %v5136_v48  ;;  %v3891_v35 = vld [vmem:[#allocation2 + $0x169] sm:$0xff] }
 0x470   :  { %v4877_v43 = vadd.f32 %v4701_v56, %v4343_v53  ;;  %9166 = vmatmul.msk.f32.gmra.mxu2 %vm37_vm0, %v3356_v25  ;;  %v6353_v56 = vld [vmem:[#allocation4 + $0x1e0] sm:$0xff] }
 0x471   :  { %9232 = vmatmul.msk.f32.gmra.mxu3 %vm37_vm0, %v3890_v39  ;;  %v6707_v25 = vld [vmem:[#allocation4 + $0x260] sm:$0xff]  ;;  %6360 = vmatpush.msrb.mxu0 %v6353_v56 }
 0x472   :  { %v4945_v57 = vadd.f32 %v11113_v3, %v4877_v43  ;;  %6714 = vmatpush.msrb.mxu1 %v6707_v25 }
 0x473   :  { %v3636_v38 = vpop.f32.mrf.mxu2 }
 0x474   :  { %v4170_v0 = vpop.f32.mrf.mxu3  ;;  %vm5009_vm12 = vcmp.ge.f32.partialorder %v4945_v57, 0.0  ;;  %v5073_v20 = vmul.f32 0.2, %v4945_v57  ;;  %v3810_v16 = vadd.f32 %v3636_v38, %v10685_v52  ;;  %v4707_v4 = vpop.f32.mrf.mxu0 }
 0x475   :  { %v11177_v52 = vpop.f32.mrf.mxu1 }
 0x476   :  { %v5137_v13 = vsel %vm5009_vm12, %v4945_v57, %v5073_v20  ;;  %v4344_v44 = vadd.f32 %v4170_v0, %v3810_v16  ;;  %v4426_v0 = vld [vmem:[#allocation2 + $0x172] sm:$0xff] }
 0x477   :  { %5287 = vst [vmem:[#allocation3 + $0x79] sm:$0xff] %v5137_v13  ;;  %9299 = vmatmul.msk.f32.gmra.mxu0 %vm37_vm0, %v4425_v34  ;;  %5550 = vmatmul.f32.gmra.mxu1 %v5137_v13  ;;  %v3358_v20 = vld [vmem:[#allocation2 + $0x170] sm:$0xff] }
 0x478   :  { %v4878_v39 = vadd.f32 %v4704_v28, %v4344_v44  ;;  %9167 = vmatmul.msk.f32.gmra.mxu2 %vm37_vm0, %v3357_v11  ;;  %v3892_v28 = vld [vmem:[#allocation2 + $0x171] sm:$0xff] }
 0x479   :  { %9233 = vmatmul.msk.f32.gmra.mxu3 %vm37_vm0, %v3891_v35 }
 0x47a   :  { %v4946_v48 = vadd.f32 %v11113_v3, %v4878_v39 }
 0x47b   :  { %v3639_v53 = vpop.f32.mrf.mxu2 }
 0x47c   :  { %v4173_v37 = vpop.f32.mrf.mxu3  ;;  %vm5010_vm13 = vcmp.ge.f32.partialorder %v4946_v48, 0.0  ;;  %v5074_v43 = vmul.f32 0.2, %v4946_v48  ;;  %v3811_v57 = vadd.f32 %v3639_v53, %v10695_v15  ;;  %v4710_v38 = vpop.f32.mrf.mxu0  ;;  %v3359_v53 = vld [vmem:[#allocation2 + $0x180] sm:$0xff] }
 0x47d   :  { %v11185_v15 = vpop.f32.mrf.mxu1 }
 0x47e   :  { %v5138_v16 = vsel %vm5010_vm13, %v4946_v48, %v5074_v43  ;;  %v4345_v34 = vadd.f32 %v4173_v37, %v3811_v57  ;;  %v4427_v48 = vld [vmem:[#allocation2 + $0x182] sm:$0xff]  ;;  %v5418_v57 = vld [vmem:[#allocation4 + $0x58] sm:$0xff] }
 0x47f   :  { %5288 = vst [vmem:[#allocation3 + $0x81] sm:$0xff] %v5138_v16  ;;  %9300 = vmatmul.msk.f32.gmra.mxu0 %vm37_vm0, %v4426_v0  ;;  %5553 = vmatmul.f32.gmra.mxu1 %v5138_v16  ;;  %v3893_v37 = vld [vmem:[#allocation2 + $0x181] sm:$0xff] }
 0x480   :  { %v4879_v11 = vadd.f32 %v4707_v4, %v4345_v34  ;;  %9168 = vmatmul.msk.f32.gmra.mxu2 %vm37_vm0, %v3358_v20 }
 0x481   :  { %9234 = vmatmul.msk.f32.gmra.mxu3 %vm37_vm0, %v3892_v28  ;;  %5717 = vmatpush.msrb.mxu2 %v5418_v57  ;;  %v12967_v57 = vld [vmem:[#allocation23_spill] sm:$0xff] }
 0x482   :  { %v4947_v35 = vadd.f32 %v11113_v3, %v4879_v11 }
 0x483   :  { %v3642_v13 = vpop.f32.mrf.mxu2 }
 0x484   :  { %v4176_v44 = vpop.f32.mrf.mxu3  ;;  %vm5011_vm14 = vcmp.ge.f32.partialorder %v4947_v35, 0.0  ;;  %v5075_v56 = vmul.f32 0.2, %v4947_v35  ;;  %v3812_v25 = vadd.f32 %v3642_v13, %v10705_v33  ;;  %v4713_v39 = vpop.f32.mrf.mxu0  ;;  %v3360_v13 = vld [vmem:[#allocation2 + $0x188] sm:$0xff] }
 0x486   :  { %v5139_v43 = vsel %vm5011_vm14, %v4947_v35, %v5075_v56  ;;  %v4346_v4 = vadd.f32 %v4176_v44, %v3812_v25  ;;  %v4428_v35 = vld [vmem:[#allocation2 + $0x18a] sm:$0xff]  ;;  %v11193_v56 = vpop.f32.mrf.mxu1 }
 0x487   :  { %5289 = vst [vmem:[#allocation3 + $0x91] sm:$0xff] %v5139_v43  ;;  %9301 = vmatmul.msk.f32.gmra.mxu0 %vm37_vm0, %v4427_v48  ;;  %5556 = vmatmul.f32.gmra.mxu1 %v5139_v43  ;;  %v3894_v44 = vld [vmem:[#allocation2 + $0x189] sm:$0xff]  ;;  %v5998_v48 = vld [vmem:[#allocation4 + $0x158] sm:$0xff] }
 0x488   :  { %v4880_v0 = vadd.f32 %v4710_v38, %v4346_v4  ;;  %9169 = vmatmul.msk.f32.gmra.mxu2 %vm37_vm0, %v3359_v53  ;;  %6007 = vmatpush.msrb.mxu3 %v5998_v48 }
 0x489   :  { %9235 = vmatmul.msk.f32.gmra.mxu3 %vm37_vm0, %v3893_v37 }
 0x48a   :  { %v4948_v20 = vadd.f32 %v11113_v3, %v4880_v0 }
 0x48b   :  { %v3645_v33 = vpop.f32.mrf.mxu2 }
 0x48c   :  { %v4179_v28 = vpop.f32.mrf.mxu3  ;;  %vm5012_vm15 = vcmp.ge.f32.partialorder %v4948_v20, 0.0  ;;  %v5076_v16 = vmul.f32 0.2, %v4948_v20  ;;  %v3813_v34 = vadd.f32 %v3645_v33, %v10715_v12  ;;  %v4716_v11 = vpop.f32.mrf.mxu0  ;;  %v4429_v33 = vld [vmem:[#allocation2 + $0x19a] sm:$0xff] }
 0x48e   :  { %v5140_v38 = vsel %vm5012_vm15, %v4948_v20, %v5076_v16  ;;  %v4347_v25 = vadd.f32 %v4179_v28, %v3813_v34  ;;  %v3361_v28 = vld [vmem:[#allocation2 + $0x198] sm:$0xff] }
 0x48f   :  { %5290 = vst [vmem:[#allocation3 + $0x99] sm:$0xff] %v5140_v38  ;;  %9302 = vmatmul.msk.f32.gmra.mxu0 %vm37_vm0, %v4428_v35  ;;  %5559 = vmatmul.f32.gmra.mxu1 %v5140_v38  ;;  %v3895_v16 = vld [vmem:[#allocation2 + $0x199] sm:$0xff] }
 0x490   :  { %v4881_v53 = vadd.f32 %v4713_v39, %v4347_v25  ;;  %9170 = vmatmul.msk.f32.gmra.mxu2 %vm37_vm0, %v3360_v13  ;;  %v6352_v39 = vld [vmem:[#allocation4 + $0x1d8] sm:$0xff] }
 0x491   :  { %9236 = vmatmul.msk.f32.gmra.mxu3 %vm37_vm0, %v3894_v44  ;;  %v6706_v13 = vld [vmem:[#allocation4 + $0x258] sm:$0xff]  ;;  %v11201_v44 = vpop.f32.mrf.mxu1  ;;  %6361 = vmatpush.msrb.mxu0 %v6352_v39 }
 0x492   :  { %v4949_v12 = vadd.f32 %v11113_v3, %v4881_v53  ;;  %6715 = vmatpush.msrb.mxu1 %v6706_v13 }
 0x493   :  { %v3648_v37 = vpop.f32.mrf.mxu2 }
 0x494   :  { %v4182_v43 = vpop.f32.mrf.mxu3  ;;  %vm5013_vm1 = vcmp.ge.f32.partialorder %v4949_v12, 0.0  ;;  %v5077_v4 = vmul.f32 0.2, %v4949_v12  ;;  %v3814_v0 = vadd.f32 %v3648_v37, %v12967_v57  ;;  %v4719_v20 = vpop.f32.mrf.mxu0  ;;  %v12968_v37 = vld [vmem:[#allocation25_spill] sm:$0xff]  ;;  %v4430_v57 = vld [vmem:[#allocation2 + $0x1a2] sm:$0xff] }
 0x496   :  { %v5141_v34 = vsel %vm5013_vm1, %v4949_v12, %v5077_v4  ;;  %v4348_v35 = vadd.f32 %v4182_v43, %v3814_v0  ;;  %v3362_v0 = vld [vmem:[#allocation2 + $0x1a0] sm:$0xff] }
 0x497   :  { %5291 = vst [vmem:[#allocation3 + $0xa9] sm:$0xff] %v5141_v34  ;;  %9303 = vmatmul.msk.f32.gmra.mxu0 %vm37_vm0, %v4429_v33  ;;  %5562 = vmatmul.f32.gmra.mxu1 %v5141_v34  ;;  %v3896_v33 = vld [vmem:[#allocation2 + $0x1a1] sm:$0xff] }
 0x498   :  { %v4882_v38 = vadd.f32 %v4716_v11, %v4348_v35  ;;  %9171 = vmatmul.msk.f32.gmra.mxu2 %vm37_vm0, %v3361_v28 }
 0x499   :  { %9237 = vmatmul.msk.f32.gmra.mxu3 %vm37_vm0, %v3895_v16  ;;  %v11210_v16 = vpop.f32.mrf.mxu1 }
 0x49a   :  { %v4950_v25 = vadd.f32 %v11113_v3, %v4882_v38 }
 0x49b   :  { %v3651_v48 = vpop.f32.mrf.mxu2 }
 0x49c   :  { %v4185_v53 = vpop.f32.mrf.mxu3  ;;  %vm5014_vm2 = vcmp.ge.f32.partialorder %v4950_v25, 0.0  ;;  %v5078_v12 = vmul.f32 0.2, %v4950_v25  ;;  %v3815_v43 = vadd.f32 %v3651_v48, %v12968_v37  ;;  %v4722_v4 = vpop.f32.mrf.mxu0  ;;  %v3897_v37 = vld [vmem:[#allocation2 + $0x1e1] sm:$0xff] }
 0x49e   :  { %v5142_v34 = vsel %vm5014_vm2, %v4950_v25, %v5078_v12  ;;  %v4349_v11 = vadd.f32 %v4185_v53, %v3815_v43  ;;  %v4431_v53 = vld [vmem:[#allocation2 + $0x1e2] sm:$0xff] }
 0x49f   :  { %5292 = vst [vmem:[#allocation3 + $0xb1] sm:$0xff] %v5142_v34  ;;  %9304 = vmatmul.msk.f32.gmra.mxu0 %vm37_vm0, %v4430_v57  ;;  %5565 = vmatmul.f32.gmra.mxu1 %v5142_v34  ;;  %v3363_v12 = vld [vmem:[#allocation2 + $0x1e0] sm:$0xff]  ;;  %v5417_v57 = vld [vmem:[#allocation4 + $0x50] sm:$0xff] }
 0x4a0   :  { %v4883_v28 = vadd.f32 %v4719_v20, %v4349_v11  ;;  %9172 = vmatmul.msk.f32.gmra.mxu2 %vm37_vm0, %v3362_v0 }
 0x4a1   :  { %9238 = vmatmul.msk.f32.gmra.mxu3 %vm37_vm0, %v3896_v33  ;;  %5718 = vmatpush.msrb.mxu2 %v5417_v57 }
 0x4a2   :  { %v4951_v35 = vadd.f32 %v11113_v3, %v4883_v28 }
 0x4a3   :  { %v3654_v39 = vpop.f32.mrf.mxu2 }
 0x4a4   :  { %v4188_v13 = vpop.f32.mrf.mxu3  ;;  %vm5015_vm3 = vcmp.ge.f32.partialorder %v4951_v35, 0.0  ;;  %v5079_v38 = vmul.f32 0.2, %v4951_v35  ;;  %v3816_v25 = vadd.f32 %v3654_v39, %v10739_v46  ;;  %v4725_v48 = vpop.f32.mrf.mxu0 }
 0x4a5   :  { %v11218_v46 = vpop.f32.mrf.mxu1 }
 0x4a6   :  { %v5143_v43 = vsel %vm5015_vm3, %v4951_v35, %v5079_v38  ;;  %v4350_v20 = vadd.f32 %v4188_v13, %v3816_v25  ;;  %v4432_v13 = vld [vmem:[#allocation2 + $0x1ea] sm:$0xff] }
 0x4a7   :  { %5293 = vst [vmem:[#allocation3 + $0xc1] sm:$0xff] %v5143_v43  ;;  %9305 = vmatmul.msk.f32.gmra.mxu0 %vm37_vm0, %v4431_v53  ;;  %5568 = vmatmul.f32.gmra.mxu1 %v5143_v43  ;;  %v3364_v38 = vld [vmem:[#allocation2 + $0x1e8] sm:$0xff] }
 0x4a8   :  { %v4884_v0 = vadd.f32 %v4722_v4, %v4350_v20  ;;  %9173 = vmatmul.msk.f32.gmra.mxu2 %vm37_vm0, %v3363_v12  ;;  %v3898_v25 = vld [vmem:[#allocation2 + $0x1e9] sm:$0xff] }
 0x4a9   :  { %9239 = vmatmul.msk.f32.gmra.mxu3 %vm37_vm0, %v3897_v37  ;;  %v5997_v12 = vld [vmem:[#allocation4 + $0x150] sm:$0xff] }
 0x4aa   :  { %v4952_v33 = vadd.f32 %v11113_v3, %v4884_v0  ;;  %6008 = vmatpush.msrb.mxu3 %v5997_v12 }
 0x4ab   :  { %v3657_v34 = vpop.f32.mrf.mxu2 }
 0x4ac   :  { %v4191_v11 = vpop.f32.mrf.mxu3  ;;  %vm5016_vm4 = vcmp.ge.f32.partialorder %v4952_v33, 0.0  ;;  %v5080_v28 = vmul.f32 0.2, %v4952_v33  ;;  %v3817_v35 = vadd.f32 %v3657_v34, %v10747_v62  ;;  %v4728_v39 = vpop.f32.mrf.mxu0  ;;  %v4433_v34 = vld [vmem:[#allocation2 + $0x1fa] sm:$0xff] }
 0x4ae   :  { %v5144_v4 = vsel %vm5016_vm4, %v4952_v33, %v5080_v28  ;;  %v4351_v53 = vadd.f32 %v4191_v11, %v3817_v35  ;;  %v3365_v28 = vld [vmem:[#allocation2 + $0x1f8] sm:$0xff] }
 0x4af   :  { %5294 = vst [vmem:[#allocation3 + $0xc9] sm:$0xff] %v5144_v4  ;;  %9306 = vmatmul.msk.f32.gmra.mxu0 %vm37_vm0, %v4432_v13  ;;  %5571 = vmatmul.f32.gmra.mxu1 %v5144_v4  ;;  %v3899_v35 = vld [vmem:[#allocation2 + $0x1f9] sm:$0xff] }
 0x4b0   :  { %v4885_v37 = vadd.f32 %v4725_v48, %v4351_v53  ;;  %9174 = vmatmul.msk.f32.gmra.mxu2 %vm37_vm0, %v3364_v38  ;;  %v6351_v38 = vld [vmem:[#allocation4 + $0x1d0] sm:$0xff] }
 0x4b1   :  { %9240 = vmatmul.msk.f32.gmra.mxu3 %vm37_vm0, %v3898_v25  ;;  %v6705_v25 = vld [vmem:[#allocation4 + $0x250] sm:$0xff]  ;;  %6362 = vmatpush.msrb.mxu0 %v6351_v38 }
 0x4b2   :  { %v4953_v43 = vadd.f32 %v11113_v3, %v4885_v37  ;;  %6716 = vmatpush.msrb.mxu1 %v6705_v25 }
 0x4b3   :  { %v3660_v62 = vpop.f32.mrf.mxu2 }
 0x4b4   :  { %v4194_v20 = vpop.f32.mrf.mxu3  ;;  %vm5017_vm5 = vcmp.ge.f32.partialorder %v4953_v43, 0.0  ;;  %v5081_v57 = vmul.f32 0.2, %v4953_v43  ;;  %v3818_v0 = vadd.f32 %v3660_v62, %v10755_v18  ;;  %v4731_v33 = vpop.f32.mrf.mxu0 }
 0x4b5   :  { %v11226_v11 = vpop.f32.mrf.mxu1 }
 0x4b6   :  { %v5145_v48 = vsel %vm5017_vm5, %v4953_v43, %v5081_v57  ;;  %v4352_v13 = vadd.f32 %v4194_v20, %v3818_v0  ;;  %v4434_v20 = vld [vmem:[#allocation2 + $0x202] sm:$0xff] }
 0x4b7   :  { %5295 = vst [vmem:[#allocation3 + $0xd9] sm:$0xff] %v5145_v48  ;;  %9307 = vmatmul.msk.f32.gmra.mxu0 %vm37_vm0, %v4433_v34  ;;  %5574 = vmatmul.f32.gmra.mxu1 %v5145_v48  ;;  %v3366_v0 = vld [vmem:[#allocation2 + $0x200] sm:$0xff] }
 0x4b8   :  { %v4886_v4 = vadd.f32 %v4728_v39, %v4352_v13  ;;  %9175 = vmatmul.msk.f32.gmra.mxu2 %vm37_vm0, %v3365_v28  ;;  %v3900_v39 = vld [vmem:[#allocation2 + $0x201] sm:$0xff] }
 0x4b9   :  { %9241 = vmatmul.msk.f32.gmra.mxu3 %vm37_vm0, %v3899_v35 }
 0x4ba   :  { %v4954_v18 = vadd.f32 %v11113_v3, %v4886_v4 }
 0x4bb   :  { %v3663_v53 = vpop.f32.mrf.mxu2 }
 0x4bc   :  { %v4197_v12 = vpop.f32.mrf.mxu3  ;;  %vm5018_vm6 = vcmp.ge.f32.partialorder %v4954_v18, 0.0  ;;  %v5082_v37 = vmul.f32 0.2, %v4954_v18  ;;  %v3819_v43 = vadd.f32 %v3663_v53, %v10763_v41  ;;  %v4734_v62 = vpop.f32.mrf.mxu0 }
 0x4bd   :  { %v11233_v57 = vpop.f32.mrf.mxu1 }
 0x4be   :  { %v5146_v34 = vsel %vm5018_vm6, %v4954_v18, %v5082_v37  ;;  %v4353_v28 = vadd.f32 %v4197_v12, %v3819_v43  ;;  %v4435_v18 = vld [vmem:[#allocation2 + $0x212] sm:$0xff] }
 0x4bf   :  { %5296 = vst [vmem:[#allocation3 + $0xe1] sm:$0xff] %v5146_v34  ;;  %9308 = vmatmul.msk.f32.gmra.mxu0 %vm37_vm0, %v4434_v20  ;;  %5577 = vmatmul.f32.gmra.mxu1 %v5146_v34  ;;  %v3367_v12 = vld [vmem:[#allocation2 + $0x210] sm:$0xff]  ;;  %v5416_v20 = vld [vmem:[#allocation4 + $0x48] sm:$0xff] }
 0x4c0   :  { %v4887_v35 = vadd.f32 %v4731_v33, %v4353_v28  ;;  %9176 = vmatmul.msk.f32.gmra.mxu2 %vm37_vm0, %v3366_v0  ;;  %v3901_v37 = vld [vmem:[#allocation2 + $0x211] sm:$0xff] }
 0x4c1   :  { %9242 = vmatmul.msk.f32.gmra.mxu3 %vm37_vm0, %v3900_v39  ;;  %5719 = vmatpush.msrb.mxu2 %v5416_v20 }
 0x4c2   :  { %v4955_v48 = vadd.f32 %v11113_v3, %v4887_v35 }
 0x4c3   :  { %v3666_v41 = vpop.f32.mrf.mxu2 }
 0x4c4   :  { %v4200_v13 = vpop.f32.mrf.mxu3  ;;  %vm5019_vm7 = vcmp.ge.f32.partialorder %v4955_v48, 0.0  ;;  %v5083_v38 = vmul.f32 0.2, %v4955_v48  ;;  %v3820_v25 = vadd.f32 %v3666_v41, %v10771_v27  ;;  %v4737_v4 = vpop.f32.mrf.mxu0  ;;  %v4436_v41 = vld [vmem:[#allocation2 + $0x21a] sm:$0xff] }
 0x4c5   :  { %v11240_v53 = vpop.f32.mrf.mxu1 }
 0x4c6   :  { %v5147_v43 = vsel %vm5019_vm7, %v4955_v48, %v5083_v38  ;;  %v4354_v33 = vadd.f32 %v4200_v13, %v3820_v25  ;;  %v3368_v38 = vld [vmem:[#allocation2 + $0x218] sm:$0xff] }
 0x4c7   :  { %5297 = vst [vmem:[#allocation3 + $0xf1] sm:$0xff] %v5147_v43  ;;  %9309 = vmatmul.msk.f32.gmra.mxu0 %vm37_vm0, %v4435_v18  ;;  %5580 = vmatmul.f32.gmra.mxu1 %v5147_v43  ;;  %v3902_v25 = vld [vmem:[#allocation2 + $0x219] sm:$0xff] }
 0x4c8   :  { %v4888_v0 = vadd.f32 %v4734_v62, %v4354_v33  ;;  %9177 = vmatmul.msk.f32.gmra.mxu2 %vm37_vm0, %v3367_v12  ;;  %v5996_v12 = vld [vmem:[#allocation4 + $0x148] sm:$0xff] }
 0x4c9   :  { %9243 = vmatmul.msk.f32.gmra.mxu3 %vm37_vm0, %v3901_v37 }
 0x4ca   :  { %v4956_v27 = vadd.f32 %v11113_v3, %v4888_v0  ;;  %6009 = vmatpush.msrb.mxu3 %v5996_v12 }
 0x4cb   :  { %v3669_v39 = vpop.f32.mrf.mxu2 }
 0x4cc   :  { %v4203_v34 = vpop.f32.mrf.mxu3  ;;  %vm5020_vm8 = vcmp.ge.f32.partialorder %v4956_v27, 0.0  ;;  %v5084_v28 = vmul.f32 0.2, %v4956_v27  ;;  %v3821_v35 = vadd.f32 %v3669_v39, %v10779_v23  ;;  %v4740_v48 = vpop.f32.mrf.mxu0  ;;  %v4437_v39 = vld [vmem:[#allocation2 + $0x22a] sm:$0xff] }
 0x4cd   :  { %v11247_v13 = vpop.f32.mrf.mxu1 }
 0x4ce   :  { %v5148_v62 = vsel %vm5020_vm8, %v4956_v27, %v5084_v28  ;;  %v4355_v18 = vadd.f32 %v4203_v34, %v3821_v35  ;;  %v3369_v28 = vld [vmem:[#allocation2 + $0x228] sm:$0xff] }
 0x4cf   :  { %5298 = vst [vmem:[#allocation3 + $0xf9] sm:$0xff] %v5148_v62  ;;  %9310 = vmatmul.msk.f32.gmra.mxu0 %vm37_vm0, %v4436_v41  ;;  %5583 = vmatmul.f32.gmra.mxu1 %v5148_v62  ;;  %v3903_v35 = vld [vmem:[#allocation2 + $0x229] sm:$0xff] }
 0x4d0   :  { %v4889_v37 = vadd.f32 %v4737_v4, %v4355_v18  ;;  %9178 = vmatmul.msk.f32.gmra.mxu2 %vm37_vm0, %v3368_v38  ;;  %v6350_v38 = vld [vmem:[#allocation4 + $0x1c8] sm:$0xff] }
 0x4d1   :  { %9244 = vmatmul.msk.f32.gmra.mxu3 %vm37_vm0, %v3902_v25  ;;  %v6704_v25 = vld [vmem:[#allocation4 + $0x248] sm:$0xff]  ;;  %6363 = vmatpush.msrb.mxu0 %v6350_v38 }
 0x4d2   :  { %v4957_v23 = vadd.f32 %v11113_v3, %v4889_v37  ;;  %6717 = vmatpush.msrb.mxu1 %v6704_v25 }
 0x4d3   :  { %v3672_v43 = vpop.f32.mrf.mxu2 }
 0x4d4   :  { %v4206_v33 = vpop.f32.mrf.mxu3  ;;  %vm5021_vm9 = vcmp.ge.f32.partialorder %v4957_v23, 0.0  ;;  %v5085_v20 = vmul.f32 0.2, %v4957_v23  ;;  %v3822_v0 = vadd.f32 %v3672_v43, %v10787_v51  ;;  %v4743_v27 = vpop.f32.mrf.mxu0 }
 0x4d5   :  { %v11254_v34 = vpop.f32.mrf.mxu1 }
 0x4d6   :  { %v5149_v4 = vsel %vm5021_vm9, %v4957_v23, %v5085_v20  ;;  %v4356_v41 = vadd.f32 %v4206_v33, %v3822_v0  ;;  %v4438_v33 = vld [vmem:[#allocation2 + $0x232] sm:$0xff] }
 0x4d7   :  { %5299 = vst [vmem:[#allocation3 + $0x109] sm:$0xff] %v5149_v4  ;;  %9311 = vmatmul.msk.f32.gmra.mxu0 %vm37_vm0, %v4437_v39  ;;  %5586 = vmatmul.f32.gmra.mxu1 %v5149_v4  ;;  %v3370_v0 = vld [vmem:[#allocation2 + $0x230] sm:$0xff] }
 0x4d8   :  { %v4890_v62 = vadd.f32 %v4740_v48, %v4356_v41  ;;  %9179 = vmatmul.msk.f32.gmra.mxu2 %vm37_vm0, %v3369_v28  ;;  %v3904_v48 = vld [vmem:[#allocation2 + $0x231] sm:$0xff] }
 0x4d9   :  { %9245 = vmatmul.msk.f32.gmra.mxu3 %vm37_vm0, %v3903_v35 }
 0x4da   :  { %v4958_v51 = vadd.f32 %v11113_v3, %v4890_v62 }
 0x4db   :  { %v3675_v18 = vpop.f32.mrf.mxu2 }
 0x4dc   :  { %v4209_v12 = vpop.f32.mrf.mxu3  ;;  %vm5022_vm10 = vcmp.ge.f32.partialorder %v4958_v51, 0.0  ;;  %v5086_v37 = vmul.f32 0.2, %v4958_v51  ;;  %v3823_v23 = vadd.f32 %v3675_v18, %v10795_v63  ;;  %v4746_v43 = vpop.f32.mrf.mxu0 }
 0x4dd   :  { %v11261_v20 = vpop.f32.mrf.mxu1 }
 0x4de   :  { %v5150_v39 = vsel %vm5022_vm10, %v4958_v51, %v5086_v37  ;;  %v4357_v28 = vadd.f32 %v4209_v12, %v3823_v23  ;;  %v4439_v51 = vld [vmem:[#allocation2 + $0x242] sm:$0xff] }
 0x4df   :  { %5300 = vst [vmem:[#allocation3 + $0x111] sm:$0xff] %v5150_v39  ;;  %9312 = vmatmul.msk.f32.gmra.mxu0 %vm37_vm0, %v4438_v33  ;;  %5589 = vmatmul.f32.gmra.mxu1 %v5150_v39  ;;  %v3371_v12 = vld [vmem:[#allocation2 + $0x240] sm:$0xff] }
 0x4e0   :  { %v4891_v35 = vadd.f32 %v4743_v27, %v4357_v28  ;;  %9180 = vmatmul.msk.f32.gmra.mxu2 %vm37_vm0, %v3370_v0  ;;  %v3905_v37 = vld [vmem:[#allocation2 + $0x241] sm:$0xff] }
 0x4e1   :  { %9246 = vmatmul.msk.f32.gmra.mxu3 %vm37_vm0, %v3904_v48  ;;  %v5415_v33 = vld [vmem:[#allocation4 + $0x40] sm:$0xff] }
 0x4e2   :  { %v4959_v4 = vadd.f32 %v11113_v3, %v4891_v35  ;;  %5720 = vmatpush.msrb.mxu2 %v5415_v33 }
 0x4e3   :  { %v3678_v63 = vpop.f32.mrf.mxu2 }
 0x4e4   :  { %v4212_v41 = vpop.f32.mrf.mxu3  ;;  %vm5023_vm11 = vcmp.ge.f32.partialorder %v4959_v4, 0.0  ;;  %v5087_v38 = vmul.f32 0.2, %v4959_v4  ;;  %v3824_v25 = vadd.f32 %v3678_v63, %v10803_v50  ;;  %v4749_v62 = vpop.f32.mrf.mxu0  ;;  %v4440_v63 = vld [vmem:[#allocation2 + $0x24a] sm:$0xff] }
 0x4e5   :  { %v11268_v18 = vpop.f32.mrf.mxu1 }
 0x4e6   :  { %v5151_v23 = vsel %vm5023_vm11, %v4959_v4, %v5087_v38  ;;  %v4358_v27 = vadd.f32 %v4212_v41, %v3824_v25  ;;  %v3372_v38 = vld [vmem:[#allocation2 + $0x248] sm:$0xff] }
 0x4e7   :  { %5301 = vst [vmem:[#allocation3 + $0x121] sm:$0xff] %v5151_v23  ;;  %9313 = vmatmul.msk.f32.gmra.mxu0 %vm37_vm0, %v4439_v51  ;;  %5592 = vmatmul.f32.gmra.mxu1 %v5151_v23  ;;  %v3906_v25 = vld [vmem:[#allocation2 + $0x249] sm:$0xff] }
 0x4e8   :  { %v4892_v0 = vadd.f32 %v4746_v43, %v4358_v27  ;;  %9181 = vmatmul.msk.f32.gmra.mxu2 %vm37_vm0, %v3371_v12  ;;  %v5995_v12 = vld [vmem:[#allocation4 + $0x140] sm:$0xff] }
 0x4e9   :  { %9247 = vmatmul.msk.f32.gmra.mxu3 %vm37_vm0, %v3905_v37 }
 0x4ea   :  { %v4960_v50 = vadd.f32 %v11113_v3, %v4892_v0  ;;  %6010 = vmatpush.msrb.mxu3 %v5995_v12 }
 0x4eb   :  { %v3681_v48 = vpop.f32.mrf.mxu2 }
 0x4ec   :  { %v4215_v39 = vpop.f32.mrf.mxu3  ;;  %vm5024_vm12 = vcmp.ge.f32.partialorder %v4960_v50, 0.0  ;;  %v5088_v28 = vmul.f32 0.2, %v4960_v50  ;;  %v3825_v35 = vadd.f32 %v3681_v48, %v10811_v45  ;;  %v4752_v4 = vpop.f32.mrf.mxu0  ;;  %v4441_v48 = vld [vmem:[#allocation2 + $0x25a] sm:$0xff] }
 0x4ed   :  { %v11275_v41 = vpop.f32.mrf.mxu1 }
 0x4ee   :  { %v5152_v43 = vsel %vm5024_vm12, %v4960_v50, %v5088_v28  ;;  %v4359_v51 = vadd.f32 %v4215_v39, %v3825_v35  ;;  %v3373_v28 = vld [vmem:[#allocation2 + $0x258] sm:$0xff] }
 0x4ef   :  { %5302 = vst [vmem:[#allocation3 + $0x129] sm:$0xff] %v5152_v43  ;;  %9314 = vmatmul.msk.f32.gmra.mxu0 %vm37_vm0, %v4440_v63  ;;  %5595 = vmatmul.f32.gmra.mxu1 %v5152_v43  ;;  %v3907_v35 = vld [vmem:[#allocation2 + $0x259] sm:$0xff] }
 0x4f0   :  { %v4893_v37 = vadd.f32 %v4749_v62, %v4359_v51  ;;  %9182 = vmatmul.msk.f32.gmra.mxu2 %vm37_vm0, %v3372_v38  ;;  %v6349_v38 = vld [vmem:[#allocation4 + $0x1c0] sm:$0xff] }
 0x4f1   :  { %9248 = vmatmul.msk.f32.gmra.mxu3 %vm37_vm0, %v3906_v25  ;;  %6364 = vmatpush.msrb.mxu0 %v6349_v38 }
 0x4f2   :  { %v4961_v45 = vadd.f32 %v11113_v3, %v4893_v37  ;;  %v6703_v3 = vld [vmem:[#allocation4 + $0x240] sm:$0xff] }
 0x4f3   :  { %v3684_v23 = vpop.f32.mrf.mxu2  ;;  %6718 = vmatpush.msrb.mxu1 %v6703_v3 }
 0x4f4   :  { %v4218_v27 = vpop.f32.mrf.mxu3  ;;  %vm5025_vm13 = vcmp.ge.f32.partialorder %v4961_v45, 0.0  ;;  %v5089_v33 = vmul.f32 0.2, %v4961_v45  ;;  %v3826_v0 = vadd.f32 %v3684_v23, %v10819_v59  ;;  %v4755_v50 = vpop.f32.mrf.mxu0  ;;  %v11290_v59 = vld [vmem:[%s12764_s2] ss:$0 sm:$0xff]  ;;  %v4442_v23 = vld [vmem:[#allocation2 + $0x262] sm:$0xff] }
 0x4f5   :  { %v11282_v39 = vpop.f32.mrf.mxu1 }
 0x4f6   :  { %v5153_v62 = vsel %vm5025_vm13, %v4961_v45, %v5089_v33  ;;  %v4360_v63 = vadd.f32 %v4218_v27, %v3826_v0  ;;  %v3374_v33 = vld [vmem:[#allocation2 + $0x260] sm:$0xff] }
 0x4f7   :  { %5303 = vst [vmem:[#allocation3 + $0x139] sm:$0xff] %v5153_v62  ;;  %9315 = vmatmul.msk.f32.gmra.mxu0 %vm37_vm0, %v4441_v48  ;;  %5598 = vmatmul.f32.gmra.mxu1 %v5153_v62  ;;  %v3908_v0 = vld [vmem:[#allocation2 + $0x261] sm:$0xff] }
 0x4f8   :  { %v4894_v25 = vadd.f32 %v4752_v4, %v4360_v63  ;;  %9183 = vmatmul.msk.f32.gmra.mxu2 %vm37_vm0, %v3373_v28 }
 0x4f9   :  { %9249 = vmatmul.msk.f32.gmra.mxu3 %vm37_vm0, %v3907_v35 }
 0x4fa   :  { %v4962_v43 = vadd.f32 %v11290_v59, %v4894_v25 }
 0x4fb   :  { %v3687_v51 = vpop.f32.mrf.mxu2 }
 0x4fc   :  { %v4221_v12 = vpop.f32.mrf.mxu3  ;;  %vm5026_vm14 = vcmp.ge.f32.partialorder %v4962_v43, 0.0  ;;  %v5090_v37 = vmul.f32 0.2, %v4962_v43  ;;  %v3827_v45 = vadd.f32 %v3687_v51, %v10827_v1  ;;  %v4758_v4 = vpop.f32.mrf.mxu0 }
 0x4fd   :  { %v11294_v27 = vpop.f32.mrf.mxu1 }
 0x4fe   :  { %v5154_v48 = vsel %vm5026_vm14, %v4962_v43, %v5090_v37  ;;  %v4361_v28 = vadd.f32 %v4221_v12, %v3827_v45  ;;  %v4443_v43 = vld [vmem:[#allocation2 + $0x272] sm:$0xff] }
 0x4ff   :  { %5304 = vst [vmem:[#allocation3 + $0x141] sm:$0xff] %v5154_v48  ;;  %9316 = vmatmul.msk.f32.gmra.mxu0 %vm37_vm0, %v4442_v23  ;;  %5601 = vmatmul.f32.gmra.mxu1 %v5154_v48  ;;  %v3375_v12 = vld [vmem:[#allocation2 + $0x270] sm:$0xff]  ;;  %v5414_v23 = vld [vmem:[#allocation4 + $0x38] sm:$0xff] }
 0x500   :  { %v4895_v35 = vadd.f32 %v4755_v50, %v4361_v28  ;;  %9184 = vmatmul.msk.f32.gmra.mxu2 %vm37_vm0, %v3374_v33  ;;  %v3909_v37 = vld [vmem:[#allocation2 + $0x271] sm:$0xff] }
 0x501   :  { %9250 = vmatmul.msk.f32.gmra.mxu3 %vm37_vm0, %v3908_v0  ;;  %5721 = vmatpush.msrb.mxu2 %v5414_v23 }
 0x502   :  { %v4963_v62 = vadd.f32 %v11290_v59, %v4895_v35 }
 0x503   :  { %v3690_v1 = vpop.f32.mrf.mxu2 }
 0x504   :  { %v4224_v63 = vpop.f32.mrf.mxu3  ;;  %vm5027_vm15 = vcmp.ge.f32.partialorder %v4963_v62, 0.0  ;;  %v5091_v38 = vmul.f32 0.2, %v4963_v62  ;;  %v3828_v3 = vadd.f32 %v3690_v1, %v10835_v32  ;;  %v4761_v25 = vpop.f32.mrf.mxu0  ;;  %v4444_v1 = vld [vmem:[#allocation2 + $0x27a] sm:$0xff] }
 0x505   :  { %v11301_v51 = vpop.f32.mrf.mxu1 }
 0x506   :  { %v5155_v45 = vsel %vm5027_vm15, %v4963_v62, %v5091_v38  ;;  %v4362_v50 = vadd.f32 %v4224_v63, %v3828_v3  ;;  %v3376_v38 = vld [vmem:[#allocation2 + $0x278] sm:$0xff] }
 0x507   :  { %5305 = vst [vmem:[#allocation3 + $0x151] sm:$0xff] %v5155_v45  ;;  %9317 = vmatmul.msk.f32.gmra.mxu0 %vm37_vm0, %v4443_v43  ;;  %5604 = vmatmul.f32.gmra.mxu1 %v5155_v45  ;;  %v3910_v3 = vld [vmem:[#allocation2 + $0x279] sm:$0xff] }
 0x508   :  { %v4896_v33 = vadd.f32 %v4758_v4, %v4362_v50  ;;  %9185 = vmatmul.msk.f32.gmra.mxu2 %vm37_vm0, %v3375_v12  ;;  %v5994_v12 = vld [vmem:[#allocation4 + $0x138] sm:$0xff] }
 0x509   :  { %9251 = vmatmul.msk.f32.gmra.mxu3 %vm37_vm0, %v3909_v37 }
 0x50a   :  { %v4964_v32 = vadd.f32 %v11290_v59, %v4896_v33  ;;  %6011 = vmatpush.msrb.mxu3 %v5994_v12 }
 0x50b   :  { %v3693_v0 = vpop.f32.mrf.mxu2 }
 0x50c   :  { %v4227_v48 = vpop.f32.mrf.mxu3  ;;  %vm5028_vm1 = vcmp.ge.f32.partialorder %v4964_v32, 0.0  ;;  %v5092_v28 = vmul.f32 0.2, %v4964_v32  ;;  %v3829_v35 = vadd.f32 %v3693_v0, %v10843_v31  ;;  %v4764_v62 = vpop.f32.mrf.mxu0  ;;  %v4445_v0 = vld [vmem:[#allocation2 + $0x28a] sm:$0xff] }
 0x50d   :  { %v11308_v63 = vpop.f32.mrf.mxu1 }
 0x50e   :  { %v5156_v4 = vsel %vm5028_vm1, %v4964_v32, %v5092_v28  ;;  %v4363_v43 = vadd.f32 %v4227_v48, %v3829_v35  ;;  %v3377_v28 = vld [vmem:[#allocation2 + $0x288] sm:$0xff] }
 0x50f   :  { %5306 = vst [vmem:[#allocation3 + $0x159] sm:$0xff] %v5156_v4  ;;  %9318 = vmatmul.msk.f32.gmra.mxu0 %vm37_vm0, %v4444_v1  ;;  %5607 = vmatmul.f32.gmra.mxu1 %v5156_v4  ;;  %v3911_v35 = vld [vmem:[#allocation2 + $0x289] sm:$0xff] }
 0x510   :  { %v4897_v37 = vadd.f32 %v4761_v25, %v4363_v43  ;;  %9186 = vmatmul.msk.f32.gmra.mxu2 %vm37_vm0, %v3376_v38  ;;  %v6348_v38 = vld [vmem:[#allocation4 + $0x1b8] sm:$0xff] }
 0x511   :  { %9252 = vmatmul.msk.f32.gmra.mxu3 %vm37_vm0, %v3910_v3  ;;  %v6702_v3 = vld [vmem:[#allocation4 + $0x238] sm:$0xff]  ;;  %6365 = vmatpush.msrb.mxu0 %v6348_v38 }
 0x512   :  { %v4965_v31 = vadd.f32 %v11290_v59, %v4897_v37  ;;  %6719 = vmatpush.msrb.mxu1 %v6702_v3 }
 0x513   :  { %v3696_v45 = vpop.f32.mrf.mxu2 }
 0x514   :  { %v4230_v50 = vpop.f32.mrf.mxu3  ;;  %vm5029_vm2 = vcmp.ge.f32.partialorder %v4965_v31, 0.0  ;;  %v5093_v23 = vmul.f32 0.2, %v4965_v31  ;;  %v3830_v33 = vadd.f32 %v3696_v45, %v10851_v49  ;;  %v4767_v32 = vpop.f32.mrf.mxu0 }
 0x515   :  { %v11315_v48 = vpop.f32.mrf.mxu1 }
 0x516   :  { %v5157_v25 = vsel %vm5029_vm2, %v4965_v31, %v5093_v23  ;;  %v4364_v1 = vadd.f32 %v4230_v50, %v3830_v33  ;;  %v4446_v50 = vld [vmem:[#allocation2 + $0x292] sm:$0xff] }
 0x517   :  { %5307 = vst [vmem:[#allocation3 + $0x169] sm:$0xff] %v5157_v25  ;;  %9319 = vmatmul.msk.f32.gmra.mxu0 %vm37_vm0, %v4445_v0  ;;  %5610 = vmatmul.f32.gmra.mxu1 %v5157_v25  ;;  %v3378_v33 = vld [vmem:[#allocation2 + $0x290] sm:$0xff] }
 0x518   :  { %v4898_v4 = vadd.f32 %v4764_v62, %v4364_v1  ;;  %9187 = vmatmul.msk.f32.gmra.mxu2 %vm37_vm0, %v3377_v28  ;;  %v3912_v62 = vld [vmem:[#allocation2 + $0x291] sm:$0xff] }
 0x519   :  { %9253 = vmatmul.msk.f32.gmra.mxu3 %vm37_vm0, %v3911_v35 }
 0x51a   :  { %v4966_v49 = vadd.f32 %v11290_v59, %v4898_v4 }
 0x51b   :  { %v3699_v43 = vpop.f32.mrf.mxu2 }
 0x51c   :  { %v4233_v12 = vpop.f32.mrf.mxu3  ;;  %vm5030_vm3 = vcmp.ge.f32.partialorder %v4966_v49, 0.0  ;;  %v5094_v37 = vmul.f32 0.2, %v4966_v49  ;;  %v3831_v31 = vadd.f32 %v3699_v43, %v10859_v10  ;;  %v4770_v45 = vpop.f32.mrf.mxu0 }
 0x51d   :  { %v11322_v23 = vpop.f32.mrf.mxu1 }
 0x51e   :  { %v5158_v0 = vsel %vm5030_vm3, %v4966_v49, %v5094_v37  ;;  %v4365_v28 = vadd.f32 %v4233_v12, %v3831_v31  ;;  %v4447_v49 = vld [vmem:[#allocation2 + $0x2a2] sm:$0xff]  ;;  %v5455_v12 = vld [vmem:[#allocation3 + $0x1b1] sm:$0xff] }
 0x51f   :  { %5308 = vst [vmem:[#allocation3 + $0x171] sm:$0xff] %v5158_v0  ;;  %9320 = vmatmul.msk.f32.gmra.mxu0 %vm37_vm0, %v4446_v50  ;;  %5613 = vmatmul.f32.gmra.mxu1 %v5158_v0  ;;  %v3379_v37 = vld [vmem:[#allocation2 + $0x2a0] sm:$0xff] }
 0x520   :  { %v4899_v35 = vadd.f32 %v4767_v32, %v4365_v28  ;;  %9188 = vmatmul.msk.f32.gmra.mxu2 %vm37_vm0, %v3378_v33  ;;  %v3913_v31 = vld [vmem:[#allocation2 + $0x2a1] sm:$0xff]  ;;  %v5413_v33 = vld [vmem:[#allocation4 + $0x30] sm:$0xff] }
 0x521   :  { %9254 = vmatmul.msk.f32.gmra.mxu3 %vm37_vm0, %v3912_v62  ;;  %5722 = vmatpush.msrb.mxu2 %v5413_v33 }
 0x522   :  { %v4967_v25 = vadd.f32 %v11290_v59, %v4899_v35 }
 0x523   :  { %v3702_v10 = vpop.f32.mrf.mxu2 }
 0x524   :  { %v4236_v1 = vpop.f32.mrf.mxu3  ;;  %vm5031_vm4 = vcmp.ge.f32.partialorder %v4967_v25, 0.0  ;;  %v5095_v38 = vmul.f32 0.2, %v4967_v25  ;;  %v3832_v3 = vadd.f32 %v3702_v10, %v10867_v47  ;;  %v4773_v4 = vpop.f32.mrf.mxu0 }
 0x525   :  { %v11329_v43 = vpop.f32.mrf.mxu1 }
 0x526   :  { %v5159_v32 = vsel %vm5031_vm4, %v4967_v25, %v5095_v38  ;;  %v4366_v50 = vadd.f32 %v4236_v1, %v3832_v3  ;;  %v4448_v1 = vld [vmem:[#allocation2 + $0x2aa] sm:$0xff]  ;;  %v5456_v3 = vld [vmem:[#allocation3 + $0x1b9] sm:$0xff] }
 0x527   :  { %5309 = vst [vmem:[#allocation3 + $0x181] sm:$0xff] %v5159_v32  ;;  %9321 = vmatmul.msk.f32.gmra.mxu0 %vm37_vm0, %v4447_v49  ;;  %5616 = vmatmul.f32.gmra.mxu1 %v5455_v12  ;;  %v3380_v49 = vld [vmem:[#allocation2 + $0x2a8] sm:$0xff] }
 0x528   :  { %v4900_v62 = vadd.f32 %v4770_v45, %v4366_v50  ;;  %9189 = vmatmul.msk.f32.gmra.mxu2 %vm37_vm0, %v3379_v37  ;;  %v3914_v45 = vld [vmem:[#allocation2 + $0x2a9] sm:$0xff] }
 0x529   :  { %9255 = vmatmul.msk.f32.gmra.mxu3 %vm37_vm0, %v3913_v31  ;;  %v5993_v31 = vld [vmem:[#allocation4 + $0x130] sm:$0xff] }
 0x52a   :  { %v4968_v47 = vadd.f32 %v11290_v59, %v4900_v62  ;;  %6012 = vmatpush.msrb.mxu3 %v5993_v31 }
 0x52b   :  { %v3705_v0 = vpop.f32.mrf.mxu2 }
 0x52c   :  { %v4239_v28 = vpop.f32.mrf.mxu3  ;;  %vm5032_vm5 = vcmp.ge.f32.partialorder %v4968_v47, 0.0  ;;  %v5096_v35 = vmul.f32 0.2, %v4968_v47  ;;  %v3833_v25 = vadd.f32 %v3705_v0, %v10873_v22  ;;  %v4776_v10 = vpop.f32.mrf.mxu0 }
 0x52d   :  { %v11336_v38 = vpop.f32.mrf.mxu1 }
 0x52e   :  { %v5160_v12 = vsel %vm5032_vm5, %v4968_v47, %v5096_v35  ;;  %v4367_v37 = vadd.f32 %v4239_v28, %v3833_v25  ;;  %v4449_v28 = vld [vmem:[#allocation2 + $0x2ba] sm:$0xff] }
 0x52f   :  { %5310 = vst [vmem:[#allocation3 + $0x189] sm:$0xff] %v5160_v12  ;;  %9322 = vmatmul.msk.f32.gmra.mxu0 %vm37_vm0, %v4448_v1  ;;  %5619 = vmatmul.f32.gmra.mxu1 %v5456_v3  ;;  %v3381_v25 = vld [vmem:[#allocation2 + $0x2b8] sm:$0xff] }
 0x530   :  { %v4901_v32 = vadd.f32 %v4773_v4, %v4367_v37  ;;  %9190 = vmatmul.msk.f32.gmra.mxu2 %vm37_vm0, %v3380_v49  ;;  %v3915_v1 = vld [vmem:[#allocation2 + $0x2b9] sm:$0xff]  ;;  %v6347_v49 = vld [vmem:[#allocation4 + $0x1b0] sm:$0xff] }
 0x531   :  { %9256 = vmatmul.msk.f32.gmra.mxu3 %vm37_vm0, %v3914_v45  ;;  %v6701_v45 = vld [vmem:[#allocation4 + $0x230] sm:$0xff]  ;;  %6366 = vmatpush.msrb.mxu0 %v6347_v49 }
 0x532   :  { %v4969_v22 = vadd.f32 %v11290_v59, %v4901_v32  ;;  %6720 = vmatpush.msrb.mxu1 %v6701_v45 }
 0x533   :  { %v3708_v50 = vpop.f32.mrf.mxu2 }
 0x534   :  { %v4242_v33 = vpop.f32.mrf.mxu3  ;;  %vm5033_vm6 = vcmp.ge.f32.partialorder %v4969_v22, 0.0  ;;  %v5097_v62 = vmul.f32 0.2, %v4969_v22  ;;  %v3834_v47 = vadd.f32 %v3708_v50, %v10880_v42  ;;  %v4779_v0 = vpop.f32.mrf.mxu0 }
 0x535   :  { %v11343_v35 = vpop.f32.mrf.mxu1 }
 0x536   :  { %v5161_v4 = vsel %vm5033_vm6, %v4969_v22, %v5097_v62  ;;  %v4368_v3 = vadd.f32 %v4242_v33, %v3834_v47  ;;  %v4450_v33 = vld [vmem:[#allocation2 + $0x2c2] sm:$0xff] }
 0x537   :  { %5311 = vst [vmem:[#allocation3 + $0x1c9] sm:$0xff] %v5161_v4  ;;  %9323 = vmatmul.msk.f32.gmra.mxu0 %vm37_vm0, %v4449_v28  ;;  %5622 = vmatmul.f32.gmra.mxu1 %v5161_v4  ;;  %v3382_v47 = vld [vmem:[#allocation2 + $0x2c0] sm:$0xff] }
 0x538   :  { %v4902_v12 = vadd.f32 %v4776_v10, %v4368_v3  ;;  %9191 = vmatmul.msk.f32.gmra.mxu2 %vm37_vm0, %v3381_v25  ;;  %v3916_v10 = vld [vmem:[#allocation2 + $0x2c1] sm:$0xff] }
 0x539   :  { %9257 = vmatmul.msk.f32.gmra.mxu3 %vm37_vm0, %v3915_v1 }
 0x53a   :  { %v4970_v42 = vadd.f32 %v11290_v59, %v4902_v12 }
 0x53b   :  { %v3711_v37 = vpop.f32.mrf.mxu2 }
 0x53c   :  { %v4245_v31 = vpop.f32.mrf.mxu3  ;;  %vm5034_vm7 = vcmp.ge.f32.partialorder %v4970_v42, 0.0  ;;  %v5098_v32 = vmul.f32 0.2, %v4970_v42  ;;  %v3835_v22 = vadd.f32 %v3711_v37, %v10887_v7  ;;  %v4782_v50 = vpop.f32.mrf.mxu0 }
 0x53d   :  { %v11350_v62 = vpop.f32.mrf.mxu1 }
 0x53e   :  { %v5162_v28 = vsel %vm5034_vm7, %v4970_v42, %v5098_v32  ;;  %v4369_v25 = vadd.f32 %v4245_v31, %v3835_v22  ;;  %v4451_v42 = vld [vmem:[#allocation2 + $0x2d2] sm:$0xff] }
 0x53f   :  { %5312 = vst [vmem:[#allocation3 + $0x1d1] sm:$0xff] %v5162_v28  ;;  %9324 = vmatmul.msk.f32.gmra.mxu0 %vm37_vm0, %v4450_v33  ;;  %5625 = vmatmul.f32.gmra.mxu1 %v5162_v28  ;;  %v3383_v31 = vld [vmem:[#allocation2 + $0x2d0] sm:$0xff]  ;;  %v5412_v33 = vld [vmem:[#allocation4 + $0x28] sm:$0xff] }
 0x540   :  { %v4903_v1 = vadd.f32 %v4779_v0, %v4369_v25  ;;  %9192 = vmatmul.msk.f32.gmra.mxu2 %vm37_vm0, %v3382_v47  ;;  %v3917_v32 = vld [vmem:[#allocation2 + $0x2d1] sm:$0xff] }
 0x541   :  { %9258 = vmatmul.msk.f32.gmra.mxu3 %vm37_vm0, %v3916_v10  ;;  %5723 = vmatpush.msrb.mxu2 %v5412_v33 }
 0x542   :  { %v4971_v4 = vadd.f32 %v11290_v59, %v4903_v1 }
 0x543   :  { %v3714_v7 = vpop.f32.mrf.mxu2 }
 0x544   :  { %v4248_v3 = vpop.f32.mrf.mxu3  ;;  %vm5035_vm8 = vcmp.ge.f32.partialorder %v4971_v4, 0.0  ;;  %v5099_v49 = vmul.f32 0.2, %v4971_v4  ;;  %v3836_v45 = vadd.f32 %v3714_v7, %v10894_v8  ;;  %v4785_v12 = vpop.f32.mrf.mxu0  ;;  %v4452_v7 = vld [vmem:[#allocation2 + $0x2da] sm:$0xff] }
 0x545   :  { %v11357_v37 = vpop.f32.mrf.mxu1 }
 0x546   :  { %v5163_v22 = vsel %vm5035_vm8, %v4971_v4, %v5099_v49  ;;  %v4370_v0 = vadd.f32 %v4248_v3, %v3836_v45  ;;  %v3384_v49 = vld [vmem:[#allocation2 + $0x2d8] sm:$0xff] }
 0x547   :  { %5313 = vst [vmem:[#allocation3 + $0x1e1] sm:$0xff] %v5163_v22  ;;  %9325 = vmatmul.msk.f32.gmra.mxu0 %vm37_vm0, %v4451_v42  ;;  %5628 = vmatmul.f32.gmra.mxu1 %v5163_v22  ;;  %v3918_v45 = vld [vmem:[#allocation2 + $0x2d9] sm:$0xff] }
 0x548   :  { %v4904_v47 = vadd.f32 %v4782_v50, %v4370_v0  ;;  %9193 = vmatmul.msk.f32.gmra.mxu2 %vm37_vm0, %v3383_v31  ;;  %v5992_v31 = vld [vmem:[#allocation4 + $0x128] sm:$0xff] }
 0x549   :  { %9259 = vmatmul.msk.f32.gmra.mxu3 %vm37_vm0, %v3917_v32 }
 0x54a   :  { %v4972_v8 = vadd.f32 %v11290_v59, %v4904_v47  ;;  %6013 = vmatpush.msrb.mxu3 %v5992_v31 }
 0x54b   :  { %v3717_v10 = vpop.f32.mrf.mxu2 }
 0x54c   :  { %v4251_v28 = vpop.f32.mrf.mxu3  ;;  %vm5036_vm9 = vcmp.ge.f32.partialorder %v4972_v8, 0.0  ;;  %v5100_v25 = vmul.f32 0.2, %v4972_v8  ;;  %v3837_v1 = vadd.f32 %v3717_v10, %v10901_v30  ;;  %v4788_v4 = vpop.f32.mrf.mxu0  ;;  %v4453_v10 = vld [vmem:[#allocation2 + $0x2ea] sm:$0xff] }
 0x54d   :  { %v11364_v3 = vpop.f32.mrf.mxu1 }
 0x54e   :  { %v5164_v50 = vsel %vm5036_vm9, %v4972_v8, %v5100_v25  ;;  %v4371_v42 = vadd.f32 %v4251_v28, %v3837_v1  ;;  %v3385_v25 = vld [vmem:[#allocation2 + $0x2e8] sm:$0xff] }
 0x54f   :  { %5314 = vst [vmem:[#allocation3 + $0x1e9] sm:$0xff] %v5164_v50  ;;  %9326 = vmatmul.msk.f32.gmra.mxu0 %vm37_vm0, %v4452_v7  ;;  %5631 = vmatmul.f32.gmra.mxu1 %v5164_v50  ;;  %v3919_v1 = vld [vmem:[#allocation2 + $0x2e9] sm:$0xff] }
 0x550   :  { %v4905_v32 = vadd.f32 %v4785_v12, %v4371_v42  ;;  %9194 = vmatmul.msk.f32.gmra.mxu2 %vm37_vm0, %v3384_v49  ;;  %v6346_v49 = vld [vmem:[#allocation4 + $0x1a8] sm:$0xff] }
 0x551   :  { %9260 = vmatmul.msk.f32.gmra.mxu3 %vm37_vm0, %v3918_v45  ;;  %v6700_v45 = vld [vmem:[#allocation4 + $0x228] sm:$0xff]  ;;  %6367 = vmatpush.msrb.mxu0 %v6346_v49 }
 0x552   :  { %v4973_v30 = vadd.f32 %v11290_v59, %v4905_v32  ;;  %6721 = vmatpush.msrb.mxu1 %v6700_v45 }
 0x553   :  { %v3720_v22 = vpop.f32.mrf.mxu2 }
 0x554   :  { %v4254_v0 = vpop.f32.mrf.mxu3  ;;  %vm5037_vm10 = vcmp.ge.f32.partialorder %v4973_v30, 0.0  ;;  %v5101_v33 = vmul.f32 0.2, %v4973_v30  ;;  %v3838_v47 = vadd.f32 %v3720_v22, %v10908_v24  ;;  %v4791_v8 = vpop.f32.mrf.mxu0 }
 0x555   :  { %v11371_v28 = vpop.f32.mrf.mxu1 }
 0x556   :  { %v5165_v12 = vsel %vm5037_vm10, %v4973_v30, %v5101_v33  ;;  %v4372_v7 = vadd.f32 %v4254_v0, %v3838_v47  ;;  %v4454_v0 = vld [vmem:[#allocation2 + $0x2f2] sm:$0xff] }
 0x557   :  { %5315 = vst [vmem:[#allocation3 + $0x1f9] sm:$0xff] %v5165_v12  ;;  %9327 = vmatmul.msk.f32.gmra.mxu0 %vm37_vm0, %v4453_v10  ;;  %5634 = vmatmul.f32.gmra.mxu1 %v5165_v12  ;;  %v3386_v47 = vld [vmem:[#allocation2 + $0x2f0] sm:$0xff] }
 0x558   :  { %v4906_v50 = vadd.f32 %v4788_v4, %v4372_v7  ;;  %9195 = vmatmul.msk.f32.gmra.mxu2 %vm37_vm0, %v3385_v25  ;;  %v3920_v4 = vld [vmem:[#allocation2 + $0x2f1] sm:$0xff] }
 0x559   :  { %9261 = vmatmul.msk.f32.gmra.mxu3 %vm37_vm0, %v3919_v1 }
 0x55a   :  { %v4974_v24 = vadd.f32 %v11290_v59, %v4906_v50 }
 0x55b   :  { %v3723_v42 = vpop.f32.mrf.mxu2 }
 0x55c   :  { %v4257_v31 = vpop.f32.mrf.mxu3  ;;  %vm5038_vm11 = vcmp.ge.f32.partialorder %v4974_v24, 0.0  ;;  %v5102_v32 = vmul.f32 0.2, %v4974_v24  ;;  %v3839_v30 = vadd.f32 %v3723_v42, %v10915_v6  ;;  %v4794_v22 = vpop.f32.mrf.mxu0 }
 0x55d   :  { %v11378_v33 = vpop.f32.mrf.mxu1 }
 0x55e   :  { %v5166_v10 = vsel %vm5038_vm11, %v4974_v24, %v5102_v32  ;;  %v4373_v25 = vadd.f32 %v4257_v31, %v3839_v30  ;;  %v4455_v24 = vld [vmem:[#allocation2 + $0x302] sm:$0xff] }
 0x55f   :  { %5316 = vst [vmem:[#allocation3 + $0x201] sm:$0xff] %v5166_v10  ;;  %9328 = vmatmul.msk.f32.gmra.mxu0 %vm37_vm0, %v4454_v0  ;;  %5637 = vmatmul.f32.gmra.mxu1 %v5166_v10  ;;  %v3387_v31 = vld [vmem:[#allocation2 + $0x300] sm:$0xff] }
 0x560   :  { %v4907_v1 = vadd.f32 %v4791_v8, %v4373_v25  ;;  %9196 = vmatmul.msk.f32.gmra.mxu2 %vm37_vm0, %v3386_v47  ;;  %v3921_v32 = vld [vmem:[#allocation2 + $0x301] sm:$0xff] }
 0x561   :  { %9262 = vmatmul.msk.f32.gmra.mxu3 %vm37_vm0, %v3920_v4  ;;  %v5411_v0 = vld [vmem:[#allocation4 + $0x20] sm:$0xff] }
 0x562   :  { %v4975_v12 = vadd.f32 %v11290_v59, %v4907_v1  ;;  %5724 = vmatpush.msrb.mxu2 %v5411_v0 }
 0x563   :  { %v3726_v6 = vpop.f32.mrf.mxu2 }
 0x564   :  { %v4260_v7 = vpop.f32.mrf.mxu3  ;;  %vm5039_vm12 = vcmp.ge.f32.partialorder %v4975_v12, 0.0  ;;  %v5103_v49 = vmul.f32 0.2, %v4975_v12  ;;  %v3840_v45 = vadd.f32 %v3726_v6, %v10922_v61  ;;  %v4797_v50 = vpop.f32.mrf.mxu0  ;;  %v3306_v61 = vadd.f32 %v10993_v17, %v10932_v54  ;;  %v5991_v54 = vld [vmem:[#allocation4 + $0x120] sm:$0xff] }
 0x565   :  { %v11385_v42 = vpop.f32.mrf.mxu1  ;;  %6014 = vmatpush.msrb.mxu3 %v5991_v54 }
 0x566   :  { %v5167_v30 = vsel %vm5039_vm12, %v4975_v12, %v5103_v49  ;;  %v4374_v8 = vadd.f32 %v4260_v7, %v3840_v45  ;;  %v4456_v7 = vld [vmem:[#allocation2 + $0x30a] sm:$0xff] }
 0x567   :  { %5317 = vst [vmem:[#allocation3 + $0x211] sm:$0xff] %v5167_v30  ;;  %9329 = vmatmul.msk.f32.gmra.mxu0 %vm37_vm0, %v4455_v24  ;;  %5640 = vmatmul.f32.gmra.mxu1 %v5167_v30  ;;  %v3922_v45 = vld [vmem:[#allocation2 + $0x309] sm:$0xff] }
 0x568   :  { %v4908_v47 = vadd.f32 %v4794_v22, %v4374_v8  ;;  %9197 = vmatmul.msk.f32.gmra.mxu2 %vm37_vm0, %v3387_v31  ;;  %v3388_v22 = vld [vmem:[#allocation2 + $0x308] sm:$0xff] }
 0x569   :  { %9263 = vmatmul.msk.f32.gmra.mxu3 %vm37_vm0, %v3921_v32  ;;  %v3307_v32 = vadd.f32 %v11001_v19, %v10943_v14  ;;  %v6345_v14 = vld [vmem:[#allocation4 + $0x1a0] sm:$0xff] }
 0x56a   :  { %v4976_v4 = vadd.f32 %v11290_v59, %v4908_v47  ;;  %v6699_v19 = vld [vmem:[#allocation4 + $0x220] sm:$0xff]  ;;  %6368 = vmatpush.msrb.mxu0 %v6345_v14 }
 0x56b   :  { %v3729_v10 = vpop.f32.mrf.mxu2  ;;  %6722 = vmatpush.msrb.mxu1 %v6699_v19  ;;  %v5409_v19 = vld [vmem:[#allocation4 + $0x10] sm:$0xff] }
 0x56c   :  { %v4263_v25 = vpop.f32.mrf.mxu3  ;;  %vm5040_vm13 = vcmp.ge.f32.partialorder %v4976_v4, 0.0  ;;  %v5104_v1 = vmul.f32 0.2, %v4976_v4  ;;  %v3841_v12 = vadd.f32 %v3729_v10, %v3306_v61  ;;  %v4800_v6 = vpop.f32.mrf.mxu0  ;;  %v4457_v10 = vld [vmem:[#allocation2 + $0x31a] sm:$0xff] }
 0x56d   :  { %v11393_v49 = vpop.f32.mrf.mxu1 }
 0x56e   :  { %v5168_v24 = vsel %vm5040_vm13, %v4976_v4, %v5104_v1  ;;  %v4375_v31 = vadd.f32 %v4263_v25, %v3841_v12  ;;  %v3923_v1 = vld [vmem:[#allocation2 + $0x319] sm:$0xff] }
 0x56f   :  { %5318 = vst [vmem:[#allocation3 + $0x219] sm:$0xff] %v5168_v24  ;;  %9330 = vmatmul.msk.f32.gmra.mxu0 %vm37_vm0, %v4456_v7  ;;  %5643 = vmatmul.f32.gmra.mxu1 %v5168_v24 }
 0x570   :  { %v4909_v17 = vadd.f32 %v4797_v50, %v4375_v31  ;;  %9198 = vmatmul.msk.f32.gmra.mxu2 %vm37_vm0, %v3388_v22  ;;  %v3389_v50 = vld [vmem:[#allocation2 + $0x318] sm:$0xff] }
 0x571   :  { %9264 = vmatmul.msk.f32.gmra.mxu3 %vm37_vm0, %v3922_v45  ;;  %v3308_v45 = vadd.f32 %v11010_v9, %v10951_v5  ;;  %v5410_v9 = vld [vmem:[#allocation4 + $0x18] sm:$0xff] }
 0x572   :  { %v4977_v30 = vadd.f32 %v11290_v59, %v4909_v17  ;;  %5725 = vmatpush.msrb.mxu2 %v5410_v9 }
 0x573   :  { %v3732_v8 = vpop.f32.mrf.mxu2 }
 0x574   :  { %v4266_v0 = vpop.f32.mrf.mxu3  ;;  %vm5041_vm14 = vcmp.ge.f32.partialorder %v4977_v30, 0.0  ;;  %v5105_v47 = vmul.f32 0.2, %v4977_v30  ;;  %v3842_v61 = vadd.f32 %v3732_v8, %v3307_v32  ;;  %v4803_v4 = vpop.f32.mrf.mxu0  ;;  %v4458_v8 = vld [vmem:[#allocation2 + $0x322] sm:$0xff]  ;;  %5726 = vmatpush.msrb.mxu2 %v5409_v19  ;;  %v12970_v19 = vld [vmem:[#allocation16_spill] sm:$0xff] }
 0x575   :  { %v11401_v25 = vpop.f32.mrf.mxu1 }
 0x576   :  { %v5169_v12 = vsel %vm5041_vm14, %v4977_v30, %v5105_v47  ;;  %v4376_v7 = vadd.f32 %v4266_v0, %v3842_v61  ;;  %v3924_v47 = vld [vmem:[#allocation2 + $0x321] sm:$0xff] }
 0x577   :  { %5319 = vst [vmem:[#allocation3 + $0x229] sm:$0xff] %v5169_v12  ;;  %9331 = vmatmul.msk.f32.gmra.mxu0 %vm37_vm0, %v4457_v10  ;;  %5646 = vmatmul.f32.gmra.mxu1 %v5169_v12  ;;  %v12969_v12 = vld [vmem:[#allocation22_spill] sm:$0xff] }
 0x578   :  { %v4910_v22 = vadd.f32 %v4800_v6, %v4376_v7  ;;  %9199 = vmatmul.msk.f32.gmra.mxu2 %vm37_vm0, %v3389_v50  ;;  %v3390_v6 = vld [vmem:[#allocation2 + $0x320] sm:$0xff]  ;;  %v6344_v50 = vld [vmem:[#allocation4 + $0x198] sm:$0xff]  ;;  %v3309_v7 = vadd.f32 %v12969_v12, %v10958_v21  ;;  %v6342_v21 = vld [vmem:[#allocation4 + $0x188] sm:$0xff] }
 0x579   :  { %9265 = vmatmul.msk.f32.gmra.mxu3 %vm37_vm0, %v3923_v1  ;;  %6369 = vmatpush.msrb.mxu0 %v6344_v50  ;;  %v5990_v1 = vld [vmem:[#allocation4 + $0x118] sm:$0xff]  ;;  %v5407_v50 = vld [vmem:[#allocation4] sm:$0xff] }
 0x57a   :  { %v4978_v24 = vadd.f32 %v11290_v59, %v4910_v22  ;;  %6015 = vmatpush.msrb.mxu3 %v5990_v1  ;;  %v6343_v22 = vld [vmem:[#allocation4 + $0x190] sm:$0xff]  ;;  %v6341_v1 = vld [vmem:[#allocation4 + $0x180] sm:$0xff] }
 0x57b   :  { %v3735_v31 = vpop.f32.mrf.mxu2  ;;  %6370 = vmatpush.msrb.mxu0 %v6343_v22  ;;  %v5987_v12 = vld [vmem:[#allocation4 + $0x100] sm:$0xff]  ;;  %v12971_v22 = vld [vmem:[#allocation40_spill] sm:$0xff] }
 0x57c   :  { %v4269_v54 = vpop.f32.mrf.mxu3  ;;  %vm5042_vm15 = vcmp.ge.f32.partialorder %v4978_v24, 0.0  ;;  %v5106_v17 = vmul.f32 0.2, %v4978_v24  ;;  %v3843_v32 = vadd.f32 %v3735_v31, %v3308_v45  ;;  %v4806_v30 = vpop.f32.mrf.mxu0 }
 0x57d   :  { %v11409_v0 = vpop.f32.mrf.mxu1  ;;  %6371 = vmatpush.msrb.mxu0 %v6342_v21  ;;  %v3392_v21 = vld [vmem:[#allocation2 + $0x338] sm:$0xff] }
 0x57e   :  { %v5170_v61 = vsel %vm5042_vm15, %v4978_v24, %v5106_v17  ;;  %v4377_v10 = vadd.f32 %v4269_v54, %v3843_v32  ;;  %v4459_v32 = vld [vmem:[#allocation2 + $0x332] sm:$0xff] }
 0x57f   :  { %5320 = vst [vmem:[#allocation3 + $0x231] sm:$0xff] %v5170_v61  ;;  %9332 = vmatmul.msk.f32.gmra.mxu0 %vm37_vm0, %v4458_v8  ;;  %5649 = vmatmul.f32.gmra.mxu1 %v5170_v61  ;;  %v3925_v61 = vld [vmem:[#allocation2 + $0x331] sm:$0xff] }
 0x580   :  { %v4911_v5 = vadd.f32 %v4803_v4, %v4377_v10  ;;  %9200 = vmatmul.msk.f32.gmra.mxu2 %vm37_vm0, %v3390_v6  ;;  %v5989_v4 = vld [vmem:[#allocation4 + $0x110] sm:$0xff]  ;;  %v5408_v6 = vld [vmem:[#allocation4 + $0x8] sm:$0xff]  ;;  %6372 = vmatpush.msrb.mxu0 %v6341_v1 }
 0x581   :  { %9266 = vmatmul.msk.f32.gmra.mxu3 %vm37_vm0, %v3924_v47  ;;  %v3391_v47 = vld [vmem:[#allocation2 + $0x330] sm:$0xff]  ;;  %5727 = vmatpush.msrb.mxu2 %v5408_v6  ;;  %v5988_v10 = vld [vmem:[#allocation4 + $0x108] sm:$0xff]  ;;  %v4460_v6 = vld [vmem:[#allocation2 + $0x33a] sm:$0xff] }
 0x582   :  { %v4979_v14 = vadd.f32 %v11290_v59, %v4911_v5  ;;  %6016 = vmatpush.msrb.mxu3 %v5989_v4 }
 0x583   :  { %v3738_v45 = vpop.f32.mrf.mxu2  ;;  %5728 = vmatpush.msrb.mxu2 %v5407_v50  ;;  %v12973_v50 = vld [vmem:[#allocation29_spill] sm:$0xff] }
 0x584   :  { %v4272_v24 = vpop.f32.mrf.mxu3  ;;  %vm5043_vm1 = vcmp.ge.f32.partialorder %v4979_v14, 0.0  ;;  %v5107_v31 = vmul.f32 0.2, %v4979_v14  ;;  %v3844_v54 = vadd.f32 %v3738_v45, %v3309_v7  ;;  %v4809_v17 = vpop.f32.mrf.mxu0  ;;  %6017 = vmatpush.msrb.mxu3 %v5988_v10  ;;  %v3310_v45 = vadd.f32 %v12971_v22, %v12970_v19 }
 0x585   :  { %v11417_v8 = vpop.f32.mrf.mxu1 }
 0x586   :  { %v5171_v5 = vsel %vm5043_vm1, %v4979_v14, %v5107_v31  ;;  %v4378_v9 = vadd.f32 %v4272_v24, %v3844_v54  ;;  %6018 = vmatpush.msrb.mxu3 %v5987_v12 }
 0x587   :  { %5321 = vst [vmem:[#allocation3 + $0x241] sm:$0xff] %v5171_v5  ;;  %9333 = vmatmul.msk.f32.gmra.mxu0 %vm37_vm0, %v4459_v32  ;;  %5652 = vmatmul.f32.gmra.mxu1 %v5171_v5 }
 0x588   :  { %v4912_v7 = vadd.f32 %v4806_v30, %v4378_v9  ;;  %9201 = vmatmul.msk.f32.gmra.mxu2 %vm37_vm0, %v3391_v47  ;;  %v3926_v47 = vld [vmem:[#allocation2 + $0x339] sm:$0xff] }
 0x589   :  { %9267 = vmatmul.msk.f32.gmra.mxu3 %vm37_vm0, %v3925_v61  ;;  %v12972_v9 = vld [vmem:[#allocation17_spill] sm:$0xff] }
 0x58a   :  { %v4980_v14 = vadd.f32 %v11290_v59, %v4912_v7  ;;  %v3311_v1 = vadd.f32 %v12973_v50, %v12972_v9 }
 0x58b   :  { %v3741_v24 = vpop.f32.mrf.mxu2 }
 0x58c   :  { %v4275_v4 = vpop.f32.mrf.mxu3  ;;  %vm5044_vm2 = vcmp.ge.f32.partialorder %v4980_v14, 0.0  ;;  %v5108_v31 = vmul.f32 0.2, %v4980_v14  ;;  %v3845_v54 = vadd.f32 %v3741_v24, %v3310_v45  ;;  %v4812_v32 = vpop.f32.mrf.mxu0  ;;  %v4461_v24 = vld [vmem:[#allocation2 + $0x34a] sm:$0xff] }
 0x58d   :  { %v11425_v30 = vpop.f32.mrf.mxu1 }
 0x58e   :  { %v5172_v61 = vsel %vm5044_vm2, %v4980_v14, %v5108_v31  ;;  %v4379_v10 = vadd.f32 %v4275_v4, %v3845_v54  ;;  %v3393_v31 = vld [vmem:[#allocation2 + $0x348] sm:$0xff] }
 0x58f   :  { %5322 = vst [vmem:[#allocation3 + $0x249] sm:$0xff] %v5172_v61  ;;  %9334 = vmatmul.msk.f32.gmra.mxu0 %vm37_vm0, %v4460_v6  ;;  %5655 = vmatmul.f32.gmra.mxu1 %v5172_v61  ;;  %v12975_v61 = vld [vmem:[#allocation28_spill] sm:$0xff] }
 0x590   :  { %v4913_v5 = vadd.f32 %v4809_v17, %v4379_v10  ;;  %9202 = vmatmul.msk.f32.gmra.mxu2 %vm37_vm0, %v3392_v21  ;;  %v3927_v17 = vld [vmem:[#allocation2 + $0x349] sm:$0xff]  ;;  %v6698_v21 = vld [vmem:[#allocation4 + $0x218] sm:$0xff] }
 0x591   :  { %9268 = vmatmul.msk.f32.gmra.mxu3 %vm37_vm0, %v3926_v47  ;;  %6723 = vmatpush.msrb.mxu1 %v6698_v21  ;;  %v12976_v10 = vld [vmem:[#allocation45_spill] sm:$0xff]  ;;  %v12979_v21 = vld [vmem:[#allocation34_spill] sm:$0xff] }
 0x592   :  { %v4981_v12 = vadd.f32 %v11290_v59, %v4913_v5  ;;  %v3312_v5 = vadd.f32 %v12976_v10, %v12975_v61 }
 0x593   :  { %v3744_v7 = vpop.f32.mrf.mxu2 }
 0x594   :  { %v4278_v19 = vpop.f32.mrf.mxu3  ;;  %vm5045_vm3 = vcmp.ge.f32.partialorder %v4981_v12, 0.0  ;;  %v5109_v22 = vmul.f32 0.2, %v4981_v12  ;;  %v3846_v45 = vadd.f32 %v3744_v7, %v3311_v1  ;;  %v4815_v14 = vpop.f32.mrf.mxu0 }
 0x595   :  { %v11433_v4 = vpop.f32.mrf.mxu1 }
 0x596   :  { %12974 = vst [vmem:[#allocation52_spill] sm:$0xff] %v11433_v4  ;;  %v5173_v54 = vsel %vm5045_vm3, %v4981_v12, %v5109_v22  ;;  %v4380_v6 = vadd.f32 %v4278_v19, %v3846_v45  ;;  %v4462_v22 = vld [vmem:[#allocation2 + $0x352] sm:$0xff] }
 0x597   :  { %5323 = vst [vmem:[#allocation3 + $0x259] sm:$0xff] %v5173_v54  ;;  %9335 = vmatmul.msk.f32.gmra.mxu0 %vm37_vm0, %v4461_v24  ;;  %5658 = vmatmul.f32.gmra.mxu1 %v5173_v54  ;;  %v3928_v24 = vld [vmem:[#allocation2 + $0x351] sm:$0xff] }
 0x598   :  { %v4914_v47 = vadd.f32 %v4812_v32, %v4380_v6  ;;  %9203 = vmatmul.msk.f32.gmra.mxu2 %vm37_vm0, %v3393_v31  ;;  %v3394_v32 = vld [vmem:[#allocation2 + $0x350] sm:$0xff]  ;;  %v12978_v6 = vld [vmem:[#allocation30_spill] sm:$0xff] }
 0x599   :  { %9269 = vmatmul.msk.f32.gmra.mxu3 %vm37_vm0, %v3927_v17 }
 0x59a   :  { %v4982_v9 = vadd.f32 %v11290_v59, %v4914_v47  ;;  %v3313_v47 = vadd.f32 %v12979_v21, %v12978_v6 }
 0x59b   :  { %v3747_v50 = vpop.f32.mrf.mxu2 }
 0x59c   :  { %v4281_v1 = vpop.f32.mrf.mxu3  ;;  %vm5046_vm4 = vcmp.ge.f32.partialorder %v4982_v9, 0.0  ;;  %v5110_v12 = vmul.f32 0.2, %v4982_v9  ;;  %v3847_v7 = vadd.f32 %v3747_v50, %v3312_v5  ;;  %v4818_v19 = vpop.f32.mrf.mxu0 }
 0x59d   :  { %v11441_v45 = vpop.f32.mrf.mxu1 }
 0x59e   :  { %12977 = vst [vmem:[#allocation54_spill] sm:$0xff] %v11441_v45  ;;  %v5174_v31 = vsel %vm5046_vm4, %v4982_v9, %v5110_v12  ;;  %v4381_v54 = vadd.f32 %v4281_v1, %v3847_v7  ;;  %v5343_v7 = vld [vmem:[#allocation3] sm:$0xff] }
 0x59f   :  { %5324 = vst [vmem:[#allocation3 + $0x261] sm:$0xff] %v5174_v31  ;;  %9336 = vmatmul.msk.f32.gmra.mxu0 %vm37_vm0, %v4462_v22  ;;  %5661 = vmatmul.f32.gmra.mxu1 %v5174_v31  ;;  %v5922_v22 = vld [vmem:[#allocation3 + $0x2] sm:$0xff] }
 0x5a0   :  { %v4915_v17 = vadd.f32 %v4815_v14, %v4381_v54  ;;  %9204 = vmatmul.msk.f32.gmra.mxu2 %vm37_vm0, %v3394_v32  ;;  %v6276_v32 = vld [vmem:[#allocation3 + $0x18] sm:$0xff]  ;;  %v12981_v54 = vld [vmem:[#allocation19_spill] sm:$0xff] }
 0x5a1   :  { %9270 = vmatmul.msk.f32.gmra.mxu3 %vm37_vm0, %v3928_v24 }
 0x5a2   :  { %v4983_v61 = vadd.f32 %v11290_v59, %v4915_v17  ;;  %v12982_v17 = vld [vmem:[#allocation37_spill] sm:$0xff] }
 0x5a3   :  { %v3750_v10 = vpop.f32.mrf.mxu2  ;;  %v3314_v6 = vadd.f32 %v12982_v17, %v12981_v54 }
 0x5a4   :  { %v4284_v5 = vpop.f32.mrf.mxu3  ;;  %vm5047_vm5 = vcmp.ge.f32.partialorder %v4983_v61, 0.0  ;;  %v5111_v50 = vmul.f32 0.2, %v4983_v61  ;;  %v3848_v9 = vadd.f32 %v3750_v10, %v3313_v47  ;;  %v4821_v1 = vpop.f32.mrf.mxu0 }
 0x5a5   :  { %v11449_v12 = vpop.f32.mrf.mxu1 }
 0x5a6   :  { %12980 = vst [vmem:[#allocation57_spill] sm:$0xff] %v11449_v12  ;;  %v5175_v14 = vsel %vm5047_vm5, %v4983_v61, %v5111_v50  ;;  %v4382_v31 = vadd.f32 %v4284_v5, %v3848_v9  ;;  %v5923_v5 = vld [vmem:[#allocation3 + $0xa] sm:$0xff] }
 0x5a7   :  { %5325 = vst [vmem:[#allocation3 + $0x271] sm:$0xff] %v5175_v14  ;;  %6373 = vmatmul.f32.vlgmr.msrb.gmra.mxu0 %v6276_v32  ;;  %5664 = vmatmul.f32.gmra.mxu1 %v5175_v14  ;;  %v6277_v14 = vld [vmem:[#allocation3 + $0x20] sm:$0xff] }
 0x5a8   :  { %v4916_v24 = vadd.f32 %v4818_v19, %v4382_v31  ;;  %5729 = vmatmul.f32.vlgmr.msrb.gmra.mxu2 %v5343_v7  ;;  %v9347_v7 = vld [vmem:[#allocation3 + $0x8] sm:$0xff]  ;;  %v12985_v31 = vld [vmem:[#allocation53_spill] sm:$0xff] }
 0x5a9   :  { %6019 = vmatmul.f32.vlgmr.msrb.gmra.mxu3 %v5922_v22  ;;  %v12984_v22 = vld [vmem:[#allocation20_spill] sm:$0xff] }
 0x5aa   :  { %v4984_v21 = vadd.f32 %v11290_v59, %v4916_v24  ;;  %v3315_v24 = vadd.f32 %v12985_v31, %v12984_v22  ;;  %v11466_v22 = vld [vmem:[%s12764_s2] ss:$0 sm:$0xff] }
 0x5ab   :  { %v3753_v47 = vpop.f32.mrf.mxu2 }
 0x5ac   :  { %v4287_v10 = vpop.f32.mrf.mxu3  ;;  %vm5048_vm0 = vcmp.ge.f32.partialorder %v4984_v21, 0.0  ;;  %v5112_v12 = vmul.f32 0.2, %v4984_v21  ;;  %v3849_v45 = vadd.f32 %v3753_v47, %v3314_v6  ;;  %v4824_v4 = vpop.f32.mrf.mxu0 }
 0x5ad   :  { %v11454_v61 = vpop.f32.mrf.mxu1 }
 0x5ae   :  { %12983 = vst [vmem:[#allocation59_spill] sm:$0xff] %v11454_v61  ;;  %v5176_v50 = vsel %vm5048_vm0, %v4984_v21, %v5112_v12  ;;  %v4383_v9 = vadd.f32 %v4287_v10, %v3849_v45 }
 0x5af   :  { %5326 = vst [vmem:[#allocation3 + $0x279] sm:$0xff] %v5176_v50  ;;  %6376 = vmatmul.f32.gmra.mxu0 %v6277_v14  ;;  %5667 = vmatmul.f32.gmra.mxu1 %v5176_v50  ;;  %v6278_v50 = vld [vmem:[#allocation3 + $0x30] sm:$0xff] }
 0x5b0   :  { %v4917_v19 = vadd.f32 %v4821_v1, %v4383_v9  ;;  %5732 = vmatmul.f32.gmra.mxu2 %v9347_v7  ;;  %v5924_v1 = vld [vmem:[#allocation3 + $0x1a] sm:$0xff] }
 0x5b1   :  { %6022 = vmatmul.f32.gmra.mxu3 %v5923_v5  ;;  %v6697_v5 = vld [vmem:[#allocation4 + $0x210] sm:$0xff] }
 0x5b2   :  { %v4985_v54 = vadd.f32 %v11290_v59, %v4917_v19  ;;  %6724 = vmatpush.msrb.mxu1 %v6697_v5  ;;  %v12987_v59 = vld [vmem:[#allocation33_spill] sm:$0xff]  ;;  %v12988_v19 = vld [vmem:[#allocation42_spill] sm:$0xff]  ;;  %v12990_v5 = vld [vmem:[#allocation35_spill] sm:$0xff] }
 0x5b3   :  { %v3756_v17 = vpop.f32.mrf.mxu2  ;;  %v3316_v7 = vadd.f32 %v12988_v19, %v12987_v59 }
 0x5b4   :  { %v4290_v6 = vpop.f32.mrf.mxu3  ;;  %vm5049_vm6 = vcmp.ge.f32.partialorder %v4985_v54, 0.0  ;;  %v5113_v47 = vmul.f32 0.2, %v4985_v54  ;;  %v3850_v61 = vadd.f32 %v3756_v17, %v3315_v24  ;;  %v4827_v12 = vpop.f32.mrf.mxu0 }
 0x5b5   :  { %v11459_v45 = vpop.f32.mrf.mxu1 }
 0x5b6   :  { %12986 = vst [vmem:[#allocation61_spill] sm:$0xff] %v11459_v45  ;;  %v5177_v21 = vsel %vm5049_vm6, %v4985_v54, %v5113_v47  ;;  %v4384_v10 = vadd.f32 %v4290_v6, %v3850_v61  ;;  %v6280_v45 = vld [vmem:[#allocation3 + $0x48] sm:$0xff] }
 0x5b7   :  { %5327 = vst [vmem:[#allocation3 + $0x289] sm:$0xff] %v5177_v21  ;;  %6379 = vmatmul.f32.gmra.mxu0 %v6278_v50  ;;  %5670 = vmatmul.f32.gmra.mxu1 %v5177_v21  ;;  %v6279_v21 = vld [vmem:[#allocation3 + $0x38] sm:$0xff] }
 0x5b8   :  { %v4918_v9 = vadd.f32 %v4824_v4, %v4384_v10  ;;  %5735 = vmatmul.f32.gmra.mxu2 %v6276_v32  ;;  %v5925_v10 = vld [vmem:[#allocation3 + $0x22] sm:$0xff] }
 0x5b9   :  { %6025 = vmatmul.f32.gmra.mxu3 %v5924_v1 }
 0x5ba   :  { %v4986_v61 = vadd.f32 %v11466_v22, %v4918_v9  ;;  %v3317_v9 = vadd.f32 %v11095_v36, %v12990_v5  ;;  %v12991_v36 = vld [vmem:[#allocation24_spill] sm:$0xff] }
 0x5bb   :  { %v3759_v31 = vpop.f32.mrf.mxu2 }
 0x5bc   :  { %v4293_v24 = vpop.f32.mrf.mxu3  ;;  %vm5050_vm7 = vcmp.ge.f32.partialorder %v4986_v61, 0.0  ;;  %v5114_v54 = vmul.f32 0.2, %v4986_v61  ;;  %v3851_v17 = vadd.f32 %v3759_v31, %v3316_v7  ;;  %v4830_v6 = vpop.f32.mrf.mxu0 }
 0x5bd   :  { %v11469_v4 = vpop.f32.mrf.mxu1 }
 0x5be   :  { %12989 = vst [vmem:[#allocation62_spill] sm:$0xff] %v11469_v4  ;;  %v5178_v32 = vsel %vm5050_vm7, %v4986_v61, %v5114_v54  ;;  %v4385_v47 = vadd.f32 %v4293_v24, %v3851_v17 }
 0x5bf   :  { %5328 = vst [vmem:[#allocation3 + $0x291] sm:$0xff] %v5178_v32  ;;  %6382 = vmatmul.f32.gmra.mxu0 %v6279_v21  ;;  %5673 = vmatmul.f32.gmra.mxu1 %v5178_v32  ;;  %v3318_v32 = vadd.f32 %v11107_v26, %v12991_v36  ;;  %v12993_v26 = vld [vmem:[#allocation38_spill] sm:$0xff] }
 0x5c0   :  { %v4919_v1 = vadd.f32 %v4827_v12, %v4385_v47  ;;  %5738 = vmatmul.f32.gmra.mxu2 %v6277_v14  ;;  %v5926_v14 = vld [vmem:[#allocation3 + $0x32] sm:$0xff] }
 0x5c1   :  { %6028 = vmatmul.f32.gmra.mxu3 %v5925_v10 }
 0x5c2   :  { %v4987_v59 = vadd.f32 %v11466_v22, %v4919_v1 }
 0x5c3   :  { %v3762_v19 = vpop.f32.mrf.mxu2 }
 0x5c4   :  { %v4296_v7 = vpop.f32.mrf.mxu3  ;;  %vm5051_vm8 = vcmp.ge.f32.partialorder %v4987_v59, 0.0  ;;  %v5115_v31 = vmul.f32 0.2, %v4987_v59  ;;  %v3852_v4 = vadd.f32 %v3762_v19, %v3317_v9  ;;  %v4833_v61 = vpop.f32.mrf.mxu0 }
 0x5c5   :  { %v11474_v24 = vpop.f32.mrf.mxu1 }
 0x5c6   :  { %v5179_v54 = vsel %vm5051_vm8, %v4987_v59, %v5115_v31  ;;  %v4386_v17 = vadd.f32 %v4296_v7, %v3852_v4  ;;  %v6281_v31 = vld [vmem:[#allocation3 + $0x50] sm:$0xff] }
 0x5c7   :  { %5329 = vst [vmem:[#allocation3 + $0x2a1] sm:$0xff] %v5179_v54  ;;  %6385 = vmatmul.f32.gmra.mxu0 %v6280_v45  ;;  %5676 = vmatmul.f32.gmra.mxu1 %v5179_v54  ;;  %v12994_v54 = vld [vmem:[#allocation49_spill] sm:$0xff] }
 0x5c8   :  { %v4920_v12 = vadd.f32 %v4830_v6, %v4386_v17  ;;  %5741 = vmatmul.f32.gmra.mxu2 %v6278_v50  ;;  %v5927_v50 = vld [vmem:[#allocation3 + $0x3a] sm:$0xff]  ;;  %v3319_v17 = vadd.f32 %v12994_v54, %v12993_v26 }
 0x5c9   :  { %6031 = vmatmul.f32.gmra.mxu3 %v5926_v14 }
 0x5ca   :  { %v4988_v47 = vadd.f32 %v11466_v22, %v4920_v12 }
 0x5cb   :  { %v3765_v10 = vpop.f32.mrf.mxu2 }
 0x5cc   :  { %v4299_v1 = vpop.f32.mrf.mxu3  ;;  %vm5052_vm9 = vcmp.ge.f32.partialorder %v4988_v47, 0.0  ;;  %v5116_v5 = vmul.f32 0.2, %v4988_v47  ;;  %v3853_v9 = vadd.f32 %v3765_v10, %v3318_v32  ;;  %v4836_v59 = vpop.f32.mrf.mxu0 }
 0x5cd   :  { %v11479_v4 = vpop.f32.mrf.mxu1 }
 0x5ce   :  { %12992 = vst [vmem:[#allocation64_spill] sm:$0xff] %v11479_v4  ;;  %v5180_v19 = vsel %vm5052_vm9, %v4988_v47, %v5116_v5  ;;  %v4387_v7 = vadd.f32 %v4299_v1, %v3853_v9  ;;  %v6282_v4 = vld [vmem:[#allocation3 + $0x60] sm:$0xff] }
 0x5cf   :  { %5330 = vst [vmem:[#allocation3 + $0x2a9] sm:$0xff] %v5180_v19  ;;  %6388 = vmatmul.f32.gmra.mxu0 %v6281_v31  ;;  %5679 = vmatmul.f32.gmra.mxu1 %v5180_v19 }
 0x5d0   :  { %v4921_v6 = vadd.f32 %v4833_v61, %v4387_v7  ;;  %5744 = vmatmul.f32.gmra.mxu2 %v6279_v21  ;;  %v5928_v21 = vld [vmem:[#allocation3 + $0x4a] sm:$0xff] }
 0x5d1   :  { %6034 = vmatmul.f32.gmra.mxu3 %v5927_v50  ;;  %v6696_v61 = vld [vmem:[#allocation4 + $0x208] sm:$0xff] }
 0x5d2   :  { %v4989_v14 = vadd.f32 %v11466_v22, %v4921_v6  ;;  %6725 = vmatpush.msrb.mxu1 %v6696_v61  ;;  %v12995_v7 = vld [vmem:[#allocation27_spill] sm:$0xff] }
 0x5d3   :  { %v3768_v12 = vpop.f32.mrf.mxu2  ;;  %v3320_v50 = vadd.f32 %v11127_v55, %v12995_v7  ;;  %v12996_v55 = vld [vmem:[#allocation43_spill] sm:$0xff] }
 0x5d4   :  { %v4302_v36 = vpop.f32.mrf.mxu3  ;;  %vm5053_vm10 = vcmp.ge.f32.partialorder %v4989_v14, 0.0  ;;  %v5117_v32 = vmul.f32 0.2, %v4989_v14  ;;  %v3854_v10 = vadd.f32 %v3768_v12, %v3319_v17  ;;  %v4839_v47 = vpop.f32.mrf.mxu0 }
 0x5d5   :  { %v11484_v1 = vpop.f32.mrf.mxu1 }
 0x5d6   :  { %v5181_v5 = vsel %vm5053_vm10, %v4989_v14, %v5117_v32  ;;  %v4388_v9 = vadd.f32 %v4302_v36, %v3854_v10 }
 0x5d7   :  { %5331 = vst [vmem:[#allocation3 + $0x2b9] sm:$0xff] %v5181_v5  ;;  %6391 = vmatmul.f32.gmra.mxu0 %v6282_v4  ;;  %5682 = vmatmul.f32.gmra.mxu1 %v5181_v5  ;;  %v6283_v5 = vld [vmem:[#allocation3 + $0x68] sm:$0xff] }
 0x5d8   :  { %v4922_v19 = vadd.f32 %v4836_v59, %v4388_v9  ;;  %5747 = vmatmul.f32.gmra.mxu2 %v6280_v45  ;;  %v5929_v45 = vld [vmem:[#allocation3 + $0x52] sm:$0xff]  ;;  %v3321_v9 = vadd.f32 %v11135_v29, %v12996_v55 }
 0x5d9   :  { %6037 = vmatmul.f32.gmra.mxu3 %v5928_v21  ;;  %v12997_v29 = vld [vmem:[#allocation32_spill] sm:$0xff] }
 0x5da   :  { %v4990_v6 = vadd.f32 %v11466_v22, %v4922_v19 }
 0x5db   :  { %v3771_v26 = vpop.f32.mrf.mxu2 }
 0x5dc   :  { %v4305_v54 = vpop.f32.mrf.mxu3  ;;  %vm5054_vm11 = vcmp.ge.f32.partialorder %v4990_v6, 0.0  ;;  %v5118_v17 = vmul.f32 0.2, %v4990_v6  ;;  %v3855_v14 = vadd.f32 %v3771_v26, %v3320_v50  ;;  %v4842_v12 = vpop.f32.mrf.mxu0 }
 0x5dd   :  { %v11489_v36 = vpop.f32.mrf.mxu1 }
 0x5de   :  { %v5182_v32 = vsel %vm5054_vm11, %v4990_v6, %v5118_v17  ;;  %v4389_v10 = vadd.f32 %v4305_v54, %v3855_v14  ;;  %v6284_v14 = vld [vmem:[#allocation3 + $0x78] sm:$0xff] }
 0x5df   :  { %5332 = vst [vmem:[#allocation3 + $0x2c1] sm:$0xff] %v5182_v32  ;;  %6394 = vmatmul.f32.gmra.mxu0 %v6283_v5  ;;  %5685 = vmatmul.f32.gmra.mxu1 %v5182_v32  ;;  %v3322_v32 = vadd.f32 %v11144_v58, %v12997_v29  ;;  %v12998_v58 = vld [vmem:[#allocation48_spill] sm:$0xff] }
 0x5e0   :  { %v4923_v59 = vadd.f32 %v4839_v47, %v4389_v10  ;;  %5750 = vmatmul.f32.gmra.mxu2 %v6281_v31  ;;  %v5930_v31 = vld [vmem:[#allocation3 + $0x62] sm:$0xff] }
 0x5e1   :  { %6040 = vmatmul.f32.gmra.mxu3 %v5929_v45 }
 0x5e2   :  { %v4991_v21 = vadd.f32 %v11466_v22, %v4923_v59 }
 0x5e3   :  { %v3774_v61 = vpop.f32.mrf.mxu2 }
 0x5e4   :  { %v4308_v19 = vpop.f32.mrf.mxu3  ;;  %vm5055_vm12 = vcmp.ge.f32.partialorder %v4991_v21, 0.0  ;;  %v5119_v7 = vmul.f32 0.2, %v4991_v21  ;;  %v3856_v50 = vadd.f32 %v3774_v61, %v3321_v9  ;;  %v4845_v6 = vpop.f32.mrf.mxu0 }
 0x5e5   :  { %v11494_v26 = vpop.f32.mrf.mxu1 }
 0x5e6   :  { %v5183_v54 = vsel %vm5055_vm12, %v4991_v21, %v5119_v7  ;;  %v4390_v17 = vadd.f32 %v4308_v19, %v3856_v50  ;;  %v6285_v50 = vld [vmem:[#allocation3 + $0x80] sm:$0xff] }
 0x5e7   :  { %5333 = vst [vmem:[#allocation3 + $0x2d1] sm:$0xff] %v5183_v54  ;;  %6397 = vmatmul.f32.gmra.mxu0 %v6284_v14  ;;  %5688 = vmatmul.f32.gmra.mxu1 %v5183_v54  ;;  %v3323_v54 = vadd.f32 %v11152_v60, %v12998_v58  ;;  %v12999_v60 = vld [vmem:[#allocation50_spill] sm:$0xff] }
 0x5e8   :  { %v4924_v47 = vadd.f32 %v4842_v12, %v4390_v17  ;;  %5753 = vmatmul.f32.gmra.mxu2 %v6282_v4  ;;  %v5931_v4 = vld [vmem:[#allocation3 + $0x6a] sm:$0xff] }
 0x5e9   :  { %6043 = vmatmul.f32.gmra.mxu3 %v5930_v31 }
 0x5ea   :  { %v4992_v10 = vadd.f32 %v11466_v22, %v4924_v47 }
 0x5eb   :  { %v3777_v45 = vpop.f32.mrf.mxu2 }
 0x5ec   :  { %v4311_v59 = vpop.f32.mrf.mxu3  ;;  %vm5056_vm13 = vcmp.ge.f32.partialorder %v4992_v10, 0.0  ;;  %v5120_v55 = vmul.f32 0.2, %v4992_v10  ;;  %v3857_v9 = vadd.f32 %v3777_v45, %v3322_v32  ;;  %v4848_v21 = vpop.f32.mrf.mxu0 }
 0x5ed   :  { %v11499_v61 = vpop.f32.mrf.mxu1 }
 0x5ee   :  { %v5184_v19 = vsel %vm5056_vm13, %v4992_v10, %v5120_v55  ;;  %v4391_v7 = vadd.f32 %v4311_v59, %v3857_v9  ;;  %v6286_v9 = vld [vmem:[#allocation3 + $0x90] sm:$0xff] }
 0x5ef   :  { %5334 = vst [vmem:[#allocation3 + $0x2d9] sm:$0xff] %v5184_v19  ;;  %6400 = vmatmul.f32.gmra.mxu0 %v6285_v50  ;;  %5691 = vmatmul.f32.gmra.mxu1 %v5184_v19 }
 0x5f0   :  { %v4925_v12 = vadd.f32 %v4845_v6, %v4391_v7  ;;  %5756 = vmatmul.f32.gmra.mxu2 %v6283_v5  ;;  %v5932_v5 = vld [vmem:[#allocation3 + $0x7a] sm:$0xff]  ;;  %v3324_v7 = vadd.f32 %v11160_v40, %v12999_v60  ;;  %v13000_v40 = vld [vmem:[#allocation39_spill] sm:$0xff] }
 0x5f1   :  { %6046 = vmatmul.f32.gmra.mxu3 %v5931_v4  ;;  %v6695_v6 = vld [vmem:[#allocation4 + $0x200] sm:$0xff] }
 0x5f2   :  { %v4993_v17 = vadd.f32 %v11466_v22, %v4925_v12  ;;  %6726 = vmatpush.msrb.mxu1 %v6695_v6 }
 0x5f3   :  { %v3780_v31 = vpop.f32.mrf.mxu2 }
 0x5f4   :  { %v4314_v47 = vpop.f32.mrf.mxu3  ;;  %vm5057_vm14 = vcmp.ge.f32.partialorder %v4993_v17, 0.0  ;;  %v5121_v29 = vmul.f32 0.2, %v4993_v17  ;;  %v3858_v32 = vadd.f32 %v3780_v31, %v3323_v54  ;;  %v4851_v10 = vpop.f32.mrf.mxu0 }
 0x5f5   :  { %v11504_v45 = vpop.f32.mrf.mxu1 }
 0x5f6   :  { %v5185_v59 = vsel %vm5057_vm14, %v4993_v17, %v5121_v29  ;;  %v4392_v55 = vadd.f32 %v4314_v47, %v3858_v32 }
 0x5f7   :  { %5335 = vst [vmem:[#allocation3 + $0x2e9] sm:$0xff] %v5185_v59  ;;  %6403 = vmatmul.f32.gmra.mxu0 %v6286_v9  ;;  %5694 = vmatmul.f32.gmra.mxu1 %v5185_v59  ;;  %v6287_v59 = vld [vmem:[#allocation3 + $0x98] sm:$0xff] }
 0x5f8   :  { %v4926_v19 = vadd.f32 %v4848_v21, %v4392_v55  ;;  %5759 = vmatmul.f32.gmra.mxu2 %v6284_v14  ;;  %v5933_v14 = vld [vmem:[#allocation3 + $0x82] sm:$0xff]  ;;  %v3325_v55 = vadd.f32 %v11168_v2, %v13000_v40 }
 0x5f9   :  { %6049 = vmatmul.f32.gmra.mxu3 %v5932_v5  ;;  %v13001_v2 = vld [vmem:[#allocation55_spill] sm:$0xff] }
 0x5fa   :  { %v4994_v4 = vadd.f32 %v11466_v22, %v4926_v19 }
 0x5fb   :  { %v3783_v12 = vpop.f32.mrf.mxu2 }
 0x5fc   :  { %v4317_v58 = vpop.f32.mrf.mxu3  ;;  %vm5058_vm15 = vcmp.ge.f32.partialorder %v4994_v4, 0.0  ;;  %v5122_v54 = vmul.f32 0.2, %v4994_v4  ;;  %v3859_v17 = vadd.f32 %v3783_v12, %v3324_v7  ;;  %v4854_v31 = vpop.f32.mrf.mxu0 }
 0x5fd   :  { %v11509_v47 = vpop.f32.mrf.mxu1 }
 0x5fe   :  { %v5186_v29 = vsel %vm5058_vm15, %v4994_v4, %v5122_v54  ;;  %v4393_v32 = vadd.f32 %v4317_v58, %v3859_v17  ;;  %v6288_v17 = vld [vmem:[#allocation3 + $0xa8] sm:$0xff] }
 0x5ff   :  { %5336 = vst [vmem:[#allocation3 + $0x2f1] sm:$0xff] %v5186_v29  ;;  %6406 = vmatmul.f32.gmra.mxu0 %v6287_v59  ;;  %5697 = vmatmul.f32.gmra.mxu1 %v5186_v29 }
 0x600   :  { %v4927_v21 = vadd.f32 %v4851_v10, %v4393_v32  ;;  %5762 = vmatmul.f32.gmra.mxu2 %v6285_v50  ;;  %v5934_v50 = vld [vmem:[#allocation3 + $0x92] sm:$0xff]  ;;  %v3326_v32 = vadd.f32 %v11177_v52, %v13001_v2 }
 0x601   :  { %6052 = vmatmul.f32.gmra.mxu3 %v5933_v14  ;;  %v7064_v10 = vld [vmem:[#allocation4 + $0x2f8] sm:$0xff] }
 0x602   :  { %v4995_v5 = vadd.f32 %v11466_v22, %v4927_v21  ;;  %7065 = vmatpush.msra.mxu2 %v7064_v10  ;;  %v8127_v52 = vld [vmem:[#allocation4 + $0x478] sm:$0xff]  ;;  %v13002_v10 = vld [vmem:[#allocation44_spill] sm:$0xff] }
 0x603   :  { %v3786_v6 = vpop.f32.mrf.mxu2  ;;  %8128 = vmatpush.msra.mxu1 %v8127_v52 }
 0x604   :  { %v4320_v19 = vpop.f32.mrf.mxu3  ;;  %vm5059_vm1 = vcmp.ge.f32.partialorder %v4995_v5, 0.0  ;;  %v5123_v60 = vmul.f32 0.2, %v4995_v5  ;;  %v3860_v7 = vadd.f32 %v3786_v6, %v3325_v55  ;;  %v4857_v4 = vpop.f32.mrf.mxu0 }
 0x605   :  { %v11514_v12 = vpop.f32.mrf.mxu1 }
 0x606   :  { %v5187_v58 = vsel %vm5059_vm1, %v4995_v5, %v5123_v60  ;;  %v4394_v54 = vadd.f32 %v4320_v19, %v3860_v7 }
 0x607   :  { %5337 = vst [vmem:[#allocation3 + $0x301] sm:$0xff] %v5187_v58  ;;  %6409 = vmatmul.f32.gmra.mxu0 %v6288_v17  ;;  %5700 = vmatmul.f32.gmra.mxu1 %v5187_v58  ;;  %v6289_v58 = vld [vmem:[#allocation3 + $0xb0] sm:$0xff] }
 0x608   :  { %v4928_v29 = vadd.f32 %v4854_v31, %v4394_v54  ;;  %5765 = vmatmul.f32.gmra.mxu2 %v6286_v9  ;;  %v5935_v31 = vld [vmem:[#allocation3 + $0x9a] sm:$0xff] }
 0x609   :  { %6055 = vmatmul.f32.gmra.mxu3 %v5934_v50  ;;  %v7419_v9 = vld [vmem:[#allocation4 + $0x378] sm:$0xff] }
 0x60a   :  { %v4996_v14 = vadd.f32 %v11466_v22, %v4928_v29  ;;  %v7773_v54 = vld [vmem:[#allocation4 + $0x3f8] sm:$0xff]  ;;  %7420 = vmatpush.msra.mxu3 %v7419_v9  ;;  %v3327_v29 = vadd.f32 %v11185_v15, %v13002_v10  ;;  %v13003_v15 = vld [vmem:[#allocation58_spill] sm:$0xff] }
 0x60b   :  { %v3789_v21 = vpop.f32.mrf.mxu2  ;;  %7774 = vmatpush.msra.mxu0 %v7773_v54  ;;  %v3328_v9 = vadd.f32 %v11193_v56, %v13003_v15  ;;  %v13004_v56 = vld [vmem:[#allocation47_spill] sm:$0xff] }
 0x60c   :  { %v4323_v40 = vpop.f32.mrf.mxu3  ;;  %vm5060_vm2 = vcmp.ge.f32.partialorder %v4996_v14, 0.0  ;;  %v5124_v55 = vmul.f32 0.2, %v4996_v14  ;;  %v3861_v5 = vadd.f32 %v3789_v21, %v3326_v32  ;;  %v4860_v6 = vpop.f32.mrf.mxu0 }
 0x60d   :  { %v11519_v19 = vpop.f32.mrf.mxu1 }
 0x60e   :  { %v5188_v60 = vsel %vm5060_vm2, %v4996_v14, %v5124_v55  ;;  %v4395_v7 = vadd.f32 %v4323_v40, %v3861_v5 }
 0x60f   :  { %5338 = vst [vmem:[#allocation3 + $0x309] sm:$0xff] %v5188_v60  ;;  %6412 = vmatmul.f32.gmra.mxu0 %v6289_v58  ;;  %5703 = vmatmul.f32.gmra.mxu1 %v5188_v60 }
 0x610   :  { %v4929_v50 = vadd.f32 %v4857_v4, %v4395_v7  ;;  %5768 = vmatmul.f32.gmra.mxu2 %v6287_v59  ;;  %v6290_v59 = vld [vmem:[#allocation3 + $0xc0] sm:$0xff]  ;;  %v5936_v7 = vld [vmem:[#allocation3 + $0xaa] sm:$0xff] }
 0x611   :  { %6058 = vmatmul.f32.gmra.mxu3 %v5935_v31 }
 0x612   :  { %v4997_v2 = vadd.f32 %v11466_v22, %v4929_v50 }
 0x613   :  { %v3792_v32 = vpop.f32.mrf.mxu2 }
 0x614   :  { %v4326_v14 = vpop.f32.mrf.mxu3  ;;  %vm5061_vm3 = vcmp.ge.f32.partialorder %v4997_v2, 0.0  ;;  %v5125_v21 = vmul.f32 0.2, %v4997_v2  ;;  %v3862_v40 = vadd.f32 %v3792_v32, %v3327_v29  ;;  %v4863_v55 = vpop.f32.mrf.mxu0 }
 0x615   :  { %v11524_v5 = vpop.f32.mrf.mxu1 }
 0x616   :  { %v5189_v60 = vsel %vm5061_vm3, %v4997_v2, %v5125_v21  ;;  %v4396_v4 = vadd.f32 %v4326_v14, %v3862_v40  ;;  %v6291_v40 = vld [vmem:[#allocation3 + $0xc8] sm:$0xff] }
 0x617   :  { %5339 = vst [vmem:[#allocation3 + $0x319] sm:$0xff] %v5189_v60  ;;  %6415 = vmatmul.f32.gmra.mxu0 %v6290_v59  ;;  %5706 = vmatmul.f32.gmra.mxu1 %v5189_v60  ;;  %v3329_v60 = vadd.f32 %v11201_v44, %v13004_v56  ;;  %v5938_v44 = vld [vmem:[#allocation3 + $0xc2] sm:$0xff] }
 0x618   :  { %v4930_v31 = vadd.f32 %v4860_v6, %v4396_v4  ;;  %5771 = vmatmul.f32.gmra.mxu2 %v6288_v17  ;;  %v5937_v17 = vld [vmem:[#allocation3 + $0xb2] sm:$0xff] }
 0x619   :  { %6061 = vmatmul.f32.gmra.mxu3 %v5936_v7 }
 0x61a   :  { %v4998_v54 = vadd.f32 %v11466_v22, %v4930_v31 }
 0x61b   :  { %v3795_v52 = vpop.f32.mrf.mxu2 }
 0x61c   :  { %v4329_v50 = vpop.f32.mrf.mxu3  ;;  %vm5062_vm4 = vcmp.ge.f32.partialorder %v4998_v54, 0.0  ;;  %v5126_v10 = vmul.f32 0.2, %v4998_v54  ;;  %v3863_v29 = vadd.f32 %v3795_v52, %v3328_v9  ;;  %v4866_v2 = vpop.f32.mrf.mxu0 }
 0x61d   :  { %v11529_v32 = vpop.f32.mrf.mxu1 }
 0x61e   :  { %v5190_v14 = vsel %vm5062_vm4, %v4998_v54, %v5126_v10  ;;  %v4397_v21 = vadd.f32 %v4329_v50, %v3863_v29  ;;  %v7063_v50 = vld [vmem:[#allocation4 + $0x2f0] sm:$0xff] }
 0x61f   :  { %5340 = vst [vmem:[#allocation3 + $0x321] sm:$0xff] %v5190_v14  ;;  %6418 = vmatmul.f32.gmra.mxu0 %v6291_v40  ;;  %5709 = vmatmul.f32.gmra.mxu1 %v5190_v14  ;;  %v7418_v14 = vld [vmem:[#allocation4 + $0x370] sm:$0xff] }
 0x620   :  { %v4931_v6 = vadd.f32 %v4863_v55, %v4397_v21  ;;  %5774 = vmatmul.f32.gmra.mxu2 %v6289_v58  ;;  %v6292_v55 = vld [vmem:[#allocation3 + $0xd8] sm:$0xff]  ;;  %7421 = vmatpush.msra.mxu3 %v7418_v14 }
 0x621   :  { %6064 = vmatmul.f32.gmra.mxu3 %v5937_v17  ;;  %7066 = vmatpush.msra.mxu2 %v7063_v50  ;;  %v6630_v58 = vld [vmem:[#allocation3 + $0x19] sm:$0xff] }
 0x622   :  { %v4999_v4 = vadd.f32 %v11466_v22, %v4931_v6 }
 0x623   :  { %v3798_v7 = vpop.f32.mrf.mxu2 }
 0x624   :  { %v4332_v31 = vpop.f32.mrf.mxu3  ;;  %vm5063_vm5 = vcmp.ge.f32.partialorder %v4999_v4, 0.0  ;;  %v5127_v15 = vmul.f32 0.2, %v4999_v4  ;;  %v3864_v9 = vadd.f32 %v3798_v7, %v3329_v60  ;;  %v6374_v54 = vpop.f32.mrf.mxu0 }
 0x625   :  { %v11534_v52 = vpop.f32.mrf.mxu1 }
 0x626   :  { %v5191_v10 = vsel %vm5063_vm5, %v4999_v4, %v5127_v15  ;;  %v4398_v29 = vadd.f32 %v4332_v31, %v3864_v9  ;;  %v6631_v15 = vld [vmem:[#allocation3 + $0x21] sm:$0xff] }
 0x627   :  { %5341 = vst [vmem:[#allocation3 + $0x331] sm:$0xff] %v5191_v10  ;;  %6421 = vmatmul.f32.gmra.mxu0 %v6292_v55  ;;  %6727 = vmatmul.f32.vlgmr.msrb.gmra.mxu1 %v6630_v58  ;;  %v6293_v10 = vld [vmem:[#allocation3 + $0xe0] sm:$0xff]  ;;  %v7772_v58 = vld [vmem:[#allocation4 + $0x3f0] sm:$0xff] }
 0x628   :  { %v4932_v21 = vadd.f32 %v4866_v2, %v4398_v29  ;;  %5777 = vmatmul.f32.gmra.mxu2 %v6290_v59  ;;  %v8126_v2 = vld [vmem:[#allocation4 + $0x470] sm:$0xff]  ;;  %7775 = vmatpush.msra.mxu0 %v7772_v58  ;;  %v6295_v58 = vld [vmem:[#allocation3 + $0xf8] sm:$0xff] }
 0x629   :  { %6067 = vmatmul.f32.gmra.mxu3 %v5938_v44  ;;  %v5939_v59 = vld [vmem:[#allocation3 + $0xca] sm:$0xff]  ;;  %8129 = vmatpush.msra.mxu1 %v8126_v2  ;;  %v6633_v2 = vld [vmem:[#allocation3 + $0x39] sm:$0xff] }
 0x62a   :  { %v5000_v17 = vadd.f32 %v11466_v22, %v4932_v21 }
 0x62b   :  { %v5730_v6 = vpop.f32.mrf.mxu2 }
 0x62c   :  { %v6020_v56 = vpop.f32.mrf.mxu3  ;;  %vm5064_vm0 = vcmp.ge.f32.partialorder %v5000_v17, 0.0  ;;  %v5128_v60 = vmul.f32 0.2, %v5000_v17  ;;  %v5731_v4 = vadd.f32 %v5730_v6, %v11210_v16  ;;  %v6377_v7 = vpop.f32.mrf.mxu0  ;;  %v6294_v6 = vld [vmem:[#allocation3 + $0xf0] sm:$0xff] }
 0x62d   :  { %v11538_v31 = vpop.f32.mrf.mxu1 }
 0x62e   :  { %v5192_v9 = vsel %vm5064_vm0, %v5000_v17, %v5128_v60  ;;  %v6212_v50 = vadd.f32 %v6020_v56, %v5731_v4  ;;  %v6632_v56 = vld [vmem:[#allocation3 + $0x31] sm:$0xff]  ;;  %v5940_v60 = vld [vmem:[#allocation3 + $0xda] sm:$0xff] }
 0x62f   :  { %5342 = vst [vmem:[#allocation3 + $0x339] sm:$0xff] %v5192_v9  ;;  %6424 = vmatmul.f32.gmra.mxu0 %v6293_v10  ;;  %6730 = vmatmul.f32.gmra.mxu1 %v6631_v15 }
 0x630   :  { %5780 = vmatmul.f32.gmra.mxu2 %v6291_v40  ;;  %v11540_v22 = vadd.f32 %v6374_v54, %v6212_v50 }
 0x631   :  { %6070 = vmatmul.f32.gmra.mxu3 %v5939_v59  ;;  %v5941_v59 = vld [vmem:[#allocation3 + $0xe2] sm:$0xff] }
 0x633   :  { %v5733_v16 = vpop.f32.mrf.mxu2 }
 0x634   :  { %v6023_v29 = vpop.f32.mrf.mxu3  ;;  %v5734_v14 = vadd.f32 %v5733_v16, %v11218_v46  ;;  %v6380_v44 = vpop.f32.mrf.mxu0 }
 0x635   :  { %v11543_v21 = vpop.f32.mrf.mxu1 }
 0x636   :  { %v6213_v17 = vadd.f32 %v6023_v29, %v5734_v14 }
 0x637   :  { %6427 = vmatmul.f32.gmra.mxu0 %v6294_v6  ;;  %6733 = vmatmul.f32.gmra.mxu1 %v6632_v56 }
 0x638   :  { %5783 = vmatmul.f32.gmra.mxu2 %v6292_v55  ;;  %v11545_v40 = vadd.f32 %v6377_v7, %v6213_v17 }
 0x639   :  { %6073 = vmatmul.f32.gmra.mxu3 %v5940_v60  ;;  %v6296_v60 = vld [vmem:[#allocation3 + $0x108] sm:$0xff] }
 0x63a   :  { %13005 = vst [vmem:[#allocation65_spill] sm:$0xff] %v11545_v40  ;;  %v5943_v40 = vld [vmem:[#allocation3 + $0xfa] sm:$0xff] }
 0x63b   :  { %v5736_v54 = vpop.f32.mrf.mxu2 }
 0x63c   :  { %v6026_v4 = vpop.f32.mrf.mxu3  ;;  %v5737_v15 = vadd.f32 %v5736_v54, %v11226_v11  ;;  %v6383_v9 = vpop.f32.mrf.mxu0  ;;  %v7062_v11 = vld [vmem:[#allocation4 + $0x2e8] sm:$0xff] }
 0x63d   :  { %v11548_v50 = vpop.f32.mrf.mxu1  ;;  %7067 = vmatpush.msra.mxu2 %v7062_v11  ;;  %v6634_v54 = vld [vmem:[#allocation3 + $0x49] sm:$0xff] }
 0x63e   :  { %v6214_v46 = vadd.f32 %v6026_v4, %v5737_v15  ;;  %v7417_v4 = vld [vmem:[#allocation4 + $0x368] sm:$0xff]  ;;  %v5942_v15 = vld [vmem:[#allocation3 + $0xf2] sm:$0xff] }
 0x63f   :  { %6430 = vmatmul.f32.gmra.mxu0 %v6295_v58  ;;  %6736 = vmatmul.f32.gmra.mxu1 %v6633_v2  ;;  %v7771_v11 = vld [vmem:[#allocation4 + $0x3e8] sm:$0xff] }
 0x640   :  { %5786 = vmatmul.f32.gmra.mxu2 %v6293_v10  ;;  %v11550_v16 = vadd.f32 %v6380_v44, %v6214_v46  ;;  %7422 = vmatpush.msra.mxu3 %v7417_v4 }
 0x641   :  { %6076 = vmatmul.f32.gmra.mxu3 %v5941_v59  ;;  %7776 = vmatpush.msra.mxu0 %v7771_v11  ;;  %v6299_v11 = vld [vmem:[#allocation3 + $0x128] sm:$0xff] }
 0x642   :  { %13006 = vst [vmem:[#allocation78_spill] sm:$0xff] %v11550_v16  ;;  %v8125_v16 = vld [vmem:[#allocation4 + $0x468] sm:$0xff] }
 0x643   :  { %v5739_v55 = vpop.f32.mrf.mxu2  ;;  %8130 = vmatpush.msra.mxu1 %v8125_v16 }
 0x644   :  { %v6029_v7 = vpop.f32.mrf.mxu3  ;;  %v5740_v29 = vadd.f32 %v5739_v55, %v11233_v57  ;;  %v6386_v14 = vpop.f32.mrf.mxu0  ;;  %v6635_v55 = vld [vmem:[#allocation3 + $0x51] sm:$0xff] }
 0x645   :  { %v11553_v17 = vpop.f32.mrf.mxu1 }
 0x646   :  { %v6215_v56 = vadd.f32 %v6029_v7, %v5740_v29  ;;  %v6297_v29 = vld [vmem:[#allocation3 + $0x110] sm:$0xff] }
 0x647   :  { %6433 = vmatmul.f32.gmra.mxu0 %v6296_v60  ;;  %6739 = vmatmul.f32.gmra.mxu1 %v6634_v54 }
 0x648   :  { %5789 = vmatmul.f32.gmra.mxu2 %v6294_v6  ;;  %v11555_v10 = vadd.f32 %v6383_v9, %v6215_v56 }
 0x649   :  { %6079 = vmatmul.f32.gmra.mxu3 %v5942_v15 }
 0x64a   :  { %13007 = vst [vmem:[#allocation82_spill] sm:$0xff] %v11555_v10  ;;  %v5947_v10 = vld [vmem:[#allocation3 + $0x12a] sm:$0xff] }
 0x64b   :  { %v5742_v44 = vpop.f32.mrf.mxu2 }
 0x64c   :  { %v6032_v46 = vpop.f32.mrf.mxu3  ;;  %v5743_v57 = vadd.f32 %v5742_v44, %v11240_v53  ;;  %v6389_v2 = vpop.f32.mrf.mxu0  ;;  %v6298_v44 = vld [vmem:[#allocation3 + $0x120] sm:$0xff] }
 0x64d   :  { %v11558_v59 = vpop.f32.mrf.mxu1 }
 0x64e   :  { %v6216_v7 = vadd.f32 %v6032_v46, %v5743_v57  ;;  %v6636_v46 = vld [vmem:[#allocation3 + $0x61] sm:$0xff]  ;;  %v5944_v57 = vld [vmem:[#allocation3 + $0x10a] sm:$0xff] }
 0x64f   :  { %6436 = vmatmul.f32.gmra.mxu0 %v6297_v29  ;;  %6742 = vmatmul.f32.gmra.mxu1 %v6635_v55 }
 0x650   :  { %5792 = vmatmul.f32.gmra.mxu2 %v6295_v58  ;;  %v11560_v6 = vadd.f32 %v6386_v14, %v6216_v7 }
 0x651   :  { %6082 = vmatmul.f32.gmra.mxu3 %v5943_v40 }
 0x652   :  { %13008 = vst [vmem:[#allocation83_spill] sm:$0xff] %v11560_v6  ;;  %v5946_v6 = vld [vmem:[#allocation3 + $0x122] sm:$0xff] }
 0x653   :  { %v5745_v9 = vpop.f32.mrf.mxu2 }
 0x654   :  { %v6035_v56 = vpop.f32.mrf.mxu3  ;;  %v5746_v53 = vadd.f32 %v5745_v9, %v11247_v13  ;;  %v6392_v54 = vpop.f32.mrf.mxu0  ;;  %v6637_v9 = vld [vmem:[#allocation3 + $0x69] sm:$0xff] }
 0x655   :  { %v11563_v4 = vpop.f32.mrf.mxu1 }
 0x656   :  { %v6217_v15 = vadd.f32 %v6035_v56, %v5746_v53  ;;  %v5945_v56 = vld [vmem:[#allocation3 + $0x112] sm:$0xff] }
 0x657   :  { %6439 = vmatmul.f32.gmra.mxu0 %v6298_v44  ;;  %6745 = vmatmul.f32.gmra.mxu1 %v6636_v46 }
 0x658   :  { %5795 = vmatmul.f32.gmra.mxu2 %v6296_v60  ;;  %v11565_v40 = vadd.f32 %v6389_v2, %v6217_v15 }
 0x659   :  { %6085 = vmatmul.f32.gmra.mxu3 %v5944_v57 }
 0x65a   :  { %13009 = vst [vmem:[#allocation11_spill] sm:$0xff] %v11565_v40  ;;  %v7416_v40 = vld [vmem:[#allocation4 + $0x360] sm:$0xff] }
 0x65b   :  { %v5748_v58 = vpop.f32.mrf.mxu2  ;;  %7423 = vmatpush.msra.mxu3 %v7416_v40 }
 0x65c   :  { %v6038_v14 = vpop.f32.mrf.mxu3  ;;  %v5749_v16 = vadd.f32 %v5748_v58, %v11254_v34  ;;  %v6395_v55 = vpop.f32.mrf.mxu0  ;;  %v7061_v34 = vld [vmem:[#allocation4 + $0x2e0] sm:$0xff] }
 0x65d   :  { %v11568_v7 = vpop.f32.mrf.mxu1  ;;  %7068 = vmatpush.msra.mxu2 %v7061_v34  ;;  %v7770_v34 = vld [vmem:[#allocation4 + $0x3e0] sm:$0xff] }
 0x65e   :  { %v6218_v13 = vadd.f32 %v6038_v14, %v5749_v16  ;;  %v6300_v14 = vld [vmem:[#allocation3 + $0x138] sm:$0xff]  ;;  %7777 = vmatpush.msra.mxu0 %v7770_v34 }
 0x65f   :  { %6442 = vmatmul.f32.gmra.mxu0 %v6299_v11  ;;  %6748 = vmatmul.f32.gmra.mxu1 %v6637_v9  ;;  %v6638_v16 = vld [vmem:[#allocation3 + $0x79] sm:$0xff] }
 0x660   :  { %5798 = vmatmul.f32.gmra.mxu2 %v6297_v29  ;;  %v11570_v53 = vadd.f32 %v6392_v54, %v6218_v13  ;;  %v6303_v34 = vld [vmem:[#allocation3 + $0x158] sm:$0xff] }
 0x661   :  { %6088 = vmatmul.f32.gmra.mxu3 %v5945_v56 }
 0x662   :  { %13010 = vst [vmem:[#allocation10_spill] sm:$0xff] %v11570_v53  ;;  %v8124_v53 = vld [vmem:[#allocation4 + $0x460] sm:$0xff] }
 0x663   :  { %v5751_v60 = vpop.f32.mrf.mxu2  ;;  %8131 = vmatpush.msra.mxu1 %v8124_v53 }
 0x664   :  { %v6041_v2 = vpop.f32.mrf.mxu3  ;;  %v5752_v15 = vadd.f32 %v5751_v60, %v11261_v20  ;;  %v6398_v46 = vpop.f32.mrf.mxu0  ;;  %v6639_v60 = vld [vmem:[#allocation3 + $0x81] sm:$0xff] }
 0x665   :  { %v11573_v57 = vpop.f32.mrf.mxu1 }
 0x666   :  { %v6219_v58 = vadd.f32 %v6041_v2, %v5752_v15  ;;  %v6301_v15 = vld [vmem:[#allocation3 + $0x140] sm:$0xff] }
 0x667   :  { %6445 = vmatmul.f32.gmra.mxu0 %v6300_v14  ;;  %6751 = vmatmul.f32.gmra.mxu1 %v6638_v16 }
 0x668   :  { %5801 = vmatmul.f32.gmra.mxu2 %v6298_v44  ;;  %v11575_v29 = vadd.f32 %v6395_v55, %v6219_v58 }
 0x669   :  { %6091 = vmatmul.f32.gmra.mxu3 %v5946_v6 }
 0x66a   :  { %13011 = vst [vmem:[#allocation12_spill] sm:$0xff] %v11575_v29  ;;  %v5951_v29 = vld [vmem:[#allocation3 + $0x15a] sm:$0xff] }
 0x66b   :  { %v5754_v54 = vpop.f32.mrf.mxu2 }
 0x66c   :  { %v6044_v13 = vpop.f32.mrf.mxu3  ;;  %v5755_v20 = vadd.f32 %v5754_v54, %v11268_v18  ;;  %v6401_v9 = vpop.f32.mrf.mxu0  ;;  %v6302_v54 = vld [vmem:[#allocation3 + $0x150] sm:$0xff] }
 0x66d   :  { %v11578_v56 = vpop.f32.mrf.mxu1 }
 0x66e   :  { %v6220_v2 = vadd.f32 %v6044_v13, %v5755_v20  ;;  %v6640_v13 = vld [vmem:[#allocation3 + $0x91] sm:$0xff]  ;;  %v5948_v20 = vld [vmem:[#allocation3 + $0x13a] sm:$0xff] }
 0x66f   :  { %6448 = vmatmul.f32.gmra.mxu0 %v6301_v15  ;;  %6754 = vmatmul.f32.gmra.mxu1 %v6639_v60 }
 0x670   :  { %5804 = vmatmul.f32.gmra.mxu2 %v6299_v11  ;;  %v11580_v6 = vadd.f32 %v6398_v46, %v6220_v2 }
 0x671   :  { %6094 = vmatmul.f32.gmra.mxu3 %v5947_v10 }
 0x672   :  { %13012 = vst [vmem:[#allocation13_spill] sm:$0xff] %v11580_v6  ;;  %v5950_v6 = vld [vmem:[#allocation3 + $0x152] sm:$0xff] }
 0x673   :  { %v5757_v44 = vpop.f32.mrf.mxu2 }
 0x674   :  { %v6047_v40 = vpop.f32.mrf.mxu3  ;;  %v5758_v18 = vadd.f32 %v5757_v44, %v11275_v41  ;;  %v6404_v55 = vpop.f32.mrf.mxu0  ;;  %v6641_v44 = vld [vmem:[#allocation3 + $0x99] sm:$0xff] }
 0x675   :  { %v11583_v58 = vpop.f32.mrf.mxu1 }
 0x676   :  { %v6221_v16 = vadd.f32 %v6047_v40, %v5758_v18  ;;  %v5949_v40 = vld [vmem:[#allocation3 + $0x142] sm:$0xff] }
 0x677   :  { %6451 = vmatmul.f32.gmra.mxu0 %v6302_v54  ;;  %6757 = vmatmul.f32.gmra.mxu1 %v6640_v13 }
 0x678   :  { %5807 = vmatmul.f32.gmra.mxu2 %v6300_v14  ;;  %v11585_v10 = vadd.f32 %v6401_v9, %v6221_v16 }
 0x679   :  { %6097 = vmatmul.f32.gmra.mxu3 %v5948_v20 }
 0x67a   :  { %13013 = vst [vmem:[#allocation14_spill] sm:$0xff] %v11585_v10  ;;  %v7415_v10 = vld [vmem:[#allocation4 + $0x358] sm:$0xff] }
 0x67b   :  { %v5760_v11 = vpop.f32.mrf.mxu2  ;;  %7424 = vmatpush.msra.mxu3 %v7415_v10 }
 0x67c   :  { %v6050_v46 = vpop.f32.mrf.mxu3  ;;  %v5761_v53 = vadd.f32 %v5760_v11, %v11282_v39  ;;  %v6407_v60 = vpop.f32.mrf.mxu0  ;;  %v7060_v39 = vld [vmem:[#allocation4 + $0x2d8] sm:$0xff] }
 0x67d   :  { %v11588_v2 = vpop.f32.mrf.mxu1  ;;  %7069 = vmatpush.msra.mxu2 %v7060_v39  ;;  %v7769_v39 = vld [vmem:[#allocation4 + $0x3d8] sm:$0xff] }
 0x67e   :  { %v6222_v41 = vadd.f32 %v6050_v46, %v5761_v53  ;;  %v6304_v46 = vld [vmem:[#allocation3 + $0x168] sm:$0xff]  ;;  %7778 = vmatpush.msra.mxu0 %v7769_v39 }
 0x67f   :  { %6454 = vmatmul.f32.gmra.mxu0 %v6303_v34  ;;  %6760 = vmatmul.f32.gmra.mxu1 %v6641_v44  ;;  %v6642_v53 = vld [vmem:[#allocation3 + $0xa9] sm:$0xff] }
 0x680   :  { %5810 = vmatmul.f32.gmra.mxu2 %v6301_v15  ;;  %v11590_v18 = vadd.f32 %v6404_v55, %v6222_v41  ;;  %v6307_v39 = vld [vmem:[#allocation3 + $0x188] sm:$0xff] }
 0x681   :  { %6100 = vmatmul.f32.gmra.mxu3 %v5949_v40 }
 0x682   :  { %13014 = vst [vmem:[#allocation15_spill] sm:$0xff] %v11590_v18  ;;  %v8123_v18 = vld [vmem:[#allocation4 + $0x458] sm:$0xff] }
 0x683   :  { %v5763_v14 = vpop.f32.mrf.mxu2  ;;  %8132 = vmatpush.msra.mxu1 %v8123_v18 }
 0x684   :  { %v6053_v9 = vpop.f32.mrf.mxu3  ;;  %v5764_v16 = vadd.f32 %v5763_v14, %v11294_v27  ;;  %v6410_v13 = vpop.f32.mrf.mxu0  ;;  %v6643_v14 = vld [vmem:[#allocation3 + $0xb1] sm:$0xff] }
 0x685   :  { %v11593_v20 = vpop.f32.mrf.mxu1 }
 0x686   :  { %v6223_v11 = vadd.f32 %v6053_v9, %v5764_v16  ;;  %v6305_v16 = vld [vmem:[#allocation3 + $0x170] sm:$0xff] }
 0x687   :  { %6457 = vmatmul.f32.gmra.mxu0 %v6304_v46  ;;  %6763 = vmatmul.f32.gmra.mxu1 %v6642_v53 }
 0x688   :  { %5813 = vmatmul.f32.gmra.mxu2 %v6302_v54  ;;  %v11595_v15 = vadd.f32 %v6407_v60, %v6223_v11 }
 0x689   :  { %6103 = vmatmul.f32.gmra.mxu3 %v5950_v6 }
 0x68a   :  { %13015 = vst [vmem:[#allocation18_spill] sm:$0xff] %v11595_v15  ;;  %v5959_v15 = vld [vmem:[#allocation3 + $0x1ea] sm:$0xff] }
 0x68b   :  { %v5766_v55 = vpop.f32.mrf.mxu2 }
 0x68c   :  { %v6056_v41 = vpop.f32.mrf.mxu3  ;;  %v5767_v27 = vadd.f32 %v5766_v55, %v11301_v51  ;;  %v6413_v44 = vpop.f32.mrf.mxu0  ;;  %v6306_v55 = vld [vmem:[#allocation3 + $0x180] sm:$0xff] }
 0x68d   :  { %v11598_v40 = vpop.f32.mrf.mxu1 }
 0x68e   :  { %v6224_v9 = vadd.f32 %v6056_v41, %v5767_v27  ;;  %v6644_v41 = vld [vmem:[#allocation3 + $0xc1] sm:$0xff]  ;;  %v5952_v27 = vld [vmem:[#allocation3 + $0x16a] sm:$0xff] }
 0x68f   :  { %6460 = vmatmul.f32.gmra.mxu0 %v6305_v16  ;;  %6766 = vmatmul.f32.gmra.mxu1 %v6643_v14 }
 0x690   :  { %5816 = vmatmul.f32.gmra.mxu2 %v6303_v34  ;;  %v11600_v6 = vadd.f32 %v6410_v13, %v6224_v9 }
 0x691   :  { %6106 = vmatmul.f32.gmra.mxu3 %v5951_v29 }
 0x692   :  { %13016 = vst [vmem:[#allocation21_spill] sm:$0xff] %v11600_v6  ;;  %v8122_v6 = vld [vmem:[#allocation4 + $0x450] sm:$0xff] }
 0x693   :  { %v5769_v54 = vpop.f32.mrf.mxu2  ;;  %8133 = vmatpush.msra.mxu1 %v8122_v6 }
 0x694   :  { %v6059_v10 = vpop.f32.mrf.mxu3  ;;  %v5770_v51 = vadd.f32 %v5769_v54, %v11308_v63  ;;  %v6416_v60 = vpop.f32.mrf.mxu0  ;;  %v6645_v54 = vld [vmem:[#allocation3 + $0xc9] sm:$0xff] }
 0x695   :  { %v11603_v11 = vpop.f32.mrf.mxu1 }
 0x696   :  { %v6225_v53 = vadd.f32 %v6059_v10, %v5770_v51  ;;  %v5953_v10 = vld [vmem:[#allocation3 + $0x172] sm:$0xff] }
 0x697   :  { %6463 = vmatmul.f32.gmra.mxu0 %v6306_v55  ;;  %6769 = vmatmul.f32.gmra.mxu1 %v6644_v41 }
 0x698   :  { %5819 = vmatmul.f32.gmra.mxu2 %v6304_v46  ;;  %v11605_v29 = vadd.f32 %v6413_v44, %v6225_v53 }
 0x699   :  { %6109 = vmatmul.f32.gmra.mxu3 %v5952_v27  ;;  %v5375_v27 = vld [vmem:[#allocation3 + $0x1b0] sm:$0xff] }
 0x69a   :  { %13017 = vst [vmem:[#allocation26_spill] sm:$0xff] %v11605_v29  ;;  %v7414_v29 = vld [vmem:[#allocation4 + $0x350] sm:$0xff] }
 0x69b   :  { %v5772_v34 = vpop.f32.mrf.mxu2  ;;  %7425 = vmatpush.msra.mxu3 %v7414_v29 }
 0x69c   :  { %v6062_v13 = vpop.f32.mrf.mxu3  ;;  %v5773_v18 = vadd.f32 %v5772_v34, %v11315_v48  ;;  %v6419_v14 = vpop.f32.mrf.mxu0  ;;  %v7059_v48 = vld [vmem:[#allocation4 + $0x2d0] sm:$0xff] }
 0x69d   :  { %v11608_v9 = vpop.f32.mrf.mxu1  ;;  %v5954_v34 = vld [vmem:[#allocation3 + $0x1b2] sm:$0xff]  ;;  %7070 = vmatpush.msra.mxu2 %v7059_v48  ;;  %v6647_v48 = vld [vmem:[#allocation3 + $0xe1] sm:$0xff] }
 0x69e   :  { %v6226_v63 = vadd.f32 %v6062_v13, %v5773_v18  ;;  %v6308_v18 = vld [vmem:[#allocation3 + $0x1c8] sm:$0xff] }
 0x69f   :  { %6466 = vmatmul.f32.gmra.mxu0 %v6307_v39  ;;  %6772 = vmatmul.f32.gmra.mxu1 %v6645_v54  ;;  %v6646_v39 = vld [vmem:[#allocation3 + $0xd9] sm:$0xff] }
 0x6a0   :  { %5822 = vmatmul.f32.gmra.mxu2 %v6305_v16  ;;  %v11610_v51 = vadd.f32 %v6416_v60, %v6226_v63 }
 0x6a1   :  { %6112 = vmatmul.f32.gmra.mxu3 %v5953_v10 }
 0x6a2   :  { %13018 = vst [vmem:[#allocation31_spill] sm:$0xff] %v11610_v51  ;;  %v7768_v51 = vld [vmem:[#allocation4 + $0x3d0] sm:$0xff] }
 0x6a3   :  { %v5775_v46 = vpop.f32.mrf.mxu2  ;;  %7779 = vmatpush.msra.mxu0 %v7768_v51 }
 0x6a4   :  { %v6065_v44 = vpop.f32.mrf.mxu3  ;;  %v5776_v53 = vadd.f32 %v5775_v46, %v11322_v23  ;;  %v6422_v55 = vpop.f32.mrf.mxu0  ;;  %v5955_v46 = vld [vmem:[#allocation3 + $0x1ba] sm:$0xff] }
 0x6a5   :  { %v11613_v41 = vpop.f32.mrf.mxu1 }
 0x6a6   :  { %v6227_v13 = vadd.f32 %v6065_v44, %v5776_v53  ;;  %v6309_v53 = vld [vmem:[#allocation3 + $0x1d0] sm:$0xff] }
 0x6a7   :  { %6469 = vmatmul.f32.gmra.mxu0 %v6308_v18  ;;  %6775 = vmatmul.f32.gmra.mxu1 %v6646_v39 }
 0x6a8   :  { %5825 = vmatmul.f32.gmra.mxu2 %v5375_v27  ;;  %v11615_v16 = vadd.f32 %v6419_v14, %v6227_v13  ;;  %v9349_v27 = vld [vmem:[#allocation3 + $0x8] sm:$0xff] }
 0x6a9   :  { %6115 = vmatmul.f32.gmra.mxu3 %v5954_v34 }
 0x6aa   :  { %13019 = vst [vmem:[#allocation36_spill] sm:$0xff] %v11615_v16  ;;  %v5956_v16 = vld [vmem:[#allocation3 + $0x1ca] sm:$0xff] }
 0x6ab   :  { %v5778_v60 = vpop.f32.mrf.mxu2 }
 0x6ac   :  { %v6068_v23 = vpop.f32.mrf.mxu3  ;;  %v5779_v63 = vadd.f32 %v5778_v60, %v11329_v43  ;;  %v6425_v54 = vpop.f32.mrf.mxu0 }
 0x6ad   :  { %v11618_v10 = vpop.f32.mrf.mxu1 }
 0x6ae   :  { %v6228_v44 = vadd.f32 %v6068_v23, %v5779_v63  ;;  %v6310_v23 = vld [vmem:[#allocation3 + $0x1e0] sm:$0xff]  ;;  %v6648_v63 = vld [vmem:[#allocation3 + $0xf1] sm:$0xff] }
 0x6af   :  { %6472 = vmatmul.f32.gmra.mxu0 %v6309_v53  ;;  %6778 = vmatmul.f32.gmra.mxu1 %v6647_v48 }
 0x6b0   :  { %5828 = vmatmul.f32.gmra.mxu2 %v9349_v27  ;;  %v11620_v14 = vadd.f32 %v6422_v55, %v6228_v44  ;;  %v6311_v27 = vld [vmem:[#allocation3 + $0x1e8] sm:$0xff] }
 0x6b1   :  { %6118 = vmatmul.f32.gmra.mxu3 %v5955_v46 }
 0x6b2   :  { %13020 = vst [vmem:[#allocation41_spill] sm:$0xff] %v11620_v14  ;;  %v5958_v14 = vld [vmem:[#allocation3 + $0x1e2] sm:$0xff] }
 0x6b3   :  { %v5781_v29 = vpop.f32.mrf.mxu2 }
 0x6b4   :  { %v6071_v43 = vpop.f32.mrf.mxu3  ;;  %v5782_v34 = vadd.f32 %v5781_v29, %v11336_v38  ;;  %v6428_v13 = vpop.f32.mrf.mxu0  ;;  %v6649_v29 = vld [vmem:[#allocation3 + $0xf9] sm:$0xff] }
 0x6b5   :  { %v11623_v39 = vpop.f32.mrf.mxu1 }
 0x6b6   :  { %v6229_v60 = vadd.f32 %v6071_v43, %v5782_v34  ;;  %v5957_v43 = vld [vmem:[#allocation3 + $0x1d2] sm:$0xff] }
 0x6b7   :  { %6475 = vmatmul.f32.gmra.mxu0 %v6310_v23  ;;  %6781 = vmatmul.f32.gmra.mxu1 %v6648_v63 }
 0x6b8   :  { %5831 = vmatmul.f32.gmra.mxu2 %v6308_v18  ;;  %v11625_v46 = vadd.f32 %v6425_v54, %v6229_v60 }
 0x6b9   :  { %6121 = vmatmul.f32.gmra.mxu3 %v5956_v16 }
 0x6ba   :  { %13021 = vst [vmem:[#allocation46_spill] sm:$0xff] %v11625_v46  ;;  %v7413_v46 = vld [vmem:[#allocation4 + $0x348] sm:$0xff] }
 0x6bb   :  { %v5784_v55 = vpop.f32.mrf.mxu2  ;;  %7426 = vmatpush.msra.mxu3 %v7413_v46 }
 0x6bc   :  { %v6074_v51 = vpop.f32.mrf.mxu3  ;;  %v5785_v6 = vadd.f32 %v5784_v55, %v11343_v35  ;;  %v6431_v48 = vpop.f32.mrf.mxu0  ;;  %v7058_v35 = vld [vmem:[#allocation4 + $0x2c8] sm:$0xff] }
 0x6bd   :  { %v11628_v44 = vpop.f32.mrf.mxu1  ;;  %7071 = vmatpush.msra.mxu2 %v7058_v35  ;;  %v7767_v35 = vld [vmem:[#allocation4 + $0x3c8] sm:$0xff] }
 0x6be   :  { %v6230_v38 = vadd.f32 %v6074_v51, %v5785_v6  ;;  %v6312_v51 = vld [vmem:[#allocation3 + $0x1f8] sm:$0xff]  ;;  %v6650_v6 = vld [vmem:[#allocation3 + $0x109] sm:$0xff]  ;;  %7780 = vmatpush.msra.mxu0 %v7767_v35 }
 0x6bf   :  { %6478 = vmatmul.f32.gmra.mxu0 %v6311_v27  ;;  %6784 = vmatmul.f32.gmra.mxu1 %v6649_v29  ;;  %v6315_v35 = vld [vmem:[#allocation3 + $0x218] sm:$0xff] }
 0x6c0   :  { %5834 = vmatmul.f32.gmra.mxu2 %v6309_v53  ;;  %v11630_v34 = vadd.f32 %v6428_v13, %v6230_v38 }
 0x6c1   :  { %6124 = vmatmul.f32.gmra.mxu3 %v5957_v43 }
 0x6c2   :  { %13022 = vst [vmem:[#allocation51_spill] sm:$0xff] %v11630_v34  ;;  %v8121_v34 = vld [vmem:[#allocation4 + $0x448] sm:$0xff] }
 0x6c3   :  { %v5787_v18 = vpop.f32.mrf.mxu2  ;;  %8134 = vmatpush.msra.mxu1 %v8121_v34 }
 0x6c4   :  { %v6077_v16 = vpop.f32.mrf.mxu3  ;;  %v5788_v54 = vadd.f32 %v5787_v18, %v11350_v62  ;;  %v6434_v60 = vpop.f32.mrf.mxu0  ;;  %v6651_v18 = vld [vmem:[#allocation3 + $0x111] sm:$0xff] }
 0x6c5   :  { %v11633_v63 = vpop.f32.mrf.mxu1 }
 0x6c6   :  { %v6231_v55 = vadd.f32 %v6077_v16, %v5788_v54  ;;  %v6313_v54 = vld [vmem:[#allocation3 + $0x200] sm:$0xff] }
 0x6c7   :  { %6481 = vmatmul.f32.gmra.mxu0 %v6312_v51  ;;  %6787 = vmatmul.f32.gmra.mxu1 %v6650_v6 }
 0x6c8   :  { %5837 = vmatmul.f32.gmra.mxu2 %v6310_v23  ;;  %v11635_v53 = vadd.f32 %v6431_v48, %v6231_v55 }
 0x6c9   :  { %6127 = vmatmul.f32.gmra.mxu3 %v5958_v14 }
 0x6ca   :  { %13023 = vst [vmem:[#allocation56_spill] sm:$0xff] %v11635_v53  ;;  %v5963_v53 = vld [vmem:[#allocation3 + $0x21a] sm:$0xff] }
 0x6cb   :  { %v5790_v13 = vpop.f32.mrf.mxu2 }
 0x6cc   :  { %v6080_v38 = vpop.f32.mrf.mxu3  ;;  %v5791_v62 = vadd.f32 %v5790_v13, %v11357_v37  ;;  %v6437_v29 = vpop.f32.mrf.mxu0  ;;  %v6314_v13 = vld [vmem:[#allocation3 + $0x210] sm:$0xff] }
 0x6cd   :  { %v11638_v43 = vpop.f32.mrf.mxu1 }
 0x6ce   :  { %v6232_v16 = vadd.f32 %v6080_v38, %v5791_v62  ;;  %v6652_v38 = vld [vmem:[#allocation3 + $0x121] sm:$0xff] }
 0x6cf   :  { %6484 = vmatmul.f32.gmra.mxu0 %v6313_v54  ;;  %6790 = vmatmul.f32.gmra.mxu1 %v6651_v18  ;;  %v5960_v62 = vld [vmem:[#allocation3 + $0x1fa] sm:$0xff] }
 0x6d0   :  { %5840 = vmatmul.f32.gmra.mxu2 %v6311_v27  ;;  %v11640_v14 = vadd.f32 %v6434_v60, %v6232_v16 }
 0x6d1   :  { %6130 = vmatmul.f32.gmra.mxu3 %v5959_v15 }
 0x6d2   :  { %13024 = vst [vmem:[#allocation60_spill] sm:$0xff] %v11640_v14  ;;  %v5962_v14 = vld [vmem:[#allocation3 + $0x212] sm:$0xff] }
 0x6d3   :  { %v5793_v23 = vpop.f32.mrf.mxu2 }
 0x6d4   :  { %v6083_v46 = vpop.f32.mrf.mxu3  ;;  %v5794_v37 = vadd.f32 %v5793_v23, %v11364_v3  ;;  %v6440_v48 = vpop.f32.mrf.mxu0  ;;  %v6653_v23 = vld [vmem:[#allocation3 + $0x129] sm:$0xff] }
 0x6d5   :  { %v11643_v55 = vpop.f32.mrf.mxu1 }
 0x6d6   :  { %v6233_v6 = vadd.f32 %v6083_v46, %v5794_v37  ;;  %v5961_v46 = vld [vmem:[#allocation3 + $0x202] sm:$0xff] }
 0x6d7   :  { %6487 = vmatmul.f32.gmra.mxu0 %v6314_v13  ;;  %6793 = vmatmul.f32.gmra.mxu1 %v6652_v38 }
 0x6d8   :  { %5843 = vmatmul.f32.gmra.mxu2 %v6312_v51  ;;  %v11645_v15 = vadd.f32 %v6437_v29, %v6233_v6 }
 0x6d9   :  { %6133 = vmatmul.f32.gmra.mxu3 %v5960_v62 }
 0x6da   :  { %13025 = vst [vmem:[#allocation63_spill] sm:$0xff] %v11645_v15  ;;  %v7412_v15 = vld [vmem:[#allocation4 + $0x340] sm:$0xff] }
 0x6db   :  { %v5796_v27 = vpop.f32.mrf.mxu2  ;;  %7427 = vmatpush.msra.mxu3 %v7412_v15 }
 0x6dc   :  { %v6086_v60 = vpop.f32.mrf.mxu3  ;;  %v5797_v34 = vadd.f32 %v5796_v27, %v11371_v28  ;;  %v6443_v18 = vpop.f32.mrf.mxu0  ;;  %v7057_v28 = vld [vmem:[#allocation4 + $0x2c0] sm:$0xff] }
 0x6dd   :  { %v11648_v16 = vpop.f32.mrf.mxu1  ;;  %7072 = vmatpush.msra.mxu2 %v7057_v28  ;;  %v7766_v28 = vld [vmem:[#allocation4 + $0x3c0] sm:$0xff] }
 0x6de   :  { %v6234_v3 = vadd.f32 %v6086_v60, %v5797_v34  ;;  %v6316_v60 = vld [vmem:[#allocation3 + $0x228] sm:$0xff]  ;;  %v6654_v34 = vld [vmem:[#allocation3 + $0x139] sm:$0xff]  ;;  %7781 = vmatpush.msra.mxu0 %v7766_v28 }
 0x6df   :  { %6490 = vmatmul.f32.gmra.mxu0 %v6315_v35  ;;  %6796 = vmatmul.f32.gmra.mxu1 %v6653_v23  ;;  %v6319_v28 = vld [vmem:[#allocation3 + $0x248] sm:$0xff] }
 0x6e0   :  { %5846 = vmatmul.f32.gmra.mxu2 %v6313_v54  ;;  %v11650_v37 = vadd.f32 %v6440_v48, %v6234_v3 }
 0x6e1   :  { %6136 = vmatmul.f32.gmra.mxu3 %v5961_v46 }
 0x6e2   :  { %13026 = vst [vmem:[#allocation66_spill] sm:$0xff] %v11650_v37  ;;  %v8120_v37 = vld [vmem:[#allocation4 + $0x440] sm:$0xff] }
 0x6e3   :  { %v5799_v51 = vpop.f32.mrf.mxu2  ;;  %8135 = vmatpush.msra.mxu1 %v8120_v37 }
 0x6e4   :  { %v6089_v29 = vpop.f32.mrf.mxu3  ;;  %v5800_v6 = vadd.f32 %v5799_v51, %v11378_v33  ;;  %v6446_v38 = vpop.f32.mrf.mxu0  ;;  %v6655_v51 = vld [vmem:[#allocation3 + $0x141] sm:$0xff] }
 0x6e5   :  { %v11653_v62 = vpop.f32.mrf.mxu1 }
 0x6e6   :  { %v6235_v27 = vadd.f32 %v6089_v29, %v5800_v6  ;;  %v6317_v6 = vld [vmem:[#allocation3 + $0x230] sm:$0xff] }
 0x6e7   :  { %6493 = vmatmul.f32.gmra.mxu0 %v6316_v60  ;;  %6799 = vmatmul.f32.gmra.mxu1 %v6654_v34 }
 0x6e8   :  { %5849 = vmatmul.f32.gmra.mxu2 %v6314_v13  ;;  %v11655_v54 = vadd.f32 %v6443_v18, %v6235_v27 }
 0x6e9   :  { %6139 = vmatmul.f32.gmra.mxu3 %v5962_v14 }
 0x6ea   :  { %13027 = vst [vmem:[#allocation67_spill] sm:$0xff] %v11655_v54  ;;  %v5967_v54 = vld [vmem:[#allocation3 + $0x24a] sm:$0xff] }
 0x6eb   :  { %v5802_v48 = vpop.f32.mrf.mxu2 }
 0x6ec   :  { %v6092_v3 = vpop.f32.mrf.mxu3  ;;  %v5803_v33 = vadd.f32 %v5802_v48, %v11385_v42  ;;  %v6449_v23 = vpop.f32.mrf.mxu0  ;;  %v6318_v48 = vld [vmem:[#allocation3 + $0x240] sm:$0xff] }
 0x6ed   :  { %v11658_v46 = vpop.f32.mrf.mxu1 }
 0x6ee   :  { %v6236_v29 = vadd.f32 %v6092_v3, %v5803_v33  ;;  %v6656_v3 = vld [vmem:[#allocation3 + $0x151] sm:$0xff] }
 0x6ef   :  { %6496 = vmatmul.f32.gmra.mxu0 %v6317_v6  ;;  %6802 = vmatmul.f32.gmra.mxu1 %v6655_v51  ;;  %v5964_v33 = vld [vmem:[#allocation3 + $0x22a] sm:$0xff] }
 0x6f0   :  { %5852 = vmatmul.f32.gmra.mxu2 %v6315_v35  ;;  %v11660_v14 = vadd.f32 %v6446_v38, %v6236_v29 }
 0x6f1   :  { %6142 = vmatmul.f32.gmra.mxu3 %v5963_v53 }
 0x6f2   :  { %13028 = vst [vmem:[#allocation68_spill] sm:$0xff] %v11660_v14  ;;  %v5966_v14 = vld [vmem:[#allocation3 + $0x242] sm:$0xff] }
 0x6f3   :  { %v5805_v13 = vpop.f32.mrf.mxu2 }
 0x6f4   :  { %v6095_v15 = vpop.f32.mrf.mxu3  ;;  %v5806_v42 = vadd.f32 %v5805_v13, %v11393_v49  ;;  %v6452_v18 = vpop.f32.mrf.mxu0  ;;  %v6657_v13 = vld [vmem:[#allocation3 + $0x159] sm:$0xff] }
 0x6f5   :  { %v11663_v27 = vpop.f32.mrf.mxu1 }
 0x6f6   :  { %13029 = vst [vmem:[#allocation69_spill] sm:$0xff] %v11663_v27  ;;  %v6237_v34 = vadd.f32 %v6095_v15, %v5806_v42  ;;  %v5965_v15 = vld [vmem:[#allocation3 + $0x232] sm:$0xff] }
 0x6f7   :  { %6499 = vmatmul.f32.gmra.mxu0 %v6318_v48  ;;  %6805 = vmatmul.f32.gmra.mxu1 %v6656_v3  ;;  %v7366_v27 = vld [vmem:[#allocation3 + $0x170] sm:$0xff] }
 0x6f8   :  { %5855 = vmatmul.f32.gmra.mxu2 %v6316_v60  ;;  %v11665_v53 = vadd.f32 %v6449_v23, %v6237_v34 }
 0x6f9   :  { %6145 = vmatmul.f32.gmra.mxu3 %v5964_v33 }
 0x6fa   :  { %13030 = vst [vmem:[#allocation70_spill] sm:$0xff] %v11665_v53  ;;  %v7411_v53 = vld [vmem:[#allocation4 + $0x338] sm:$0xff] }
 0x6fb   :  { %v5808_v35 = vpop.f32.mrf.mxu2  ;;  %7428 = vmatpush.msra.mxu3 %v7411_v53 }
 0x6fc   :  { %v6098_v38 = vpop.f32.mrf.mxu3  ;;  %v5809_v37 = vadd.f32 %v5808_v35, %v11401_v25  ;;  %v6455_v51 = vpop.f32.mrf.mxu0  ;;  %v7056_v25 = vld [vmem:[#allocation4 + $0x2b8] sm:$0xff] }
 0x6fd   :  { %v11668_v29 = vpop.f32.mrf.mxu1  ;;  %7073 = vmatpush.msra.mxu2 %v7056_v25  ;;  %v7765_v25 = vld [vmem:[#allocation4 + $0x3b8] sm:$0xff] }
 0x6fe   :  { %13031 = vst [vmem:[#allocation71_spill] sm:$0xff] %v11668_v29  ;;  %v6238_v49 = vadd.f32 %v6098_v38, %v5809_v37  ;;  %v6320_v38 = vld [vmem:[#allocation3 + $0x258] sm:$0xff]  ;;  %v6658_v37 = vld [vmem:[#allocation3 + $0x169] sm:$0xff]  ;;  %7782 = vmatpush.msra.mxu0 %v7765_v25 }
 0x6ff   :  { %6502 = vmatmul.f32.gmra.mxu0 %v6319_v28  ;;  %6808 = vmatmul.f32.gmra.mxu1 %v6657_v13 }
 0x700   :  { %5858 = vmatmul.f32.gmra.mxu2 %v6317_v6  ;;  %v11670_v42 = vadd.f32 %v6452_v18, %v6238_v49 }
 0x701   :  { %6148 = vmatmul.f32.gmra.mxu3 %v5965_v15 }
 0x702   :  { %13032 = vst [vmem:[#allocation72_spill] sm:$0xff] %v11670_v42  ;;  %v8119_v42 = vld [vmem:[#allocation4 + $0x438] sm:$0xff] }
 0x703   :  { %v5811_v60 = vpop.f32.mrf.mxu2  ;;  %8136 = vmatpush.msra.mxu1 %v8119_v42  ;;  %v13039_v42 = vld [vmem:[#allocation52_spill] sm:$0xff] }
 0x704   :  { %v6101_v23 = vpop.f32.mrf.mxu3  ;;  %v5812_v34 = vadd.f32 %v5811_v60, %v11409_v0  ;;  %v6458_v3 = vpop.f32.mrf.mxu0  ;;  %v6659_v60 = vld [vmem:[#allocation3 + $0x171] sm:$0xff] }
 0x705   :  { %v11673_v33 = vpop.f32.mrf.mxu1 }
 0x706   :  { %13033 = vst [vmem:[#allocation73_spill] sm:$0xff] %v11673_v33  ;;  %v6239_v35 = vadd.f32 %v6101_v23, %v5812_v34  ;;  %v6321_v34 = vld [vmem:[#allocation3 + $0x260] sm:$0xff]  ;;  %v7365_v33 = vld [vmem:[#allocation3 + $0x168] sm:$0xff] }
 0x707   :  { %6505 = vmatmul.f32.gmra.mxu0 %v6320_v38  ;;  %6811 = vmatmul.f32.gmra.mxu1 %v6658_v37 }
 0x708   :  { %5861 = vmatmul.f32.gmra.mxu2 %v6318_v48  ;;  %v11675_v6 = vadd.f32 %v6455_v51, %v6239_v35 }
 0x709   :  { %6151 = vmatmul.f32.gmra.mxu3 %v5966_v14 }
 0x70a   :  { %13034 = vst [vmem:[#allocation74_spill] sm:$0xff] %v11675_v6  ;;  %v7410_v6 = vld [vmem:[#allocation4 + $0x330] sm:$0xff] }
 0x70b   :  { %v5814_v18 = vpop.f32.mrf.mxu2  ;;  %7429 = vmatpush.msra.mxu3 %v7410_v6 }
 0x70c   :  { %v6104_v49 = vpop.f32.mrf.mxu3  ;;  %v5815_v0 = vadd.f32 %v5814_v18, %v11417_v8  ;;  %v6461_v13 = vpop.f32.mrf.mxu0  ;;  %v6322_v18 = vld [vmem:[#allocation3 + $0x270] sm:$0xff] }
 0x70d   :  { %v11678_v15 = vpop.f32.mrf.mxu1 }
 0x70e   :  { %13035 = vst [vmem:[#allocation75_spill] sm:$0xff] %v11678_v15  ;;  %v6240_v23 = vadd.f32 %v6104_v49, %v5815_v0  ;;  %v6660_v49 = vld [vmem:[#allocation3 + $0x181] sm:$0xff]  ;;  %v7719_v15 = vld [vmem:[#allocation3 + $0x169] sm:$0xff] }
 0x70f   :  { %6508 = vmatmul.f32.gmra.mxu0 %v6321_v34  ;;  %6814 = vmatmul.f32.gmra.mxu1 %v6659_v60  ;;  %v5968_v0 = vld [vmem:[#allocation3 + $0x25a] sm:$0xff] }
 0x710   :  { %5864 = vmatmul.f32.gmra.mxu2 %v6319_v28  ;;  %v11680_v14 = vadd.f32 %v6458_v3, %v6240_v23 }
 0x711   :  { %6154 = vmatmul.f32.gmra.mxu3 %v5967_v54 }
 0x712   :  { %13036 = vst [vmem:[#allocation76_spill] sm:$0xff] %v11680_v14  ;;  %v6661_v14 = vld [vmem:[#allocation3 + $0x189] sm:$0xff] }
 0x713   :  { %v5817_v48 = vpop.f32.mrf.mxu2 }
 0x714   :  { %v6107_v53 = vpop.f32.mrf.mxu3  ;;  %v5818_v8 = vadd.f32 %v5817_v48, %v11425_v30  ;;  %v6464_v51 = vpop.f32.mrf.mxu0  ;;  %v6323_v48 = vld [vmem:[#allocation3 + $0x278] sm:$0xff] }
 0x715   :  { %v11683_v35 = vpop.f32.mrf.mxu1 }
 0x716   :  { %13037 = vst [vmem:[#allocation77_spill] sm:$0xff] %v11683_v35  ;;  %v6241_v37 = vadd.f32 %v6107_v53, %v5818_v8  ;;  %v5969_v53 = vld [vmem:[#allocation3 + $0x262] sm:$0xff]  ;;  %v5971_v35 = vld [vmem:[#allocation3 + $0x27a] sm:$0xff] }
 0x717   :  { %6511 = vmatmul.f32.gmra.mxu0 %v6322_v18  ;;  %6817 = vmatmul.f32.gmra.mxu1 %v6660_v49 }
 0x718   :  { %5867 = vmatmul.f32.gmra.mxu2 %v6320_v38  ;;  %v11685_v54 = vadd.f32 %v6461_v13, %v6241_v37  ;;  %v13042_v37 = vld [vmem:[#allocation54_spill] sm:$0xff] }
 0x719   :  { %6157 = vmatmul.f32.gmra.mxu3 %v5968_v0 }
 0x71a   :  { %13038 = vst [vmem:[#allocation79_spill] sm:$0xff] %v11685_v54 }
 0x71b   :  { %v5820_v28 = vpop.f32.mrf.mxu2 }
 0x71c   :  { %v6110_v3 = vpop.f32.mrf.mxu3  ;;  %v5821_v60 = vadd.f32 %v5820_v28, %v13039_v42  ;;  %v6467_v23 = vpop.f32.mrf.mxu0  ;;  %v7055_v28 = vld [vmem:[#allocation4 + $0x2b0] sm:$0xff] }
 0x71d   :  { %v11688_v25 = vpop.f32.mrf.mxu1  ;;  %7074 = vmatpush.msra.mxu2 %v7055_v28  ;;  %v6663_v28 = vld [vmem:[#allocation3 + $0x1d1] sm:$0xff] }
 0x71e   :  { %13040 = vst [vmem:[#allocation80_spill] sm:$0xff] %v11688_v25  ;;  %v6242_v30 = vadd.f32 %v6110_v3, %v5821_v60  ;;  %v6324_v3 = vld [vmem:[#allocation3 + $0x288] sm:$0xff]  ;;  %v5970_v25 = vld [vmem:[#allocation3 + $0x272] sm:$0xff] }
 0x71f   :  { %6514 = vmatmul.f32.gmra.mxu0 %v6323_v48  ;;  %6820 = vmatmul.f32.gmra.mxu1 %v6661_v14  ;;  %v6662_v60 = vld [vmem:[#allocation3 + $0x1c9] sm:$0xff] }
 0x720   :  { %5870 = vmatmul.f32.gmra.mxu2 %v6321_v34  ;;  %v11690_v8 = vadd.f32 %v6464_v51, %v6242_v30  ;;  %v13045_v30 = vld [vmem:[#allocation57_spill] sm:$0xff] }
 0x721   :  { %6160 = vmatmul.f32.gmra.mxu3 %v5969_v53 }
 0x722   :  { %13041 = vst [vmem:[#allocation81_spill] sm:$0xff] %v11690_v8  ;;  %v7764_v8 = vld [vmem:[#allocation4 + $0x3b0] sm:$0xff] }
 0x723   :  { %v5823_v38 = vpop.f32.mrf.mxu2  ;;  %7783 = vmatpush.msra.mxu0 %v7764_v8 }
 0x724   :  { %v6113_v13 = vpop.f32.mrf.mxu3  ;;  %v5824_v49 = vadd.f32 %v5823_v38, %v13042_v37  ;;  %v6470_v0 = vpop.f32.mrf.mxu0 }
 0x725   :  { %v11693_v54 = vpop.f32.mrf.mxu1 }
 0x726   :  { %13043 = vst [vmem:[#allocation84_spill] sm:$0xff] %v11693_v54  ;;  %v6243_v42 = vadd.f32 %v6113_v13, %v5824_v49  ;;  %v6325_v49 = vld [vmem:[#allocation3 + $0x290] sm:$0xff] }
 0x727   :  { %6517 = vmatmul.f32.gmra.mxu0 %v6324_v3  ;;  %6823 = vmatmul.f32.gmra.mxu1 %v6662_v60  ;;  %v8118_v54 = vld [vmem:[#allocation4 + $0x430] sm:$0xff] }
 0x728   :  { %5873 = vmatmul.f32.gmra.mxu2 %v6322_v18  ;;  %v11695_v34 = vadd.f32 %v6467_v23, %v6243_v42  ;;  %8137 = vmatpush.msra.mxu1 %v8118_v54  ;;  %v13051_v54 = vld [vmem:[#allocation61_spill] sm:$0xff] }
 0x729   :  { %6163 = vmatmul.f32.gmra.mxu3 %v5970_v25  ;;  %v13048_v25 = vld [vmem:[#allocation59_spill] sm:$0xff] }
 0x72a   :  { %13044 = vst [vmem:[#allocation23_spill] sm:$0xff] %v11695_v34  ;;  %v5972_v34 = vld [vmem:[#allocation3 + $0x28a] sm:$0xff] }
 0x72b   :  { %v5826_v14 = vpop.f32.mrf.mxu2 }
 0x72c   :  { %v6116_v51 = vpop.f32.mrf.mxu3  ;;  %v5827_v53 = vadd.f32 %v5826_v14, %v13045_v30  ;;  %v6473_v38 = vpop.f32.mrf.mxu0  ;;  %v6326_v30 = vld [vmem:[#allocation3 + $0x2a0] sm:$0xff] }
 0x72d   :  { %v11698_v37 = vpop.f32.mrf.mxu1 }
 0x72e   :  { %13046 = vst [vmem:[#allocation25_spill] sm:$0xff] %v11698_v37  ;;  %v6244_v13 = vadd.f32 %v6116_v51, %v5827_v53  ;;  %v6664_v53 = vld [vmem:[#allocation3 + $0x1e1] sm:$0xff] }
 0x72f   :  { %6520 = vmatmul.f32.gmra.mxu0 %v6325_v49  ;;  %6826 = vmatmul.f32.gmra.mxu1 %v6663_v28 }
 0x730   :  { %5876 = vmatmul.f32.gmra.mxu2 %v6323_v48  ;;  %v11700_v18 = vadd.f32 %v6470_v0, %v6244_v13 }
 0x731   :  { %6166 = vmatmul.f32.gmra.mxu3 %v5971_v35 }
 0x732   :  { %13047 = vst [vmem:[#allocation22_spill] sm:$0xff] %v11700_v18  ;;  %v6665_v18 = vld [vmem:[#allocation3 + $0x1e9] sm:$0xff] }
 0x733   :  { %v5829_v6 = vpop.f32.mrf.mxu2 }
 0x734   :  { %v6119_v23 = vpop.f32.mrf.mxu3  ;;  %v5830_v42 = vadd.f32 %v5829_v6, %v13048_v25  ;;  %v6476_v60 = vpop.f32.mrf.mxu0  ;;  %v6327_v25 = vld [vmem:[#allocation3 + $0x2a8] sm:$0xff] }
 0x735   :  { %v11703_v14 = vpop.f32.mrf.mxu1 }
 0x736   :  { %13049 = vst [vmem:[#allocation16_spill] sm:$0xff] %v11703_v14  ;;  %v6245_v51 = vadd.f32 %v6119_v23, %v5830_v42  ;;  %v5973_v23 = vld [vmem:[#allocation3 + $0x292] sm:$0xff]  ;;  %v5974_v14 = vld [vmem:[#allocation3 + $0x2a2] sm:$0xff] }
 0x737   :  { %6523 = vmatmul.f32.gmra.mxu0 %v6326_v30  ;;  %6829 = vmatmul.f32.gmra.mxu1 %v6664_v53 }
 0x738   :  { %5879 = vmatmul.f32.gmra.mxu2 %v6324_v3  ;;  %v11705_v35 = vadd.f32 %v6473_v38, %v6245_v51  ;;  %v13054_v38 = vld [vmem:[#allocation62_spill] sm:$0xff] }
 0x739   :  { %6169 = vmatmul.f32.gmra.mxu3 %v5972_v34 }
 0x73a   :  { %13050 = vst [vmem:[#allocation40_spill] sm:$0xff] %v11705_v35 }
 0x73b   :  { %v5832_v48 = vpop.f32.mrf.mxu2 }
 0x73c   :  { %v6122_v8 = vpop.f32.mrf.mxu3  ;;  %v5833_v0 = vadd.f32 %v5832_v48, %v13051_v54  ;;  %v6479_v28 = vpop.f32.mrf.mxu0  ;;  %v7054_v48 = vld [vmem:[#allocation4 + $0x2a8] sm:$0xff] }
 0x73d   :  { %v11708_v13 = vpop.f32.mrf.mxu1  ;;  %7075 = vmatpush.msra.mxu2 %v7054_v48  ;;  %v7763_v48 = vld [vmem:[#allocation4 + $0x3a8] sm:$0xff] }
 0x73e   :  { %13052 = vst [vmem:[#allocation17_spill] sm:$0xff] %v11708_v13  ;;  %v6246_v6 = vadd.f32 %v6122_v8, %v5833_v0  ;;  %v6328_v8 = vld [vmem:[#allocation3 + $0x2b8] sm:$0xff]  ;;  %v7409_v13 = vld [vmem:[#allocation4 + $0x328] sm:$0xff]  ;;  %7784 = vmatpush.msra.mxu0 %v7763_v48 }
 0x73f   :  { %6526 = vmatmul.f32.gmra.mxu0 %v6327_v25  ;;  %6832 = vmatmul.f32.gmra.mxu1 %v6665_v18  ;;  %v6666_v0 = vld [vmem:[#allocation3 + $0x1f9] sm:$0xff] }
 0x740   :  { %5882 = vmatmul.f32.gmra.mxu2 %v6325_v49  ;;  %v11710_v42 = vadd.f32 %v6476_v60, %v6246_v6  ;;  %7430 = vmatpush.msra.mxu3 %v7409_v13 }
 0x741   :  { %6172 = vmatmul.f32.gmra.mxu3 %v5973_v23 }
 0x742   :  { %13053 = vst [vmem:[#allocation29_spill] sm:$0xff] %v11710_v42  ;;  %v8117_v42 = vld [vmem:[#allocation4 + $0x428] sm:$0xff] }
 0x743   :  { %v5835_v3 = vpop.f32.mrf.mxu2  ;;  %8138 = vmatpush.msra.mxu1 %v8117_v42 }
 0x744   :  { %v6125_v34 = vpop.f32.mrf.mxu3  ;;  %v5836_v51 = vadd.f32 %v5835_v3, %v13054_v38  ;;  %v6482_v53 = vpop.f32.mrf.mxu0  ;;  %v6667_v38 = vld [vmem:[#allocation3 + $0x201] sm:$0xff] }
 0x745   :  { %v11713_v35 = vpop.f32.mrf.mxu1 }
 0x746   :  { %13055 = vst [vmem:[#allocation28_spill] sm:$0xff] %v11713_v35  ;;  %v6247_v54 = vadd.f32 %v6125_v34, %v5836_v51  ;;  %v6329_v51 = vld [vmem:[#allocation3 + $0x2c0] sm:$0xff]  ;;  %v5975_v35 = vld [vmem:[#allocation3 + $0x2aa] sm:$0xff] }
 0x747   :  { %6529 = vmatmul.f32.gmra.mxu0 %v6328_v8  ;;  %6835 = vmatmul.f32.gmra.mxu1 %v6666_v0 }
 0x748   :  { %5885 = vmatmul.f32.gmra.mxu2 %v6326_v30  ;;  %v11715_v49 = vadd.f32 %v6479_v28, %v6247_v54 }
 0x749   :  { %6175 = vmatmul.f32.gmra.mxu3 %v5974_v14 }
 0x74a   :  { %13056 = vst [vmem:[#allocation45_spill] sm:$0xff] %v11715_v49  ;;  %v5976_v49 = vld [vmem:[#allocation3 + $0x2ba] sm:$0xff] }
 0x74b   :  { %v5838_v18 = vpop.f32.mrf.mxu2 }
 0x74c   :  { %v6128_v60 = vpop.f32.mrf.mxu3  ;;  %v5839_v6 = vadd.f32 %v5838_v18, %v11474_v24  ;;  %v6485_v23 = vpop.f32.mrf.mxu0  ;;  %v13059_v24 = vld [vmem:[#allocation64_spill] sm:$0xff] }
 0x74d   :  { %v11718_v3 = vpop.f32.mrf.mxu1 }
 0x74e   :  { %13057 = vst [vmem:[#allocation30_spill] sm:$0xff] %v11718_v3  ;;  %v6248_v34 = vadd.f32 %v6128_v60, %v5839_v6  ;;  %v6330_v60 = vld [vmem:[#allocation3 + $0x2d0] sm:$0xff]  ;;  %v7364_v3 = vld [vmem:[#allocation3 + $0x158] sm:$0xff] }
 0x74f   :  { %6532 = vmatmul.f32.gmra.mxu0 %v6329_v51  ;;  %6838 = vmatmul.f32.gmra.mxu1 %v6667_v38  ;;  %v6668_v6 = vld [vmem:[#allocation3 + $0x211] sm:$0xff] }
 0x750   :  { %5888 = vmatmul.f32.gmra.mxu2 %v6327_v25  ;;  %v11720_v14 = vadd.f32 %v6482_v53, %v6248_v34 }
 0x751   :  { %6178 = vmatmul.f32.gmra.mxu3 %v5975_v35 }
 0x752   :  { %13058 = vst [vmem:[#allocation34_spill] sm:$0xff] %v11720_v14  ;;  %v5978_v14 = vld [vmem:[#allocation3 + $0x2d2] sm:$0xff] }
 0x753   :  { %v5841_v30 = vpop.f32.mrf.mxu2 }
 0x754   :  { %v6131_v28 = vpop.f32.mrf.mxu3  ;;  %v5842_v13 = vadd.f32 %v5841_v30, %v13059_v24  ;;  %v6488_v54 = vpop.f32.mrf.mxu0  ;;  %v6331_v30 = vld [vmem:[#allocation3 + $0x2d8] sm:$0xff] }
 0x755   :  { %v11723_v0 = vpop.f32.mrf.mxu1  ;;  %v6669_v24 = vld [vmem:[#allocation3 + $0x219] sm:$0xff] }
 0x756   :  { %13060 = vst [vmem:[#allocation19_spill] sm:$0xff] %v11723_v0  ;;  %v6249_v18 = vadd.f32 %v6131_v28, %v5842_v13  ;;  %v5977_v28 = vld [vmem:[#allocation3 + $0x2c2] sm:$0xff]  ;;  %v7718_v0 = vld [vmem:[#allocation3 + $0x159] sm:$0xff] }
 0x757   :  { %6535 = vmatmul.f32.gmra.mxu0 %v6330_v60  ;;  %6841 = vmatmul.f32.gmra.mxu1 %v6668_v6 }
 0x758   :  { %5891 = vmatmul.f32.gmra.mxu2 %v6328_v8  ;;  %v11725_v35 = vadd.f32 %v6485_v23, %v6249_v18 }
 0x759   :  { %6181 = vmatmul.f32.gmra.mxu3 %v5976_v49 }
 0x75a   :  { %13061 = vst [vmem:[#allocation37_spill] sm:$0xff] %v11725_v35  ;;  %v7408_v35 = vld [vmem:[#allocation4 + $0x320] sm:$0xff] }
 0x75b   :  { %v5844_v25 = vpop.f32.mrf.mxu2  ;;  %7431 = vmatpush.msra.mxu3 %v7408_v35 }
 0x75c   :  { %v6134_v53 = vpop.f32.mrf.mxu3  ;;  %v5845_v42 = vadd.f32 %v5844_v25, %v11484_v1  ;;  %v6491_v38 = vpop.f32.mrf.mxu0  ;;  %v7053_v1 = vld [vmem:[#allocation4 + $0x2a0] sm:$0xff] }
 0x75d   :  { %v11728_v34 = vpop.f32.mrf.mxu1  ;;  %7076 = vmatpush.msra.mxu2 %v7053_v1  ;;  %v7762_v1 = vld [vmem:[#allocation4 + $0x3a0] sm:$0xff] }
 0x75e   :  { %13062 = vst [vmem:[#allocation20_spill] sm:$0xff] %v11728_v34  ;;  %v6250_v48 = vadd.f32 %v6134_v53, %v5845_v42  ;;  %v6332_v53 = vld [vmem:[#allocation3 + $0x2e8] sm:$0xff]  ;;  %7785 = vmatpush.msra.mxu0 %v7762_v1 }
 0x75f   :  { %6538 = vmatmul.f32.gmra.mxu0 %v6331_v30  ;;  %6844 = vmatmul.f32.gmra.mxu1 %v6669_v24  ;;  %v6670_v42 = vld [vmem:[#allocation3 + $0x229] sm:$0xff] }
 0x760   :  { %5894 = vmatmul.f32.gmra.mxu2 %v6329_v51  ;;  %v11730_v13 = vadd.f32 %v6488_v54, %v6250_v48  ;;  %v6335_v1 = vld [vmem:[#allocation3 + $0x308] sm:$0xff] }
 0x761   :  { %6184 = vmatmul.f32.gmra.mxu3 %v5977_v28 }
 0x762   :  { %13063 = vst [vmem:[#allocation53_spill] sm:$0xff] %v11730_v13  ;;  %v8116_v13 = vld [vmem:[#allocation4 + $0x420] sm:$0xff] }
 0x763   :  { %v5847_v8 = vpop.f32.mrf.mxu2  ;;  %8139 = vmatpush.msra.mxu1 %v8116_v13 }
 0x764   :  { %v6137_v49 = vpop.f32.mrf.mxu3  ;;  %v5848_v23 = vadd.f32 %v5847_v8, %v11489_v36  ;;  %v6494_v18 = vpop.f32.mrf.mxu0  ;;  %v6671_v8 = vld [vmem:[#allocation3 + $0x231] sm:$0xff] }
 0x765   :  { %v11733_v6 = vpop.f32.mrf.mxu1 }
 0x766   :  { %13064 = vst [vmem:[#allocation33_spill] sm:$0xff] %v11733_v6  ;;  %v6251_v25 = vadd.f32 %v6137_v49, %v5848_v23  ;;  %v6333_v23 = vld [vmem:[#allocation3 + $0x2f0] sm:$0xff]  ;;  %v5979_v6 = vld [vmem:[#allocation3 + $0x2da] sm:$0xff] }
 0x767   :  { %6541 = vmatmul.f32.gmra.mxu0 %v6332_v53  ;;  %6847 = vmatmul.f32.gmra.mxu1 %v6670_v42 }
 0x768   :  { %5897 = vmatmul.f32.gmra.mxu2 %v6330_v60  ;;  %v11735_v51 = vadd.f32 %v6491_v38, %v6251_v25 }
 0x769   :  { %6187 = vmatmul.f32.gmra.mxu3 %v5978_v14 }
 0x76a   :  { %13065 = vst [vmem:[#allocation42_spill] sm:$0xff] %v11735_v51  ;;  %v8115_v51 = vld [vmem:[#allocation4 + $0x418] sm:$0xff] }
 0x76b   :  { %v5850_v54 = vpop.f32.mrf.mxu2  ;;  %8140 = vmatpush.msra.mxu1 %v8115_v51 }
 0x76c   :  { %v6140_v48 = vpop.f32.mrf.mxu3  ;;  %v5851_v36 = vadd.f32 %v5850_v54, %v11494_v26  ;;  %v6497_v24 = vpop.f32.mrf.mxu0  ;;  %v6334_v54 = vld [vmem:[#allocation3 + $0x300] sm:$0xff] }
 0x76d   :  { %v11738_v28 = vpop.f32.mrf.mxu1 }
 0x76e   :  { %13066 = vst [vmem:[#allocation35_spill] sm:$0xff] %v11738_v28  ;;  %v6252_v49 = vadd.f32 %v6140_v48, %v5851_v36  ;;  %v6672_v48 = vld [vmem:[#allocation3 + $0x241] sm:$0xff]  ;;  %v5980_v36 = vld [vmem:[#allocation3 + $0x2ea] sm:$0xff] }
 0x76f   :  { %6544 = vmatmul.f32.gmra.mxu0 %v6333_v23  ;;  %6850 = vmatmul.f32.gmra.mxu1 %v6671_v8  ;;  %v7363_v28 = vld [vmem:[#allocation3 + $0x150] sm:$0xff] }
 0x770   :  { %5900 = vmatmul.f32.gmra.mxu2 %v6331_v30  ;;  %v11740_v14 = vadd.f32 %v6494_v18, %v6252_v49 }
 0x771   :  { %6190 = vmatmul.f32.gmra.mxu3 %v5979_v6 }
 0x772   :  { %13067 = vst [vmem:[#allocation24_spill] sm:$0xff] %v11740_v14  ;;  %v6336_v14 = vld [vmem:[#allocation3 + $0x318] sm:$0xff] }
 0x773   :  { %v5853_v60 = vpop.f32.mrf.mxu2 }
 0x774   :  { %v6143_v35 = vpop.f32.mrf.mxu3  ;;  %v5854_v26 = vadd.f32 %v5853_v60, %v11499_v61  ;;  %v6500_v38 = vpop.f32.mrf.mxu0  ;;  %v6673_v60 = vld [vmem:[#allocation3 + $0x249] sm:$0xff] }
 0x775   :  { %v11743_v25 = vpop.f32.mrf.mxu1 }
 0x776   :  { %13068 = vst [vmem:[#allocation38_spill] sm:$0xff] %v11743_v25  ;;  %v6253_v42 = vadd.f32 %v6143_v35, %v5854_v26  ;;  %v5981_v35 = vld [vmem:[#allocation3 + $0x2f2] sm:$0xff] }
 0x777   :  { %6547 = vmatmul.f32.gmra.mxu0 %v6334_v54  ;;  %6853 = vmatmul.f32.gmra.mxu1 %v6672_v48  ;;  %v7052_v26 = vld [vmem:[#allocation4 + $0x298] sm:$0xff] }
 0x778   :  { %5903 = vmatmul.f32.gmra.mxu2 %v6332_v53  ;;  %v11745_v30 = vadd.f32 %v6497_v24, %v6253_v42  ;;  %v7761_v53 = vld [vmem:[#allocation4 + $0x398] sm:$0xff] }
 0x779   :  { %6193 = vmatmul.f32.gmra.mxu3 %v5980_v36  ;;  %v7407_v48 = vld [vmem:[#allocation4 + $0x318] sm:$0xff]  ;;  %7077 = vmatpush.msra.mxu2 %v7052_v26  ;;  %v5982_v26 = vld [vmem:[#allocation3 + $0x302] sm:$0xff] }
 0x77a   :  { %13069 = vst [vmem:[#allocation49_spill] sm:$0xff] %v11745_v30  ;;  %7786 = vmatpush.msra.mxu0 %v7761_v53  ;;  %7432 = vmatpush.msra.mxu3 %v7407_v48  ;;  %v7760_v30 = vld [vmem:[#allocation4 + $0x390] sm:$0xff]  ;;  %v7405_v53 = vld [vmem:[#allocation4 + $0x308] sm:$0xff]  ;;  %v7758_v48 = vld [vmem:[#allocation4 + $0x380] sm:$0xff] }
 0x77b   :  { %v5856_v18 = vpop.f32.mrf.mxu2  ;;  %v7717_v25 = vld [vmem:[#allocation3 + $0x151] sm:$0xff] }
 0x77c   :  { %v6146_v6 = vpop.f32.mrf.mxu3  ;;  %v5857_v13 = vadd.f32 %v5856_v18, %v11504_v45  ;;  %v6503_v8 = vpop.f32.mrf.mxu0  ;;  %7787 = vmatpush.msra.mxu0 %v7760_v30 }
 0x77d   :  { %v11748_v49 = vpop.f32.mrf.mxu1 }
 0x77e   :  { %13070 = vst [vmem:[#allocation27_spill] sm:$0xff] %v11748_v49  ;;  %v6254_v61 = vadd.f32 %v6146_v6, %v5857_v13  ;;  %v7051_v13 = vld [vmem:[#allocation4 + $0x290] sm:$0xff]  ;;  %v7362_v49 = vld [vmem:[#allocation3 + $0x140] sm:$0xff] }
 0x77f   :  { %6550 = vmatmul.f32.gmra.mxu0 %v6335_v1  ;;  %6856 = vmatmul.f32.gmra.mxu1 %v6673_v60  ;;  %v6674_v60 = vld [vmem:[#allocation3 + $0x259] sm:$0xff] }
 0x780   :  { %5906 = vmatmul.f32.gmra.mxu2 %v6333_v23  ;;  %v11750_v24 = vadd.f32 %v6500_v38, %v6254_v61  ;;  %v7406_v23 = vld [vmem:[#allocation4 + $0x310] sm:$0xff]  ;;  %v7050_v38 = vld [vmem:[#allocation4 + $0x288] sm:$0xff] }
 0x781   :  { %6196 = vmatmul.f32.gmra.mxu3 %v5981_v35  ;;  %7078 = vmatpush.msra.mxu2 %v7051_v13  ;;  %v7759_v61 = vld [vmem:[#allocation4 + $0x388] sm:$0xff]  ;;  %v7404_v13 = vld [vmem:[#allocation4 + $0x300] sm:$0xff] }
 0x782   :  { %13071 = vst [vmem:[#allocation43_spill] sm:$0xff] %v11750_v24  ;;  %7433 = vmatpush.msra.mxu3 %v7406_v23  ;;  %7788 = vmatpush.msra.mxu0 %v7759_v61 }
 0x783   :  { %v5859_v45 = vpop.f32.mrf.mxu2  ;;  %7079 = vmatpush.msra.mxu2 %v7050_v38 }
 0x784   :  { %v6149_v42 = vpop.f32.mrf.mxu3  ;;  %v5860_v36 = vadd.f32 %v5859_v45, %v11509_v47  ;;  %v6506_v18 = vpop.f32.mrf.mxu0  ;;  %v7049_v47 = vld [vmem:[#allocation4 + $0x280] sm:$0xff]  ;;  %7434 = vmatpush.msra.mxu3 %v7405_v53  ;;  %7789 = vmatpush.msra.mxu0 %v7758_v48 }
 0x785   :  { %v11753_v6 = vpop.f32.mrf.mxu1  ;;  %7080 = vmatpush.msra.mxu2 %v7049_v47 }
 0x786   :  { %13072 = vst [vmem:[#allocation32_spill] sm:$0xff] %v11753_v6  ;;  %v6255_v35 = vadd.f32 %v6149_v42, %v5860_v36  ;;  %7435 = vmatpush.msra.mxu3 %v7404_v13  ;;  %v6338_v13 = vld [vmem:[#allocation3 + $0x330] sm:$0xff] }
 0x787   :  { %6553 = vmatmul.f32.gmra.mxu0 %v6336_v14  ;;  %6859 = vmatmul.f32.gmra.mxu1 %v6674_v60  ;;  %v6337_v60 = vld [vmem:[#allocation3 + $0x320] sm:$0xff]  ;;  %v11985_v6 = vld [vmem:[#allocation3 + $0x12a] sm:$0xff] }
 0x788   :  { %5909 = vmatmul.f32.gmra.mxu2 %v6334_v54  ;;  %v11755_v45 = vadd.f32 %v6503_v8, %v6255_v35  ;;  %v5983_v8 = vld [vmem:[#allocation3 + $0x30a] sm:$0xff] }
 0x789   :  { %6199 = vmatmul.f32.gmra.mxu3 %v5982_v26  ;;  %v6675_v26 = vld [vmem:[#allocation3 + $0x261] sm:$0xff] }
 0x78a   :  { %13073 = vst [vmem:[#allocation48_spill] sm:$0xff] %v11755_v45  ;;  %v11817_v45 = vld [vmem:[#allocation3 + $0x62] sm:$0xff] }
 0x78b   :  { %v5862_v30 = vpop.f32.mrf.mxu2 }
 0x78c   :  { %v6152_v42 = vpop.f32.mrf.mxu3  ;;  %v5863_v36 = vadd.f32 %v5862_v30, %v11514_v12  ;;  %v6509_v23 = vpop.f32.mrf.mxu0  ;;  %v6676_v30 = vld [vmem:[#allocation3 + $0x271] sm:$0xff] }
 0x78d   :  { %v11758_v24 = vpop.f32.mrf.mxu1 }
 0x78e   :  { %13074 = vst [vmem:[#allocation50_spill] sm:$0xff] %v11758_v24  ;;  %v6256_v54 = vadd.f32 %v6152_v42, %v5863_v36  ;;  %v5984_v42 = vld [vmem:[#allocation3 + $0x31a] sm:$0xff] }
 0x78f   :  { %6556 = vmatmul.f32.gmra.mxu0 %v6337_v60  ;;  %6862 = vmatmul.f32.gmra.mxu1 %v6675_v26  ;;  %v7716_v24 = vld [vmem:[#allocation3 + $0x141] sm:$0xff] }
 0x790   :  { %5912 = vmatmul.f32.gmra.mxu2 %v6335_v1  ;;  %v11760_v35 = vadd.f32 %v6506_v18, %v6256_v54 }
 0x791   :  { %6202 = vmatmul.f32.gmra.mxu3 %v5983_v8  ;;  %v6339_v8 = vld [vmem:[#allocation3 + $0x338] sm:$0xff] }
 0x792   :  { %13075 = vst [vmem:[#allocation39_spill] sm:$0xff] %v11760_v35  ;;  %v11809_v35 = vld [vmem:[#allocation3 + $0x52] sm:$0xff] }
 0x793   :  { %v5865_v38 = vpop.f32.mrf.mxu2 }
 0x794   :  { %v6155_v61 = vpop.f32.mrf.mxu3  ;;  %v5866_v12 = vadd.f32 %v5865_v38, %v11519_v19  ;;  %v6512_v53 = vpop.f32.mrf.mxu0  ;;  %v6677_v38 = vld [vmem:[#allocation3 + $0x279] sm:$0xff] }
 0x795   :  { %v11763_v47 = vpop.f32.mrf.mxu1 }
 0x796   :  { %13076 = vst [vmem:[#allocation55_spill] sm:$0xff] %v11763_v47  ;;  %v6257_v48 = vadd.f32 %v6155_v61, %v5866_v12  ;;  %v5985_v61 = vld [vmem:[#allocation3 + $0x322] sm:$0xff]  ;;  %v7361_v47 = vld [vmem:[#allocation3 + $0x138] sm:$0xff] }
 0x797   :  { %6559 = vmatmul.f32.gmra.mxu0 %v6338_v13  ;;  %6865 = vmatmul.f32.gmra.mxu1 %v6676_v30 }
 0x798   :  { %5915 = vmatmul.f32.gmra.mxu2 %v6336_v14  ;;  %v11765_v1 = vadd.f32 %v6509_v23, %v6257_v48 }
 0x799   :  { %6205 = vmatmul.f32.gmra.mxu3 %v5984_v42  ;;  %v7693_v42 = vld [vmem:[#allocation3 + $0x31] sm:$0xff] }
 0x79a   :  { %13077 = vst [vmem:[#allocation44_spill] sm:$0xff] %v11765_v1  ;;  %v8113_v1 = vld [vmem:[#allocation4 + $0x408] sm:$0xff] }
 0x79b   :  { %v5868_v18 = vpop.f32.mrf.mxu2 }
 0x79c   :  { %v6158_v36 = vpop.f32.mrf.mxu3  ;;  %v5869_v51 = vadd.f32 %v5868_v18, %v11524_v5  ;;  %v6515_v54 = vpop.f32.mrf.mxu0  ;;  %v6678_v18 = vld [vmem:[#allocation3 + $0x289] sm:$0xff] }
 0x79d   :  { %v11768_v26 = vpop.f32.mrf.mxu1 }
 0x79e   :  { %13078 = vst [vmem:[#allocation58_spill] sm:$0xff] %v11768_v26  ;;  %v6258_v19 = vadd.f32 %v6158_v36, %v5869_v51  ;;  %v6984_v36 = vld [vmem:[#allocation3 + $0x1a] sm:$0xff]  ;;  %v7339_v51 = vld [vmem:[#allocation3 + $0x30] sm:$0xff] }
 0x79f   :  { %6562 = vmatmul.f32.gmra.mxu0 %v6339_v8  ;;  %6868 = vmatmul.f32.gmra.mxu1 %v6677_v38  ;;  %v7715_v26 = vld [vmem:[#allocation3 + $0x139] sm:$0xff] }
 0x7a0   :  { %5918 = vmatmul.f32.gmra.mxu2 %v6337_v60  ;;  %v11770_v12 = vadd.f32 %v6512_v53, %v6258_v19 }
 0x7a1   :  { %6208 = vmatmul.f32.gmra.mxu3 %v5985_v61 }
 0x7a2   :  { %13079 = vst [vmem:[#allocation47_spill] sm:$0xff] %v11770_v12  ;;  %v6985_v12 = vld [vmem:[#allocation3 + $0x22] sm:$0xff] }
 0x7a3   :  { %v5871_v14 = vpop.f32.mrf.mxu2 }
 0x7a4   :  { %v6161_v23 = vpop.f32.mrf.mxu3  ;;  %v5872_v48 = vadd.f32 %v5871_v14, %v11529_v32  ;;  %v6518_v13 = vpop.f32.mrf.mxu0  ;;  %v7694_v14 = vld [vmem:[#allocation3 + $0x39] sm:$0xff] }
 0x7a5   :  { %v11773_v30 = vpop.f32.mrf.mxu1 }
 0x7a6   :  { %13080 = vst [vmem:[#allocation52_spill] sm:$0xff] %v11773_v30  ;;  %v6259_v5 = vadd.f32 %v6161_v23, %v5872_v48  ;;  %v6679_v23 = vld [vmem:[#allocation3 + $0x291] sm:$0xff] }
 0x7a7   :  { %7790 = vmatmul.f32.vlgmr.msra.gmra.mxu0 %v7693_v42  ;;  %6871 = vmatmul.f32.gmra.mxu1 %v6678_v18  ;;  %v8114_v48 = vld [vmem:[#allocation4 + $0x410] sm:$0xff]  ;;  %v7340_v42 = vld [vmem:[#allocation3 + $0x38] sm:$0xff] }
 0x7a8   :  { %7081 = vmatmul.f32.vlgmr.msra.gmra.mxu2 %v6984_v36  ;;  %v11775_v60 = vadd.f32 %v6515_v54, %v6259_v5  ;;  %8141 = vmatpush.msra.mxu1 %v8114_v48 }
 0x7a9   :  { %7436 = vmatmul.f32.vlgmr.msra.gmra.mxu3 %v7339_v51 }
 0x7aa   :  { %13081 = vst [vmem:[#allocation54_spill] sm:$0xff] %v11775_v60  ;;  %v11785_v60 = vld [vmem:[#allocation3 + $0x32] sm:$0xff]  ;;  %8142 = vmatpush.msra.mxu1 %v8113_v1 }
 0x7ab   :  { %v5874_v53 = vpop.f32.mrf.mxu2 }
 0x7ac   :  { %v6164_v19 = vpop.f32.mrf.mxu3  ;;  %v5875_v8 = vadd.f32 %v5874_v53, %v11534_v52  ;;  %v6521_v38 = vpop.f32.mrf.mxu0 }
 0x7ad   :  { %v11778_v32 = vpop.f32.mrf.mxu1 }
 0x7ae   :  { %13082 = vst [vmem:[#allocation57_spill] sm:$0xff] %v11778_v32  ;;  %v6260_v61 = vadd.f32 %v6164_v19, %v5875_v8  ;;  %v7695_v19 = vld [vmem:[#allocation3 + $0x49] sm:$0xff]  ;;  %v6680_v8 = vld [vmem:[#allocation3 + $0x2a1] sm:$0xff] }
 0x7af   :  { %7793 = vmatmul.f32.gmra.mxu0 %v7694_v14  ;;  %6874 = vmatmul.f32.gmra.mxu1 %v6679_v23  ;;  %v7341_v14 = vld [vmem:[#allocation3 + $0x48] sm:$0xff] }
 0x7b0   :  { %7084 = vmatmul.f32.gmra.mxu2 %v6985_v12  ;;  %v11780_v18 = vadd.f32 %v6518_v13, %v6260_v61  ;;  %v7360_v32 = vld [vmem:[#allocation3 + $0x128] sm:$0xff] }
 0x7b1   :  { %7439 = vmatmul.f32.gmra.mxu3 %v7340_v42 }
 0x7b2   :  { %13083 = vst [vmem:[#allocation59_spill] sm:$0xff] %v11780_v18  ;;  %v11801_v18 = vld [vmem:[#allocation3 + $0x4a] sm:$0xff] }
 0x7b3   :  { %v5877_v54 = vpop.f32.mrf.mxu2 }
 0x7b4   :  { %v6167_v5 = vpop.f32.mrf.mxu3  ;;  %v5878_v52 = vadd.f32 %v5877_v54, %v11538_v31  ;;  %v6524_v36 = vpop.f32.mrf.mxu0  ;;  %v7696_v54 = vld [vmem:[#allocation3 + $0x51] sm:$0xff] }
 0x7b5   :  { %v11783_v51 = vpop.f32.mrf.mxu1 }
 0x7b6   :  { %13084 = vst [vmem:[#allocation61_spill] sm:$0xff] %v11783_v51  ;;  %v6261_v53 = vadd.f32 %v6167_v5, %v5878_v52  ;;  %v6681_v5 = vld [vmem:[#allocation3 + $0x2a9] sm:$0xff]  ;;  %v11793_v52 = vld [vmem:[#allocation3 + $0x3a] sm:$0xff] }
 0x7b7   :  { %7796 = vmatmul.f32.gmra.mxu0 %v7695_v19  ;;  %6877 = vmatmul.f32.gmra.mxu1 %v6680_v8  ;;  %v7342_v19 = vld [vmem:[#allocation3 + $0x50] sm:$0xff] }
 0x7b8   :  { %7087 = vmatmul.f32.gmra.mxu2 %v11785_v60  ;;  %v11788_v12 = vadd.f32 %v6521_v38, %v6261_v53  ;;  %v7714_v51 = vld [vmem:[#allocation3 + $0x129] sm:$0xff] }
 0x7b9   :  { %7442 = vmatmul.f32.gmra.mxu3 %v7341_v14 }
 0x7ba   :  { %13085 = vst [vmem:[#allocation62_spill] sm:$0xff] %v11788_v12  ;;  %v6682_v12 = vld [vmem:[#allocation3 + $0x2b9] sm:$0xff] }
 0x7bb   :  { %v5880_v13 = vpop.f32.mrf.mxu2 }
 0x7bc   :  { %v6170_v61 = vpop.f32.mrf.mxu3  ;;  %v5881_v31 = vadd.f32 %v5880_v13, %v11543_v21  ;;  %v6527_v23 = vpop.f32.mrf.mxu0 }
 0x7bd   :  { %v11791_v48 = vpop.f32.mrf.mxu1 }
 0x7be   :  { %13086 = vst [vmem:[#allocation64_spill] sm:$0xff] %v11791_v48  ;;  %v6262_v42 = vadd.f32 %v6170_v61, %v5881_v31  ;;  %v7697_v31 = vld [vmem:[#allocation3 + $0x61] sm:$0xff] }
 0x7bf   :  { %7799 = vmatmul.f32.gmra.mxu0 %v7696_v54  ;;  %6880 = vmatmul.f32.gmra.mxu1 %v6681_v5  ;;  %v7343_v54 = vld [vmem:[#allocation3 + $0x60] sm:$0xff] }
 0x7c0   :  { %7090 = vmatmul.f32.gmra.mxu2 %v11793_v52  ;;  %v11796_v38 = vadd.f32 %v6524_v36, %v6262_v42 }
 0x7c1   :  { %7445 = vmatmul.f32.gmra.mxu3 %v7342_v19 }
 0x7c2   :  { %13087 = vst [vmem:[#allocation85_spill] sm:$0xff] %v11796_v38  ;;  %v6683_v38 = vld [vmem:[#allocation3 + $0x2c1] sm:$0xff] }
 0x7c3   :  { %v5883_v53 = vpop.f32.mrf.mxu2 }
 0x7c4   :  { %v6173_v8 = vpop.f32.mrf.mxu3  ;;  %v5884_v21 = vadd.f32 %v5883_v53, %v11548_v50  ;;  %v6530_v14 = vpop.f32.mrf.mxu0 }
 0x7c5   :  { %v11799_v13 = vpop.f32.mrf.mxu1 }
 0x7c6   :  { %13088 = vst [vmem:[#allocation86_spill] sm:$0xff] %v11799_v13  ;;  %v6263_v61 = vadd.f32 %v6173_v8, %v5884_v21  ;;  %v7698_v21 = vld [vmem:[#allocation3 + $0x69] sm:$0xff]  ;;  %v7359_v13 = vld [vmem:[#allocation3 + $0x120] sm:$0xff] }
 0x7c7   :  { %7802 = vmatmul.f32.gmra.mxu0 %v7697_v31  ;;  %6883 = vmatmul.f32.gmra.mxu1 %v6682_v12  ;;  %v7344_v12 = vld [vmem:[#allocation3 + $0x68] sm:$0xff] }
 0x7c8   :  { %7093 = vmatmul.f32.gmra.mxu2 %v11801_v18  ;;  %v11804_v36 = vadd.f32 %v6527_v23, %v6263_v61 }
 0x7c9   :  { %7448 = vmatmul.f32.gmra.mxu3 %v7343_v54 }
 0x7ca   :  { %13089 = vst [vmem:[#allocation87_spill] sm:$0xff] %v11804_v36  ;;  %v6684_v36 = vld [vmem:[#allocation3 + $0x2d1] sm:$0xff] }
 0x7cb   :  { %v5886_v42 = vpop.f32.mrf.mxu2 }
 0x7cc   :  { %v6176_v5 = vpop.f32.mrf.mxu3  ;;  %v5887_v50 = vadd.f32 %v5886_v42, %v11553_v17  ;;  %v6533_v19 = vpop.f32.mrf.mxu0 }
 0x7cd   :  { %v11807_v53 = vpop.f32.mrf.mxu1 }
 0x7ce   :  { %13090 = vst [vmem:[#allocation88_spill] sm:$0xff] %v11807_v53  ;;  %v6264_v8 = vadd.f32 %v6176_v5, %v5887_v50  ;;  %v7699_v50 = vld [vmem:[#allocation3 + $0x79] sm:$0xff]  ;;  %v7713_v53 = vld [vmem:[#allocation3 + $0x121] sm:$0xff] }
 0x7cf   :  { %7805 = vmatmul.f32.gmra.mxu0 %v7698_v21  ;;  %6886 = vmatmul.f32.gmra.mxu1 %v6683_v38  ;;  %v7345_v38 = vld [vmem:[#allocation3 + $0x78] sm:$0xff] }
 0x7d0   :  { %7096 = vmatmul.f32.gmra.mxu2 %v11809_v35  ;;  %v11812_v23 = vadd.f32 %v6530_v14, %v6264_v8 }
 0x7d1   :  { %7451 = vmatmul.f32.gmra.mxu3 %v7344_v12 }
 0x7d2   :  { %13091 = vst [vmem:[#allocation89_spill] sm:$0xff] %v11812_v23  ;;  %v11825_v23 = vld [vmem:[#allocation3 + $0x6a] sm:$0xff] }
 0x7d3   :  { %v5889_v61 = vpop.f32.mrf.mxu2 }
 0x7d4   :  { %v6179_v17 = vpop.f32.mrf.mxu3  ;;  %v5890_v31 = vadd.f32 %v5889_v61, %v11558_v59  ;;  %v6536_v54 = vpop.f32.mrf.mxu0 }
 0x7d5   :  { %v11815_v42 = vpop.f32.mrf.mxu1 }
 0x7d6   :  { %13092 = vst [vmem:[#allocation90_spill] sm:$0xff] %v11815_v42  ;;  %v6265_v5 = vadd.f32 %v6179_v17, %v5890_v31  ;;  %v7700_v17 = vld [vmem:[#allocation3 + $0x81] sm:$0xff]  ;;  %v6685_v31 = vld [vmem:[#allocation3 + $0x2d9] sm:$0xff] }
 0x7d7   :  { %7808 = vmatmul.f32.gmra.mxu0 %v7699_v50  ;;  %6889 = vmatmul.f32.gmra.mxu1 %v6684_v36  ;;  %v7346_v50 = vld [vmem:[#allocation3 + $0x80] sm:$0xff] }
 0x7d8   :  { %7099 = vmatmul.f32.gmra.mxu2 %v11817_v45  ;;  %v11820_v14 = vadd.f32 %v6533_v19, %v6265_v5  ;;  %v11841_v42 = vld [vmem:[#allocation3 + $0x82] sm:$0xff] }
 0x7d9   :  { %7454 = vmatmul.f32.gmra.mxu3 %v7345_v38 }
 0x7da   :  { %13093 = vst [vmem:[#allocation91_spill] sm:$0xff] %v11820_v14  ;;  %v6686_v14 = vld [vmem:[#allocation3 + $0x2e9] sm:$0xff] }
 0x7db   :  { %v5892_v1 = vpop.f32.mrf.mxu2 }
 0x7dc   :  { %v6182_v8 = vpop.f32.mrf.mxu3  ;;  %v5893_v59 = vadd.f32 %v5892_v1, %v11563_v4  ;;  %v6539_v21 = vpop.f32.mrf.mxu0 }
 0x7dd   :  { %v11823_v12 = vpop.f32.mrf.mxu1 }
 0x7de   :  { %13094 = vst [vmem:[#allocation92_spill] sm:$0xff] %v11823_v12  ;;  %v6266_v61 = vadd.f32 %v6182_v8, %v5893_v59  ;;  %v7701_v59 = vld [vmem:[#allocation3 + $0x91] sm:$0xff]  ;;  %v11833_v12 = vld [vmem:[#allocation3 + $0x7a] sm:$0xff] }
 0x7df   :  { %7811 = vmatmul.f32.gmra.mxu0 %v7700_v17  ;;  %6892 = vmatmul.f32.gmra.mxu1 %v6685_v31  ;;  %v7347_v17 = vld [vmem:[#allocation3 + $0x90] sm:$0xff] }
 0x7e0   :  { %7102 = vmatmul.f32.gmra.mxu2 %v11825_v23  ;;  %v11828_v36 = vadd.f32 %v6536_v54, %v6266_v61 }
 0x7e1   :  { %7457 = vmatmul.f32.gmra.mxu3 %v7346_v50 }
 0x7e2   :  { %13095 = vst [vmem:[#allocation93_spill] sm:$0xff] %v11828_v36  ;;  %v6687_v36 = vld [vmem:[#allocation3 + $0x2f1] sm:$0xff] }
 0x7e3   :  { %v5895_v19 = vpop.f32.mrf.mxu2 }
 0x7e4   :  { %v6185_v5 = vpop.f32.mrf.mxu3  ;;  %v5896_v4 = vadd.f32 %v5895_v19, %v11568_v7  ;;  %v6542_v38 = vpop.f32.mrf.mxu0 }
 0x7e5   :  { %v11831_v1 = vpop.f32.mrf.mxu1 }
 0x7e6   :  { %13096 = vst [vmem:[#allocation94_spill] sm:$0xff] %v11831_v1  ;;  %v6267_v8 = vadd.f32 %v6185_v5, %v5896_v4  ;;  %v7702_v4 = vld [vmem:[#allocation3 + $0x99] sm:$0xff] }
 0x7e7   :  { %7814 = vmatmul.f32.gmra.mxu0 %v7701_v59  ;;  %6895 = vmatmul.f32.gmra.mxu1 %v6686_v14  ;;  %v8112_v1 = vld [vmem:[#allocation4 + $0x400] sm:$0xff]  ;;  %v7348_v14 = vld [vmem:[#allocation3 + $0x98] sm:$0xff] }
 0x7e8   :  { %7105 = vmatmul.f32.gmra.mxu2 %v11833_v12  ;;  %v11836_v54 = vadd.f32 %v6539_v21, %v6267_v8  ;;  %8143 = vmatpush.msra.mxu1 %v8112_v1 }
 0x7e9   :  { %7460 = vmatmul.f32.gmra.mxu3 %v7347_v17 }
 0x7ea   :  { %13097 = vst [vmem:[#allocation95_spill] sm:$0xff] %v11836_v54  ;;  %v6688_v54 = vld [vmem:[#allocation3 + $0x301] sm:$0xff] }
 0x7eb   :  { %v5898_v61 = vpop.f32.mrf.mxu2 }
 0x7ec   :  { %v6188_v31 = vpop.f32.mrf.mxu3  ;;  %v5899_v7 = vadd.f32 %v5898_v61, %v11573_v57  ;;  %v6545_v50 = vpop.f32.mrf.mxu0 }
 0x7ed   :  { %v11839_v19 = vpop.f32.mrf.mxu1 }
 0x7ee   :  { %13098 = vst [vmem:[#allocation96_spill] sm:$0xff] %v11839_v19  ;;  %v6268_v5 = vadd.f32 %v6188_v31, %v5899_v7  ;;  %v7703_v7 = vld [vmem:[#allocation3 + $0xa9] sm:$0xff]  ;;  %v11849_v19 = vld [vmem:[#allocation3 + $0x92] sm:$0xff] }
 0x7ef   :  { %7817 = vmatmul.f32.gmra.mxu0 %v7702_v4  ;;  %6898 = vmatmul.f32.gmra.mxu1 %v6687_v36  ;;  %v7349_v36 = vld [vmem:[#allocation3 + $0xa8] sm:$0xff] }
 0x7f0   :  { %7108 = vmatmul.f32.gmra.mxu2 %v11841_v42  ;;  %v11844_v21 = vadd.f32 %v6542_v38, %v6268_v5 }
 0x7f1   :  { %7463 = vmatmul.f32.gmra.mxu3 %v7348_v14 }
 0x7f2   :  { %13099 = vst [vmem:[#allocation97_spill] sm:$0xff] %v11844_v21  ;;  %v11857_v21 = vld [vmem:[#allocation3 + $0x9a] sm:$0xff] }
 0x7f3   :  { %v5901_v8 = vpop.f32.mrf.mxu2 }
 0x7f4   :  { %v6191_v57 = vpop.f32.mrf.mxu3  ;;  %v5902_v59 = vadd.f32 %v5901_v8, %v11578_v56  ;;  %v6548_v17 = vpop.f32.mrf.mxu0 }
 0x7f5   :  { %v11847_v61 = vpop.f32.mrf.mxu1 }
 0x7f6   :  { %13100 = vst [vmem:[#allocation98_spill] sm:$0xff] %v11847_v61  ;;  %v6269_v31 = vadd.f32 %v6191_v57, %v5902_v59  ;;  %v7704_v57 = vld [vmem:[#allocation3 + $0xb1] sm:$0xff]  ;;  %v6689_v59 = vld [vmem:[#allocation3 + $0x309] sm:$0xff] }
 0x7f7   :  { %7820 = vmatmul.f32.gmra.mxu0 %v7703_v7  ;;  %6901 = vmatmul.f32.gmra.mxu1 %v6688_v54  ;;  %v7350_v7 = vld [vmem:[#allocation3 + $0xb0] sm:$0xff] }
 0x7f8   :  { %7111 = vmatmul.f32.gmra.mxu2 %v11849_v19  ;;  %v11852_v38 = vadd.f32 %v6545_v50, %v6269_v31 }
 0x7f9   :  { %7466 = vmatmul.f32.gmra.mxu3 %v7349_v36 }
 0x7fa   :  { %13101 = vst [vmem:[#allocation99_spill] sm:$0xff] %v11852_v38  ;;  %v6690_v38 = vld [vmem:[#allocation3 + $0x319] sm:$0xff] }
 0x7fb   :  { %v5904_v1 = vpop.f32.mrf.mxu2 }
 0x7fc   :  { %v6194_v5 = vpop.f32.mrf.mxu3  ;;  %v5905_v56 = vadd.f32 %v5904_v1, %v11583_v58  ;;  %v6551_v4 = vpop.f32.mrf.mxu0 }
 0x7fd   :  { %v11855_v14 = vpop.f32.mrf.mxu1 }
 0x7fe   :  { %13102 = vst [vmem:[#allocation100_spill] sm:$0xff] %v11855_v14  ;;  %v6270_v8 = vadd.f32 %v6194_v5, %v5905_v56  ;;  %v7705_v56 = vld [vmem:[#allocation3 + $0xc1] sm:$0xff]  ;;  %v11865_v14 = vld [vmem:[#allocation3 + $0xaa] sm:$0xff] }
 0x7ff   :  { %7823 = vmatmul.f32.gmra.mxu0 %v7704_v57  ;;  %6904 = vmatmul.f32.gmra.mxu1 %v6689_v59  ;;  %v7351_v57 = vld [vmem:[#allocation3 + $0xc0] sm:$0xff] }
 0x800   :  { %7114 = vmatmul.f32.gmra.mxu2 %v11857_v21  ;;  %v11860_v54 = vadd.f32 %v6548_v17, %v6270_v8 }
 0x801   :  { %7469 = vmatmul.f32.gmra.mxu3 %v7350_v7 }
 0x802   :  { %13103 = vst [vmem:[#allocation101_spill] sm:$0xff] %v11860_v54  ;;  %v6691_v54 = vld [vmem:[#allocation3 + $0x321] sm:$0xff] }
 0x803   :  { %v5907_v50 = vpop.f32.mrf.mxu2 }
 0x804   :  { %v6197_v31 = vpop.f32.mrf.mxu3  ;;  %v5908_v58 = vadd.f32 %v5907_v50, %v11588_v2  ;;  %v6554_v36 = vpop.f32.mrf.mxu0 }
 0x805   :  { %v11863_v1 = vpop.f32.mrf.mxu1 }
 0x806   :  { %13104 = vst [vmem:[#allocation102_spill] sm:$0xff] %v11863_v1  ;;  %v6271_v5 = vadd.f32 %v6197_v31, %v5908_v58  ;;  %v7706_v58 = vld [vmem:[#allocation3 + $0xc9] sm:$0xff]  ;;  %v11873_v1 = vld [vmem:[#allocation3 + $0xb2] sm:$0xff] }
 0x807   :  { %7826 = vmatmul.f32.gmra.mxu0 %v7705_v56  ;;  %6907 = vmatmul.f32.gmra.mxu1 %v6690_v38  ;;  %v7352_v56 = vld [vmem:[#allocation3 + $0xc8] sm:$0xff] }
 0x808   :  { %7117 = vmatmul.f32.gmra.mxu2 %v11865_v14  ;;  %v11868_v17 = vadd.f32 %v6551_v4, %v6271_v5 }
 0x809   :  { %7472 = vmatmul.f32.gmra.mxu3 %v7351_v57 }
 0x80a   :  { %13105 = vst [vmem:[#allocation103_spill] sm:$0xff] %v11868_v17  ;;  %v6692_v17 = vld [vmem:[#allocation3 + $0x331] sm:$0xff] }
 0x80b   :  { %v5910_v8 = vpop.f32.mrf.mxu2 }
 0x80c   :  { %v6200_v59 = vpop.f32.mrf.mxu3  ;;  %v5911_v2 = vadd.f32 %v5910_v8, %v11593_v20  ;;  %v6557_v7 = vpop.f32.mrf.mxu0 }
 0x80d   :  { %v11871_v50 = vpop.f32.mrf.mxu1 }
 0x80e   :  { %13106 = vst [vmem:[#allocation104_spill] sm:$0xff] %v11871_v50  ;;  %v6272_v31 = vadd.f32 %v6200_v59, %v5911_v2  ;;  %v7707_v2 = vld [vmem:[#allocation3 + $0xd9] sm:$0xff]  ;;  %v11881_v50 = vld [vmem:[#allocation3 + $0xc2] sm:$0xff] }
 0x80f   :  { %7829 = vmatmul.f32.gmra.mxu0 %v7706_v58  ;;  %6910 = vmatmul.f32.gmra.mxu1 %v6691_v54  ;;  %v7353_v58 = vld [vmem:[#allocation3 + $0xd8] sm:$0xff] }
 0x810   :  { %7120 = vmatmul.f32.gmra.mxu2 %v11873_v1  ;;  %v11876_v38 = vadd.f32 %v6554_v36, %v6272_v31 }
 0x811   :  { %7475 = vmatmul.f32.gmra.mxu3 %v7352_v56 }
 0x812   :  { %13107 = vst [vmem:[#allocation105_spill] sm:$0xff] %v11876_v38  ;;  %v6693_v38 = vld [vmem:[#allocation3 + $0x339] sm:$0xff] }
 0x813   :  { %v5913_v4 = vpop.f32.mrf.mxu2 }
 0x814   :  { %v6203_v5 = vpop.f32.mrf.mxu3  ;;  %v5914_v20 = vadd.f32 %v5913_v4, %v11598_v40  ;;  %v6560_v57 = vpop.f32.mrf.mxu0 }
 0x815   :  { %v11879_v8 = vpop.f32.mrf.mxu1 }
 0x816   :  { %13108 = vst [vmem:[#allocation106_spill] sm:$0xff] %v11879_v8  ;;  %v6273_v59 = vadd.f32 %v6203_v5, %v5914_v20  ;;  %v7708_v20 = vld [vmem:[#allocation3 + $0xe1] sm:$0xff]  ;;  %v11889_v8 = vld [vmem:[#allocation3 + $0xca] sm:$0xff] }
 0x817   :  { %7832 = vmatmul.f32.gmra.mxu0 %v7707_v2  ;;  %6913 = vmatmul.f32.gmra.mxu1 %v6692_v17  ;;  %v7354_v2 = vld [vmem:[#allocation3 + $0xe0] sm:$0xff] }
 0x818   :  { %7123 = vmatmul.f32.gmra.mxu2 %v11881_v50  ;;  %v11884_v54 = vadd.f32 %v6557_v7, %v6273_v59 }
 0x819   :  { %7478 = vmatmul.f32.gmra.mxu3 %v7353_v58 }
 0x81a   :  { %13109 = vst [vmem:[#allocation107_spill] sm:$0xff] %v11884_v54  ;;  %v11899_v54 = vld [vmem:[#allocation3 + $0xda] sm:$0xff] }
 0x81b   :  { %v5916_v36 = vpop.f32.mrf.mxu2 }
 0x81c   :  { %v6206_v31 = vpop.f32.mrf.mxu3  ;;  %v5917_v40 = vadd.f32 %v5916_v36, %v11603_v11  ;;  %v6563_v56 = vpop.f32.mrf.mxu0 }
 0x81d   :  { %v11887_v4 = vpop.f32.mrf.mxu1 }
 0x81e   :  { %13110 = vst [vmem:[#allocation108_spill] sm:$0xff] %v11887_v4  ;;  %v6274_v5 = vadd.f32 %v6206_v31, %v5917_v40  ;;  %v7709_v40 = vld [vmem:[#allocation3 + $0xf1] sm:$0xff] }
 0x81f   :  { %7835 = vmatmul.f32.gmra.mxu0 %v7708_v20  ;;  %6916 = vmatmul.f32.gmra.mxu1 %v6693_v38  ;;  %v7355_v20 = vld [vmem:[#allocation3 + $0xf0] sm:$0xff] }
 0x820   :  { %7126 = vmatmul.f32.gmra.mxu2 %v11889_v8  ;;  %v11892_v17 = vadd.f32 %v6560_v57, %v6274_v5  ;;  %v7358_v4 = vld [vmem:[#allocation3 + $0x110] sm:$0xff] }
 0x821   :  { %7481 = vmatmul.f32.gmra.mxu3 %v7354_v2 }
 0x822   :  { %13111 = vst [vmem:[#allocation109_spill] sm:$0xff] %v11892_v17  ;;  %v7357_v17 = vld [vmem:[#allocation3 + $0x108] sm:$0xff] }
 0x823   :  { %v5919_v7 = vpop.f32.mrf.mxu2 }
 0x824   :  { %v6209_v59 = vpop.f32.mrf.mxu3  ;;  %v5920_v11 = vadd.f32 %v5919_v7, %v11608_v9  ;;  %v11895_v58 = vpop.f32.mrf.mxu0  ;;  %v7710_v7 = vld [vmem:[#allocation3 + $0xf9] sm:$0xff] }
 0x825   :  { %v11897_v36 = vpop.f32.mrf.mxu1 }
 0x826   :  { %13112 = vst [vmem:[#allocation110_spill] sm:$0xff] %v11897_v36  ;;  %v6275_v31 = vadd.f32 %v6209_v59, %v5920_v11  ;;  %v11913_v59 = vld [vmem:[#allocation3 + $0xe2] sm:$0xff]  ;;  %v7356_v11 = vld [vmem:[#allocation3 + $0xf8] sm:$0xff] }
 0x827   :  { %7838 = vmatmul.f32.gmra.mxu0 %v7709_v40  ;;  %8144 = vmatmul.f32.vlgmr.msra.gmra.mxu1 %v11785_v60  ;;  %v7712_v36 = vld [vmem:[#allocation3 + $0x111] sm:$0xff] }
 0x828   :  { %7129 = vmatmul.f32.gmra.mxu2 %v11899_v54  ;;  %v11903_v38 = vadd.f32 %v6563_v56, %v6275_v31 }
 0x829   :  { %7484 = vmatmul.f32.gmra.mxu3 %v7355_v20  ;;  %v7711_v20 = vld [vmem:[#allocation3 + $0x109] sm:$0xff] }
 0x82a   :  { %13113 = vst [vmem:[#allocation111_spill] sm:$0xff] %v11903_v38  ;;  %v11925_v38 = vld [vmem:[#allocation3 + $0xf2] sm:$0xff] }
 0x82b   :  { %v11905_v57 = vpop.f32.mrf.mxu2 }
 0x82c   :  { %v11907_v9 = vpop.f32.mrf.mxu3  ;;  %v11909_v5 = vpop.f32.mrf.mxu0 }
 0x82d   :  { %v11911_v2 = vpop.f32.mrf.mxu1 }
 0x82e   :  { %13114 = vst [vmem:[#allocation112_spill] sm:$0xff] %v11911_v2 }
 0x82f   :  { %7841 = vmatmul.f32.gmra.mxu0 %v7710_v7  ;;  %8147 = vmatmul.f32.gmra.mxu1 %v11793_v52 }
 0x830   :  { %7132 = vmatmul.f32.gmra.mxu2 %v11913_v59 }
 0x831   :  { %7487 = vmatmul.f32.gmra.mxu3 %v7356_v11 }
 0x833   :  { %v11917_v60 = vpop.f32.mrf.mxu2 }
 0x834   :  { %v11919_v56 = vpop.f32.mrf.mxu3  ;;  %v11921_v31 = vpop.f32.mrf.mxu0 }
 0x835   :  { %v11923_v40 = vpop.f32.mrf.mxu1 }
 0x836   :  { %13115 = vst [vmem:[#allocation113_spill] sm:$0xff] %v11923_v40  ;;  %v11937_v40 = vld [vmem:[#allocation3 + $0xfa] sm:$0xff] }
 0x837   :  { %7844 = vmatmul.f32.gmra.mxu0 %v7711_v20  ;;  %8150 = vmatmul.f32.gmra.mxu1 %v11801_v18 }
 0x838   :  { %7135 = vmatmul.f32.gmra.mxu2 %v11925_v38 }
 0x839   :  { %7490 = vmatmul.f32.gmra.mxu3 %v7357_v17 }
 0x83b   :  { %v11929_v52 = vpop.f32.mrf.mxu2 }
 0x83c   :  { %v11931_v7 = vpop.f32.mrf.mxu3  ;;  %v11933_v11 = vpop.f32.mrf.mxu0 }
 0x83d   :  { %v11935_v2 = vpop.f32.mrf.mxu1 }
 0x83e   :  { %13116 = vst [vmem:[#allocation114_spill] sm:$0xff] %v11935_v2  ;;  %v11949_v2 = vld [vmem:[#allocation3 + $0x10a] sm:$0xff] }
 0x83f   :  { %7847 = vmatmul.f32.gmra.mxu0 %v7712_v36  ;;  %8153 = vmatmul.f32.gmra.mxu1 %v11809_v35 }
 0x840   :  { %7138 = vmatmul.f32.gmra.mxu2 %v11937_v40 }
 0x841   :  { %7493 = vmatmul.f32.gmra.mxu3 %v7358_v4 }
 0x843   :  { %v11941_v18 = vpop.f32.mrf.mxu2 }
 0x844   :  { %v11943_v17 = vpop.f32.mrf.mxu3  ;;  %v11945_v20 = vpop.f32.mrf.mxu0 }
 0x845   :  { %v11947_v61 = vpop.f32.mrf.mxu1 }
 0x846   :  { %13117 = vst [vmem:[#allocation115_spill] sm:$0xff] %v11947_v61  ;;  %v11961_v61 = vld [vmem:[#allocation3 + $0x112] sm:$0xff] }
 0x847   :  { %7850 = vmatmul.f32.gmra.mxu0 %v7713_v53  ;;  %8156 = vmatmul.f32.gmra.mxu1 %v11817_v45 }
 0x848   :  { %7141 = vmatmul.f32.gmra.mxu2 %v11949_v2 }
 0x849   :  { %7496 = vmatmul.f32.gmra.mxu3 %v7359_v13 }
 0x84b   :  { %v11953_v35 = vpop.f32.mrf.mxu2 }
 0x84c   :  { %v11955_v4 = vpop.f32.mrf.mxu3  ;;  %v11957_v36 = vpop.f32.mrf.mxu0 }
 0x84d   :  { %v11959_v48 = vpop.f32.mrf.mxu1 }
 0x84e   :  { %13118 = vst [vmem:[#allocation116_spill] sm:$0xff] %v11959_v48  ;;  %v11973_v48 = vld [vmem:[#allocation3 + $0x122] sm:$0xff] }
 0x84f   :  { %7853 = vmatmul.f32.gmra.mxu0 %v7714_v51  ;;  %8159 = vmatmul.f32.gmra.mxu1 %v11825_v23 }
 0x850   :  { %7144 = vmatmul.f32.gmra.mxu2 %v11961_v61 }
 0x851   :  { %7499 = vmatmul.f32.gmra.mxu3 %v7360_v32 }
 0x853   :  { %v11965_v45 = vpop.f32.mrf.mxu2 }
 0x854   :  { %v11967_v13 = vpop.f32.mrf.mxu3  ;;  %v11971_v30 = vpop.f32.mrf.mxu0 }
 0x855   :  { %v11969_v53 = vpop.f32.mrf.mxu1 }
 0x856   :  { %13119 = vst [vmem:[#allocation117_spill] sm:$0xff] %v11969_v53 }
 0x857   :  { %7856 = vmatmul.f32.gmra.mxu0 %v7715_v26  ;;  %8162 = vmatmul.f32.gmra.mxu1 %v11833_v12 }
 0x858   :  { %7147 = vmatmul.f32.gmra.mxu2 %v11973_v48 }
 0x859   :  { %7502 = vmatmul.f32.gmra.mxu3 %v7361_v47 }
 0x85b   :  { %v11977_v51 = vpop.f32.mrf.mxu2 }
 0x85c   :  { %v11979_v32 = vpop.f32.mrf.mxu3  ;;  %v11983_v53 = vpop.f32.mrf.mxu0 }
 0x85d   :  { %v11981_v23 = vpop.f32.mrf.mxu1 }
 0x85e   :  { %13120 = vst [vmem:[#allocation118_spill] sm:$0xff] %v11981_v23  ;;  %v11995_v23 = vld [vmem:[#allocation3 + $0x13a] sm:$0xff] }
 0x85f   :  { %7859 = vmatmul.f32.gmra.mxu0 %v7716_v24  ;;  %8165 = vmatmul.f32.gmra.mxu1 %v11841_v42 }
 0x860   :  { %7150 = vmatmul.f32.gmra.mxu2 %v11985_v6 }
 0x861   :  { %7505 = vmatmul.f32.gmra.mxu3 %v7362_v49 }
 0x863   :  { %v11989_v26 = vpop.f32.mrf.mxu2 }
 0x864   :  { %v11991_v47 = vpop.f32.mrf.mxu3  ;;  %v11999_v24 = vpop.f32.mrf.mxu0 }
 0x865   :  { %v11993_v12 = vpop.f32.mrf.mxu1 }
 0x866   :  { %13121 = vst [vmem:[#allocation119_spill] sm:$0xff] %v11993_v12  ;;  %v12007_v12 = vld [vmem:[#allocation3 + $0x142] sm:$0xff] }
 0x867   :  { %7862 = vmatmul.f32.gmra.mxu0 %v7717_v25  ;;  %8168 = vmatmul.f32.gmra.mxu1 %v11849_v19 }
 0x868   :  { %7153 = vmatmul.f32.gmra.mxu2 %v11995_v23 }
 0x869   :  { %7508 = vmatmul.f32.gmra.mxu3 %v7363_v28 }
 0x86b   :  { %v12001_v42 = vpop.f32.mrf.mxu2 }
 0x86c   :  { %v12003_v49 = vpop.f32.mrf.mxu3  ;;  %v12011_v25 = vpop.f32.mrf.mxu0 }
 0x86d   :  { %v12005_v34 = vpop.f32.mrf.mxu1  ;;  %13123 = vst [vmem:[#allocation121_spill] sm:$0xff] %v12011_v25  ;;  %v7720_v25 = vld [vmem:[#allocation3 + $0x171] sm:$0xff] }
 0x86e   :  { %13122 = vst [vmem:[#allocation120_spill] sm:$0xff] %v12005_v34  ;;  %v12019_v34 = vld [vmem:[#allocation3 + $0x152] sm:$0xff] }
 0x86f   :  { %7865 = vmatmul.f32.gmra.mxu0 %v7718_v0  ;;  %8171 = vmatmul.f32.gmra.mxu1 %v11857_v21 }
 0x870   :  { %7156 = vmatmul.f32.gmra.mxu2 %v12007_v12 }
 0x871   :  { %7511 = vmatmul.f32.gmra.mxu3 %v7364_v3 }
 0x873   :  { %v12013_v28 = vpop.f32.mrf.mxu2 }
 0x874   :  { %v12015_v19 = vpop.f32.mrf.mxu3  ;;  %v12025_v3 = vpop.f32.mrf.mxu0 }
 0x875   :  { %v12017_v37 = vpop.f32.mrf.mxu1  ;;  %13126 = vst [vmem:[#allocation124_spill] sm:$0xff] %v12025_v3  ;;  %v12041_v3 = vld [vmem:[#allocation3 + $0x16a] sm:$0xff] }
 0x876   :  { %13124 = vst [vmem:[#allocation122_spill] sm:$0xff] %v12017_v37  ;;  %v12031_v37 = vld [vmem:[#allocation3 + $0x15a] sm:$0xff] }
 0x877   :  { %7868 = vmatmul.f32.gmra.mxu0 %v7719_v15  ;;  %8174 = vmatmul.f32.gmra.mxu1 %v11865_v14  ;;  %13131 = vst [vmem:[#allocation129_spill] sm:$0xff] %v12041_v3 }
 0x878   :  { %7159 = vmatmul.f32.gmra.mxu2 %v12019_v34 }
 0x879   :  { %7514 = vmatmul.f32.gmra.mxu3 %v7365_v33  ;;  %v7721_v33 = vld [vmem:[#allocation3 + $0x181] sm:$0xff] }
 0x87b   :  { %v12027_v21 = vpop.f32.mrf.mxu2 }
 0x87c   :  { %v12029_v29 = vpop.f32.mrf.mxu3  ;;  %v12037_v14 = vpop.f32.mrf.mxu0 }
 0x87d   :  { %v12023_v0 = vpop.f32.mrf.mxu1  ;;  %13127 = vst [vmem:[#allocation125_spill] sm:$0xff] %v12029_v29  ;;  %v7367_v29 = vld [vmem:[#allocation3 + $0x180] sm:$0xff] }
 0x87e   :  { %13125 = vst [vmem:[#allocation123_spill] sm:$0xff] %v12023_v0 }
 0x87f   :  { %7871 = vmatmul.f32.gmra.mxu0 %v7720_v25  ;;  %8177 = vmatmul.f32.gmra.mxu1 %v11873_v1  ;;  %13129 = vst [vmem:[#allocation127_spill] sm:$0xff] %v12037_v14  ;;  %v7368_v14 = vld [vmem:[#allocation3 + $0x188] sm:$0xff] }
 0x880   :  { %7162 = vmatmul.f32.gmra.mxu2 %v12031_v37 }
 0x881   :  { %7517 = vmatmul.f32.gmra.mxu3 %v7366_v27  ;;  %v7722_v27 = vld [vmem:[#allocation3 + $0x189] sm:$0xff] }
 0x883   :  { %v12039_v0 = vpop.f32.mrf.mxu2 }
 0x884   :  { %13130 = vst [vmem:[#allocation128_spill] sm:$0xff] %v12039_v0  ;;  %v12044_v25 = vpop.f32.mrf.mxu3  ;;  %v12061_v0 = vld [vmem:[#allocation3 + $0x182] sm:$0xff] }
 0x885   :  { %v12035_v15 = vpop.f32.mrf.mxu1  ;;  %13132 = vst [vmem:[#allocation130_spill] sm:$0xff] %v12044_v25 }
 0x886   :  { %13128 = vst [vmem:[#allocation126_spill] sm:$0xff] %v12035_v15  ;;  %v12049_v15 = vld [vmem:[#allocation3 + $0x172] sm:$0xff] }
 0x887   :  { %7874 = vmatmul.f32.gmra.mxu0 %v7721_v33  ;;  %8180 = vmatmul.f32.gmra.mxu1 %v11881_v50  ;;  %13134 = vst [vmem:[#allocation132_spill] sm:$0xff] %v12049_v15  ;;  %v12053_v33 = vpop.f32.mrf.mxu0 }
 0x888   :  { %7165 = vmatmul.f32.gmra.mxu2 %v12041_v3  ;;  %13135 = vst [vmem:[#allocation133_spill] sm:$0xff] %v12053_v33  ;;  %v7723_v3 = vld [vmem:[#allocation3 + $0x199] sm:$0xff] }
 0x889   :  { %7520 = vmatmul.f32.gmra.mxu3 %v7367_v29 }
 0x88b   :  { %v12055_v50 = vpop.f32.mrf.mxu2 }
 0x88c   :  { %v12057_v25 = vpop.f32.mrf.mxu3 }
 0x88d   :  { %v12047_v1 = vpop.f32.mrf.mxu1  ;;  %13136 = vst [vmem:[#allocation134_spill] sm:$0xff] %v12057_v25 }
 0x88e   :  { %13133 = vst [vmem:[#allocation131_spill] sm:$0xff] %v12047_v1  ;;  %v7369_v1 = vld [vmem:[#allocation3 + $0x198] sm:$0xff] }
 0x88f   :  { %7877 = vmatmul.f32.gmra.mxu0 %v7722_v27  ;;  %8183 = vmatmul.f32.gmra.mxu1 %v11889_v8  ;;  %v6920_v8 = vadd.f32 %v11613_v41, %v11540_v22  ;;  %v12068_v27 = vpop.f32.mrf.mxu0  ;;  %v9350_v22 = vld [vmem:[#allocation3 + $0x8] sm:$0xff]  ;;  %v13141_v41 = vld [vmem:[#allocation65_spill] sm:$0xff] }
 0x890   :  { %7168 = vmatmul.f32.gmra.mxu2 %v12049_v15  ;;  %13138 = vst [vmem:[#allocation136_spill] sm:$0xff] %v12068_v27 }
 0x891   :  { %7523 = vmatmul.f32.gmra.mxu3 %v7368_v14  ;;  %v7274_v14 = vadd.f32 %v11905_v57, %v6920_v8  ;;  %v6921_v57 = vadd.f32 %v11618_v10, %v13141_v41  ;;  %v7016_v41 = vld [vmem:[#allocation3 + $0x1ca] sm:$0xff] }
 0x893   :  { %v12070_v33 = vpop.f32.mrf.mxu2 }
 0x894   :  { %v12072_v15 = vpop.f32.mrf.mxu3 }
 0x895   :  { %v12059_v29 = vpop.f32.mrf.mxu1 }
 0x896   :  { %13137 = vst [vmem:[#allocation135_spill] sm:$0xff] %v12059_v29  ;;  %v7724_v29 = vld [vmem:[#allocation3 + $0x1a1] sm:$0xff] }
 0x897   :  { %7880 = vmatmul.f32.gmra.mxu0 %v7723_v3  ;;  %8186 = vmatmul.f32.gmra.mxu1 %v11899_v54  ;;  %v7629_v3 = vadd.f32 %v11907_v9, %v7274_v14  ;;  %v12077_v54 = vld [vmem:[#allocation3 + $0x18a] sm:$0xff]  ;;  %v12088_v9 = vld [vmem:[%s12766_s4] ss:$0 sm:$0xff] }
 0x898   :  { %7171 = vmatmul.f32.gmra.mxu2 %v12061_v0  ;;  %13140 = vst [vmem:[#allocation138_spill] sm:$0xff] %v12077_v54 }
 0x899   :  { %7526 = vmatmul.f32.gmra.mxu3 %v7369_v1  ;;  %v7275_v1 = vadd.f32 %v11917_v60, %v6921_v57  ;;  %v7983_v8 = vadd.f32 %v11895_v58, %v7629_v3  ;;  %v7371_v60 = vld [vmem:[#allocation3 + $0x1e0] sm:$0xff] }
 0x89a   :  { %v13144_v3 = vld [vmem:[#allocation78_spill] sm:$0xff] }
 0x89b   :  { %v7630_v10 = vadd.f32 %v11919_v56, %v7275_v1  ;;  %v6922_v57 = vadd.f32 %v11623_v39, %v13144_v3  ;;  %v7372_v39 = vld [vmem:[#allocation3 + $0x1e8] sm:$0xff] }
 0x89d   :  { %v12074_v25 = vpop.f32.mrf.mxu1 }
 0x89e   :  { %13139 = vst [vmem:[#allocation137_spill] sm:$0xff] %v12074_v25 }
 0x89f   :  { %7883 = vmatmul.f32.gmra.mxu0 %v7724_v29  ;;  %8189 = vmatmul.f32.gmra.mxu1 %v11913_v59  ;;  %v12090_v29 = vpop.f32.mrf.mxu0  ;;  %v12092_v59 = vpop.f32.mrf.mxu2 }
 0x8a0   :  { %7174 = vmatmul.f32.gmra.mxu2 %v12077_v54  ;;  %13142 = vst [vmem:[#allocation65_spill] sm:$0xff] %v12090_v29  ;;  %v12094_v54 = vpop.f32.mrf.mxu3 }
 0x8a1   :  { %7529 = vmatmul.f32.gmra.mxu3 %v9350_v22  ;;  %13143 = vst [vmem:[#allocation139_spill] sm:$0xff] %v12094_v54  ;;  %v7725_v22 = vld [vmem:[#allocation3 + $0x1e1] sm:$0xff]  ;;  %v7984_v54 = vadd.f32 %v11909_v5, %v7630_v10 }
 0x8a2   :  { %v13145_v5 = vld [vmem:[#allocation82_spill] sm:$0xff] }
 0x8a5   :  { %v8145_v14 = vpop.f32.mrf.mxu1 }
 0x8a6   :  { %v8337_v25 = vadd.f32 %v8145_v14, %v7983_v8  ;;  %v7276_v8 = vadd.f32 %v11929_v52, %v6922_v57 }
 0x8a7   :  { %7886 = vmatmul.f32.gmra.mxu0 %v7725_v22  ;;  %8192 = vmatmul.f32.gmra.mxu1 %v11925_v38  ;;  %v7726_v22 = vld [vmem:[#allocation3 + $0x1e9] sm:$0xff]  ;;  %v12104_v27 = vpop.f32.mrf.mxu0  ;;  %v12106_v38 = vpop.f32.mrf.mxu2 }
 0x8a8   :  { %v8405_v58 = vadd.f32 %v12088_v9, %v8337_v25  ;;  %7177 = vmatmul.f32.gmra.mxu2 %v7016_v41  ;;  %v7631_v25 = vadd.f32 %v11931_v7, %v7276_v8  ;;  %v7017_v41 = vld [vmem:[#allocation3 + $0x1d2] sm:$0xff]  ;;  %v12110_v52 = vpop.f32.mrf.mxu3 }
 0x8a9   :  { %7532 = vmatmul.f32.gmra.mxu3 %v7371_v60  ;;  %v7727_v8 = vld [vmem:[#allocation3 + $0x1f9] sm:$0xff] }
 0x8aa   :  { %vm8469_vm6 = vcmp.ge.f32.partialorder %v8405_v58, 0.0  ;;  %v8533_v29 = vmul.f32 0.2, %v8405_v58 }
 0x8ac   :  { %v8597_v14 = vsel %vm8469_vm6, %v8405_v58, %v8533_v29  ;;  %v7985_v58 = vadd.f32 %v11921_v31, %v7631_v25 }
 0x8ad   :  { %8661 = vst [vmem:[#allocation7] sm:$0xff] %v8597_v14  ;;  %v8148_v56 = vpop.f32.mrf.mxu1  ;;  %v12117_v14 = vld [vmem:[#allocation3 + $0x1e2] sm:$0xff] }
 0x8ae   :  { %v8338_v1 = vadd.f32 %v8148_v56, %v7984_v54  ;;  %v6923_v54 = vadd.f32 %v11628_v44, %v13145_v5  ;;  %v7373_v56 = vld [vmem:[#allocation3 + $0x1f8] sm:$0xff]  ;;  %v13146_v44 = vld [vmem:[#allocation83_spill] sm:$0xff] }
 0x8af   :  { %7889 = vmatmul.f32.gmra.mxu0 %v7726_v22  ;;  %8195 = vmatmul.f32.gmra.mxu1 %v11937_v40  ;;  %v6924_v31 = vadd.f32 %v11633_v63, %v13146_v44  ;;  %v12126_v22 = vpop.f32.mrf.mxu2  ;;  %v12133_v63 = vld [vmem:[#allocation3 + $0x1ea] sm:$0xff] }
 0x8b0   :  { %v8406_v60 = vadd.f32 %v12088_v9, %v8338_v1  ;;  %7180 = vmatmul.f32.gmra.mxu2 %v7017_v41  ;;  %v7277_v29 = vadd.f32 %v11941_v18, %v6923_v54  ;;  %v12124_v18 = vpop.f32.mrf.mxu0  ;;  %v12128_v25 = vpop.f32.mrf.mxu3  ;;  %v7728_v54 = vld [vmem:[#allocation3 + $0x201] sm:$0xff]  ;;  %v7729_v44 = vld [vmem:[#allocation3 + $0x211] sm:$0xff] }
 0x8b1   :  { %7535 = vmatmul.f32.gmra.mxu3 %v7372_v39  ;;  %v7278_v41 = vadd.f32 %v11953_v35, %v6924_v31  ;;  %v13147_v35 = vld [vmem:[#allocation11_spill] sm:$0xff] }
 0x8b2   :  { %vm8470_vm7 = vcmp.ge.f32.partialorder %v8406_v60, 0.0  ;;  %v8534_v7 = vmul.f32 0.2, %v8406_v60  ;;  %v7632_v40 = vadd.f32 %v11943_v17, %v7277_v29  ;;  %v7374_v29 = vld [vmem:[#allocation3 + $0x200] sm:$0xff] }
 0x8b4   :  { %v8598_v10 = vsel %vm8470_vm7, %v8406_v60, %v8534_v7  ;;  %v7986_v60 = vadd.f32 %v11933_v11, %v7632_v40  ;;  %v7633_v7 = vadd.f32 %v11955_v4, %v7278_v41  ;;  %v6925_v11 = vadd.f32 %v11638_v43, %v13147_v35  ;;  %v12149_v43 = vld [vmem:[#allocation3 + $0x1fa] sm:$0xff] }
 0x8b5   :  { %8662 = vst [vmem:[#allocation7 + $0x8] sm:$0xff] %v8598_v10  ;;  %v8151_v3 = vpop.f32.mrf.mxu1 }
 0x8b6   :  { %v8339_v57 = vadd.f32 %v8151_v3, %v7985_v58  ;;  %v7279_v3 = vadd.f32 %v11965_v45, %v6925_v11  ;;  %v7987_v40 = vadd.f32 %v11945_v20, %v7633_v7  ;;  %v13148_v20 = vld [vmem:[#allocation10_spill] sm:$0xff]  ;;  %v7376_v11 = vld [vmem:[#allocation3 + $0x218] sm:$0xff] }
 0x8b7   :  { %7892 = vmatmul.f32.gmra.mxu0 %v7727_v8  ;;  %8198 = vmatmul.f32.gmra.mxu1 %v11949_v2  ;;  %v12143_v4 = vpop.f32.mrf.mxu2  ;;  %v6926_v41 = vadd.f32 %v11643_v55, %v13148_v20  ;;  %v12165_v55 = vld [vmem:[#allocation3 + $0x202] sm:$0xff] }
 0x8b8   :  { %v8407_v1 = vadd.f32 %v12088_v9, %v8339_v57  ;;  %7183 = vmatmul.f32.gmra.mxu2 %v12117_v14  ;;  %v12141_v57 = vpop.f32.mrf.mxu0  ;;  %v7634_v31 = vadd.f32 %v11967_v13, %v7279_v3 }
 0x8b9   :  { %7538 = vmatmul.f32.gmra.mxu3 %v7373_v56  ;;  %v12146_v56 = vpop.f32.mrf.mxu3 }
 0x8ba   :  { %vm8471_vm8 = vcmp.ge.f32.partialorder %v8407_v1, 0.0  ;;  %v8535_v17 = vmul.f32 0.2, %v8407_v1  ;;  %v7988_v13 = vadd.f32 %v11957_v36, %v7634_v31  ;;  %v13149_v36 = vld [vmem:[#allocation12_spill] sm:$0xff] }
 0x8bc   :  { %v8599_v39 = vsel %vm8471_vm8, %v8407_v1, %v8535_v17  ;;  %v7375_v17 = vld [vmem:[#allocation3 + $0x210] sm:$0xff] }
 0x8bd   :  { %8663 = vst [vmem:[#allocation7 + $0x10] sm:$0xff] %v8599_v39  ;;  %v8154_v2 = vpop.f32.mrf.mxu1 }
 0x8be   :  { %v8340_v5 = vadd.f32 %v8154_v2, %v7986_v60  ;;  %v7280_v60 = vadd.f32 %v11977_v51, %v6926_v41 }
 0x8bf   :  { %7895 = vmatmul.f32.gmra.mxu0 %v7728_v54  ;;  %8201 = vmatmul.f32.gmra.mxu1 %v11961_v61  ;;  %v12160_v7 = vpop.f32.mrf.mxu2 }
 0x8c0   :  { %v8408_v10 = vadd.f32 %v12088_v9, %v8340_v5  ;;  %7186 = vmatmul.f32.gmra.mxu2 %v12133_v63  ;;  %v12158_v54 = vpop.f32.mrf.mxu0  ;;  %v7635_v35 = vadd.f32 %v11979_v32, %v7280_v60 }
 0x8c1   :  { %7541 = vmatmul.f32.gmra.mxu3 %v7374_v29  ;;  %v12162_v29 = vpop.f32.mrf.mxu3 }
 0x8c2   :  { %vm8472_vm9 = vcmp.ge.f32.partialorder %v8408_v10, 0.0  ;;  %v8536_v58 = vmul.f32 0.2, %v8408_v10  ;;  %v7989_v32 = vadd.f32 %v11971_v30, %v7635_v35  ;;  %v13150_v30 = vld [vmem:[#allocation13_spill] sm:$0xff]  ;;  %v7378_v35 = vld [vmem:[#allocation3 + $0x230] sm:$0xff] }
 0x8c4   :  { %v8600_v8 = vsel %vm8472_vm9, %v8408_v10, %v8536_v58  ;;  %v7730_v10 = vld [vmem:[#allocation3 + $0x219] sm:$0xff]  ;;  %v6927_v58 = vadd.f32 %v11648_v16, %v13149_v36  ;;  %v7377_v16 = vld [vmem:[#allocation3 + $0x228] sm:$0xff] }
 0x8c5   :  { %8664 = vst [vmem:[#allocation7 + $0x18] sm:$0xff] %v8600_v8  ;;  %v8157_v61 = vpop.f32.mrf.mxu1 }
 0x8c6   :  { %v8341_v1 = vadd.f32 %v8157_v61, %v7987_v40  ;;  %v7281_v8 = vadd.f32 %v11989_v26, %v6927_v58 }
 0x8c7   :  { %7898 = vmatmul.f32.gmra.mxu0 %v7729_v44  ;;  %8204 = vmatmul.f32.gmra.mxu1 %v11973_v48  ;;  %v7731_v44 = vld [vmem:[#allocation3 + $0x229] sm:$0xff] }
 0x8c8   :  { %v8409_v45 = vadd.f32 %v12088_v9, %v8341_v1  ;;  %7189 = vmatmul.f32.gmra.mxu2 %v12149_v43  ;;  %v7636_v31 = vadd.f32 %v11991_v47, %v7281_v8  ;;  %v6928_v47 = vadd.f32 %v11653_v62, %v13150_v30  ;;  %v13151_v62 = vld [vmem:[#allocation14_spill] sm:$0xff] }
 0x8c9   :  { %7544 = vmatmul.f32.gmra.mxu3 %v7375_v17  ;;  %v12177_v17 = vpop.f32.mrf.mxu2  ;;  %v12183_v26 = vpop.f32.mrf.mxu3 }
 0x8ca   :  { %vm8473_vm10 = vcmp.ge.f32.partialorder %v8409_v45, 0.0  ;;  %v8537_v39 = vmul.f32 0.2, %v8409_v45 }
 0x8cc   :  { %v8601_v2 = vsel %vm8473_vm10, %v8409_v45, %v8537_v39  ;;  %v12179_v45 = vld [vmem:[#allocation3 + $0x212] sm:$0xff]  ;;  %v7282_v39 = vadd.f32 %v12001_v42, %v6928_v47 }
 0x8cd   :  { %8665 = vst [vmem:[#allocation7 + $0x20] sm:$0xff] %v8601_v2  ;;  %v8160_v5 = vpop.f32.mrf.mxu1  ;;  %v7990_v2 = vadd.f32 %v11983_v53, %v7636_v31  ;;  %v6929_v53 = vadd.f32 %v11658_v46, %v13151_v62  ;;  %v12207_v46 = vld [vmem:[#allocation3 + $0x22a] sm:$0xff]  ;;  %v13153_v31 = vld [vmem:[#allocation69_spill] sm:$0xff] }
 0x8ce   :  { %v8342_v48 = vadd.f32 %v8160_v5, %v7988_v13  ;;  %v13157_v62 = vld [vmem:[#allocation71_spill] sm:$0xff] }
 0x8cf   :  { %7901 = vmatmul.f32.gmra.mxu0 %v7730_v10  ;;  %8207 = vmatmul.f32.gmra.mxu1 %v11985_v6  ;;  %v12175_v6 = vpop.f32.mrf.mxu0  ;;  %v12191_v10 = vld [vmem:[#allocation3 + $0x21a] sm:$0xff]  ;;  %v7283_v58 = vadd.f32 %v12013_v28, %v6929_v53  ;;  %v13152_v28 = vld [vmem:[#allocation15_spill] sm:$0xff] }
 0x8d0   :  { %v8410_v51 = vadd.f32 %v12088_v9, %v8342_v48  ;;  %7192 = vmatmul.f32.gmra.mxu2 %v12165_v55  ;;  %v7732_v48 = vld [vmem:[#allocation3 + $0x231] sm:$0xff] }
 0x8d1   :  { %7547 = vmatmul.f32.gmra.mxu3 %v7376_v11  ;;  %v12202_v36 = vpop.f32.mrf.mxu3 }
 0x8d2   :  { %vm8474_vm11 = vcmp.ge.f32.partialorder %v8410_v51, 0.0  ;;  %v8538_v3 = vmul.f32 0.2, %v8410_v51 }
 0x8d4   :  { %v8602_v40 = vsel %vm8474_vm11, %v8410_v51, %v8538_v3  ;;  %v12200_v51 = vpop.f32.mrf.mxu2 }
 0x8d5   :  { %8666 = vst [vmem:[#allocation7 + $0x28] sm:$0xff] %v8602_v40  ;;  %v8163_v61 = vpop.f32.mrf.mxu1 }
 0x8d6   :  { %v8343_v1 = vadd.f32 %v8163_v61, %v7989_v32  ;;  %v7733_v32 = vld [vmem:[#allocation3 + $0x241] sm:$0xff]  ;;  %v7638_v61 = vadd.f32 %v12015_v19, %v7283_v58  ;;  %v13158_v58 = vld [vmem:[#allocation128_spill] sm:$0xff] }
 0x8d7   :  { %7904 = vmatmul.f32.gmra.mxu0 %v7731_v44  ;;  %8210 = vmatmul.f32.gmra.mxu1 %v11995_v23  ;;  %v7637_v23 = vadd.f32 %v12003_v49, %v7282_v39  ;;  %v12198_v42 = vpop.f32.mrf.mxu0 }
 0x8d8   :  { %v8411_v20 = vadd.f32 %v12088_v9, %v8343_v1  ;;  %7195 = vmatmul.f32.gmra.mxu2 %v12179_v45  ;;  %v7379_v1 = vld [vmem:[#allocation3 + $0x240] sm:$0xff] }
 0x8d9   :  { %7550 = vmatmul.f32.gmra.mxu3 %v7377_v16  ;;  %v7991_v8 = vadd.f32 %v11999_v24, %v7637_v23  ;;  %v6930_v24 = vadd.f32 %v13153_v31, %v13152_v28  ;;  %v12223_v23 = vld [vmem:[#allocation3 + $0x232] sm:$0xff]  ;;  %v13160_v31 = vld [vmem:[#allocation130_spill] sm:$0xff] }
 0x8da   :  { %vm8475_vm12 = vcmp.ge.f32.partialorder %v8411_v20, 0.0  ;;  %v8539_v41 = vmul.f32 0.2, %v8411_v20  ;;  %v7735_v28 = vld [vmem:[#allocation3 + $0x259] sm:$0xff] }
 0x8dc   :  { %v8603_v60 = vsel %vm8475_vm12, %v8411_v20, %v8539_v41  ;;  %v7284_v20 = vadd.f32 %v12027_v21, %v6930_v24  ;;  %v12217_v19 = vpop.f32.mrf.mxu2  ;;  %v13154_v41 = vld [vmem:[#allocation121_spill] sm:$0xff] }
 0x8dd   :  { %8667 = vst [vmem:[#allocation7 + $0x30] sm:$0xff] %v8603_v60  ;;  %v8166_v13 = vpop.f32.mrf.mxu1  ;;  %v7992_v39 = vadd.f32 %v13154_v41, %v7638_v61  ;;  %v12220_v60 = vpop.f32.mrf.mxu3  ;;  %v13161_v41 = vld [vmem:[#allocation129_spill] sm:$0xff] }
 0x8de   :  { %v8344_v5 = vadd.f32 %v8166_v13, %v7990_v2  ;;  %v7734_v13 = vld [vmem:[#allocation3 + $0x249] sm:$0xff] }
 0x8df   :  { %7907 = vmatmul.f32.gmra.mxu0 %v7732_v48  ;;  %8213 = vmatmul.f32.gmra.mxu1 %v12007_v12  ;;  %v12215_v30 = vpop.f32.mrf.mxu0 }
 0x8e0   :  { %v8412_v11 = vadd.f32 %v12088_v9, %v8344_v5  ;;  %7198 = vmatmul.f32.gmra.mxu2 %v12191_v10  ;;  %v13155_v5 = vld [vmem:[#allocation125_spill] sm:$0xff] }
 0x8e1   :  { %7553 = vmatmul.f32.gmra.mxu3 %v7378_v35  ;;  %v7639_v48 = vadd.f32 %v13155_v5, %v7284_v20  ;;  %v7380_v35 = vld [vmem:[#allocation3 + $0x248] sm:$0xff]  ;;  %v7381_v20 = vld [vmem:[#allocation3 + $0x258] sm:$0xff] }
 0x8e2   :  { %vm8476_vm13 = vcmp.ge.f32.partialorder %v8412_v11, 0.0  ;;  %v8540_v49 = vmul.f32 0.2, %v8412_v11 }
 0x8e4   :  { %v8604_v3 = vsel %vm8476_vm13, %v8412_v11, %v8540_v49  ;;  %v13156_v11 = vld [vmem:[#allocation18_spill] sm:$0xff] }
 0x8e5   :  { %8668 = vst [vmem:[#allocation7 + $0x38] sm:$0xff] %v8604_v3  ;;  %v8169_v12 = vpop.f32.mrf.mxu1  ;;  %v6931_v53 = vadd.f32 %v13157_v62, %v13156_v11 }
 0x8e6   :  { %v8345_v40 = vadd.f32 %v8169_v12, %v7991_v8  ;;  %v13159_v12 = vld [vmem:[#allocation124_spill] sm:$0xff] }
 0x8e7   :  { %7910 = vmatmul.f32.gmra.mxu0 %v7733_v32  ;;  %8216 = vmatmul.f32.gmra.mxu1 %v12019_v34  ;;  %v7285_v3 = vadd.f32 %v13158_v58, %v6931_v53  ;;  %v12232_v61 = vpop.f32.mrf.mxu0  ;;  %v7736_v53 = vld [vmem:[#allocation3 + $0x261] sm:$0xff] }
 0x8e8   :  { %v8413_v44 = vadd.f32 %v12088_v9, %v8345_v40  ;;  %7201 = vmatmul.f32.gmra.mxu2 %v12207_v46  ;;  %v7993_v40 = vadd.f32 %v13159_v12, %v7639_v48  ;;  %v12253_v12 = vld [vmem:[#allocation3 + $0x24a] sm:$0xff] }
 0x8e9   :  { %7556 = vmatmul.f32.gmra.mxu3 %v7379_v1  ;;  %v12234_v1 = vpop.f32.mrf.mxu2  ;;  %v7640_v24 = vadd.f32 %v13160_v31, %v7285_v3  ;;  %v13168_v31 = vld [vmem:[#allocation75_spill] sm:$0xff] }
 0x8ea   :  { %vm8477_vm14 = vcmp.ge.f32.partialorder %v8413_v44, 0.0  ;;  %v8541_v16 = vmul.f32 0.2, %v8413_v44 }
 0x8ec   :  { %v8605_v47 = vsel %vm8477_vm14, %v8413_v44, %v8541_v16  ;;  %v12236_v44 = vpop.f32.mrf.mxu3  ;;  %v12239_v16 = vld [vmem:[#allocation3 + $0x242] sm:$0xff] }
 0x8ed   :  { %8669 = vst [vmem:[#allocation7 + $0x40] sm:$0xff] %v8605_v47  ;;  %v8172_v34 = vpop.f32.mrf.mxu1 }
 0x8ee   :  { %v8346_v2 = vadd.f32 %v8172_v34, %v7992_v39  ;;  %v13162_v39 = vld [vmem:[#allocation21_spill] sm:$0xff] }
 0x8ef   :  { %7913 = vmatmul.f32.gmra.mxu0 %v7734_v13  ;;  %8219 = vmatmul.f32.gmra.mxu1 %v12031_v37  ;;  %v13163_v34 = vld [vmem:[#allocation73_spill] sm:$0xff]  ;;  %v12249_v3 = vpop.f32.mrf.mxu0 }
 0x8f0   :  { %v8414_v21 = vadd.f32 %v12088_v9, %v8346_v2  ;;  %7204 = vmatmul.f32.gmra.mxu2 %v12223_v23  ;;  %v6932_v2 = vadd.f32 %v13163_v34, %v13162_v39  ;;  %v13169_v39 = vld [vmem:[#allocation133_spill] sm:$0xff] }
 0x8f1   :  { %7559 = vmatmul.f32.gmra.mxu3 %v7380_v35  ;;  %v13164_v35 = vld [vmem:[#allocation127_spill] sm:$0xff] }
 0x8f2   :  { %vm8478_vm15 = vcmp.ge.f32.partialorder %v8414_v21, 0.0  ;;  %v8542_v49 = vmul.f32 0.2, %v8414_v21  ;;  %v7286_v5 = vadd.f32 %v12055_v50, %v6932_v2  ;;  %v13166_v50 = vld [vmem:[#allocation132_spill] sm:$0xff] }
 0x8f4   :  { %v8606_v8 = vsel %vm8478_vm15, %v8414_v21, %v8542_v49  ;;  %v7994_v21 = vadd.f32 %v13164_v35, %v7640_v24  ;;  %v13165_v49 = vld [vmem:[#allocation134_spill] sm:$0xff] }
 0x8f5   :  { %8670 = vst [vmem:[#allocation7 + $0x48] sm:$0xff] %v8606_v8  ;;  %v8175_v32 = vpop.f32.mrf.mxu1  ;;  %v7641_v58 = vadd.f32 %v13165_v49, %v7286_v5  ;;  %v12251_v8 = vpop.f32.mrf.mxu2  ;;  %v7737_v5 = vld [vmem:[#allocation3 + $0x271] sm:$0xff]  ;;  %v12265_v35 = vld [vmem:[#allocation3 + $0x25a] sm:$0xff] }
 0x8f6   :  { %v8347_v37 = vadd.f32 %v8175_v32, %v7993_v40  ;;  %v7382_v40 = vld [vmem:[#allocation3 + $0x260] sm:$0xff] }
 0x8f7   :  { %7916 = vmatmul.f32.gmra.mxu0 %v7735_v28  ;;  %8222 = vmatmul.f32.gmra.mxu1 %v13161_v41  ;;  %v13167_v28 = vld [vmem:[#allocation26_spill] sm:$0xff]  ;;  %v7995_v34 = vadd.f32 %v13169_v39, %v7641_v58  ;;  %v12272_v49 = vpop.f32.mrf.mxu0 }
 0x8f8   :  { %v8415_v47 = vadd.f32 %v12088_v9, %v8347_v37  ;;  %7207 = vmatmul.f32.gmra.mxu2 %v12239_v16  ;;  %v12257_v37 = vpop.f32.mrf.mxu3  ;;  %v6933_v24 = vadd.f32 %v13168_v31, %v13167_v28  ;;  %v13172_v28 = vld [vmem:[#allocation136_spill] sm:$0xff]  ;;  %v12281_v39 = vld [vmem:[#allocation3 + $0x262] sm:$0xff] }
 0x8f9   :  { %7562 = vmatmul.f32.gmra.mxu3 %v7381_v20 }
 0x8fa   :  { %vm8479_vm1 = vcmp.ge.f32.partialorder %v8415_v47, 0.0  ;;  %v8543_v13 = vmul.f32 0.2, %v8415_v47 }
 0x8fc   :  { %v8607_v48 = vsel %vm8479_vm1, %v8415_v47, %v8543_v13  ;;  %v7287_v47 = vadd.f32 %v12070_v33, %v6933_v24  ;;  %v13170_v33 = vld [vmem:[#allocation31_spill] sm:$0xff] }
 0x8fd   :  { %8671 = vst [vmem:[#allocation7 + $0x50] sm:$0xff] %v8607_v48  ;;  %v8178_v11 = vpop.f32.mrf.mxu1  ;;  %v12274_v58 = vpop.f32.mrf.mxu2 }
 0x8fe   :  { %v8348_v62 = vadd.f32 %v8178_v11, %v7994_v21  ;;  %v7642_v48 = vadd.f32 %v12072_v15, %v7287_v47  ;;  %v7383_v21 = vld [vmem:[#allocation3 + $0x270] sm:$0xff]  ;;  %v13173_v47 = vld [vmem:[#allocation139_spill] sm:$0xff] }
 0x8ff   :  { %7919 = vmatmul.f32.gmra.mxu0 %v7736_v53  ;;  %8225 = vmatmul.f32.gmra.mxu1 %v13166_v50 }
 0x900   :  { %v8416_v32 = vadd.f32 %v12088_v9, %v8348_v62  ;;  %7210 = vmatmul.f32.gmra.mxu2 %v12253_v12  ;;  %v13171_v62 = vld [vmem:[#allocation77_spill] sm:$0xff]  ;;  %v7996_v31 = vadd.f32 %v13172_v28, %v7642_v48 }
 0x901   :  { %7565 = vmatmul.f32.gmra.mxu3 %v7382_v40  ;;  %v6934_v53 = vadd.f32 %v13171_v62, %v13170_v33  ;;  %v12276_v40 = vpop.f32.mrf.mxu3  ;;  %v12289_v33 = vpop.f32.mrf.mxu0 }
 0x902   :  { %vm8480_vm2 = vcmp.ge.f32.partialorder %v8416_v32, 0.0  ;;  %v8544_v20 = vmul.f32 0.2, %v8416_v32 }
 0x904   :  { %v8608_v41 = vsel %vm8480_vm2, %v8416_v32, %v8544_v20  ;;  %v7288_v32 = vadd.f32 %v12092_v59, %v6934_v53  ;;  %v7738_v20 = vld [vmem:[#allocation3 + $0x279] sm:$0xff]  ;;  %v13175_v59 = vld [vmem:[#allocation36_spill] sm:$0xff] }
 0x905   :  { %8672 = vst [vmem:[#allocation7 + $0x58] sm:$0xff] %v8608_v41  ;;  %v8181_v2 = vpop.f32.mrf.mxu1  ;;  %v12291_v62 = vpop.f32.mrf.mxu2 }
 0x906   :  { %v8349_v13 = vadd.f32 %v8181_v2, %v7995_v34  ;;  %v7643_v41 = vadd.f32 %v13173_v47, %v7288_v32  ;;  %v7384_v34 = vld [vmem:[#allocation3 + $0x278] sm:$0xff] }
 0x907   :  { %7922 = vmatmul.f32.gmra.mxu0 %v7737_v5  ;;  %8228 = vmatmul.f32.gmra.mxu1 %v12061_v0  ;;  %v13176_v5 = vld [vmem:[#allocation80_spill] sm:$0xff] }
 0x908   :  { %v8417_v11 = vadd.f32 %v12088_v9, %v8349_v13  ;;  %7213 = vmatmul.f32.gmra.mxu2 %v12265_v35  ;;  %v13174_v13 = vld [vmem:[#allocation138_spill] sm:$0xff]  ;;  %v6935_v48 = vadd.f32 %v13176_v5, %v13175_v59  ;;  %v12297_v47 = vld [vmem:[#allocation3 + $0x272] sm:$0xff] }
 0x909   :  { %7568 = vmatmul.f32.gmra.mxu3 %v7383_v21 }
 0x90a   :  { %vm8481_vm3 = vcmp.ge.f32.partialorder %v8417_v11, 0.0  ;;  %v8545_v15 = vmul.f32 0.2, %v8417_v11 }
 0x90c   :  { %v8609_v50 = vsel %vm8481_vm3, %v8417_v11, %v8545_v15  ;;  %v7289_v11 = vadd.f32 %v12106_v38, %v6935_v48  ;;  %v13177_v15 = vld [vmem:[#allocation65_spill] sm:$0xff]  ;;  %v7385_v38 = vld [vmem:[#allocation3 + $0x288] sm:$0xff] }
 0x90d   :  { %8673 = vst [vmem:[#allocation7 + $0x60] sm:$0xff] %v8609_v50  ;;  %v8184_v0 = vpop.f32.mrf.mxu1  ;;  %v7997_v32 = vadd.f32 %v13177_v15, %v7643_v41  ;;  %v12294_v50 = vpop.f32.mrf.mxu3  ;;  %v13178_v41 = vld [vmem:[#allocation41_spill] sm:$0xff] }
 0x90e   :  { %v8350_v24 = vadd.f32 %v8184_v0, %v7996_v31  ;;  %v8077_v31 = vld [vmem:[#allocation3 + $0x19a] sm:$0xff]  ;;  %v12307_v15 = vpop.f32.mrf.mxu2 }
 0x90f   :  { %7925 = vmatmul.f32.gmra.mxu0 %v7738_v20  ;;  %8231 = vmatmul.f32.gmra.mxu1 %v13174_v13  ;;  %v7644_v20 = vadd.f32 %v12110_v52, %v7289_v11  ;;  %v8078_v11 = vld [vmem:[#allocation3 + $0x1a2] sm:$0xff] }
 0x910   :  { %v8418_v2 = vadd.f32 %v12088_v9, %v8350_v24  ;;  %7216 = vmatmul.f32.gmra.mxu2 %v12281_v39  ;;  %v7739_v24 = vld [vmem:[#allocation3 + $0x289] sm:$0xff] }
 0x911   :  { %7571 = vmatmul.f32.gmra.mxu3 %v7384_v34  ;;  %v7998_v52 = vadd.f32 %v12104_v27, %v7644_v20  ;;  %v13180_v27 = vld [vmem:[#allocation46_spill] sm:$0xff]  ;;  %v13181_v20 = vld [vmem:[#allocation25_spill] sm:$0xff] }
 0x912   :  { %vm8482_vm4 = vcmp.ge.f32.partialorder %v8418_v2, 0.0  ;;  %v8546_v21 = vmul.f32 0.2, %v8418_v2 }
 0x914   :  { %v8610_v53 = vsel %vm8482_vm4, %v8418_v2, %v8546_v21  ;;  %v13179_v2 = vld [vmem:[#allocation84_spill] sm:$0xff] }
 0x915   :  { %8674 = vst [vmem:[#allocation7 + $0x68] sm:$0xff] %v8610_v53  ;;  %v8187_v28 = vpop.f32.mrf.mxu1  ;;  %v6936_v13 = vadd.f32 %v13179_v2, %v13178_v41  ;;  %v12305_v53 = vpop.f32.mrf.mxu0 }
 0x916   :  { %v8351_v0 = vadd.f32 %v8187_v28, %v7997_v32  ;;  %v12309_v28 = vpop.f32.mrf.mxu3 }
 0x917   :  { %7928 = vmatmul.f32.gmra.mxu0 %v7739_v24  ;;  %8234 = vmatmul.f32.gmra.mxu1 %v8077_v31  ;;  %v7290_v5 = vadd.f32 %v12126_v22, %v6936_v13  ;;  %v7740_v31 = vld [vmem:[#allocation3 + $0x291] sm:$0xff]  ;;  %v12312_v24 = vld [vmem:[#allocation3 + $0x27a] sm:$0xff] }
 0x918   :  { %v8419_v34 = vadd.f32 %v12088_v9, %v8351_v0  ;;  %7219 = vmatmul.f32.gmra.mxu2 %v12297_v47  ;;  %v7386_v22 = vld [vmem:[#allocation3 + $0x290] sm:$0xff] }
 0x919   :  { %7574 = vmatmul.f32.gmra.mxu3 %v7385_v38  ;;  %v7645_v0 = vadd.f32 %v12128_v25, %v7290_v5 }
 0x91a   :  { %vm8483_vm5 = vcmp.ge.f32.partialorder %v8419_v34, 0.0  ;;  %v8547_v59 = vmul.f32 0.2, %v8419_v34 }
 0x91b   :  { %v7999_v25 = vadd.f32 %v12124_v18, %v7645_v0  ;;  %v13182_v18 = vld [vmem:[#allocation51_spill] sm:$0xff]  ;;  %v13183_v0 = vld [vmem:[#allocation16_spill] sm:$0xff] }
 0x91c   :  { %v8611_v48 = vsel %vm8483_vm5, %v8419_v34, %v8547_v59  ;;  %v6937_v34 = vadd.f32 %v13181_v20, %v13180_v27 }
 0x91d   :  { %8675 = vst [vmem:[#allocation7 + $0x70] sm:$0xff] %v8611_v48  ;;  %v8190_v21 = vpop.f32.mrf.mxu1  ;;  %v7741_v48 = vld [vmem:[#allocation3 + $0x2a1] sm:$0xff] }
 0x91e   :  { %v8352_v32 = vadd.f32 %v8190_v21, %v7998_v52  ;;  %v7291_v2 = vadd.f32 %v12143_v4, %v6937_v34  ;;  %v12321_v21 = vpop.f32.mrf.mxu0  ;;  %v12329_v4 = vpop.f32.mrf.mxu3 }
 0x91f   :  { %7931 = vmatmul.f32.gmra.mxu0 %v7740_v31  ;;  %8237 = vmatmul.f32.gmra.mxu1 %v8078_v11  ;;  %v12323_v11 = vpop.f32.mrf.mxu2  ;;  %v7387_v31 = vld [vmem:[#allocation3 + $0x2a0] sm:$0xff] }
 0x920   :  { %v8420_v38 = vadd.f32 %v12088_v9, %v8352_v32  ;;  %7222 = vmatmul.f32.gmra.mxu2 %v12312_v24  ;;  %v7646_v52 = vadd.f32 %v12146_v56, %v7291_v2  ;;  %v12325_v32 = vld [vmem:[#allocation3 + $0x28a] sm:$0xff]  ;;  %v6938_v56 = vadd.f32 %v13183_v0, %v13182_v18 }
 0x921   :  { %7577 = vmatmul.f32.gmra.mxu3 %v7386_v22 }
 0x922   :  { %vm8484_vm0 = vcmp.ge.f32.partialorder %v8420_v38, 0.0  ;;  %v8548_v41 = vmul.f32 0.2, %v8420_v38  ;;  %v7292_v27 = vadd.f32 %v12160_v7, %v6938_v56  ;;  %v8000_v34 = vadd.f32 %v12141_v57, %v7646_v52  ;;  %v13184_v7 = vld [vmem:[#allocation56_spill] sm:$0xff] }
 0x924   :  { %v8612_v13 = vsel %vm8484_vm0, %v8420_v38, %v8548_v41 }
 0x925   :  { %8676 = vst [vmem:[#allocation7 + $0x78] sm:$0xff] %v8612_v13  ;;  %v8193_v59 = vpop.f32.mrf.mxu1  ;;  %v7742_v13 = vld [vmem:[#allocation3 + $0x2a9] sm:$0xff] }
 0x926   :  { %v8353_v5 = vadd.f32 %v8193_v59, %v7999_v25  ;;  %v12337_v25 = vld [vmem:[#allocation3 + $0x292] sm:$0xff]  ;;  %v7388_v59 = vld [vmem:[#allocation3 + $0x2a8] sm:$0xff]  ;;  %v12344_v52 = vpop.f32.mrf.mxu0 }
 0x927   :  { %7934 = vmatmul.f32.gmra.mxu0 %v7741_v48  ;;  %8240 = vmatmul.f32.gmra.mxu1 %v12117_v14  ;;  %v7647_v14 = vadd.f32 %v12162_v29, %v7292_v27  ;;  %v13185_v48 = vld [vmem:[#allocation17_spill] sm:$0xff] }
 0x928   :  { %v8421_v22 = vadd.f32 %v12088_v9, %v8353_v5  ;;  %7225 = vmatmul.f32.gmra.mxu2 %v12325_v32  ;;  %v6939_v57 = vadd.f32 %v13185_v48, %v13184_v7  ;;  %v7743_v27 = vld [vmem:[#allocation3 + $0x2b9] sm:$0xff] }
 0x929   :  { %7580 = vmatmul.f32.gmra.mxu3 %v7387_v31  ;;  %v12346_v31 = vpop.f32.mrf.mxu2  ;;  %v8001_v56 = vadd.f32 %v12158_v54, %v7647_v14 }
 0x92a   :  { %vm8485_vm6 = vcmp.ge.f32.partialorder %v8421_v22, 0.0  ;;  %v8549_v38 = vmul.f32 0.2, %v8421_v22  ;;  %v7293_v18 = vadd.f32 %v12177_v17, %v6939_v57  ;;  %v13186_v17 = vld [vmem:[#allocation60_spill] sm:$0xff] }
 0x92c   :  { %v8613_v20 = vsel %vm8485_vm6, %v8421_v22, %v8549_v38  ;;  %v12348_v22 = vpop.f32.mrf.mxu3 }
 0x92d   :  { %8677 = vst [vmem:[#allocation7 + $0x80] sm:$0xff] %v8613_v20  ;;  %v8196_v41 = vpop.f32.mrf.mxu1  ;;  %v7648_v20 = vadd.f32 %v12183_v26, %v7293_v18  ;;  %v7744_v18 = vld [vmem:[#allocation3 + $0x2c1] sm:$0xff] }
 0x92e   :  { %v8354_v2 = vadd.f32 %v8196_v41, %v8000_v34  ;;  %v12353_v34 = vld [vmem:[#allocation3 + $0x2a2] sm:$0xff]  ;;  %v7389_v41 = vld [vmem:[#allocation3 + $0x2b8] sm:$0xff] }
 0x92f   :  { %7937 = vmatmul.f32.gmra.mxu0 %v7742_v13  ;;  %8243 = vmatmul.f32.gmra.mxu1 %v12133_v63  ;;  %v13187_v13 = vld [vmem:[#allocation28_spill] sm:$0xff]  ;;  %v8002_v48 = vadd.f32 %v12175_v6, %v7648_v20  ;;  %v13188_v6 = vld [vmem:[#allocation63_spill] sm:$0xff] }
 0x930   :  { %v8422_v5 = vadd.f32 %v12088_v9, %v8354_v2  ;;  %7228 = vmatmul.f32.gmra.mxu2 %v12337_v25  ;;  %v6940_v54 = vadd.f32 %v13187_v13, %v13186_v17 }
 0x931   :  { %7583 = vmatmul.f32.gmra.mxu3 %v7388_v59  ;;  %v12363_v26 = vpop.f32.mrf.mxu2 }
 0x932   :  { %vm8486_vm7 = vcmp.ge.f32.partialorder %v8422_v5, 0.0  ;;  %v8550_v29 = vmul.f32 0.2, %v8422_v5  ;;  %v7294_v59 = vadd.f32 %v12200_v51, %v6940_v54 }
 0x934   :  { %v8614_v0 = vsel %vm8486_vm7, %v8422_v5, %v8550_v29  ;;  %v12361_v5 = vpop.f32.mrf.mxu0  ;;  %v12366_v57 = vpop.f32.mrf.mxu3 }
 0x935   :  { %8678 = vst [vmem:[#allocation7 + $0x88] sm:$0xff] %v8614_v0  ;;  %v8199_v63 = vpop.f32.mrf.mxu1  ;;  %v7649_v0 = vadd.f32 %v12202_v36, %v7294_v59  ;;  %v7745_v59 = vld [vmem:[#allocation3 + $0x2d1] sm:$0xff] }
 0x936   :  { %v8355_v38 = vadd.f32 %v8199_v63, %v8001_v56  ;;  %v12369_v56 = vld [vmem:[#allocation3 + $0x2aa] sm:$0xff]  ;;  %v7390_v63 = vld [vmem:[#allocation3 + $0x2c0] sm:$0xff] }
 0x937   :  { %7940 = vmatmul.f32.gmra.mxu0 %v7743_v27  ;;  %8246 = vmatmul.f32.gmra.mxu1 %v12149_v43  ;;  %v8003_v36 = vadd.f32 %v12198_v42, %v7649_v0  ;;  %v13190_v42 = vld [vmem:[#allocation66_spill] sm:$0xff] }
 0x938   :  { %v8423_v2 = vadd.f32 %v12088_v9, %v8355_v38  ;;  %7231 = vmatmul.f32.gmra.mxu2 %v12353_v34  ;;  %v13189_v38 = vld [vmem:[#allocation30_spill] sm:$0xff] }
 0x939   :  { %7586 = vmatmul.f32.gmra.mxu3 %v7389_v41  ;;  %v6941_v27 = vadd.f32 %v13189_v38, %v13188_v6  ;;  %v12380_v54 = vpop.f32.mrf.mxu2 }
 0x93a   :  { %vm8487_vm8 = vcmp.ge.f32.partialorder %v8423_v2, 0.0  ;;  %v8551_v14 = vmul.f32 0.2, %v8423_v2 }
 0x93b   :  { %v7295_v41 = vadd.f32 %v12217_v19, %v6941_v27  ;;  %v7746_v27 = vld [vmem:[#allocation3 + $0x2d9] sm:$0xff] }
 0x93c   :  { %v8615_v7 = vsel %vm8487_vm8, %v8423_v2, %v8551_v14  ;;  %v12378_v13 = vpop.f32.mrf.mxu0  ;;  %v12382_v14 = vpop.f32.mrf.mxu3 }
 0x93d   :  { %8679 = vst [vmem:[#allocation7 + $0x90] sm:$0xff] %v8615_v7  ;;  %v8202_v43 = vpop.f32.mrf.mxu1  ;;  %v7650_v7 = vadd.f32 %v12220_v60, %v7295_v41 }
 0x93e   :  { %v8356_v29 = vadd.f32 %v8202_v43, %v8002_v48  ;;  %v12385_v48 = vld [vmem:[#allocation3 + $0x2ba] sm:$0xff]  ;;  %v7391_v43 = vld [vmem:[#allocation3 + $0x2d0] sm:$0xff] }
 0x93f   :  { %7943 = vmatmul.f32.gmra.mxu0 %v7744_v18  ;;  %8249 = vmatmul.f32.gmra.mxu1 %v12165_v55  ;;  %v8004_v60 = vadd.f32 %v12215_v30, %v7650_v7  ;;  %v13192_v30 = vld [vmem:[#allocation67_spill] sm:$0xff] }
 0x940   :  { %v8424_v51 = vadd.f32 %v12088_v9, %v8356_v29  ;;  %7234 = vmatmul.f32.gmra.mxu2 %v12369_v56  ;;  %v13191_v29 = vld [vmem:[#allocation19_spill] sm:$0xff] }
 0x941   :  { %7589 = vmatmul.f32.gmra.mxu3 %v7390_v63  ;;  %v6942_v18 = vadd.f32 %v13191_v29, %v13190_v42  ;;  %v12397_v41 = vpop.f32.mrf.mxu2 }
 0x942   :  { %vm8488_vm9 = vcmp.ge.f32.partialorder %v8424_v51, 0.0  ;;  %v8552_v20 = vmul.f32 0.2, %v8424_v51 }
 0x943   :  { %v7296_v63 = vadd.f32 %v12234_v1, %v6942_v18  ;;  %v7747_v18 = vld [vmem:[#allocation3 + $0x2e9] sm:$0xff] }
 0x944   :  { %v8616_v2 = vsel %vm8488_vm9, %v8424_v51, %v8552_v20  ;;  %v12403_v1 = vpop.f32.mrf.mxu3 }
 0x945   :  { %8680 = vst [vmem:[#allocation7 + $0x98] sm:$0xff] %v8616_v2  ;;  %v8205_v17 = vpop.f32.mrf.mxu1  ;;  %v7651_v20 = vadd.f32 %v12236_v44, %v7296_v63  ;;  %v12399_v2 = vld [vmem:[#allocation3 + $0x2c2] sm:$0xff] }
 0x946   :  { %v8357_v55 = vadd.f32 %v8205_v17, %v8003_v36  ;;  %v7392_v36 = vld [vmem:[#allocation3 + $0x2d8] sm:$0xff]  ;;  %v7393_v63 = vld [vmem:[#allocation3 + $0x2e8] sm:$0xff] }
 0x947   :  { %7946 = vmatmul.f32.gmra.mxu0 %v7745_v59  ;;  %8252 = vmatmul.f32.gmra.mxu1 %v12179_v45  ;;  %v12395_v45 = vpop.f32.mrf.mxu0 }
 0x948   :  { %v8425_v19 = vadd.f32 %v12088_v9, %v8357_v55  ;;  %7237 = vmatmul.f32.gmra.mxu2 %v12385_v48  ;;  %v13193_v55 = vld [vmem:[#allocation20_spill] sm:$0xff] }
 0x949   :  { %7592 = vmatmul.f32.gmra.mxu3 %v7391_v43  ;;  %v6943_v44 = vadd.f32 %v13193_v55, %v13192_v30  ;;  %v7748_v55 = vld [vmem:[#allocation3 + $0x2f1] sm:$0xff] }
 0x94a   :  { %vm8489_vm10 = vcmp.ge.f32.partialorder %v8425_v19, 0.0  ;;  %v8553_v0 = vmul.f32 0.2, %v8425_v19 }
 0x94b   :  { %v7297_v7 = vadd.f32 %v12251_v8, %v6943_v44  ;;  %v13194_v8 = vld [vmem:[#allocation68_spill] sm:$0xff] }
 0x94c   :  { %v8617_v51 = vsel %vm8489_vm10, %v8425_v19, %v8553_v0  ;;  %v8005_v19 = vadd.f32 %v12232_v61, %v7651_v20  ;;  %v12411_v0 = vld [vmem:[#allocation3 + $0x2d2] sm:$0xff] }
 0x94d   :  { %8681 = vst [vmem:[#allocation7 + $0xa0] sm:$0xff] %v8617_v51  ;;  %v8208_v6 = vpop.f32.mrf.mxu1 }
 0x94e   :  { %v8358_v38 = vadd.f32 %v8208_v6, %v8004_v60  ;;  %v13195_v60 = vld [vmem:[#allocation33_spill] sm:$0xff] }
 0x94f   :  { %7949 = vmatmul.f32.gmra.mxu0 %v7746_v27  ;;  %8255 = vmatmul.f32.gmra.mxu1 %v12191_v10  ;;  %v7652_v10 = vadd.f32 %v12257_v37, %v7297_v7  ;;  %v6944_v61 = vadd.f32 %v13195_v60, %v13194_v8  ;;  %v12418_v6 = vpop.f32.mrf.mxu0  ;;  %v12422_v27 = vpop.f32.mrf.mxu3  ;;  %v7394_v7 = vld [vmem:[#allocation3 + $0x2f0] sm:$0xff]  ;;  %v7749_v60 = vld [vmem:[#allocation3 + $0x301] sm:$0xff] }
 0x950   :  { %v8426_v17 = vadd.f32 %v12088_v9, %v8358_v38  ;;  %7240 = vmatmul.f32.gmra.mxu2 %v12399_v2  ;;  %v12420_v38 = vpop.f32.mrf.mxu2 }
 0x951   :  { %7595 = vmatmul.f32.gmra.mxu3 %v7392_v36  ;;  %v7298_v20 = vadd.f32 %v12274_v58, %v6944_v61  ;;  %v13196_v58 = vld [vmem:[#allocation70_spill] sm:$0xff] }
 0x952   :  { %vm8490_vm11 = vcmp.ge.f32.partialorder %v8426_v17, 0.0  ;;  %v8554_v59 = vmul.f32 0.2, %v8426_v17 }
 0x953   :  { %v7653_v44 = vadd.f32 %v12276_v40, %v7298_v20  ;;  %v7395_v20 = vld [vmem:[#allocation3 + $0x300] sm:$0xff] }
 0x954   :  { %v8618_v43 = vsel %vm8490_vm11, %v8426_v17, %v8554_v59  ;;  %v8006_v17 = vadd.f32 %v12249_v3, %v7652_v10  ;;  %v12427_v59 = vld [vmem:[#allocation3 + $0x2da] sm:$0xff] }
 0x955   :  { %8682 = vst [vmem:[#allocation7 + $0xa8] sm:$0xff] %v8618_v43  ;;  %v8211_v42 = vpop.f32.mrf.mxu1 }
 0x956   :  { %v8359_v29 = vadd.f32 %v8211_v42, %v8005_v19  ;;  %v13197_v19 = vld [vmem:[#allocation35_spill] sm:$0xff] }
 0x957   :  { %7952 = vmatmul.f32.gmra.mxu0 %v7747_v18  ;;  %8258 = vmatmul.f32.gmra.mxu1 %v12207_v46  ;;  %v6945_v3 = vadd.f32 %v13197_v19, %v13196_v58  ;;  %v12435_v18 = vpop.f32.mrf.mxu0  ;;  %v7750_v58 = vld [vmem:[#allocation3 + $0x309] sm:$0xff] }
 0x958   :  { %v8427_v51 = vadd.f32 %v12088_v9, %v8359_v29  ;;  %7243 = vmatmul.f32.gmra.mxu2 %v12411_v0  ;;  %v12437_v40 = vpop.f32.mrf.mxu2 }
 0x959   :  { %7598 = vmatmul.f32.gmra.mxu3 %v7393_v63  ;;  %v7299_v29 = vadd.f32 %v12291_v62, %v6945_v3  ;;  %v8007_v63 = vadd.f32 %v12272_v49, %v7653_v44  ;;  %v13198_v49 = vld [vmem:[#allocation72_spill] sm:$0xff] }
 0x95a   :  { %vm8491_vm12 = vcmp.ge.f32.partialorder %v8427_v51, 0.0  ;;  %v8555_v37 = vmul.f32 0.2, %v8427_v51  ;;  %v12459_v3 = vld [vmem:[#allocation3 + $0x2f2] sm:$0xff] }
 0x95b   :  { %v7654_v61 = vadd.f32 %v12294_v50, %v7299_v29  ;;  %v13200_v29 = vld [vmem:[#allocation74_spill] sm:$0xff] }
 0x95c   :  { %v8619_v36 = vsel %vm8491_vm12, %v8427_v51, %v8555_v37  ;;  %v12440_v51 = vpop.f32.mrf.mxu3  ;;  %v12443_v37 = vld [vmem:[#allocation3 + $0x2ea] sm:$0xff] }
 0x95d   :  { %8683 = vst [vmem:[#allocation7 + $0xb0] sm:$0xff] %v8619_v36  ;;  %v8214_v46 = vpop.f32.mrf.mxu1  ;;  %v13199_v36 = vld [vmem:[#allocation38_spill] sm:$0xff]  ;;  %v8008_v50 = vadd.f32 %v12289_v33, %v7654_v61 }
 0x95e   :  { %v8360_v30 = vadd.f32 %v8214_v46, %v8006_v17  ;;  %v6946_v17 = vadd.f32 %v13199_v36, %v13198_v49  ;;  %v12464_v33 = vld [vmem:[%s12766_s4] ss:$0 sm:$0xff] }
 0x95f   :  { %7955 = vmatmul.f32.gmra.mxu0 %v7748_v55  ;;  %8261 = vmatmul.f32.gmra.mxu1 %v12223_v23 }
 0x960   :  { %v8428_v43 = vadd.f32 %v12088_v9, %v8360_v30  ;;  %7246 = vmatmul.f32.gmra.mxu2 %v12427_v59  ;;  %v7300_v30 = vadd.f32 %v12307_v15, %v6946_v17  ;;  %v12478_v17 = vld [vmem:[#allocation3 + $0x302] sm:$0xff] }
 0x961   :  { %7601 = vmatmul.f32.gmra.mxu3 %v7394_v7  ;;  %v12452_v7 = vpop.f32.mrf.mxu0 }
 0x962   :  { %vm8492_vm13 = vcmp.ge.f32.partialorder %v8428_v43, 0.0  ;;  %v8556_v42 = vmul.f32 0.2, %v8428_v43  ;;  %v7655_v19 = vadd.f32 %v12309_v28, %v7300_v30 }
 0x964   :  { %v8620_v10 = vsel %vm8492_vm13, %v8428_v43, %v8556_v42  ;;  %v12456_v43 = vpop.f32.mrf.mxu3  ;;  %v7396_v42 = vld [vmem:[#allocation3 + $0x308] sm:$0xff] }
 0x965   :  { %8684 = vst [vmem:[#allocation7 + $0xb8] sm:$0xff] %v8620_v10  ;;  %v8217_v23 = vpop.f32.mrf.mxu1  ;;  %v13201_v10 = vld [vmem:[#allocation27_spill] sm:$0xff] }
 0x966   :  { %v8361_v8 = vadd.f32 %v8217_v23, %v8007_v63  ;;  %v6947_v63 = vadd.f32 %v13201_v10, %v13200_v29  ;;  %v12490_v29 = vld [vmem:[#allocation3 + $0x30a] sm:$0xff]  ;;  %v7398_v10 = vld [vmem:[#allocation3 + $0x320] sm:$0xff] }
 0x967   :  { %7958 = vmatmul.f32.gmra.mxu0 %v7749_v60  ;;  %8264 = vmatmul.f32.gmra.mxu1 %v12239_v16  ;;  %v8009_v60 = vadd.f32 %v12305_v53, %v7655_v19  ;;  %v13202_v53 = vld [vmem:[#allocation76_spill] sm:$0xff] }
 0x968   :  { %v8429_v62 = vadd.f32 %v12088_v9, %v8361_v8  ;;  %7249 = vmatmul.f32.gmra.mxu2 %v12443_v37  ;;  %v12454_v9 = vpop.f32.mrf.mxu2  ;;  %v7301_v23 = vadd.f32 %v12323_v11, %v6947_v63 }
 0x969   :  { %7604 = vmatmul.f32.gmra.mxu3 %v7395_v20 }
 0x96a   :  { %vm8493_vm14 = vcmp.ge.f32.partialorder %v8429_v62, 0.0  ;;  %v8557_v46 = vmul.f32 0.2, %v8429_v62  ;;  %v7656_v49 = vadd.f32 %v12329_v4, %v7301_v23 }
 0x96c   :  { %v8621_v55 = vsel %vm8493_vm14, %v8429_v62, %v8557_v46  ;;  %v7751_v62 = vld [vmem:[#allocation3 + $0x319] sm:$0xff]  ;;  %v12482_v11 = vpop.f32.mrf.mxu3 }
 0x96d   :  { %8685 = vst [vmem:[#allocation7 + $0xc0] sm:$0xff] %v8621_v55  ;;  %v8220_v44 = vpop.f32.mrf.mxu1  ;;  %v7397_v46 = vld [vmem:[#allocation3 + $0x318] sm:$0xff]  ;;  %v13203_v55 = vld [vmem:[#allocation32_spill] sm:$0xff] }
 0x96e   :  { %v8362_v16 = vadd.f32 %v8220_v44, %v8008_v50  ;;  %v6948_v4 = vadd.f32 %v13203_v55, %v13202_v53  ;;  %v12506_v53 = vld [vmem:[#allocation3 + $0x31a] sm:$0xff]  ;;  %v7399_v55 = vld [vmem:[#allocation3 + $0x330] sm:$0xff] }
 0x96f   :  { %7961 = vmatmul.f32.gmra.mxu0 %v7750_v58  ;;  %8267 = vmatmul.f32.gmra.mxu1 %v12253_v12  ;;  %v12474_v12 = vpop.f32.mrf.mxu0  ;;  %v8010_v58 = vadd.f32 %v12321_v21, %v7656_v49 }
 0x970   :  { %v8430_v15 = vadd.f32 %v12464_v33, %v8362_v16  ;;  %7252 = vmatmul.f32.gmra.mxu2 %v12459_v3  ;;  %v12476_v36 = vpop.f32.mrf.mxu2  ;;  %v7302_v44 = vadd.f32 %v12346_v31, %v6948_v4  ;;  %v13204_v31 = vld [vmem:[#allocation79_spill] sm:$0xff] }
 0x971   :  { %7607 = vmatmul.f32.gmra.mxu3 %v7396_v42 }
 0x972   :  { %vm8494_vm15 = vcmp.ge.f32.partialorder %v8430_v15, 0.0  ;;  %v8558_v28 = vmul.f32 0.2, %v8430_v15 }
 0x974   :  { %v8622_v8 = vsel %vm8494_vm15, %v8430_v15, %v8558_v28  ;;  %v7752_v15 = vld [vmem:[#allocation3 + $0x321] sm:$0xff] }
 0x975   :  { %8686 = vst [vmem:[#allocation7 + $0xc8] sm:$0xff] %v8622_v8  ;;  %v8223_v61 = vpop.f32.mrf.mxu1  ;;  %v13205_v28 = vld [vmem:[#allocation50_spill] sm:$0xff] }
 0x976   :  { %v8363_v20 = vadd.f32 %v8223_v61, %v8009_v60  ;;  %v6949_v21 = vadd.f32 %v13205_v28, %v13204_v31  ;;  %v12501_v60 = vpop.f32.mrf.mxu3  ;;  %v12522_v31 = vld [vmem:[#allocation3 + $0x322] sm:$0xff]  ;;  %v7400_v28 = vld [vmem:[#allocation3 + $0x338] sm:$0xff] }
 0x977   :  { %7964 = vmatmul.f32.gmra.mxu0 %v7751_v62  ;;  %8270 = vmatmul.f32.gmra.mxu1 %v12265_v35  ;;  %v7657_v35 = vadd.f32 %v12348_v22, %v7302_v44  ;;  %v12497_v23 = vpop.f32.mrf.mxu0 }
 0x978   :  { %v8431_v30 = vadd.f32 %v12464_v33, %v8363_v20  ;;  %7255 = vmatmul.f32.gmra.mxu2 %v12478_v17  ;;  %v12499_v8 = vpop.f32.mrf.mxu2  ;;  %v7303_v61 = vadd.f32 %v12363_v26, %v6949_v21  ;;  %v13206_v26 = vld [vmem:[#allocation81_spill] sm:$0xff]  ;;  %v13209_v21 = vld [vmem:[#allocation58_spill] sm:$0xff] }
 0x979   :  { %7610 = vmatmul.f32.gmra.mxu3 %v7397_v46  ;;  %v8011_v62 = vadd.f32 %v12344_v52, %v7657_v35  ;;  %v7753_v46 = vld [vmem:[#allocation3 + $0x331] sm:$0xff] }
 0x97a   :  { %vm8495_vm1 = vcmp.ge.f32.partialorder %v8431_v30, 0.0  ;;  %v8559_v50 = vmul.f32 0.2, %v8431_v30 }
 0x97c   :  { %v8623_v16 = vsel %vm8495_vm1, %v8431_v30, %v8559_v50  ;;  %v7658_v30 = vadd.f32 %v12366_v57, %v7303_v61  ;;  %v13207_v50 = vld [vmem:[#allocation55_spill] sm:$0xff] }
 0x97d   :  { %8687 = vst [vmem:[#allocation7 + $0xd0] sm:$0xff] %v8623_v16  ;;  %v8226_v19 = vpop.f32.mrf.mxu1  ;;  %v6950_v52 = vadd.f32 %v13207_v50, %v13206_v26  ;;  %v12538_v50 = vld [vmem:[#allocation3 + $0x332] sm:$0xff] }
 0x97e   :  { %v8364_v42 = vadd.f32 %v8226_v19, %v8010_v58 }
 0x97f   :  { %7967 = vmatmul.f32.gmra.mxu0 %v7752_v15  ;;  %8273 = vmatmul.f32.gmra.mxu1 %v12281_v39  ;;  %v7304_v16 = vadd.f32 %v12380_v54, %v6950_v52  ;;  %v12514_v58 = vpop.f32.mrf.mxu0  ;;  %v12519_v15 = vpop.f32.mrf.mxu3  ;;  %v13211_v52 = vld [vmem:[#allocation52_spill] sm:$0xff] }
 0x980   :  { %v8432_v63 = vadd.f32 %v12464_v33, %v8364_v42  ;;  %7258 = vmatmul.f32.gmra.mxu2 %v12490_v29  ;;  %v12516_v57 = vpop.f32.mrf.mxu2  ;;  %v8012_v42 = vadd.f32 %v12361_v5, %v7658_v30  ;;  %v13208_v5 = vld [vmem:[#allocation23_spill] sm:$0xff] }
 0x981   :  { %7613 = vmatmul.f32.gmra.mxu3 %v7398_v10  ;;  %v7754_v10 = vld [vmem:[#allocation3 + $0x339] sm:$0xff]  ;;  %v7401_v30 = vld [vmem:[#allocation3 + $0x348] sm:$0xff] }
 0x982   :  { %vm8496_vm2 = vcmp.ge.f32.partialorder %v8432_v63, 0.0  ;;  %v8560_v22 = vmul.f32 0.2, %v8432_v63 }
 0x984   :  { %v8624_v20 = vsel %vm8496_vm2, %v8432_v63, %v8560_v22  ;;  %v7659_v63 = vadd.f32 %v12382_v14, %v7304_v16  ;;  %v6951_v22 = vadd.f32 %v13209_v21, %v13208_v5  ;;  %v13212_v21 = vld [vmem:[#allocation40_spill] sm:$0xff] }
 0x985   :  { %8688 = vst [vmem:[#allocation7 + $0xd8] sm:$0xff] %v8624_v20  ;;  %v8229_v39 = vpop.f32.mrf.mxu1 }
 0x986   :  { %v8365_v49 = vadd.f32 %v8229_v39, %v8011_v62  ;;  %v7305_v20 = vadd.f32 %v12397_v41, %v6951_v22  ;;  %v8013_v14 = vadd.f32 %v12378_v13, %v7659_v63  ;;  %v13210_v13 = vld [vmem:[#allocation22_spill] sm:$0xff]  ;;  %v13213_v22 = vld [vmem:[#allocation57_spill] sm:$0xff] }
 0x987   :  { %7970 = vmatmul.f32.gmra.mxu0 %v7753_v46  ;;  %8276 = vmatmul.f32.gmra.mxu1 %v12297_v47  ;;  %v12531_v46 = vpop.f32.mrf.mxu0 }
 0x988   :  { %v8433_v4 = vadd.f32 %v12464_v33, %v8365_v49  ;;  %7261 = vmatmul.f32.gmra.mxu2 %v12506_v53  ;;  %v7755_v49 = vld [vmem:[#allocation3 + $0x349] sm:$0xff]  ;;  %v7660_v26 = vadd.f32 %v12403_v1, %v7305_v20 }
 0x989   :  { %7616 = vmatmul.f32.gmra.mxu3 %v7399_v55  ;;  %v12533_v55 = vpop.f32.mrf.mxu2 }
 0x98a   :  { %vm8497_vm3 = vcmp.ge.f32.partialorder %v8433_v4, 0.0  ;;  %v8561_v44 = vmul.f32 0.2, %v8433_v4  ;;  %v8014_v1 = vadd.f32 %v12395_v45, %v7660_v26  ;;  %v9352_v45 = vld [vmem:[#allocation3 + $0x8] sm:$0xff]  ;;  %v13215_v26 = vld [vmem:[#allocation61_spill] sm:$0xff] }
 0x98c   :  { %v8625_v19 = vsel %vm8497_vm3, %v8433_v4, %v8561_v44  ;;  %v12535_v4 = vpop.f32.mrf.mxu3  ;;  %v6952_v44 = vadd.f32 %v13211_v52, %v13210_v13 }
 0x98d   :  { %8689 = vst [vmem:[#allocation7 + $0xe0] sm:$0xff] %v8625_v19  ;;  %v8232_v47 = vpop.f32.mrf.mxu1 }
 0x98e   :  { %v8366_v35 = vadd.f32 %v8232_v47, %v8012_v42  ;;  %v7306_v19 = vadd.f32 %v12420_v38, %v6952_v44 }
 0x98f   :  { %7973 = vmatmul.f32.gmra.mxu0 %v7754_v10  ;;  %8279 = vmatmul.f32.gmra.mxu1 %v12312_v24  ;;  %v12548_v63 = vpop.f32.mrf.mxu0 }
 0x990   :  { %v8434_v54 = vadd.f32 %v12464_v33, %v8366_v35  ;;  %7264 = vmatmul.f32.gmra.mxu2 %v12522_v31  ;;  %v7756_v35 = vld [vmem:[#allocation3 + $0x351] sm:$0xff] }
 0x991   :  { %7619 = vmatmul.f32.gmra.mxu3 %v7400_v28  ;;  %v12550_v28 = vld [vmem:[#allocation3 + $0x33a] sm:$0xff]  ;;  %v12554_v5 = vpop.f32.mrf.mxu2 }
 0x992   :  { %vm8498_vm4 = vcmp.ge.f32.partialorder %v8434_v54, 0.0  ;;  %v8562_v61 = vmul.f32 0.2, %v8434_v54 }
 0x994   :  { %v8626_v62 = vsel %vm8498_vm4, %v8434_v54, %v8562_v61  ;;  %v12556_v38 = vpop.f32.mrf.mxu3 }
 0x995   :  { %8690 = vst [vmem:[#allocation7 + $0xe8] sm:$0xff] %v8626_v62  ;;  %v8235_v39 = vpop.f32.mrf.mxu1 }
 0x996   :  { %v8367_v24 = vadd.f32 %v8235_v39, %v8013_v14 }
 0x997   :  { %8282 = vmatmul.f32.gmra.mxu1 %v12325_v32  ;;  %7976 = vmatmul.f32.gmra.mxu0 %v7755_v49  ;;  %v7661_v32 = vadd.f32 %v12422_v27, %v7306_v19  ;;  %v6953_v27 = vadd.f32 %v13213_v22, %v13212_v21 }
 0x998   :  { %v8435_v41 = vadd.f32 %v12464_v33, %v8367_v24  ;;  %7267 = vmatmul.f32.gmra.mxu2 %v12538_v50  ;;  %v13214_v24 = vld [vmem:[#allocation29_spill] sm:$0xff] }
 0x999   :  { %7622 = vmatmul.f32.gmra.mxu3 %v7401_v30  ;;  %v7307_v20 = vadd.f32 %v12437_v40, %v6953_v27  ;;  %v8015_v14 = vadd.f32 %v12418_v6, %v7661_v32  ;;  %v12568_v52 = vpop.f32.mrf.mxu2  ;;  %v12580_v32 = vpop.f32.mrf.mxu0 }
 0x99a   :  { %vm8499_vm5 = vcmp.ge.f32.partialorder %v8435_v41, 0.0  ;;  %v8563_v16 = vmul.f32 0.2, %v8435_v41 }
 0x99b   :  { %v7662_v49 = vadd.f32 %v12440_v51, %v7307_v20 }
 0x99c   :  { %v8627_v42 = vsel %vm8499_vm5, %v8435_v41, %v8563_v16  ;;  %v6954_v41 = vadd.f32 %v13215_v26, %v13214_v24  ;;  %v12572_v51 = vpop.f32.mrf.mxu3  ;;  %v13220_v26 = vld [vmem:[#allocation37_spill] sm:$0xff] }
 0x99d   :  { %8691 = vst [vmem:[#allocation7 + $0xf0] sm:$0xff] %v8627_v42  ;;  %v8238_v47 = vpop.f32.mrf.mxu1  ;;  %v8016_v6 = vadd.f32 %v12435_v18, %v7662_v49 }
 0x99e   :  { %v8368_v10 = vadd.f32 %v8238_v47, %v8014_v1  ;;  %v7308_v40 = vadd.f32 %v12454_v9, %v6954_v41  ;;  %v13216_v1 = vld [vmem:[#allocation45_spill] sm:$0xff]  ;;  %v13217_v47 = vld [vmem:[#allocation64_spill] sm:$0xff] }
 0x99f   :  { %8285 = vmatmul.f32.gmra.mxu1 %v12337_v25  ;;  %7979 = vmatmul.f32.gmra.mxu0 %v7756_v35  ;;  %v6955_v35 = vadd.f32 %v13217_v47, %v13216_v1  ;;  %v13221_v41 = vld [vmem:[#allocation88_spill] sm:$0xff]  ;;  %v13222_v1 = vld [vmem:[#allocation53_spill] sm:$0xff]  ;;  %v13223_v47 = vld [vmem:[#allocation90_spill] sm:$0xff] }
 0x9a0   :  { %v8436_v54 = vadd.f32 %v12464_v33, %v8368_v10  ;;  %7270 = vmatmul.f32.gmra.mxu2 %v12550_v28  ;;  %v7663_v42 = vadd.f32 %v12456_v43, %v7308_v40 }
 0x9a1   :  { %7625 = vmatmul.f32.gmra.mxu3 %v9352_v45  ;;  %v7309_v9 = vadd.f32 %v12476_v36, %v6955_v35  ;;  %v12583_v45 = vpop.f32.mrf.mxu2  ;;  %v13219_v36 = vld [vmem:[#allocation86_spill] sm:$0xff]  ;;  %v12594_v49 = vpop.f32.mrf.mxu0  ;;  %v6958_v35 = vadd.f32 %v13223_v47, %v13222_v1 }
 0x9a2   :  { %vm8500_vm0 = vcmp.ge.f32.partialorder %v8436_v54, 0.0  ;;  %v8564_v61 = vmul.f32 0.2, %v8436_v54 }
 0x9a3   :  { %v7664_v22 = vadd.f32 %v12482_v11, %v7309_v9 }
 0x9a4   :  { %v8628_v62 = vsel %vm8500_vm0, %v8436_v54, %v8564_v61  ;;  %v8017_v54 = vadd.f32 %v12452_v7, %v7663_v42  ;;  %v12588_v27 = vpop.f32.mrf.mxu3  ;;  %v13218_v61 = vld [vmem:[#allocation34_spill] sm:$0xff] }
 0x9a5   :  { %8692 = vst [vmem:[#allocation7 + $0xf8] sm:$0xff] %v8628_v62  ;;  %v8241_v25 = vpop.f32.mrf.mxu1  ;;  %v6956_v20 = vadd.f32 %v13219_v36, %v13218_v61 }
 0x9a6   :  { %v8369_v39 = vadd.f32 %v8241_v25, %v8015_v14  ;;  %v8018_v25 = vadd.f32 %v12474_v12, %v7664_v22  ;;  %v13225_v22 = vld [vmem:[#allocation92_spill] sm:$0xff] }
 0x9a7   :  { %8288 = vmatmul.f32.gmra.mxu1 %v12353_v34  ;;  %v7310_v7 = vadd.f32 %v12499_v8, %v6956_v20 }
 0x9a8   :  { %v8437_v30 = vadd.f32 %v12464_v33, %v8369_v39 }
 0x9a9   :  { %v12608_v42 = vpop.f32.mrf.mxu0 }
 0x9aa   :  { %vm8501_vm6 = vcmp.ge.f32.partialorder %v8437_v30, 0.0  ;;  %v8565_v13 = vmul.f32 0.2, %v8437_v30 }
 0x9ac   :  { %v8629_v44 = vsel %vm8501_vm6, %v8437_v30, %v8565_v13  ;;  %v12596_v30 = vpop.f32.mrf.mxu2  ;;  %v6957_v13 = vadd.f32 %v13221_v41, %v13220_v26  ;;  %v12603_v40 = vpop.f32.mrf.mxu3 }
 0x9ad   :  { %8693 = vst [vmem:[#allocation7 + $0x100] sm:$0xff] %v8629_v44  ;;  %v8244_v16 = vpop.f32.mrf.mxu1 }
 0x9ae   :  { %v8370_v19 = vadd.f32 %v8244_v16, %v8016_v6  ;;  %v7311_v12 = vadd.f32 %v12516_v57, %v6957_v13 }
 0x9af   :  { %8291 = vmatmul.f32.gmra.mxu1 %v12369_v56 }
 0x9b0   :  { %v8438_v34 = vadd.f32 %v12464_v33, %v8370_v19 }
 0x9b1   :  { %v12625_v61 = vpop.f32.mrf.mxu0 }
 0x9b2   :  { %vm8502_vm7 = vcmp.ge.f32.partialorder %v8438_v34, 0.0  ;;  %v8566_v10 = vmul.f32 0.2, %v8438_v34 }
 0x9b4   :  { %v8630_v18 = vsel %vm8502_vm7, %v8438_v34, %v8566_v10  ;;  %v12612_v34 = vpop.f32.mrf.mxu2 }
 0x9b5   :  { %8694 = vst [vmem:[#allocation7 + $0x108] sm:$0xff] %v8630_v18  ;;  %v8247_v43 = vpop.f32.mrf.mxu1  ;;  %v12618_v18 = vpop.f32.mrf.mxu3 }
 0x9b6   :  { %v8371_v21 = vadd.f32 %v8247_v43, %v8017_v54 }
 0x9b7   :  { %8294 = vmatmul.f32.gmra.mxu1 %v12385_v48  ;;  %v7665_v48 = vadd.f32 %v12501_v60, %v7310_v7  ;;  %v7666_v60 = vadd.f32 %v12519_v15, %v7311_v12 }
 0x9b8   :  { %v8439_v56 = vadd.f32 %v12464_v33, %v8371_v21  ;;  %v13224_v21 = vld [vmem:[#allocation42_spill] sm:$0xff] }
 0x9b9   :  { %v8019_v6 = vadd.f32 %v12497_v23, %v7665_v48  ;;  %v7312_v23 = vadd.f32 %v12533_v55, %v6958_v35  ;;  %v8020_v9 = vadd.f32 %v12514_v58, %v7666_v60  ;;  %v12639_v26 = vpop.f32.mrf.mxu0 }
 0x9ba   :  { %vm8503_vm8 = vcmp.ge.f32.partialorder %v8439_v56, 0.0  ;;  %v8567_v62 = vmul.f32 0.2, %v8439_v56 }
 0x9bb   :  { %v7667_v43 = vadd.f32 %v12535_v4, %v7312_v23  ;;  %v13230_v23 = vld [vmem:[#allocation43_spill] sm:$0xff] }
 0x9bc   :  { %v8631_v14 = vsel %vm8503_vm8, %v8439_v56, %v8567_v62  ;;  %v6959_v56 = vadd.f32 %v13225_v22, %v13224_v21  ;;  %v12627_v36 = vpop.f32.mrf.mxu2 }
 0x9bd   :  { %8695 = vst [vmem:[#allocation7 + $0x110] sm:$0xff] %v8631_v14  ;;  %v8250_v39 = vpop.f32.mrf.mxu1  ;;  %v8021_v62 = vadd.f32 %v12531_v46, %v7667_v43  ;;  %v12631_v14 = vpop.f32.mrf.mxu3 }
 0x9be   :  { %v8372_v11 = vadd.f32 %v8250_v39, %v8018_v25  ;;  %v7313_v58 = vadd.f32 %v12554_v5, %v6959_v56  ;;  %v13226_v39 = vld [vmem:[#allocation24_spill] sm:$0xff] }
 0x9bf   :  { %8297 = vmatmul.f32.gmra.mxu1 %v12399_v2 }
 0x9c0   :  { %v8440_v24 = vadd.f32 %v12464_v33, %v8372_v11  ;;  %v13227_v11 = vld [vmem:[#allocation94_spill] sm:$0xff] }
 0x9c1   :  { %v6960_v48 = vadd.f32 %v13227_v11, %v13226_v39  ;;  %v12653_v47 = vpop.f32.mrf.mxu0  ;;  %v13235_v11 = vld [vmem:[#allocation102_spill] sm:$0xff] }
 0x9c2   :  { %vm8504_vm9 = vcmp.ge.f32.partialorder %v8440_v24, 0.0  ;;  %v8568_v8 = vmul.f32 0.2, %v8440_v24 }
 0x9c3   :  { %v7314_v5 = vadd.f32 %v12568_v52, %v6960_v48  ;;  %v13229_v52 = vld [vmem:[#allocation96_spill] sm:$0xff] }
 0x9c4   :  { %v8632_v44 = vsel %vm8504_vm9, %v8440_v24, %v8568_v8  ;;  %v12642_v13 = vpop.f32.mrf.mxu2 }
 0x9c5   :  { %8696 = vst [vmem:[#allocation7 + $0x118] sm:$0xff] %v8632_v44  ;;  %v8253_v16 = vpop.f32.mrf.mxu1  ;;  %v7669_v12 = vadd.f32 %v12572_v51, %v7314_v5  ;;  %v12647_v44 = vpop.f32.mrf.mxu3 }
 0x9c6   :  { %v8373_v19 = vadd.f32 %v8253_v16, %v8019_v6  ;;  %v13228_v6 = vld [vmem:[#allocation49_spill] sm:$0xff] }
 0x9c7   :  { %8300 = vmatmul.f32.gmra.mxu1 %v12411_v0  ;;  %v6961_v16 = vadd.f32 %v13229_v52, %v13228_v6  ;;  %v13237_v6 = vld [vmem:[#allocation104_spill] sm:$0xff] }
 0x9c8   :  { %v8441_v2 = vadd.f32 %v12464_v33, %v8373_v19 }
 0x9c9   :  { %v12667_v22 = vpop.f32.mrf.mxu0 }
 0x9ca   :  { %vm8505_vm10 = vcmp.ge.f32.partialorder %v8441_v2, 0.0  ;;  %v8569_v57 = vmul.f32 0.2, %v8441_v2 }
 0x9cc   :  { %v8633_v10 = vsel %vm8505_vm10, %v8441_v2, %v8569_v57  ;;  %v8023_v2 = vadd.f32 %v12580_v32, %v7669_v12  ;;  %v12655_v35 = vpop.f32.mrf.mxu2 }
 0x9cd   :  { %8697 = vst [vmem:[#allocation7 + $0x120] sm:$0xff] %v8633_v10  ;;  %v8256_v15 = vpop.f32.mrf.mxu1  ;;  %v13231_v10 = vld [vmem:[#allocation98_spill] sm:$0xff] }
 0x9ce   :  { %v8374_v54 = vadd.f32 %v8256_v15, %v8020_v9  ;;  %v6962_v9 = vadd.f32 %v13231_v10, %v13230_v23  ;;  %v12662_v15 = vpop.f32.mrf.mxu3 }
 0x9cf   :  { %8303 = vmatmul.f32.gmra.mxu1 %v12427_v59  ;;  %v7668_v59 = vadd.f32 %v12556_v38, %v7313_v58  ;;  %v13233_v58 = vld [vmem:[#allocation100_spill] sm:$0xff] }
 0x9d0   :  { %v8442_v0 = vadd.f32 %v12464_v33, %v8374_v54  ;;  %v7316_v32 = vadd.f32 %v12596_v30, %v6962_v9 }
 0x9d1   :  { %v8022_v41 = vadd.f32 %v12548_v63, %v7668_v59  ;;  %v7315_v63 = vadd.f32 %v12583_v45, %v6961_v16 }
 0x9d2   :  { %vm8506_vm11 = vcmp.ge.f32.partialorder %v8442_v0, 0.0  ;;  %v8570_v55 = vmul.f32 0.2, %v8442_v0 }
 0x9d4   :  { %v8634_v20 = vsel %vm8506_vm11, %v8442_v0, %v8570_v55  ;;  %v7223_v56 = vpop.f32.mrf.mxu2  ;;  %v13232_v55 = vld [vmem:[#allocation48_spill] sm:$0xff] }
 0x9d5   :  { %8698 = vst [vmem:[#allocation7 + $0x128] sm:$0xff] %v8634_v20  ;;  %v8259_v4 = vpop.f32.mrf.mxu1  ;;  %v6963_v20 = vadd.f32 %v13233_v58, %v13232_v55 }
 0x9d6   :  { %v8375_v7 = vadd.f32 %v8259_v4, %v8021_v62 }
 0x9d7   :  { %8306 = vmatmul.f32.gmra.mxu1 %v12443_v37  ;;  %v7317_v62 = vadd.f32 %v12612_v34, %v6963_v20 }
 0x9d8   :  { %v8443_v25 = vadd.f32 %v12464_v33, %v8375_v7  ;;  %v7578_v7 = vpop.f32.mrf.mxu3 }
 0x9da   :  { %vm8507_vm12 = vcmp.ge.f32.partialorder %v8443_v25, 0.0  ;;  %v8571_v24 = vmul.f32 0.2, %v8443_v25 }
 0x9dc   :  { %v8635_v46 = vsel %vm8507_vm12, %v8443_v25, %v8571_v24  ;;  %v7672_v25 = vadd.f32 %v12618_v18, %v7317_v62  ;;  %v12680_v24 = vpop.f32.mrf.mxu0  ;;  %v7226_v5 = vpop.f32.mrf.mxu2 }
 0x9dd   :  { %8699 = vst [vmem:[#allocation7 + $0x130] sm:$0xff] %v8635_v46  ;;  %v8262_v38 = vpop.f32.mrf.mxu1 }
 0x9de   :  { %v8376_v8 = vadd.f32 %v8262_v38, %v8022_v41  ;;  %v8026_v41 = vadd.f32 %v12625_v61, %v7672_v25 }
 0x9df   :  { %8309 = vmatmul.f32.gmra.mxu1 %v12459_v3  ;;  %v7670_v3 = vadd.f32 %v12588_v27, %v7315_v63  ;;  %v7671_v27 = vadd.f32 %v12603_v40, %v7316_v32 }
 0x9e0   :  { %v8444_v37 = vadd.f32 %v12464_v33, %v8376_v8  ;;  %v7581_v8 = vpop.f32.mrf.mxu3 }
 0x9e1   :  { %v8024_v43 = vadd.f32 %v12594_v49, %v7670_v3  ;;  %v8025_v4 = vadd.f32 %v12608_v42, %v7671_v27  ;;  %v13238_v3 = vld [vmem:[#allocation47_spill] sm:$0xff] }
 0x9e2   :  { %vm8508_vm13 = vcmp.ge.f32.partialorder %v8444_v37, 0.0  ;;  %v8572_v19 = vmul.f32 0.2, %v8444_v37 }
 0x9e4   :  { %v8636_v60 = vsel %vm8508_vm13, %v8444_v37, %v8572_v19  ;;  %v13236_v37 = vld [vmem:[#allocation44_spill] sm:$0xff]  ;;  %v12690_v19 = vpop.f32.mrf.mxu0 }
 0x9e5   :  { %8700 = vst [vmem:[#allocation7 + $0x138] sm:$0xff] %v8636_v60  ;;  %v8265_v1 = vpop.f32.mrf.mxu1  ;;  %v6965_v52 = vadd.f32 %v13237_v6, %v13236_v37  ;;  %v7229_v60 = vpop.f32.mrf.mxu2 }
 0x9e6   :  { %v8377_v51 = vadd.f32 %v8265_v1, %v8023_v2 }
 0x9e7   :  { %8312 = vmatmul.f32.gmra.mxu1 %v12478_v17 }
 0x9e8   :  { %v8445_v57 = vadd.f32 %v12464_v33, %v8377_v51  ;;  %v7584_v51 = vpop.f32.mrf.mxu3 }
 0x9ea   :  { %vm8509_vm14 = vcmp.ge.f32.partialorder %v8445_v57, 0.0  ;;  %v8573_v45 = vmul.f32 0.2, %v8445_v57 }
 0x9ec   :  { %v8637_v54 = vsel %vm8509_vm14, %v8445_v57, %v8573_v45  ;;  %v13239_v57 = vld [vmem:[#allocation106_spill] sm:$0xff]  ;;  %v7938_v32 = vpop.f32.mrf.mxu0 }
 0x9ed   :  { %8701 = vst [vmem:[#allocation7 + $0x140] sm:$0xff] %v8637_v54  ;;  %v8268_v0 = vpop.f32.mrf.mxu1  ;;  %v6966_v23 = vadd.f32 %v13239_v57, %v13238_v3 }
 0x9ee   :  { %v8378_v21 = vadd.f32 %v8268_v0, %v8024_v43  ;;  %v13240_v0 = vld [vmem:[#allocation54_spill] sm:$0xff] }
 0x9ef   :  { %8315 = vmatmul.f32.gmra.mxu1 %v12490_v29  ;;  %v13234_v29 = vld [vmem:[#allocation39_spill] sm:$0xff]  ;;  %v7320_v10 = vadd.f32 %v12655_v35, %v6966_v23 }
 0x9f0   :  { %v8446_v17 = vadd.f32 %v12464_v33, %v8378_v21  ;;  %v6964_v48 = vadd.f32 %v13235_v11, %v13234_v29  ;;  %v13241_v21 = vld [vmem:[#allocation108_spill] sm:$0xff]  ;;  %v7587_v35 = vpop.f32.mrf.mxu3 }
 0x9f1   :  { %v7675_v43 = vadd.f32 %v12662_v15, %v7320_v10  ;;  %v6967_v27 = vadd.f32 %v13241_v21, %v13240_v0 }
 0x9f2   :  { %vm8510_vm15 = vcmp.ge.f32.partialorder %v8446_v17, 0.0  ;;  %v8574_v30 = vmul.f32 0.2, %v8446_v17  ;;  %v7318_v42 = vadd.f32 %v12627_v36, %v6964_v48  ;;  %v7319_v36 = vadd.f32 %v12642_v13, %v6965_v52 }
 0x9f3   :  { %v7321_v55 = vadd.f32 %v7223_v56, %v6967_v27 }
 0x9f4   :  { %v8638_v49 = vsel %vm8510_vm15, %v8446_v17, %v8574_v30  ;;  %v7673_v12 = vadd.f32 %v12631_v14, %v7318_v42  ;;  %v7674_v1 = vadd.f32 %v12647_v44, %v7319_v36  ;;  %v7232_v44 = vpop.f32.mrf.mxu2  ;;  %v8109_v30 = vld [vmem:[#allocation3 + $0x34a] sm:$0xff]  ;;  %v7941_v15 = vpop.f32.mrf.mxu0 }
 0x9f5   :  { %8702 = vst [vmem:[#allocation7 + $0x148] sm:$0xff] %v8638_v49  ;;  %v8271_v40 = vpop.f32.mrf.mxu1  ;;  %v7676_v49 = vadd.f32 %v7578_v7, %v7321_v55 }
 0x9f6   :  { %v8379_v59 = vadd.f32 %v8271_v40, %v8025_v4  ;;  %v8027_v63 = vadd.f32 %v12639_v26, %v7673_v12  ;;  %v8028_v26 = vadd.f32 %v12653_v47, %v7674_v1  ;;  %v8029_v47 = vadd.f32 %v12667_v22, %v7675_v43  ;;  %v13242_v40 = vld [vmem:[#allocation59_spill] sm:$0xff] }
 0x9f7   :  { %8318 = vmatmul.f32.gmra.mxu1 %v12506_v53  ;;  %v8030_v11 = vadd.f32 %v12680_v24, %v7676_v49 }
 0x9f8   :  { %v8447_v39 = vadd.f32 %v12464_v33, %v8379_v59  ;;  %v13243_v59 = vld [vmem:[#allocation110_spill] sm:$0xff]  ;;  %v7590_v22 = vpop.f32.mrf.mxu3 }
 0x9f9   :  { %v6968_v25 = vadd.f32 %v13243_v59, %v13242_v40 }
 0x9fa   :  { %vm8511_vm1 = vcmp.ge.f32.partialorder %v8447_v39, 0.0  ;;  %v8575_v34 = vmul.f32 0.2, %v8447_v39 }
 0x9fb   :  { %v7322_v29 = vadd.f32 %v7226_v5, %v6968_v25 }
 0x9fc   :  { %v8639_v46 = vsel %vm8511_vm1, %v8447_v39, %v8575_v34  ;;  %v8110_v34 = vld [vmem:[#allocation3 + $0x352] sm:$0xff]  ;;  %v7944_v12 = vpop.f32.mrf.mxu0 }
 0x9fd   :  { %8703 = vst [vmem:[#allocation7 + $0x150] sm:$0xff] %v8639_v46  ;;  %v8274_v38 = vpop.f32.mrf.mxu1  ;;  %v7677_v7 = vadd.f32 %v7581_v8, %v7322_v29 }
 0x9fe   :  { %v8380_v18 = vadd.f32 %v8274_v38, %v8026_v41  ;;  %v13244_v41 = vld [vmem:[#allocation62_spill] sm:$0xff]  ;;  %v13245_v38 = vld [vmem:[#allocation112_spill] sm:$0xff] }
 0x9ff   :  { %8321 = vmatmul.f32.gmra.mxu1 %v12522_v31  ;;  %v8031_v24 = vadd.f32 %v12690_v19, %v7677_v7 }
 0xa00   :  { %v8448_v53 = vadd.f32 %v12464_v33, %v8380_v18  ;;  %v6969_v18 = vadd.f32 %v13245_v38, %v13244_v41  ;;  %v7593_v36 = vpop.f32.mrf.mxu3 }
 0xa02   :  { %vm8512_vm2 = vcmp.ge.f32.partialorder %v8448_v53, 0.0  ;;  %v8576_v16 = vmul.f32 0.2, %v8448_v53  ;;  %v7323_v5 = vadd.f32 %v7229_v60, %v6969_v18 }
 0xa04   :  { %v8640_v61 = vsel %vm8512_vm2, %v8448_v53, %v8576_v16  ;;  %v7947_v3 = vpop.f32.mrf.mxu0 }
 0xa05   :  { %8704 = vst [vmem:[#allocation7 + $0x158] sm:$0xff] %v8640_v61  ;;  %v8277_v2 = vpop.f32.mrf.mxu1  ;;  %v7678_v61 = vadd.f32 %v7584_v51, %v7323_v5  ;;  %v13248_v51 = vld [vmem:[#allocation87_spill] sm:$0xff] }
 0xa06   :  { %v8381_v14 = vadd.f32 %v8277_v2, %v8027_v63  ;;  %v13246_v63 = vld [vmem:[#allocation85_spill] sm:$0xff] }
 0xa07   :  { %8324 = vmatmul.f32.gmra.mxu1 %v12538_v50  ;;  %v13247_v2 = vld [vmem:[#allocation113_spill] sm:$0xff]  ;;  %v8032_v23 = vadd.f32 %v7938_v32, %v7678_v61 }
 0xa08   :  { %v8449_v31 = vadd.f32 %v12464_v33, %v8381_v14  ;;  %v6970_v14 = vadd.f32 %v13247_v2, %v13246_v63 }
 0xa0a   :  { %vm8513_vm3 = vcmp.ge.f32.partialorder %v8449_v31, 0.0  ;;  %v8577_v13 = vmul.f32 0.2, %v8449_v31 }
 0xa0c   :  { %v8641_v9 = vsel %vm8513_vm3, %v8449_v31, %v8577_v13  ;;  %v7324_v31 = vadd.f32 %v7232_v44, %v6970_v14  ;;  %v7950_v27 = vpop.f32.mrf.mxu0 }
 0xa0d   :  { %8705 = vst [vmem:[#allocation7 + $0x160] sm:$0xff] %v8641_v9  ;;  %v8280_v45 = vpop.f32.mrf.mxu1 }
 0xa0e   :  { %v8382_v54 = vadd.f32 %v8280_v45, %v8028_v26  ;;  %v7679_v10 = vadd.f32 %v7587_v35, %v7324_v31  ;;  %v7596_v26 = vpop.f32.mrf.mxu3  ;;  %v13249_v45 = vld [vmem:[#allocation114_spill] sm:$0xff]  ;;  %v13250_v35 = vld [vmem:[#allocation89_spill] sm:$0xff]  ;;  %v13256_v31 = vld [vmem:[#allocation95_spill] sm:$0xff] }
 0xa0f   :  { %8327 = vmatmul.f32.gmra.mxu1 %v12550_v28  ;;  %v7235_v28 = vpop.f32.mrf.mxu2 }
 0xa10   :  { %v8450_v50 = vadd.f32 %v12464_v33, %v8382_v54  ;;  %v6971_v54 = vadd.f32 %v13249_v45, %v13248_v51  ;;  %v8033_v21 = vadd.f32 %v7941_v15, %v7679_v10 }
 0xa12   :  { %vm8514_vm4 = vcmp.ge.f32.partialorder %v8450_v50, 0.0  ;;  %v8578_v17 = vmul.f32 0.2, %v8450_v50 }
 0xa14   :  { %v8642_v58 = vsel %vm8514_vm4, %v8450_v50, %v8578_v17  ;;  %v7325_v50 = vadd.f32 %v7235_v28, %v6971_v54  ;;  %v7953_v25 = vpop.f32.mrf.mxu0 }
 0xa15   :  { %8706 = vst [vmem:[#allocation7 + $0x168] sm:$0xff] %v8642_v58  ;;  %v8283_v20 = vpop.f32.mrf.mxu1 }
 0xa16   :  { %v8383_v62 = vadd.f32 %v8283_v20, %v8029_v47  ;;  %v7680_v55 = vadd.f32 %v7590_v22, %v7325_v50  ;;  %v13251_v47 = vld [vmem:[#allocation115_spill] sm:$0xff]  ;;  %v13258_v50 = vld [vmem:[#allocation97_spill] sm:$0xff] }
 0xa17   :  { %8330 = vmatmul.f32.gmra.mxu1 %v8109_v30  ;;  %v7238_v37 = vpop.f32.mrf.mxu2  ;;  %v6972_v20 = vadd.f32 %v13251_v47, %v13250_v35 }
 0xa18   :  { %v8451_v4 = vadd.f32 %v12464_v33, %v8383_v62  ;;  %v7599_v62 = vpop.f32.mrf.mxu3  ;;  %v8034_v40 = vadd.f32 %v7944_v12, %v7680_v55 }
 0xa19   :  { %v7326_v49 = vadd.f32 %v7238_v37, %v6972_v20  ;;  %v13255_v37 = vld [vmem:[#allocation117_spill] sm:$0xff] }
 0xa1a   :  { %vm8515_vm5 = vcmp.ge.f32.partialorder %v8451_v4, 0.0  ;;  %v8579_v39 = vmul.f32 0.2, %v8451_v4 }
 0xa1b   :  { %v7681_v59 = vadd.f32 %v7593_v36, %v7326_v49  ;;  %v13261_v49 = vld [vmem:[#allocation120_spill] sm:$0xff] }
 0xa1c   :  { %v8643_v56 = vsel %vm8515_vm5, %v8451_v4, %v8579_v39 }
 0xa1d   :  { %8707 = vst [vmem:[#allocation7 + $0x170] sm:$0xff] %v8643_v56  ;;  %v8286_v48 = vpop.f32.mrf.mxu1  ;;  %v13252_v56 = vld [vmem:[#allocation91_spill] sm:$0xff]  ;;  %v8035_v7 = vadd.f32 %v7947_v3, %v7681_v59  ;;  %v13257_v3 = vld [vmem:[#allocation118_spill] sm:$0xff] }
 0xa1e   :  { %v8384_v42 = vadd.f32 %v8286_v48, %v8030_v11  ;;  %v13253_v11 = vld [vmem:[#allocation116_spill] sm:$0xff] }
 0xa1f   :  { %8333 = vmatmul.f32.gmra.mxu1 %v8110_v34  ;;  %v7241_v60 = vpop.f32.mrf.mxu2  ;;  %v6973_v22 = vadd.f32 %v13253_v11, %v13252_v56 }
 0xa20   :  { %v8452_v46 = vadd.f32 %v12464_v33, %v8384_v42 }
 0xa21   :  { %v7327_v34 = vadd.f32 %v7241_v60, %v6973_v22 }
 0xa22   :  { %vm8516_vm0 = vcmp.ge.f32.partialorder %v8452_v46, 0.0  ;;  %v8580_v53 = vmul.f32 0.2, %v8452_v46 }
 0xa23   :  { %v7682_v18 = vadd.f32 %v7596_v26, %v7327_v34  ;;  %v13262_v34 = vld [vmem:[#allocation101_spill] sm:$0xff] }
 0xa24   :  { %v8644_v6 = vsel %vm8516_vm0, %v8452_v46, %v8580_v53  ;;  %v7602_v46 = vpop.f32.mrf.mxu3  ;;  %v13254_v53 = vld [vmem:[#allocation93_spill] sm:$0xff] }
 0xa25   :  { %8708 = vst [vmem:[#allocation7 + $0x178] sm:$0xff] %v8644_v6  ;;  %v8289_v52 = vpop.f32.mrf.mxu1  ;;  %v6974_v5 = vadd.f32 %v13255_v37, %v13254_v53  ;;  %v7956_v6 = vpop.f32.mrf.mxu0  ;;  %v8036_v61 = vadd.f32 %v7950_v27, %v7682_v18 }
 0xa26   :  { %v8385_v16 = vadd.f32 %v8289_v52, %v8031_v24 }
 0xa27   :  { %v7244_v17 = vpop.f32.mrf.mxu2 }
 0xa28   :  { %v8453_v8 = vadd.f32 %v12464_v33, %v8385_v16  ;;  %v7328_v16 = vadd.f32 %v7244_v17, %v6974_v5 }
 0xa2a   :  { %vm8517_vm6 = vcmp.ge.f32.partialorder %v8453_v8, 0.0  ;;  %v8581_v1 = vmul.f32 0.2, %v8453_v8  ;;  %v7683_v14 = vadd.f32 %v7599_v62, %v7328_v16  ;;  %v13260_v62 = vld [vmem:[#allocation99_spill] sm:$0xff] }
 0xa2c   :  { %v8645_v57 = vsel %vm8517_vm6, %v8453_v8, %v8581_v1  ;;  %v7605_v2 = vpop.f32.mrf.mxu3  ;;  %v8037_v10 = vadd.f32 %v7953_v25, %v7683_v14 }
 0xa2d   :  { %8709 = vst [vmem:[#allocation7 + $0x180] sm:$0xff] %v8645_v57  ;;  %v8292_v13 = vpop.f32.mrf.mxu1  ;;  %v6975_v57 = vadd.f32 %v13257_v3, %v13256_v31 }
 0xa2e   :  { %v8386_v19 = vadd.f32 %v8292_v13, %v8032_v23  ;;  %v7959_v13 = vpop.f32.mrf.mxu0 }
 0xa2f   :  { %v7247_v29 = vpop.f32.mrf.mxu2 }
 0xa30   :  { %v8454_v9 = vadd.f32 %v12464_v33, %v8386_v19  ;;  %v7329_v60 = vadd.f32 %v7247_v29, %v6975_v57 }
 0xa32   :  { %vm8518_vm7 = vcmp.ge.f32.partialorder %v8454_v9, 0.0  ;;  %v8582_v43 = vmul.f32 0.2, %v8454_v9  ;;  %v7684_v45 = vadd.f32 %v7602_v46, %v7329_v60  ;;  %v13266_v60 = vld [vmem:[#allocation105_spill] sm:$0xff] }
 0xa34   :  { %v8646_v0 = vsel %vm8518_vm7, %v8454_v9, %v8582_v43  ;;  %v7608_v43 = vpop.f32.mrf.mxu3  ;;  %v8038_v17 = vadd.f32 %v7956_v6, %v7684_v45 }
 0xa35   :  { %8710 = vst [vmem:[#allocation7 + $0x188] sm:$0xff] %v8646_v0  ;;  %v8295_v44 = vpop.f32.mrf.mxu1  ;;  %v13259_v0 = vld [vmem:[#allocation119_spill] sm:$0xff] }
 0xa36   :  { %v8387_v32 = vadd.f32 %v8295_v44, %v8033_v21  ;;  %v6976_v21 = vadd.f32 %v13259_v0, %v13258_v50 }
 0xa37   :  { %v7250_v52 = vpop.f32.mrf.mxu2 }
 0xa38   :  { %v8455_v58 = vadd.f32 %v12464_v33, %v8387_v32  ;;  %v7330_v27 = vadd.f32 %v7250_v52, %v6976_v21  ;;  %v13265_v52 = vld [vmem:[#allocation123_spill] sm:$0xff]  ;;  %v9353_v21 = vld [vmem:[%s12766_s4] ss:$0 sm:$0xff]  ;;  %s9410_s4 = smov [#allocation7]  }
 0xa39   :  { %s8729_s10 = sshll.u32 %s9410_s4, 4  ;;  %s8730_s10 = int_to_ptr.vmem [resolvable:$true] %s8729_s10 }
 0xa3a   :  { %vm8519_vm8 = vcmp.ge.f32.partialorder %v8455_v58, 0.0  ;;  %v8583_v30 = vmul.f32 0.2, %v8455_v58  ;;  %v7685_v20 = vadd.f32 %v7605_v2, %v7330_v27  ;;  %v13268_v27 = vld [vmem:[#allocation107_spill] sm:$0xff] }
 0xa3c   :  { %v8647_v4 = vsel %vm8519_vm8, %v8455_v58, %v8583_v30  ;;  %v7962_v58 = vpop.f32.mrf.mxu0  ;;  %v8039_v25 = vadd.f32 %v7959_v13, %v7685_v20  ;;  %v13267_v13 = vld [vmem:[#allocation126_spill] sm:$0xff] }
 0xa3d   :  { %8711 = vst [vmem:[#allocation7 + $0x190] sm:$0xff] %v8647_v4  ;;  %v8298_v28 = vpop.f32.mrf.mxu1  ;;  %v6977_v4 = vadd.f32 %v13261_v49, %v13260_v62 }
 0xa3e   :  { %v8388_v15 = vadd.f32 %v8298_v28, %v8034_v40  ;;  %v7611_v28 = vpop.f32.mrf.mxu3 }
 0xa3f   :  { %v7253_v9 = vpop.f32.mrf.mxu2 }
 0xa40   :  { %v8456_v39 = vadd.f32 %v12464_v33, %v8388_v15  ;;  %v7331_v15 = vadd.f32 %v7253_v9, %v6977_v4 }
 0xa42   :  { %vm8520_vm9 = vcmp.ge.f32.partialorder %v8456_v39, 0.0  ;;  %v8584_v48 = vmul.f32 0.2, %v8456_v39  ;;  %v7686_v56 = vadd.f32 %v7608_v43, %v7331_v15  ;;  %v13271_v15 = vld [vmem:[#allocation135_spill] sm:$0xff] }
 0xa44   :  { %v8648_v42 = vsel %vm8520_vm9, %v8456_v39, %v8584_v48  ;;  %v7965_v11 = vpop.f32.mrf.mxu0  ;;  %v8040_v18 = vadd.f32 %v7962_v58, %v7686_v56 }
 0xa45   :  { %8712 = vst [vmem:[#allocation7 + $0x198] sm:$0xff] %v8648_v42  ;;  %v8301_v41 = vpop.f32.mrf.mxu1  ;;  %v13263_v42 = vld [vmem:[#allocation122_spill] sm:$0xff] }
 0xa46   :  { %v8389_v38 = vadd.f32 %v8301_v41, %v8035_v7  ;;  %v6978_v7 = vadd.f32 %v13263_v42, %v13262_v34 }
 0xa47   :  { %v7256_v47 = vpop.f32.mrf.mxu2 }
 0xa48   :  { %v8457_v12 = vadd.f32 %v12464_v33, %v8389_v38  ;;  %v7332_v41 = vadd.f32 %v7256_v47, %v6978_v7 }
 0xa4a   :  { %vm8521_vm10 = vcmp.ge.f32.partialorder %v8457_v12, 0.0  ;;  %v8585_v24 = vmul.f32 0.2, %v8457_v12  ;;  %v7687_v5 = vadd.f32 %v7611_v28, %v7332_v41  ;;  %v13270_v28 = vld [vmem:[#allocation109_spill] sm:$0xff]  ;;  %v13272_v41 = vld [vmem:[#allocation111_spill] sm:$0xff] }
 0xa4c   :  { %v8649_v36 = vsel %vm8521_vm10, %v8457_v12, %v8585_v24  ;;  %v7614_v12 = vpop.f32.mrf.mxu3  ;;  %v13264_v24 = vld [vmem:[#allocation103_spill] sm:$0xff]  ;;  %v8041_v14 = vadd.f32 %v7965_v11, %v7687_v5 }
 0xa4d   :  { %8713 = vst [vmem:[#allocation7 + $0x1a0] sm:$0xff] %v8649_v36  ;;  %v8304_v8 = vpop.f32.mrf.mxu1  ;;  %v6979_v16 = vadd.f32 %v13265_v52, %v13264_v24  ;;  %v7968_v36 = vpop.f32.mrf.mxu0 }
 0xa4e   :  { %v8390_v63 = vadd.f32 %v8304_v8, %v8036_v61 }
 0xa4f   :  { %v7259_v48 = vpop.f32.mrf.mxu2 }
 0xa50   :  { %v8458_v1 = vadd.f32 %v12464_v33, %v8390_v63  ;;  %v7333_v63 = vadd.f32 %v7259_v48, %v6979_v16 }
 0xa52   :  { %vm8522_vm11 = vcmp.ge.f32.partialorder %v8458_v1, 0.0  ;;  %v8586_v23 = vmul.f32 0.2, %v8458_v1  ;;  %v7688_v57 = vadd.f32 %v7614_v12, %v7333_v63 }
 0xa54   :  { %v8650_v19 = vsel %vm8522_vm11, %v8458_v1, %v8586_v23  ;;  %v7617_v3 = vpop.f32.mrf.mxu3  ;;  %v8042_v45 = vadd.f32 %v7968_v36, %v7688_v57 }
 0xa55   :  { %8714 = vst [vmem:[#allocation7 + $0x1a8] sm:$0xff] %v8650_v19  ;;  %v8307_v26 = vpop.f32.mrf.mxu1  ;;  %v6980_v19 = vadd.f32 %v13267_v13, %v13266_v60  ;;  %v7971_v9 = vpop.f32.mrf.mxu0 }
 0xa56   :  { %v8391_v51 = vadd.f32 %v8307_v26, %v8037_v10 }
 0xa57   :  { %v7262_v8 = vpop.f32.mrf.mxu2 }
 0xa58   :  { %v8459_v54 = vadd.f32 %v12464_v33, %v8391_v51  ;;  %v7334_v26 = vadd.f32 %v7262_v8, %v6980_v19 }
 0xa5a   :  { %vm8523_vm12 = vcmp.ge.f32.partialorder %v8459_v54, 0.0  ;;  %v8587_v44 = vmul.f32 0.2, %v8459_v54  ;;  %v7689_v0 = vadd.f32 %v7617_v3, %v7334_v26 }
 0xa5c   :  { %v8651_v32 = vsel %vm8523_vm12, %v8459_v54, %v8587_v44  ;;  %v8043_v47 = vadd.f32 %v7971_v9, %v7689_v0 }
 0xa5d   :  { %8715 = vst [vmem:[#allocation7 + $0x1b0] sm:$0xff] %v8651_v32  ;;  %v8310_v55 = vpop.f32.mrf.mxu1  ;;  %v13269_v32 = vld [vmem:[#allocation131_spill] sm:$0xff]  ;;  %v7974_v62 = vpop.f32.mrf.mxu0 }
 0xa5e   :  { %v8392_v35 = vadd.f32 %v8310_v55, %v8038_v17  ;;  %v6981_v17 = vadd.f32 %v13269_v32, %v13268_v27 }
 0xa5f   :  { %v7265_v54 = vpop.f32.mrf.mxu2 }
 0xa60   :  { %v8460_v30 = vadd.f32 %v12464_v33, %v8392_v35  ;;  %v7335_v58 = vadd.f32 %v7265_v54, %v6981_v17 }
 0xa62   :  { %vm8524_vm13 = vcmp.ge.f32.partialorder %v8460_v30, 0.0  ;;  %v8588_v40 = vmul.f32 0.2, %v8460_v30 }
 0xa64   :  { %v8652_v59 = vsel %vm8524_vm13, %v8460_v30, %v8588_v40 }
 0xa65   :  { %8716 = vst [vmem:[#allocation7 + $0x1b8] sm:$0xff] %v8652_v59  ;;  %v8313_v39 = vpop.f32.mrf.mxu1  ;;  %v6982_v59 = vadd.f32 %v13271_v15, %v13270_v28  ;;  %v7977_v34 = vpop.f32.mrf.mxu0 }
 0xa66   :  { %v8393_v29 = vadd.f32 %v8313_v39, %v8039_v25 }
 0xa67   :  { %v7268_v49 = vpop.f32.mrf.mxu2 }
 0xa68   :  { %v8461_v22 = vadd.f32 %v12464_v33, %v8393_v29  ;;  %v7336_v29 = vadd.f32 %v7268_v49, %v6982_v59 }
 0xa6a   :  { %vm8525_vm14 = vcmp.ge.f32.partialorder %v8461_v22, 0.0  ;;  %v8589_v46 = vmul.f32 0.2, %v8461_v22 }
 0xa6c   :  { %v8653_v38 = vsel %vm8525_vm14, %v8461_v22, %v8589_v46 }
 0xa6d   :  { %8717 = vst [vmem:[#allocation7 + $0x1c0] sm:$0xff] %v8653_v38  ;;  %v8316_v53 = vpop.f32.mrf.mxu1  ;;  %v13273_v38 = vld [vmem:[#allocation137_spill] sm:$0xff] }
 0xa6e   :  { %v8394_v37 = vadd.f32 %v8316_v53, %v8040_v18  ;;  %v6983_v18 = vadd.f32 %v13273_v38, %v13272_v41 }
 0xa6f   :  { %v7271_v46 = vpop.f32.mrf.mxu2 }
 0xa70   :  { %v8462_v6 = vadd.f32 %v12464_v33, %v8394_v37  ;;  %v7337_v37 = vadd.f32 %v7271_v46, %v6983_v18 }
 0xa72   :  { %vm8526_vm15 = vcmp.ge.f32.partialorder %v8462_v6, 0.0  ;;  %v8590_v61 = vmul.f32 0.2, %v8462_v6 }
 0xa74   :  { %v8654_v2 = vsel %vm8526_vm15, %v8462_v6, %v8590_v61  ;;  %v7980_v61 = vpop.f32.mrf.mxu0 }
 0xa75   :  { %8718 = vst [vmem:[#allocation7 + $0x1c8] sm:$0xff] %v8654_v2  ;;  %v8319_v1 = vpop.f32.mrf.mxu1 }
 0xa76   :  { %v8395_v31 = vadd.f32 %v8319_v1, %v8041_v14 }
 0xa78   :  { %v8463_v23 = vadd.f32 %v12464_v33, %v8395_v31  ;;  %v7620_v33 = vpop.f32.mrf.mxu3 }
 0xa79   :  { %v7690_v4 = vadd.f32 %v7620_v33, %v7335_v58 }
 0xa7a   :  { %vm8527_vm1 = vcmp.ge.f32.partialorder %v8463_v23, 0.0  ;;  %v8591_v10 = vmul.f32 0.2, %v8463_v23 }
 0xa7b   :  { %v8044_v11 = vadd.f32 %v7974_v62, %v7690_v4 }
 0xa7c   :  { %v8655_v51 = vsel %vm8527_vm1, %v8463_v23, %v8591_v10 }
 0xa7d   :  { %8719 = vst [vmem:[#allocation7 + $0x1d0] sm:$0xff] %v8655_v51  ;;  %v8322_v43 = vpop.f32.mrf.mxu1 }
 0xa7e   :  { %v8396_v50 = vadd.f32 %v8322_v43, %v8042_v45 }
 0xa80   :  { %v8464_v44 = vadd.f32 %v9353_v21, %v8396_v50  ;;  %v7623_v39 = vpop.f32.mrf.mxu3 }
 0xa81   :  { %v7691_v42 = vadd.f32 %v7623_v39, %v7336_v29 }
 0xa82   :  { %vm8528_vm2 = vcmp.ge.f32.partialorder %v8464_v44, 0.0  ;;  %v8592_v55 = vmul.f32 0.2, %v8464_v44 }
 0xa83   :  { %v8045_v53 = vadd.f32 %v7977_v34, %v7691_v42 }
 0xa84   :  { %v8656_v35 = vsel %vm8528_vm2, %v8464_v44, %v8592_v55 }
 0xa85   :  { %8720 = vst [vmem:[#allocation7 + $0x1d8] sm:$0xff] %v8656_v35  ;;  %v8325_v20 = vpop.f32.mrf.mxu1 }
 0xa86   :  { %v8397_v30 = vadd.f32 %v8325_v20, %v8043_v47 }
 0xa88   :  { %v8465_v40 = vadd.f32 %v9353_v21, %v8397_v30  ;;  %v7626_v6 = vpop.f32.mrf.mxu3 }
 0xa89   :  { %v7692_v16 = vadd.f32 %v7626_v6, %v7337_v37 }
 0xa8a   :  { %vm8529_vm3 = vcmp.ge.f32.partialorder %v8465_v40, 0.0  ;;  %v8593_v25 = vmul.f32 0.2, %v8465_v40 }
 0xa8b   :  { %v8046_v63 = vadd.f32 %v7980_v61, %v7692_v16 }
 0xa8c   :  { %v8657_v56 = vsel %vm8529_vm3, %v8465_v40, %v8593_v25 }
 0xa8d   :  { %8721 = vst [vmem:[#allocation7 + $0x1e0] sm:$0xff] %v8657_v56  ;;  %v8328_v22 = vpop.f32.mrf.mxu1 }
 0xa8e   :  { %v8398_v48 = vadd.f32 %v8328_v22, %v8044_v11 }
 0xa90   :  { %v8466_v7 = vadd.f32 %v9353_v21, %v8398_v48 }
 0xa92   :  { %vm8530_vm4 = vcmp.ge.f32.partialorder %v8466_v7, 0.0  ;;  %v8594_v12 = vmul.f32 0.2, %v8466_v7 }
 0xa94   :  { %v8658_v5 = vsel %vm8530_vm4, %v8466_v7, %v8594_v12 }
 0xa95   :  { %8722 = vst [vmem:[#allocation7 + $0x1e8] sm:$0xff] %v8658_v5  ;;  %v8331_v24 = vpop.f32.mrf.mxu1 }
 0xa96   :  { %v8399_v52 = vadd.f32 %v8331_v24, %v8045_v53 }
 0xa98   :  { %v8467_v36 = vadd.f32 %v9353_v21, %v8399_v52 }
 0xa9a   :  { %vm8531_vm5 = vcmp.ge.f32.partialorder %v8467_v36, 0.0  ;;  %v8595_v8 = vmul.f32 0.2, %v8467_v36 }
 0xa9c   :  { %v8659_v2 = vsel %vm8531_vm5, %v8467_v36, %v8595_v8 }
 0xa9d   :  { %8723 = vst [vmem:[#allocation7 + $0x1f0] sm:$0xff] %v8659_v2  ;;  %v8334_v14 = vpop.f32.mrf.mxu1 }
 0xa9e   :  { %v8400_v1 = vadd.f32 %v8334_v14, %v8046_v63 }
 0xaa0   :  { %v8468_v31 = vadd.f32 %v9353_v21, %v8400_v1 }
 0xaa2   :  { %vm8532_vm0 = vcmp.ge.f32.partialorder %v8468_v31, 0.0  ;;  %v8596_v3 = vmul.f32 0.2, %v8468_v31 }
 0xaa4   :  { %v8660_v57 = vsel %vm8532_vm0, %v8468_v31, %v8596_v3 }
 0xaa5   :  { %8724 = vst [vmem:[#allocation7 + $0x1f8] sm:$0xff] %v8660_v57 }
 0xaa6   :  { %8737 = dma.vmem_to_hbm [thread:$0]  %s8730_s10, 8192, %s8732_s13, [#allocation6], %s9407_s23, %s9407_s23, %s9408_s24  }
 0xaa7   :  { %9404 = dma.done.wait [#allocation6], 8192  }
 0xaa8   :  { %9405 = vsyncadd [#allocation6], 4294959104 }
 0xaa9   :  { %8742 = vsyncpa [#allocation5], 1 }
 0xaaa   :  { %8743 = vsyncpa [#allocation6], 1 }

</bundles_post_ra>
